<compile_context>
chip_gen: v7x
topology: tpu7x:2x2x1
jax: 0.10.0
libtpu: 0.0.40
codegen_flags: <defaults>
</compile_context>

<pallas_src>
import functools

import jax
import jax.numpy as jnp
from jax.experimental import pallas as pl
from jax.experimental.pallas import tpu as pltpu


_NEG = -1e30   # bias value for padded fc2 lanes (exp -> 0 under softmax)
_LANE = 128    # lane width for the padded fc2 output


def _round_up(n: int, m: int) -> int:
    return ((n + m - 1) // m) * m


def _pick_tb(batch: int, max_tb: int) -> int:
    """Pick the batch tile minimizing padded work + per-step grid overhead."""
    best_tb, best_cost = 16, None
    for tb in (16, 32, 64, 128, 256, 512):
        if tb > max_tb:
            break
        steps = -(-batch // tb)
        # padded rows of MXU/DMA work + ~32 rows-equivalent fixed step overhead
        cost = steps * tb + 32 * steps
        if best_cost is None or cost <= best_cost:   # ties -> larger tile
            best_tb, best_cost = tb, cost
    return best_tb


def _fusion_kernel(x_ref, w0_ref, b0_ref, w1_ref, b1_ref, w2_ref, b2_ref,
                   o_ref, *, include_final_softmax: bool):
    # fc0: Linear(3072 -> 1024) + ReLU   (bf16 MXU inputs, f32 accumulate)
    x = x_ref[...]
    if x.dtype != jnp.bfloat16:        # no-op when x is streamed as bf16
        x = x.astype(jnp.bfloat16)
    h0 = jnp.dot(x, w0_ref[...],
                 preferred_element_type=jnp.float32) + b0_ref[...]
    h0 = jnp.maximum(h0, 0.0).astype(jnp.bfloat16)

    # fc1: Linear(1024 -> 512) + ReLU
    h1 = jnp.dot(h0, w1_ref[...],
                 preferred_element_type=jnp.float32) + b1_ref[...]
    h1 = jnp.maximum(h1, 0.0).astype(jnp.bfloat16)

    # fc2: Linear(512 -> 2), padded to 128 lanes (pad weights 0, pad bias -1e30)
    logits = jnp.dot(h1, w2_ref[...],
                     preferred_element_type=jnp.float32) + b2_ref[...]

    if include_final_softmax:
        # exact 2-way softmax over dim=1; padded lanes carry ~-1e30 -> exp==0,
        # so reducing over the full 128 lanes equals the 2-class softmax.
        m = jnp.max(logits, axis=-1, keepdims=True)
        e = jnp.exp(logits - m)
        s = jnp.sum(e, axis=-1, keepdims=True)
        logits = e * pl.reciprocal(s, approx=True)   # EUP slot, not VPU divide

    o_ref[...] = logits.astype(o_ref.dtype)


def fusion_layer(x, params, include_final_softmax: bool = False):
    """Pallas implementation of SVHF FusionLayer.forward.

    x: (B, 3072), float32 or bfloat16 (bf16 halves the activation HBM stream).
    params: dict with
        w0 (3072,1024) bf16, b0 (1,1024) f32,
        w1 (1024,512)  bf16, b1 (1,512)  f32,
        w2 (512,2)     bf16, b2 (1,2)    f32
    Returns (B, 2) float32 logits / softmax probabilities.
    """
    B, D = x.shape
    assert D == 3072

    # Batch tile.  Cap at 256 rows for f32 inputs / 512 for bf16 so the VMEM
    # footprint (single-buffered weights ~7.3 MiB + double-buffered x tiles +
    # intermediates) stays well under the 32 MiB scoped budget on every chip
    # (v7x: 64 MiB per TensorCore, both active under "parallel").
    max_tb = 512 if x.dtype == jnp.bfloat16 else 256
    TB = _pick_tb(B, max_tb)
    B_pad = _round_up(B, TB)
    if B_pad != B:
        x = jnp.pad(x, ((0, B_pad - B), (0, 0)))

    # Pad fc2 to a full 128-lane output so the epilogue store is lane-dense.
    n_out = params["w2"].shape[1]
    w2 = jnp.pad(params["w2"], ((0, 0), (0, _LANE - n_out)))
    b2 = jnp.pad(params["b2"], ((0, 0), (0, _LANE - n_out)),
                 constant_values=_NEG)

    num_steps = B_pad // TB
    kernel = functools.partial(_fusion_kernel,
                               include_final_softmax=include_final_softmax)

    const = lambda i: (0, 0)  # grid-invariant blocks (stay resident in VMEM)
    resident = dict(index_map=const, pipeline_mode=pl.Buffered(1))
    in_specs = [
        pl.BlockSpec((TB, 3072), lambda i: (i, 0)),   # x tile (double-buffered)
        pl.BlockSpec((3072, 1024), **resident),       # w0
        pl.BlockSpec((1, 1024), **resident),          # b0
        pl.BlockSpec((1024, 512), **resident),        # w1
        pl.BlockSpec((1, 512), **resident),           # b1
        pl.BlockSpec((512, _LANE), **resident),       # w2 (lane-padded)
        pl.BlockSpec((1, _LANE), **resident),         # b2 (lane-padded)
    ]
    out_spec = pl.BlockSpec((TB, _LANE), lambda i: (i, 0))

    out = pl.pallas_call(
        kernel,
        out_shape=jax.ShapeDtypeStruct((B_pad, _LANE), jnp.float32),
        grid=(num_steps,),
        in_specs=in_specs,
        out_specs=out_spec,
        compiler_params=pltpu.CompilerParams(
            # Split the batch grid across TensorCores only when there is
            # enough work to amortize the duplicated weight DMA / footprint.
            dimension_semantics=(
                ("parallel",) if num_steps >= 4 else ("arbitrary",)),
            vmem_limit_bytes=32 << 20,
        ),
    )(x, params["w0"], params["b0"], params["w1"], params["b1"], w2, b2)

    return out[:B, :n_out]


def init_params(key):
    """Deterministic synthetic parameters (PyTorch Linear-style uniform init).

    Weights are stored transposed (in, out) and cast to bfloat16 (the kernel
    accumulates in f32); biases stay f32.
    """
    ks = jax.random.split(key, 6)

    def linear_init(kw, kb, fan_in, fan_out):
        bound = 1.0 / jnp.sqrt(fan_in)
        w = jax.random.uniform(kw, (fan_in, fan_out), jnp.float32,
                               minval=-bound, maxval=bound)
        b = jax.random.uniform(kb, (1, fan_out), jnp.float32,
                               minval=-bound, maxval=bound)
        return w.astype(jnp.bfloat16), b

    w0, b0 = linear_init(ks[0], ks[1], 3072, 1024)
    w1, b1 = linear_init(ks[2], ks[3], 1024, 512)
    w2, b2 = linear_init(ks[4], ks[5], 512, 2)
    return {"w0": w0, "b0": b0, "w1": w1, "b1": b1, "w2": w2, "b2": b2}


def _reference(x, p, include_final_softmax):
    """Pure-JAX reference using the same bf16-input / f32-accumulate recipe."""
    h0 = jnp.dot(x.astype(jnp.bfloat16), p["w0"],
                 preferred_element_type=jnp.float32) + p["b0"]
    h0 = jnp.maximum(h0, 0.0).astype(jnp.bfloat16)
    h1 = jnp.dot(h0, p["w1"],
                 preferred_element_type=jnp.float32) + p["b1"]
    h1 = jnp.maximum(h1, 0.0).astype(jnp.bfloat16)
    logits = jnp.dot(h1, p["w2"],
                     preferred_element_type=jnp.float32) + p["b2"]
    if include_final_softmax:
        logits = jax.nn.softmax(logits, axis=1)
    return logits


if __name__ == "__main__":
    key = jax.random.PRNGKey(0)
    k_params, k_x = jax.random.split(key)

    params = init_params(k_params)
    B = 8
    x = jax.random.normal(k_x, (B, 3072), jnp.float32)

    # logits path (f32 activations, original module semantics)
    out_logits = jax.block_until_ready(
        fusion_layer(x, params, include_final_softmax=False))
    # softmax path
    out_probs = jax.block_until_ready(
        fusion_layer(x, params, include_final_softmax=True))
    # bf16 activation-streaming path (what a bf16 upstream producer would feed)
    out_bf16 = jax.block_until_ready(
        fusion_layer(x.astype(jnp.bfloat16), params,
                     include_final_softmax=False))

    ref_logits = _reference(x, params, False)
    ref_probs = _reference(x, params, True)

    assert out_logits.shape == (B, 2) and out_probs.shape == (B, 2)
    assert out_bf16.shape == (B, 2)
    assert jnp.allclose(out_logits, ref_logits, atol=2e-3, rtol=2e-3), (
        jnp.max(jnp.abs(out_logits - ref_logits)))
    assert jnp.allclose(out_probs, ref_probs, atol=2e-3, rtol=2e-3), (
        jnp.max(jnp.abs(out_probs - ref_probs)))
    assert jnp.allclose(out_bf16, ref_logits, atol=2e-3, rtol=2e-3), (
        jnp.max(jnp.abs(out_bf16 - ref_logits)))

    print("KERNEL_OK")
</pallas_src>

<mosaic_0001>
module attributes {stable_mosaic.version = 11 : i64} {
  func.func @_fusion_kernel(%arg0: i32, %arg1: memref<16x3072xf32, #tpu.memory_space<vmem>>, %arg2: memref<3072x1024xbf16, #tpu.memory_space<vmem>>, %arg3: memref<1x1024xf32, #tpu.memory_space<vmem>>, %arg4: memref<1024x512xbf16, #tpu.memory_space<vmem>>, %arg5: memref<1x512xf32, #tpu.memory_space<vmem>>, %arg6: memref<512x128xbf16, #tpu.memory_space<vmem>>, %arg7: memref<1x128xf32, #tpu.memory_space<vmem>>, %arg8: memref<16x128xf32, #tpu.memory_space<vmem>>) attributes {dimension_semantics = [#tpu.dimension_semantics<arbitrary>], iteration_bounds = array<i64: 1>, scalar_prefetch = 0 : i64, scratch_operands = 0 : i64, tpu.core_type = #tpu.core_type<tc>, window_params = [{transform_indices = @transform_0, window_bounds = array<i64: 16, 3072>}, {pipeline_mode = #tpu.pipeline_mode<synchronous>, transform_indices = @transform_1, window_bounds = array<i64: 3072, 1024>}, {pipeline_mode = #tpu.pipeline_mode<synchronous>, transform_indices = @transform_2, window_bounds = array<i64: 1, 1024>}, {pipeline_mode = #tpu.pipeline_mode<synchronous>, transform_indices = @transform_3, window_bounds = array<i64: 1024, 512>}, {pipeline_mode = #tpu.pipeline_mode<synchronous>, transform_indices = @transform_4, window_bounds = array<i64: 1, 512>}, {pipeline_mode = #tpu.pipeline_mode<synchronous>, transform_indices = @transform_5, window_bounds = array<i64: 512, 128>}, {pipeline_mode = #tpu.pipeline_mode<synchronous>, transform_indices = @transform_6, window_bounds = array<i64: 1, 128>}, {transform_indices = @transform_7, window_bounds = array<i64: 16, 128>}]} {
    %c0 = arith.constant 0 : index
    %c0_0 = arith.constant 0 : index
    %0 = vector.load %arg1[%c0, %c0_0] : memref<16x3072xf32, #tpu.memory_space<vmem>>, vector<16x3072xf32>
    %1 = arith.truncf %0 : vector<16x3072xf32> to vector<16x3072xbf16>
    %c0_1 = arith.constant 0 : index
    %c0_2 = arith.constant 0 : index
    %2 = vector.load %arg2[%c0_1, %c0_2] : memref<3072x1024xbf16, #tpu.memory_space<vmem>>, vector<3072x1024xbf16>
    %cst = arith.constant dense<0.000000e+00> : vector<16x1024xf32>
    %3 = tpu.matmul %1, %2, %cst {dimension_numbers = #tpu.dot_dimension_numbers<[1], [0], [0], [1], [0, 0, 1, 1], [], []>} : vector<16x3072xbf16>, vector<3072x1024xbf16>, vector<16x1024xf32> -> vector<16x1024xf32>
    %c0_3 = arith.constant 0 : index
    %c0_4 = arith.constant 0 : index
    %4 = vector.load %arg3[%c0_3, %c0_4] : memref<1x1024xf32, #tpu.memory_space<vmem>>, vector<1x1024xf32>
    %5 = vector.broadcast %4 : vector<1x1024xf32> to vector<16x1024xf32>
    %6 = arith.addf %3, %5 : vector<16x1024xf32>
    %cst_5 = arith.constant 0.000000e+00 : f32
    %7 = vector.broadcast %cst_5 : f32 to vector<16x1024xf32>
    %8 = arith.maximumf %6, %7 : vector<16x1024xf32>
    %9 = arith.truncf %8 : vector<16x1024xf32> to vector<16x1024xbf16>
    %c0_6 = arith.constant 0 : index
    %c0_7 = arith.constant 0 : index
    %10 = vector.load %arg4[%c0_6, %c0_7] : memref<1024x512xbf16, #tpu.memory_space<vmem>>, vector<1024x512xbf16>
    %cst_8 = arith.constant dense<0.000000e+00> : vector<16x512xf32>
    %11 = tpu.matmul %9, %10, %cst_8 {dimension_numbers = #tpu.dot_dimension_numbers<[1], [0], [0], [1], [0, 0, 1, 1], [], []>} : vector<16x1024xbf16>, vector<1024x512xbf16>, vector<16x512xf32> -> vector<16x512xf32>
    %c0_9 = arith.constant 0 : index
    %c0_10 = arith.constant 0 : index
    %12 = vector.load %arg5[%c0_9, %c0_10] : memref<1x512xf32, #tpu.memory_space<vmem>>, vector<1x512xf32>
    %13 = vector.broadcast %12 : vector<1x512xf32> to vector<16x512xf32>
    %14 = arith.addf %11, %13 : vector<16x512xf32>
    %cst_11 = arith.constant 0.000000e+00 : f32
    %15 = vector.broadcast %cst_11 : f32 to vector<16x512xf32>
    %16 = arith.maximumf %14, %15 : vector<16x512xf32>
    %17 = arith.truncf %16 : vector<16x512xf32> to vector<16x512xbf16>
    %c0_12 = arith.constant 0 : index
    %c0_13 = arith.constant 0 : index
    %18 = vector.load %arg6[%c0_12, %c0_13] : memref<512x128xbf16, #tpu.memory_space<vmem>>, vector<512x128xbf16>
    %cst_14 = arith.constant dense<0.000000e+00> : vector<16x128xf32>
    %19 = tpu.matmul %17, %18, %cst_14 {dimension_numbers = #tpu.dot_dimension_numbers<[1], [0], [0], [1], [0, 0, 1, 1], [], []>} : vector<16x512xbf16>, vector<512x128xbf16>, vector<16x128xf32> -> vector<16x128xf32>
    %c0_15 = arith.constant 0 : index
    %c0_16 = arith.constant 0 : index
    %20 = vector.load %arg7[%c0_15, %c0_16] : memref<1x128xf32, #tpu.memory_space<vmem>>, vector<1x128xf32>
    %21 = vector.broadcast %20 : vector<1x128xf32> to vector<16x128xf32>
    %22 = arith.addf %19, %21 : vector<16x128xf32>
    %c0_17 = arith.constant 0 : index
    %c0_18 = arith.constant 0 : index
    %23 = vector.load %arg8[%c0_17, %c0_18] : memref<16x128xf32, #tpu.memory_space<vmem>>, vector<16x128xf32>
    tpu.vector_store %arg8[%c0_17, %c0_18], %22 {strides = array<i32>} : memref<16x128xf32, #tpu.memory_space<vmem>>, vector<16x128xf32>,
    return
  }
  func.func @transform_0(%arg0: i32) -> (i32, i32) {
    %c0_i32 = arith.constant 0 : i32
    %c0_i32_0 = arith.constant 0 : i32
    return %arg0, %c0_i32 : i32, i32
  }
  func.func @transform_1(%arg0: i32) -> (i32, i32) {
    %c0_i32 = arith.constant 0 : i32
    %c0_i32_0 = arith.constant 0 : i32
    %c0_i32_1 = arith.constant 0 : i32
    return %c0_i32, %c0_i32_0 : i32, i32
  }
  func.func @transform_2(%arg0: i32) -> (i32, i32) {
    %c0_i32 = arith.constant 0 : i32
    %c0_i32_0 = arith.constant 0 : i32
    %c0_i32_1 = arith.constant 0 : i32
    return %c0_i32, %c0_i32_0 : i32, i32
  }
  func.func @transform_3(%arg0: i32) -> (i32, i32) {
    %c0_i32 = arith.constant 0 : i32
    %c0_i32_0 = arith.constant 0 : i32
    %c0_i32_1 = arith.constant 0 : i32
    return %c0_i32, %c0_i32_0 : i32, i32
  }
  func.func @transform_4(%arg0: i32) -> (i32, i32) {
    %c0_i32 = arith.constant 0 : i32
    %c0_i32_0 = arith.constant 0 : i32
    %c0_i32_1 = arith.constant 0 : i32
    return %c0_i32, %c0_i32_0 : i32, i32
  }
  func.func @transform_5(%arg0: i32) -> (i32, i32) {
    %c0_i32 = arith.constant 0 : i32
    %c0_i32_0 = arith.constant 0 : i32
    %c0_i32_1 = arith.constant 0 : i32
    return %c0_i32, %c0_i32_0 : i32, i32
  }
  func.func @transform_6(%arg0: i32) -> (i32, i32) {
    %c0_i32 = arith.constant 0 : i32
    %c0_i32_0 = arith.constant 0 : i32
    %c0_i32_1 = arith.constant 0 : i32
    return %c0_i32, %c0_i32_0 : i32, i32
  }
  func.func @transform_7(%arg0: i32) -> (i32, i32) {
    %c0_i32 = arith.constant 0 : i32
    %c0_i32_0 = arith.constant 0 : i32
    return %arg0, %c0_i32 : i32, i32
  }
}

</mosaic_0001>

<bundles_post_ra>
// kernel: tpu_custom_call.1
= control target key start
LH: loop header
LB: loop body
LE: loop exit
PB: predicated region body
PF: predicated region fallthrough
CT: control target
= control target key end

     0   :  { %12 = vsyncpa [#allocation3], 0  ;;  %s16874_s0 = inlined_call_operand.hbm [shape: f32[16,3072], index: 0, kind: input, shape index: {}]   ;;  %s16875_s1 = inlined_call_operand.hbm [shape: bf16[3072,1024], index: 1, kind: input, shape index: {}]   ;;  %s16876_s2 = inlined_call_operand.hbm [shape: f32[1,1024], index: 2, kind: input, shape index: {}]   ;;  %s16877_s3 = inlined_call_operand.hbm [shape: bf16[1024,512], index: 3, kind: input, shape index: {}]   ;;  %s16878_s4 = inlined_call_operand.hbm [shape: f32[1,512], index: 4, kind: input, shape index: {}]   ;;  %s16879_s5 = inlined_call_operand.hbm [shape: bf16[512,128], index: 5, kind: input, shape index: {}]   ;;  %s16880_s6 = inlined_call_operand.hbm [shape: f32[1,128], index: 6, kind: input, shape index: {}]   ;;  %s16881_s7 = inlined_call_operand.hbm [shape: f32[16,128], index: 7, kind: output, shape index: {}]  }
   0x1   :  { %13 = vsyncpa [#allocation6], 0 }
   0x2   :  { %14 = vsyncpa [#allocation9], 0 }
   0x3   :  { %15 = vsyncpa [#allocation12], 0 }
   0x4   :  { %16 = vsyncpa [#allocation4], 0  ;;  %s16530_s24 = smov [#allocation5]   ;;  %s16344_s28 = scalar_lea.hbm %s16875_s1, 196608 }
   0x5   :  { %s34_s25 = sshll.u32 %s16530_s24, 4  ;;  %p16345_p0 = scmp.ne.s32.totalorder %s16875_s1, %s16344_s28  ;;  %s35_s25 = int_to_ptr.vmem [resolvable:$true] %s34_s25 }
   0x6   :  { %p16348_p1 = scmp.lt.u32.totalorder %s16344_s28, %s16875_s1 }
   0x8   :  { %p16350_p2 = pnand %p16348_p1, %p16345_p0 }
   0xa   :  { %16353 = shalt.err (!%p16350_p2)
}
   0xb   :  { %s16354_s10 = scalar_lea.vmem %s35_s25, 196608  ;;  %p16359_p4 = scmp.lt.s32.totalorder %s35_s25, %s35_s25 }
   0xc   :  { %p16355_p3 = scmp.ne.s32.totalorder %s35_s25, %s16354_s10  ;;  %p16360_p5 = scmp.lt.s32.totalorder %s16354_s10, %s16354_s10 }
   0xe   :  { %p16361_p6 = por %p16360_p5, %p16359_p4 }
  0x10   :  { %p16362_p7 = pnand %p16361_p6, %p16355_p3 }
  0x12   :  { %16365 = shalt.err (!%p16362_p7)
}
  0x13   :  { %s16531_s11 = smov 512   ;;  %s16532_s12 = smov 32  }
  0x14   :  { %40 = dma.hbm_to_vmem [thread:$0]  %s16875_s1, 196608, %s35_s25, [#allocation6], %s16531_s11, %s16531_s11, %s16532_s12  }
  0x15   :  { %s16533_s15 = smov [#allocation8]   ;;  %s16366_s19 = scalar_lea.hbm %s16877_s3, 32768 }
  0x16   :  { %s56_s16 = sshll.u32 %s16533_s15, 4  ;;  %p16367_p8 = scmp.ne.s32.totalorder %s16877_s3, %s16366_s19  ;;  %s57_s16 = int_to_ptr.vmem [resolvable:$true] %s56_s16 }
  0x17   :  { %p16370_p9 = scmp.lt.u32.totalorder %s16366_s19, %s16877_s3 }
  0x19   :  { %p16372_p10 = pnand %p16370_p9, %p16367_p8 }
  0x1b   :  { %16375 = shalt.err (!%p16372_p10)
}
  0x1c   :  { %s16376_s24 = scalar_lea.vmem %s57_s16, 32768  ;;  %p16381_p12 = scmp.lt.s32.totalorder %s57_s16, %s57_s16 }
  0x1d   :  { %p16377_p11 = scmp.ne.s32.totalorder %s57_s16, %s16376_s24  ;;  %p16382_p13 = scmp.lt.s32.totalorder %s16376_s24, %s16376_s24 }
  0x1f   :  { %p16383_p0 = por %p16382_p13, %p16381_p12 }
  0x21   :  { %p16384_p1 = pnand %p16383_p0, %p16377_p11 }
  0x23   :  { %16387 = shalt.err (!%p16384_p1)
}
  0x24   :  { %s16534_s1 = smov 256   ;;  %s16535_s25 = smov 16  }
  0x25   :  { %62 = dma.hbm_to_vmem [thread:$0]  %s16877_s3, 32768, %s57_s16, [#allocation9], %s16534_s1, %s16534_s1, %s16535_s25  }
  0x26   :  { %s16536_s28 = smov [#allocation11]   ;;  %s16388_s9 = scalar_lea.hbm %s16879_s5, 4096 }
  0x27   :  { %s78_s29 = sshll.u32 %s16536_s28, 4  ;;  %p16389_p2 = scmp.ne.s32.totalorder %s16879_s5, %s16388_s9  ;;  %s79_s29 = int_to_ptr.vmem [resolvable:$true] %s78_s29 }
  0x28   :  { %p16392_p3 = scmp.lt.u32.totalorder %s16388_s9, %s16879_s5 }
  0x2a   :  { %p16394_p4 = pnand %p16392_p3, %p16389_p2 }
  0x2c   :  { %16397 = shalt.err (!%p16394_p4)
}
  0x2d   :  { %s16398_s14 = scalar_lea.vmem %s79_s29, 4096  ;;  %p16403_p6 = scmp.lt.s32.totalorder %s79_s29, %s79_s29 }
  0x2e   :  { %p16399_p5 = scmp.ne.s32.totalorder %s79_s29, %s16398_s14  ;;  %p16404_p7 = scmp.lt.s32.totalorder %s16398_s14, %s16398_s14 }
  0x30   :  { %p16405_p8 = por %p16404_p7, %p16403_p6 }
  0x32   :  { %p16406_p9 = pnand %p16405_p8, %p16399_p5 }
  0x34   :  { %16409 = shalt.err (!%p16406_p9)
}
  0x35   :  { %s16537_s3 = smov 64   ;;  %s16538_s15 = smov 4  }
  0x36   :  { %84 = dma.hbm_to_vmem [thread:$0]  %s16879_s5, 4096, %s79_s29, [#allocation12], %s16537_s3, %s16537_s3, %s16538_s15  }
  0x37   :  { %s16539_s18 = smov [#allocation2]   ;;  %s16410_s22 = scalar_lea.hbm %s16874_s0, 6144 }
  0x38   :  { %s22_s19 = sshll.u32 %s16539_s18, 4  ;;  %p16411_p10 = scmp.ne.s32.totalorder %s16874_s0, %s16410_s22  ;;  %s23_s19 = int_to_ptr.vmem [resolvable:$true] %s22_s19 }
  0x39   :  { %p16414_p11 = scmp.lt.u32.totalorder %s16410_s22, %s16874_s0 }
  0x3b   :  { %p16416_p12 = pnand %p16414_p11, %p16411_p10 }
  0x3d   :  { %16419 = shalt.err (!%p16416_p12)
}
  0x3e   :  { %s16420_s26 = scalar_lea.vmem %s23_s19, 6144  ;;  %p16425_p0 = scmp.lt.s32.totalorder %s23_s19, %s23_s19 }
  0x3f   :  { %p16421_p13 = scmp.ne.s32.totalorder %s23_s19, %s16420_s26  ;;  %p16426_p1 = scmp.lt.s32.totalorder %s16420_s26, %s16420_s26 }
  0x41   :  { %p16427_p2 = por %p16426_p1, %p16425_p0 }
  0x43   :  { %p16428_p3 = pnand %p16427_p2, %p16421_p13 }
  0x45   :  { %16431 = shalt.err (!%p16428_p3)
}
  0x46   :  { %s16540_s5 = smov 3072   ;;  %s16541_s27 = smov 192  }
  0x47   :  { %28 = dma.hbm_to_vmem [thread:$0]  %s16874_s0, 6144, %s23_s19, [#allocation3], %s16540_s5, %s16540_s5, %s16541_s27  }
  0x48   :  { %s16542_s30 = smov [#allocation7]   ;;  %s16543_s9 = smov [#allocation10]  }
  0x49   :  { %s47_s8 = sshll.u32 %s16542_s30, 4  ;;  %s69_s10 = sshll.u32 %s16543_s9, 4  ;;  %s48_s8 = int_to_ptr.vmem [resolvable:$true] %s47_s8  ;;  %s70_s10 = int_to_ptr.vmem [resolvable:$true] %s69_s10 }
  0x4a   :  { %s16432_s13 = scalar_lea.hbm %s16876_s2, 128 }
  0x4b   :  { %p16433_p4 = scmp.ne.s32.totalorder %s16876_s2, %s16432_s13  ;;  %p16436_p5 = scmp.lt.u32.totalorder %s16432_s13, %s16876_s2 }
  0x4d   :  { %p16438_p6 = pnand %p16436_p5, %p16433_p4 }
  0x4f   :  { %16441 = shalt.err (!%p16438_p6)
}
  0x50   :  { %s16442_s0 = scalar_lea.vmem %s48_s8, 128  ;;  %p16447_p8 = scmp.lt.s32.totalorder %s48_s8, %s48_s8 }
  0x51   :  { %p16443_p7 = scmp.ne.s32.totalorder %s48_s8, %s16442_s0  ;;  %p16448_p9 = scmp.lt.s32.totalorder %s16442_s0, %s16442_s0 }
  0x53   :  { %p16449_p10 = por %p16448_p9, %p16447_p8 }
  0x55   :  { %p16450_p11 = pnand %p16449_p10, %p16443_p7 }
  0x57   :  { %16453 = shalt.err (!%p16450_p11)
}
  0x58   :  { %50 = dma.hbm_to_vmem [thread:$0]  %s16876_s2, 128, %s48_s8, [#allocation6]  }
  0x59   :  { %s16454_s21 = scalar_lea.hbm %s16878_s4, 64 }
  0x5a   :  { %p16455_p12 = scmp.ne.s32.totalorder %s16878_s4, %s16454_s21  ;;  %p16458_p13 = scmp.lt.u32.totalorder %s16454_s21, %s16878_s4 }
  0x5c   :  { %p16460_p0 = pnand %p16458_p13, %p16455_p12 }
  0x5e   :  { %16463 = shalt.err (!%p16460_p0)
}
  0x5f   :  { %s16464_s25 = scalar_lea.vmem %s70_s10, 64  ;;  %p16469_p2 = scmp.lt.s32.totalorder %s70_s10, %s70_s10 }
  0x60   :  { %p16465_p1 = scmp.ne.s32.totalorder %s70_s10, %s16464_s25  ;;  %p16470_p3 = scmp.lt.s32.totalorder %s16464_s25, %s16464_s25 }
  0x62   :  { %p16471_p4 = por %p16470_p3, %p16469_p2 }
  0x64   :  { %p16472_p5 = pnand %p16471_p4, %p16465_p1 }
  0x66   :  { %16475 = shalt.err (!%p16472_p5)
}
  0x67   :  { %72 = dma.hbm_to_vmem [thread:$0]  %s16878_s4, 64, %s70_s10, [#allocation9]  }
  0x68   :  { %s16544_s5 = smov [#allocation13]   ;;  %s16476_s30 = scalar_lea.hbm %s16880_s6, 16 }
  0x69   :  { %s91_s27 = sshll.u32 %s16544_s5, 4  ;;  %p16477_p6 = scmp.ne.s32.totalorder %s16880_s6, %s16476_s30  ;;  %s92_s27 = int_to_ptr.vmem [resolvable:$true] %s91_s27 }
  0x6a   :  { %p16480_p7 = scmp.lt.u32.totalorder %s16476_s30, %s16880_s6 }
  0x6c   :  { %p16482_p8 = pnand %p16480_p7, %p16477_p6 }
  0x6e   :  { %16485 = shalt.err (!%p16482_p8)
}
  0x6f   :  { %s16486_s13 = scalar_lea.vmem %s92_s27, 16  ;;  %s16490_s4 = scalar_lea.vmem %s92_s27, 32 }
  0x70   :  { %p16487_p9 = scmp.ne.s32.totalorder %s92_s27, %s16486_s13  ;;  %p16491_p10 = scmp.lt.s32.totalorder %s92_s27, %s92_s27 }
  0x71   :  { %p16492_p11 = scmp.lt.s32.totalorder %s16490_s4, %s16486_s13 }
  0x73   :  { %p16493_p12 = por %p16492_p11, %p16491_p10 }
  0x75   :  { %p16494_p13 = pnand %p16493_p12, %p16487_p9 }
  0x77   :  { %16497 = shalt.err (!%p16494_p13)
}
  0x78   :  { %94 = dma.hbm_to_vmem [thread:$0]  %s16880_s6, 16, %s92_s27, [#allocation12]  }
  0x79   :  { %16520 = dma.done.wait [#allocation3], 6144  }
  0x7a   :  { %16521 = vsyncadd [#allocation3], 4294961152 }
  0x7b   :  { %16522 = dma.done.wait [#allocation6], 196736  }
  0x7c   :  { %16523 = vsyncadd [#allocation6], 4294770560 }
  0x7d   :  { %16524 = dma.done.wait [#allocation9], 32832  }
  0x7e   :  { %16525 = vsyncadd [#allocation9], 4294934464 }
  0x7f   :  { %16526 = dma.done.wait [#allocation12], 4112  }
  0x80   :  { %16527 = vsyncadd [#allocation12], 4294963184  ;;  %v189_v0 = vld [vmem:[#allocation5] sm:$0xff]  ;;  %v190_v2 = vld [vmem:[#allocation5 + $0x8] sm:$0xff]  ;;  %s16545_s6 = smov [#allocation14]  }
  0x81   :  { %v193_v1 = vld [vmem:[#allocation5 + $0x20] sm:$0xff]  ;;  %v194_v4 = vld [vmem:[#allocation5 + $0x28] sm:$0xff]  ;;  %s13801_s3 = sshll.u32 %s16545_s6, 4  ;;  %s13802_s3 = int_to_ptr.vmem [resolvable:$true] %s13801_s3 }
  0x82   :  { %v13817_v3 = vcombine.high %v189_v0, %v193_v1  ;;  %v13816_v5 = vcombine.low %v189_v0, %v193_v1  ;;  %v197_v6 = vld [vmem:[#allocation5 + $0x40] sm:$0xff]  ;;  %v13819_v8 = vcombine.high %v190_v2, %v194_v4  ;;  %v13818_v9 = vcombine.low %v190_v2, %v194_v4  ;;  %v198_v11 = vld [vmem:[#allocation5 + $0x48] sm:$0xff]  ;;  %s16498_s15 = scalar_lea.vmem %s13802_s3, 256  ;;  %p16503_p1 = scmp.lt.s32.totalorder %s13802_s3, %s13802_s3 }
  0x83   :  { %v201_v7 = vld [vmem:[#allocation5 + $0x60] sm:$0xff]  ;;  %v202_v12 = vld [vmem:[#allocation5 + $0x68] sm:$0xff]  ;;  %p16499_p0 = scmp.ne.s32.totalorder %s13802_s3, %s16498_s15  ;;  %p16504_p2 = scmp.lt.s32.totalorder %s16498_s15, %s16498_s15 }
  0x84   :  { %v13825_v10 = vcombine.high %v197_v6, %v201_v7  ;;  %v205_v13 = vld [vmem:[#allocation5 + $0x80] sm:$0xff]  ;;  %9447 = vmatprep.subr.bf16.mxu0 %v13817_v3  ;;  %v13827_v14 = vcombine.high %v198_v11, %v202_v12  ;;  %v206_v16 = vld [vmem:[#allocation5 + $0x88] sm:$0xff]  ;;  %9963 = vmatprep.subr.bf16.mxu1 %v13819_v8  ;;  %v13824_v18 = vcombine.low %v197_v6, %v201_v7 }
  0x85   :  { %v209_v15 = vld [vmem:[#allocation5 + $0xa0] sm:$0xff]  ;;  %v210_v17 = vld [vmem:[#allocation5 + $0xa8] sm:$0xff]  ;;  %9448 = vmatpush1.bf16.msra.mxu0 %v13816_v5  ;;  %9964 = vmatpush1.bf16.msra.mxu1 %v13818_v9  ;;  %v13826_v19 = vcombine.low %v198_v11, %v202_v12  ;;  %p16505_p3 = por %p16504_p2, %p16503_p1 }
  0x86   :  { %9449 = vmatprep.subr.bf16.mxu0 %v13825_v10  ;;  %v13833_v20 = vcombine.high %v205_v13, %v209_v15  ;;  %9965 = vmatprep.subr.bf16.mxu1 %v13827_v14  ;;  %v13835_v21 = vcombine.high %v206_v16, %v210_v17  ;;  %v213_v22 = vld [vmem:[#allocation5 + $0xc0] sm:$0xff]  ;;  %v214_v24 = vld [vmem:[#allocation5 + $0xc8] sm:$0xff]  ;;  %v13832_v26 = vcombine.low %v205_v13, %v209_v15 }
  0x87   :  { %v217_v23 = vld [vmem:[#allocation5 + $0xe0] sm:$0xff]  ;;  %v218_v25 = vld [vmem:[#allocation5 + $0xe8] sm:$0xff]  ;;  %v13834_v27 = vcombine.low %v206_v16, %v210_v17  ;;  %p16506_p4 = pnand %p16505_p3, %p16499_p0 }
  0x88   :  { %v13841_v28 = vcombine.high %v213_v22, %v217_v23  ;;  %v13843_v29 = vcombine.high %v214_v24, %v218_v25  ;;  %v221_v30 = vld [vmem:[#allocation5 + $0x100] sm:$0xff]  ;;  %v222_v32 = vld [vmem:[#allocation5 + $0x108] sm:$0xff]  ;;  %v13840_v34 = vcombine.low %v213_v22, %v217_v23  ;;  %v13842_v35 = vcombine.low %v214_v24, %v218_v25 }
  0x89   :  { %9450 = vmatpush1.bf16.msra.mxu0 %v13824_v18  ;;  %9966 = vmatpush1.bf16.msra.mxu1 %v13826_v19  ;;  %v225_v31 = vld [vmem:[#allocation5 + $0x120] sm:$0xff]  ;;  %v226_v33 = vld [vmem:[#allocation5 + $0x128] sm:$0xff] }
  0x8a   :  { %9451 = vmatprep.subr.bf16.mxu0 %v13833_v20  ;;  %9967 = vmatprep.subr.bf16.mxu1 %v13835_v21  ;;  %v13849_v36 = vcombine.high %v221_v30, %v225_v31  ;;  %v13851_v37 = vcombine.high %v222_v32, %v226_v33  ;;  %v229_v38 = vld [vmem:[#allocation5 + $0x140] sm:$0xff]  ;;  %v230_v40 = vld [vmem:[#allocation5 + $0x148] sm:$0xff]  ;;  %v13848_v42 = vcombine.low %v221_v30, %v225_v31 }
  0x8b   :  { %v233_v39 = vld [vmem:[#allocation5 + $0x160] sm:$0xff]  ;;  %v234_v41 = vld [vmem:[#allocation5 + $0x168] sm:$0xff]  ;;  %v13850_v43 = vcombine.low %v222_v32, %v226_v33 }
  0x8c   :  { %v13857_v44 = vcombine.high %v229_v38, %v233_v39  ;;  %v13859_v45 = vcombine.high %v230_v40, %v234_v41  ;;  %v237_v46 = vld [vmem:[#allocation5 + $0x180] sm:$0xff]  ;;  %v238_v48 = vld [vmem:[#allocation5 + $0x188] sm:$0xff]  ;;  %v13856_v50 = vcombine.low %v229_v38, %v233_v39  ;;  %v13858_v51 = vcombine.low %v230_v40, %v234_v41 }
  0x8d   :  { %9452 = vmatpush1.bf16.msra.mxu0 %v13832_v26  ;;  %9968 = vmatpush1.bf16.msra.mxu1 %v13834_v27  ;;  %v241_v47 = vld [vmem:[#allocation5 + $0x1a0] sm:$0xff]  ;;  %v242_v49 = vld [vmem:[#allocation5 + $0x1a8] sm:$0xff] }
  0x8e   :  { %9453 = vmatprep.subr.bf16.mxu0 %v13841_v28  ;;  %9969 = vmatprep.subr.bf16.mxu1 %v13843_v29  ;;  %v13865_v52 = vcombine.high %v237_v46, %v241_v47  ;;  %v118_v53 = vld [vmem:[#allocation2 + $0x8] sm:$0xff]  ;;  %v13867_v55 = vcombine.high %v238_v48, %v242_v49  ;;  %v245_v56 = vld [vmem:[#allocation5 + $0x1c0] sm:$0xff]  ;;  %v13864_v61 = vcombine.low %v237_v46, %v241_v47 }
  0x8f   :  { %v142_v54 = vld [vmem:[#allocation2 + $0xc8] sm:$0xff]  ;;  %v249_v57 = vld [vmem:[#allocation5 + $0x1e0] sm:$0xff]  ;;  %v13866_v62 = vcombine.low %v238_v48, %v242_v49 }
  0x90   :  { %v16672_v58 = vpack.c.bf16 %v142_v54, %v118_v53  ;;  %v246_v59 = vld [vmem:[#allocation5 + $0x1c8] sm:$0xff]  ;;  %v13873_v63 = vcombine.high %v245_v56, %v249_v57  ;;  %v253_v1 = vld [vmem:[#allocation5 + $0x200] sm:$0xff]  ;;  %v13872_v5 = vcombine.low %v245_v56, %v249_v57 }
  0x91   :  { %9454 = vmatpush1.bf16.msra.mxu0 %v13840_v34  ;;  %9970 = vmatpush1.bf16.msra.mxu1 %v13842_v35  ;;  %v250_v60 = vld [vmem:[#allocation5 + $0x1e8] sm:$0xff]  ;;  %v257_v2 = vld [vmem:[#allocation5 + $0x220] sm:$0xff] }
  0x92   :  { %9455 = vmatprep.subr.bf16.mxu0 %v13849_v36  ;;  %9971 = vmatprep.subr.bf16.mxu1 %v13851_v37  ;;  %v13875_v0 = vcombine.high %v246_v59, %v250_v60  ;;  %v254_v3 = vld [vmem:[#allocation5 + $0x208] sm:$0xff]  ;;  %v13874_v6 = vcombine.low %v246_v59, %v250_v60  ;;  %v13881_v7 = vcombine.high %v253_v1, %v257_v2  ;;  %v261_v9 = vld [vmem:[#allocation5 + $0x240] sm:$0xff] }
  0x93   :  { %9479 = vmatprep.mubr.bf16.mxu0 %v16672_v58  ;;  %9995 = vmatprep.mubr.bf16.mxu1 %v16672_v58  ;;  %v258_v4 = vld [vmem:[#allocation5 + $0x228] sm:$0xff]  ;;  %v265_v10 = vld [vmem:[#allocation5 + $0x260] sm:$0xff]  ;;  %v13880_v13 = vcombine.low %v253_v1, %v257_v2 }
  0x94   :  { %v13883_v8 = vcombine.high %v254_v3, %v258_v4  ;;  %v262_v11 = vld [vmem:[#allocation5 + $0x248] sm:$0xff]  ;;  %v13882_v14 = vcombine.low %v254_v3, %v258_v4  ;;  %v13889_v15 = vcombine.high %v261_v9, %v265_v10  ;;  %v269_v17 = vld [vmem:[#allocation5 + $0x280] sm:$0xff]  ;;  %v13888_v21 = vcombine.low %v261_v9, %v265_v10 }
  0x95   :  { %9456 = vmatpush1.bf16.msra.mxu0 %v13848_v42  ;;  %9972 = vmatpush1.bf16.msra.mxu1 %v13850_v43  ;;  %v266_v12 = vld [vmem:[#allocation5 + $0x268] sm:$0xff]  ;;  %v273_v18 = vld [vmem:[#allocation5 + $0x2a0] sm:$0xff] }
  0x96   :  { %9457 = vmatprep.subr.bf16.mxu0 %v13857_v44  ;;  %9973 = vmatprep.subr.bf16.mxu1 %v13859_v45  ;;  %v13891_v16 = vcombine.high %v262_v11, %v266_v12  ;;  %v270_v19 = vld [vmem:[#allocation5 + $0x288] sm:$0xff]  ;;  %v13890_v22 = vcombine.low %v262_v11, %v266_v12  ;;  %v13897_v23 = vcombine.high %v269_v17, %v273_v18  ;;  %v277_v25 = vld [vmem:[#allocation5 + $0x2c0] sm:$0xff] }
  0x97   :  { %v274_v20 = vld [vmem:[#allocation5 + $0x2a8] sm:$0xff]  ;;  %v281_v26 = vld [vmem:[#allocation5 + $0x2e0] sm:$0xff]  ;;  %v13896_v29 = vcombine.low %v269_v17, %v273_v18  ;;  %v120_v17 = vld [vmem:[#allocation2 + $0x18] sm:$0xff] }
  0x98   :  { %v13899_v24 = vcombine.high %v270_v19, %v274_v20  ;;  %v278_v27 = vld [vmem:[#allocation5 + $0x2c8] sm:$0xff]  ;;  %v13898_v30 = vcombine.low %v270_v19, %v274_v20  ;;  %v13905_v31 = vcombine.high %v277_v25, %v281_v26  ;;  %v285_v33 = vld [vmem:[#allocation5 + $0x300] sm:$0xff]  ;;  %v13904_v37 = vcombine.low %v277_v25, %v281_v26  ;;  %v144_v18 = vld [vmem:[#allocation2 + $0xd8] sm:$0xff] }
  0x99   :  { %9458 = vmatpush1.bf16.msra.mxu0 %v13856_v50  ;;  %9974 = vmatpush1.bf16.msra.mxu1 %v13858_v51  ;;  %v282_v28 = vld [vmem:[#allocation5 + $0x2e8] sm:$0xff]  ;;  %v289_v34 = vld [vmem:[#allocation5 + $0x320] sm:$0xff]  ;;  %v16678_v25 = vpack.c.bf16 %v144_v18, %v120_v17 }
  0x9a   :  { %9459 = vmatprep.subr.bf16.mxu0 %v13865_v52  ;;  %9975 = vmatprep.subr.bf16.mxu1 %v13867_v55  ;;  %v13907_v32 = vcombine.high %v278_v27, %v282_v28  ;;  %v286_v35 = vld [vmem:[#allocation5 + $0x308] sm:$0xff]  ;;  %v13906_v38 = vcombine.low %v278_v27, %v282_v28  ;;  %v13913_v39 = vcombine.high %v285_v33, %v289_v34  ;;  %v293_v41 = vld [vmem:[#allocation5 + $0x340] sm:$0xff] }
  0x9b   :  { %v290_v36 = vld [vmem:[#allocation5 + $0x328] sm:$0xff]  ;;  %v297_v42 = vld [vmem:[#allocation5 + $0x360] sm:$0xff]  ;;  %v13912_v45 = vcombine.low %v285_v33, %v289_v34 }
  0x9c   :  { %v13915_v40 = vcombine.high %v286_v35, %v290_v36  ;;  %v294_v43 = vld [vmem:[#allocation5 + $0x348] sm:$0xff]  ;;  %v13914_v46 = vcombine.low %v286_v35, %v290_v36  ;;  %v13921_v47 = vcombine.high %v293_v41, %v297_v42  ;;  %v301_v49 = vld [vmem:[#allocation5 + $0x380] sm:$0xff]  ;;  %v13920_v53 = vcombine.low %v293_v41, %v297_v42 }
  0x9d   :  { %9460 = vmatpush1.bf16.msra.mxu0 %v13864_v61  ;;  %9976 = vmatpush1.bf16.msra.mxu1 %v13866_v62  ;;  %v298_v44 = vld [vmem:[#allocation5 + $0x368] sm:$0xff]  ;;  %v305_v50 = vld [vmem:[#allocation5 + $0x3a0] sm:$0xff] }
  0x9e   :  { %9461 = vmatprep.subr.bf16.mxu0 %v13873_v63  ;;  %9977 = vmatprep.subr.bf16.mxu1 %v13875_v0  ;;  %v13923_v48 = vcombine.high %v294_v43, %v298_v44  ;;  %v302_v51 = vld [vmem:[#allocation5 + $0x388] sm:$0xff]  ;;  %v13922_v54 = vcombine.low %v294_v43, %v298_v44  ;;  %v13929_v55 = vcombine.high %v301_v49, %v305_v50  ;;  %v309_v57 = vld [vmem:[#allocation5 + $0x3c0] sm:$0xff] }
  0x9f   :  { %v306_v52 = vld [vmem:[#allocation5 + $0x3a8] sm:$0xff]  ;;  %v313_v59 = vld [vmem:[#allocation5 + $0x3e0] sm:$0xff]  ;;  %v13928_v62 = vcombine.low %v301_v49, %v305_v50 }
  0xa0   :  { %v13931_v56 = vcombine.high %v302_v51, %v306_v52  ;;  %v310_v60 = vld [vmem:[#allocation5 + $0x3c8] sm:$0xff]  ;;  %v13930_v63 = vcombine.low %v302_v51, %v306_v52  ;;  %v13937_v0 = vcombine.high %v309_v57, %v313_v59  ;;  %v317_v2 = vld [vmem:[#allocation5 + $0x400] sm:$0xff] }
  0xa1   :  { %9462 = vmatpush1.bf16.msra.mxu0 %v13872_v5  ;;  %9978 = vmatpush1.bf16.msra.mxu1 %v13874_v6  ;;  %v314_v61 = vld [vmem:[#allocation5 + $0x3e8] sm:$0xff]  ;;  %v321_v3 = vld [vmem:[#allocation5 + $0x420] sm:$0xff]  ;;  %v13936_v6 = vcombine.low %v309_v57, %v313_v59 }
  0xa2   :  { %9463 = vmatprep.subr.bf16.mxu0 %v13881_v7  ;;  %9979 = vmatprep.subr.bf16.mxu1 %v13883_v8  ;;  %v13939_v1 = vcombine.high %v310_v60, %v314_v61  ;;  %v318_v4 = vld [vmem:[#allocation5 + $0x408] sm:$0xff]  ;;  %v117_v7 = vld [vmem:[#allocation2] sm:$0xff]  ;;  %v13938_v9 = vcombine.low %v310_v60, %v314_v61  ;;  %v13945_v10 = vcombine.high %v317_v2, %v321_v3 }
  0xa3   :  { %v322_v5 = vld [vmem:[#allocation5 + $0x428] sm:$0xff]  ;;  %v141_v8 = vld [vmem:[#allocation2 + $0xc0] sm:$0xff]  ;;  %v13944_v19 = vcombine.low %v317_v2, %v321_v3 }
  0xa4   :  { %v13947_v11 = vcombine.high %v318_v4, %v322_v5  ;;  %v325_v12 = vld [vmem:[#allocation5 + $0x440] sm:$0xff]  ;;  %v13946_v20 = vcombine.low %v318_v4, %v322_v5  ;;  %v334_v26 = vld [vmem:[#allocation5 + $0x488] sm:$0xff] }
  0xa5   :  { %9464 = vmatpush1.bf16.msra.mxu0 %v13880_v13  ;;  %9980 = vmatpush1.bf16.msra.mxu1 %v13882_v14  ;;  %v329_v13 = vld [vmem:[#allocation5 + $0x460] sm:$0xff]  ;;  %v326_v14 = vld [vmem:[#allocation5 + $0x448] sm:$0xff] }
  0xa6   :  { %9465 = vmatprep.subr.bf16.mxu0 %v13889_v15  ;;  %9981 = vmatprep.subr.bf16.mxu1 %v13891_v16  ;;  %v16676_v15 = vpack.c.bf16 %v141_v8, %v117_v7  ;;  %v330_v16 = vld [vmem:[#allocation5 + $0x468] sm:$0xff]  ;;  %v13952_v28 = vcombine.low %v325_v12, %v329_v13  ;;  %v381_v8 = vld [vmem:[#allocation5 + $0x600] sm:$0xff] }
  0xa7   :  { %v338_v27 = vld [vmem:[#allocation5 + $0x4a8] sm:$0xff]  ;;  %v389_v17 = vld [vmem:[#allocation5 + $0x640] sm:$0xff] }
  0xa8   :  { %v13963_v33 = vcombine.high %v334_v26, %v338_v27  ;;  %v342_v34 = vld [vmem:[#allocation5 + $0x4c8] sm:$0xff]  ;;  %v393_v18 = vld [vmem:[#allocation5 + $0x660] sm:$0xff] }
  0xa9   :  { %9466 = vmatpush1.bf16.msra.mxu0 %v13888_v21  ;;  %9982 = vmatpush1.bf16.msra.mxu1 %v13890_v22  ;;  %v13953_v21 = vcombine.high %v325_v12, %v329_v13  ;;  %v13955_v22 = vcombine.high %v326_v14, %v330_v16  ;;  %v346_v35 = vld [vmem:[#allocation5 + $0x4e8] sm:$0xff] }
  0xaa   :  { %9467 = vmatprep.subr.bf16.mxu0 %v13897_v23  ;;  %9983 = vmatprep.subr.bf16.mxu1 %v13899_v24  ;;  %v333_v23 = vld [vmem:[#allocation5 + $0x480] sm:$0xff]  ;;  %v350_v41 = vld [vmem:[#allocation5 + $0x508] sm:$0xff]  ;;  %v13971_v42 = vcombine.high %v342_v34, %v346_v35 }
  0xab   :  { %v337_v24 = vld [vmem:[#allocation5 + $0x4a0] sm:$0xff]  ;;  %v354_v43 = vld [vmem:[#allocation5 + $0x528] sm:$0xff] }
  0xac   :  { %v13960_v36 = vcombine.low %v333_v23, %v337_v24  ;;  %v358_v49 = vld [vmem:[#allocation5 + $0x548] sm:$0xff]  ;;  %v13979_v50 = vcombine.high %v350_v41, %v354_v43 }
  0xad   :  { %9468 = vmatpush1.bf16.msra.mxu0 %v13896_v29  ;;  %9984 = vmatpush1.bf16.msra.mxu1 %v13898_v30  ;;  %v13954_v29 = vcombine.low %v326_v14, %v330_v16  ;;  %v13961_v30 = vcombine.high %v333_v23, %v337_v24  ;;  %v362_v51 = vld [vmem:[#allocation5 + $0x568] sm:$0xff]  ;;  %v14017_v24 = vcombine.high %v389_v17, %v393_v18 }
  0xae   :  { %9469 = vmatprep.subr.bf16.mxu0 %v13905_v31  ;;  %9985 = vmatprep.subr.bf16.mxu1 %v13907_v32  ;;  %v341_v31 = vld [vmem:[#allocation5 + $0x4c0] sm:$0xff]  ;;  %v366_v57 = vld [vmem:[#allocation5 + $0x588] sm:$0xff]  ;;  %v13987_v59 = vcombine.high %v358_v49, %v362_v51 }
  0xaf   :  { %v345_v32 = vld [vmem:[#allocation5 + $0x4e0] sm:$0xff]  ;;  %v370_v60 = vld [vmem:[#allocation5 + $0x5a8] sm:$0xff] }
  0xb0   :  { %v13968_v44 = vcombine.low %v341_v31, %v345_v32  ;;  %v374_v2 = vld [vmem:[#allocation5 + $0x5c8] sm:$0xff]  ;;  %v13995_v3 = vcombine.high %v366_v57, %v370_v60 }
  0xb1   :  { %9470 = vmatpush1.bf16.msra.mxu0 %v13904_v37  ;;  %9986 = vmatpush1.bf16.msra.mxu1 %v13906_v38  ;;  %v13962_v37 = vcombine.low %v334_v26, %v338_v27  ;;  %v13969_v38 = vcombine.high %v341_v31, %v345_v32  ;;  %v378_v4 = vld [vmem:[#allocation5 + $0x5e8] sm:$0xff]  ;;  %v397_v26 = vld [vmem:[#allocation5 + $0x680] sm:$0xff]  ;;  %v14016_v31 = vcombine.low %v389_v17, %v393_v18  ;;  %v119_v17 = vld [vmem:[#allocation2 + $0x10] sm:$0xff] }
  0xb2   :  { %9471 = vmatprep.subr.bf16.mxu0 %v13913_v39  ;;  %9987 = vmatprep.subr.bf16.mxu1 %v13915_v40  ;;  %v349_v39 = vld [vmem:[#allocation5 + $0x500] sm:$0xff]  ;;  %v386_v12 = vld [vmem:[#allocation5 + $0x628] sm:$0xff]  ;;  %v14002_v14 = vcombine.low %v374_v2, %v378_v4  ;;  %v143_v18 = vld [vmem:[#allocation2 + $0xd0] sm:$0xff] }
  0xb3   :  { %v353_v40 = vld [vmem:[#allocation5 + $0x520] sm:$0xff] }
  0xb4   :  { %v13976_v52 = vcombine.low %v349_v39, %v353_v40  ;;  %v401_v27 = vld [vmem:[#allocation5 + $0x6a0] sm:$0xff] }
  0xb5   :  { %9472 = vmatpush1.bf16.msra.mxu0 %v13912_v45  ;;  %9988 = vmatpush1.bf16.msra.mxu1 %v13914_v46  ;;  %v13970_v45 = vcombine.low %v342_v34, %v346_v35  ;;  %v13977_v46 = vcombine.high %v349_v39, %v353_v40  ;;  %v405_v34 = vld [vmem:[#allocation5 + $0x6c0] sm:$0xff]  ;;  %v14024_v39 = vcombine.low %v397_v26, %v401_v27 }
  0xb6   :  { %9473 = vmatprep.subr.bf16.mxu0 %v13921_v47  ;;  %9989 = vmatprep.subr.bf16.mxu1 %v13923_v48  ;;  %v357_v47 = vld [vmem:[#allocation5 + $0x540] sm:$0xff] }
  0xb7   :  { %v361_v48 = vld [vmem:[#allocation5 + $0x560] sm:$0xff] }
  0xb8   :  { %v13984_v61 = vcombine.low %v357_v47, %v361_v48  ;;  %v409_v35 = vld [vmem:[#allocation5 + $0x6e0] sm:$0xff] }
  0xb9   :  { %9474 = vmatpush1.bf16.msra.mxu0 %v13920_v53  ;;  %9990 = vmatpush1.bf16.msra.mxu1 %v13922_v54  ;;  %v13978_v53 = vcombine.low %v350_v41, %v354_v43  ;;  %v13985_v54 = vcombine.high %v357_v47, %v361_v48  ;;  %v14033_v41 = vcombine.high %v405_v34, %v409_v35  ;;  %v417_v43 = vld [vmem:[#allocation5 + $0x720] sm:$0xff] }
  0xba   :  { %9475 = vmatprep.subr.bf16.mxu0 %v13929_v55  ;;  %9991 = vmatprep.subr.bf16.mxu1 %v13931_v56  ;;  %v365_v55 = vld [vmem:[#allocation5 + $0x580] sm:$0xff]  ;;  %v14032_v47 = vcombine.low %v405_v34, %v409_v35 }
  0xbb   :  { %v369_v56 = vld [vmem:[#allocation5 + $0x5a0] sm:$0xff] }
  0xbc   :  { %v13992_v5 = vcombine.low %v365_v55, %v369_v56  ;;  %v461_v35 = vld [vmem:[#allocation5 + $0x880] sm:$0xff] }
  0xbd   :  { %9476 = vmatpush1.bf16.msra.mxu0 %v13928_v62  ;;  %9992 = vmatpush1.bf16.msra.mxu1 %v13930_v63  ;;  %v13986_v62 = vcombine.low %v358_v49, %v362_v51  ;;  %v13993_v63 = vcombine.high %v365_v55, %v369_v56  ;;  %v425_v51 = vld [vmem:[#allocation5 + $0x760] sm:$0xff] }
  0xbe   :  { %9477 = vmatprep.subr.bf16.mxu0 %v13937_v0  ;;  %9993 = vmatprep.subr.bf16.mxu1 %v13939_v1  ;;  %v373_v0 = vld [vmem:[#allocation5 + $0x5c0] sm:$0xff] }
  0xbf   :  { %v377_v1 = vld [vmem:[#allocation5 + $0x5e0] sm:$0xff] }
  0xc0   :  { %v14001_v7 = vcombine.high %v373_v0, %v377_v1  ;;  %v14000_v13 = vcombine.low %v373_v0, %v377_v1 }
  0xc1   :  { %9478 = vmatpush1.bf16.msra.mxu0 %v13936_v6  ;;  %9994 = vmatpush1.bf16.msra.mxu1 %v13938_v9  ;;  %v13994_v6 = vcombine.low %v366_v57, %v370_v60  ;;  %v385_v9 = vld [vmem:[#allocation5 + $0x620] sm:$0xff] }
  0xc2   :  { %9490 = vmatprep.subr.bf16.mxu0 %v13945_v10  ;;  %10006 = vmatprep.subr.bf16.mxu1 %v13947_v11  ;;  %v382_v10 = vld [vmem:[#allocation5 + $0x608] sm:$0xff]  ;;  %v14003_v11 = vcombine.high %v374_v2, %v378_v4  ;;  %v14009_v16 = vcombine.high %v381_v8, %v385_v9  ;;  %v433_v60 = vld [vmem:[#allocation5 + $0x7a0] sm:$0xff] }
  0xc3   :  { %v14010_v23 = vcombine.low %v382_v10, %v386_v12  ;;  %v441_v4 = vld [vmem:[#allocation5 + $0x7e0] sm:$0xff] }
  0xc4   :  { %9480 = vmatmul.mubr.bf16.vlgmr.msra.gmra.mrb[0].mxu0 %v16676_v15  ;;  %9996 = vmatmul.mubr.bf16.vlgmr.msra.gmra.mrb[0].mxu1 %v16676_v15 }
  0xc5   :  { %9491 = vmatpush1.bf16.msra.mxu0 %v13944_v19  ;;  %10007 = vmatpush1.bf16.msra.mxu1 %v13946_v20  ;;  %v390_v19 = vld [vmem:[#allocation5 + $0x648] sm:$0xff]  ;;  %v14011_v20 = vcombine.high %v382_v10, %v386_v12  ;;  %v449_v12 = vld [vmem:[#allocation5 + $0x820] sm:$0xff] }
  0xc6   :  { %9492 = vmatprep.subr.bf16.mxu0 %v13953_v21  ;;  %10008 = vmatprep.subr.bf16.mxu1 %v13955_v22  ;;  %v394_v21 = vld [vmem:[#allocation5 + $0x668] sm:$0xff]  ;;  %v14008_v22 = vcombine.low %v381_v8, %v385_v9  ;;  %v445_v9 = vld [vmem:[#allocation5 + $0x800] sm:$0xff] }
  0xc7   :  { %9522 = vmatprep.mubr.bf16.mxu0 %v16678_v25  ;;  %10038 = vmatprep.mubr.bf16.mxu1 %v16678_v25  ;;  %v14018_v32 = vcombine.low %v390_v19, %v394_v21 }
  0xc9   :  { %9493 = vmatpush1.bf16.msra.mxu0 %v13952_v28  ;;  %10009 = vmatpush1.bf16.msra.mxu1 %v13954_v29  ;;  %v398_v28 = vld [vmem:[#allocation5 + $0x688] sm:$0xff]  ;;  %v14019_v29 = vcombine.high %v390_v19, %v394_v21  ;;  %v457_v21 = vld [vmem:[#allocation5 + $0x860] sm:$0xff] }
  0xca   :  { %9494 = vmatprep.subr.bf16.mxu0 %v13961_v30  ;;  %10010 = vmatprep.subr.bf16.mxu1 %v13963_v33  ;;  %v402_v30 = vld [vmem:[#allocation5 + $0x6a8] sm:$0xff]  ;;  %v14025_v33 = vcombine.high %v397_v26, %v401_v27 }
  0xcb   :  { %v14026_v40 = vcombine.low %v398_v28, %v402_v30  ;;  %v458_v26 = vld [vmem:[#allocation5 + $0x868] sm:$0xff] }
  0xcc   :  { %v122_v27 = vld [vmem:[#allocation2 + $0x28] sm:$0xff] }
  0xcd   :  { %9495 = vmatpush1.bf16.msra.mxu0 %v13960_v36  ;;  %10011 = vmatpush1.bf16.msra.mxu1 %v13962_v37  ;;  %v406_v36 = vld [vmem:[#allocation5 + $0x6c8] sm:$0xff]  ;;  %v14027_v37 = vcombine.high %v398_v28, %v402_v30  ;;  %v16684_v30 = vpack.c.bf16 %v143_v18, %v119_v17 }
  0xce   :  { %9496 = vmatprep.subr.bf16.mxu0 %v13969_v38  ;;  %10012 = vmatprep.subr.bf16.mxu1 %v13971_v42  ;;  %v410_v38 = vld [vmem:[#allocation5 + $0x6e8] sm:$0xff]  ;;  %v413_v42 = vld [vmem:[#allocation5 + $0x700] sm:$0xff] }
  0xcf   :  { %v14034_v48 = vcombine.low %v406_v36, %v410_v38  ;;  %v14041_v49 = vcombine.high %v413_v42, %v417_v43  ;;  %v14040_v55 = vcombine.low %v413_v42, %v417_v43  ;;  %v469_v43 = vld [vmem:[#allocation5 + $0x8c0] sm:$0xff]  ;;  %v506_v17 = vld [vmem:[#allocation5 + $0x9e8] sm:$0xff] }
  0xd1   :  { %9497 = vmatpush1.bf16.msra.mxu0 %v13968_v44  ;;  %10013 = vmatpush1.bf16.msra.mxu1 %v13970_v45  ;;  %v414_v44 = vld [vmem:[#allocation5 + $0x708] sm:$0xff]  ;;  %v14035_v45 = vcombine.high %v406_v36, %v410_v38  ;;  %v465_v36 = vld [vmem:[#allocation5 + $0x8a0] sm:$0xff] }
  0xd2   :  { %9498 = vmatprep.subr.bf16.mxu0 %v13977_v46  ;;  %10014 = vmatprep.subr.bf16.mxu1 %v13979_v50  ;;  %v418_v46 = vld [vmem:[#allocation5 + $0x728] sm:$0xff]  ;;  %v421_v50 = vld [vmem:[#allocation5 + $0x740] sm:$0xff]  ;;  %v14089_v42 = vcombine.high %v461_v35, %v465_v36 }
  0xd3   :  { %v14042_v56 = vcombine.low %v414_v44, %v418_v46  ;;  %v14049_v57 = vcombine.high %v421_v50, %v425_v51  ;;  %v14048_v0 = vcombine.low %v421_v50, %v425_v51  ;;  %v462_v38 = vld [vmem:[#allocation5 + $0x888] sm:$0xff]  ;;  %v477_v51 = vld [vmem:[#allocation5 + $0x900] sm:$0xff] }
  0xd5   :  { %9499 = vmatpush1.bf16.msra.mxu0 %v13976_v52  ;;  %10015 = vmatpush1.bf16.msra.mxu1 %v13978_v53  ;;  %v422_v52 = vld [vmem:[#allocation5 + $0x748] sm:$0xff]  ;;  %v14043_v53 = vcombine.high %v414_v44, %v418_v46  ;;  %v473_v44 = vld [vmem:[#allocation5 + $0x8e0] sm:$0xff] }
  0xd6   :  { %9500 = vmatprep.subr.bf16.mxu0 %v13985_v54  ;;  %10016 = vmatprep.subr.bf16.mxu1 %v13987_v59  ;;  %v426_v54 = vld [vmem:[#allocation5 + $0x768] sm:$0xff]  ;;  %v429_v59 = vld [vmem:[#allocation5 + $0x780] sm:$0xff]  ;;  %v14097_v50 = vcombine.high %v469_v43, %v473_v44 }
  0xd7   :  { %v14050_v1 = vcombine.low %v422_v52, %v426_v54  ;;  %v14057_v2 = vcombine.high %v429_v59, %v433_v60  ;;  %v14056_v8 = vcombine.low %v429_v59, %v433_v60  ;;  %v485_v60 = vld [vmem:[#allocation5 + $0x940] sm:$0xff] }
  0xd9   :  { %9501 = vmatpush1.bf16.msra.mxu0 %v13984_v61  ;;  %10017 = vmatpush1.bf16.msra.mxu1 %v13986_v62  ;;  %v430_v61 = vld [vmem:[#allocation5 + $0x788] sm:$0xff]  ;;  %v14051_v62 = vcombine.high %v422_v52, %v426_v54  ;;  %v481_v52 = vld [vmem:[#allocation5 + $0x920] sm:$0xff] }
  0xda   :  { %9502 = vmatprep.subr.bf16.mxu0 %v13993_v63  ;;  %10018 = vmatprep.subr.bf16.mxu1 %v13995_v3  ;;  %v434_v63 = vld [vmem:[#allocation5 + $0x7a8] sm:$0xff]  ;;  %v437_v3 = vld [vmem:[#allocation5 + $0x7c0] sm:$0xff]  ;;  %v14105_v59 = vcombine.high %v477_v51, %v481_v52 }
  0xdb   :  { %v14058_v10 = vcombine.low %v430_v61, %v434_v63  ;;  %v14064_v19 = vcombine.low %v437_v3, %v441_v4 }
  0xdd   :  { %9503 = vmatpush1.bf16.msra.mxu0 %v13992_v5  ;;  %10019 = vmatpush1.bf16.msra.mxu1 %v13994_v6  ;;  %v438_v5 = vld [vmem:[#allocation5 + $0x7c8] sm:$0xff]  ;;  %v14059_v6 = vcombine.high %v430_v61, %v434_v63  ;;  %v489_v61 = vld [vmem:[#allocation5 + $0x960] sm:$0xff] }
  0xde   :  { %9504 = vmatprep.subr.bf16.mxu0 %v14001_v7  ;;  %10020 = vmatprep.subr.bf16.mxu1 %v14003_v11  ;;  %v442_v7 = vld [vmem:[#allocation5 + $0x7e8] sm:$0xff]  ;;  %v14065_v11 = vcombine.high %v437_v3, %v441_v4  ;;  %v14113_v3 = vcombine.high %v485_v60, %v489_v61  ;;  %v493_v4 = vld [vmem:[#allocation5 + $0x980] sm:$0xff] }
  0xe1   :  { %9505 = vmatpush1.bf16.msra.mxu0 %v14000_v13  ;;  %10021 = vmatpush1.bf16.msra.mxu1 %v14002_v14  ;;  %v446_v13 = vld [vmem:[#allocation5 + $0x808] sm:$0xff] }
  0xe2   :  { %9506 = vmatprep.subr.bf16.mxu0 %v14009_v16  ;;  %10022 = vmatprep.subr.bf16.mxu1 %v14011_v20  ;;  %v450_v14 = vld [vmem:[#allocation5 + $0x828] sm:$0xff]  ;;  %v14067_v16 = vcombine.high %v438_v5, %v442_v7  ;;  %v453_v20 = vld [vmem:[#allocation5 + $0x840] sm:$0xff] }
  0xe3   :  { %v14075_v28 = vcombine.high %v446_v13, %v450_v14 }
  0xe5   :  { %9507 = vmatpush1.bf16.msra.mxu0 %v14008_v22  ;;  %10023 = vmatpush1.bf16.msra.mxu1 %v14010_v23  ;;  %v14066_v22 = vcombine.low %v438_v5, %v442_v7  ;;  %v14073_v23 = vcombine.high %v445_v9, %v449_v12  ;;  %v497_v5 = vld [vmem:[#allocation5 + $0x9a0] sm:$0xff] }
  0xe6   :  { %9508 = vmatprep.subr.bf16.mxu0 %v14017_v24  ;;  %10024 = vmatprep.subr.bf16.mxu1 %v14019_v29  ;;  %v454_v24 = vld [vmem:[#allocation5 + $0x848] sm:$0xff]  ;;  %v14120_v18 = vcombine.low %v493_v4, %v497_v5 }
  0xe7   :  { %v146_v29 = vld [vmem:[#allocation2 + $0xe8] sm:$0xff]  ;;  %v14083_v34 = vcombine.high %v454_v24, %v458_v26 }
  0xe9   :  { %9509 = vmatpush1.bf16.msra.mxu0 %v14016_v31  ;;  %10025 = vmatpush1.bf16.msra.mxu1 %v14018_v32  ;;  %v14072_v31 = vcombine.low %v445_v9, %v449_v12  ;;  %v14074_v32 = vcombine.low %v446_v13, %v450_v14  ;;  %v14112_v9 = vcombine.low %v485_v60, %v489_v61  ;;  %v501_v12 = vld [vmem:[#allocation5 + $0x9c0] sm:$0xff]  ;;  %v502_v14 = vld [vmem:[#allocation5 + $0x9c8] sm:$0xff] }
  0xea   :  { %9510 = vmatprep.subr.bf16.mxu0 %v14025_v33  ;;  %10026 = vmatprep.subr.bf16.mxu1 %v14027_v37  ;;  %v14081_v33 = vcombine.high %v453_v20, %v457_v21  ;;  %v16686_v37 = vpack.c.bf16 %v146_v29, %v122_v27  ;;  %v505_v13 = vld [vmem:[#allocation5 + $0x9e0] sm:$0xff]  ;;  %v546_v61 = vld [vmem:[#allocation5 + $0xb28] sm:$0xff] }
  0xeb   :  { %v14128_v27 = vcombine.low %v501_v12, %v505_v13 }
  0xed   :  { %9511 = vmatpush1.bf16.msra.mxu0 %v14024_v39  ;;  %10027 = vmatpush1.bf16.msra.mxu1 %v14026_v40  ;;  %v466_v39 = vld [vmem:[#allocation5 + $0x8a8] sm:$0xff]  ;;  %v14080_v40 = vcombine.low %v453_v20, %v457_v21  ;;  %v14129_v20 = vcombine.high %v501_v12, %v505_v13  ;;  %v509_v21 = vld [vmem:[#allocation5 + $0xa00] sm:$0xff] }
  0xee   :  { %9512 = vmatprep.subr.bf16.mxu0 %v14033_v41  ;;  %10028 = vmatprep.subr.bf16.mxu1 %v14035_v45  ;;  %v14082_v41 = vcombine.low %v454_v24, %v458_v26  ;;  %v470_v45 = vld [vmem:[#allocation5 + $0x8c8] sm:$0xff]  ;;  %v14091_v46 = vcombine.high %v462_v38, %v466_v39  ;;  %v14131_v24 = vcombine.high %v502_v14, %v506_v17 }
  0xef   :  { %v514_v26 = vld [vmem:[#allocation5 + $0xa28] sm:$0xff] }
  0xf0   :  { %v562_v13 = vld [vmem:[#allocation5 + $0xba8] sm:$0xff] }
  0xf1   :  { %9513 = vmatpush1.bf16.msra.mxu0 %v14032_v47  ;;  %10029 = vmatpush1.bf16.msra.mxu1 %v14034_v48  ;;  %v474_v47 = vld [vmem:[#allocation5 + $0x8e8] sm:$0xff]  ;;  %v14088_v48 = vcombine.low %v461_v35, %v465_v36 }
  0xf2   :  { %9514 = vmatprep.subr.bf16.mxu0 %v14041_v49  ;;  %10030 = vmatprep.subr.bf16.mxu1 %v14043_v53  ;;  %v14090_v49 = vcombine.low %v462_v38, %v466_v39  ;;  %v478_v53 = vld [vmem:[#allocation5 + $0x908] sm:$0xff]  ;;  %v14099_v54 = vcombine.high %v470_v45, %v474_v47 }
  0xf3   :  { %v522_v35 = vld [vmem:[#allocation5 + $0xa68] sm:$0xff] }
  0xf5   :  { %9515 = vmatpush1.bf16.msra.mxu0 %v14040_v55  ;;  %10031 = vmatpush1.bf16.msra.mxu1 %v14042_v56  ;;  %v482_v55 = vld [vmem:[#allocation5 + $0x928] sm:$0xff]  ;;  %v14096_v56 = vcombine.low %v469_v43, %v473_v44 }
  0xf6   :  { %9516 = vmatprep.subr.bf16.mxu0 %v14049_v57  ;;  %10032 = vmatprep.subr.bf16.mxu1 %v14051_v62  ;;  %v14098_v57 = vcombine.low %v470_v45, %v474_v47  ;;  %v486_v62 = vld [vmem:[#allocation5 + $0x948] sm:$0xff]  ;;  %v14107_v63 = vcombine.high %v478_v53, %v482_v55 }
  0xf7   :  { %v530_v44 = vld [vmem:[#allocation5 + $0xaa8] sm:$0xff] }
  0xf9   :  { %9517 = vmatpush1.bf16.msra.mxu0 %v14048_v0  ;;  %10033 = vmatpush1.bf16.msra.mxu1 %v14050_v1  ;;  %v490_v0 = vld [vmem:[#allocation5 + $0x968] sm:$0xff]  ;;  %v14104_v1 = vcombine.low %v477_v51, %v481_v52 }
  0xfa   :  { %9518 = vmatprep.subr.bf16.mxu0 %v14057_v2  ;;  %10034 = vmatprep.subr.bf16.mxu1 %v14059_v6  ;;  %v14106_v2 = vcombine.low %v478_v53, %v482_v55  ;;  %v494_v6 = vld [vmem:[#allocation5 + $0x988] sm:$0xff]  ;;  %v14115_v7 = vcombine.high %v486_v62, %v490_v0 }
  0xfb   :  { %v538_v52 = vld [vmem:[#allocation5 + $0xae8] sm:$0xff] }
  0xfd   :  { %9519 = vmatpush1.bf16.msra.mxu0 %v14056_v8  ;;  %10035 = vmatpush1.bf16.msra.mxu1 %v14058_v10  ;;  %v498_v8 = vld [vmem:[#allocation5 + $0x9a8] sm:$0xff]  ;;  %v14114_v10 = vcombine.low %v486_v62, %v490_v0 }
  0xfe   :  { %9520 = vmatprep.subr.bf16.mxu0 %v14065_v11  ;;  %10036 = vmatprep.subr.bf16.mxu1 %v14067_v16  ;;  %v14121_v11 = vcombine.high %v493_v4, %v497_v5  ;;  %v14123_v16 = vcombine.high %v494_v6, %v498_v8  ;;  %v554_v5 = vld [vmem:[#allocation5 + $0xb68] sm:$0xff] }
 0x101   :  { %9521 = vmatpush1.bf16.msra.mxu0 %v14064_v19  ;;  %10037 = vmatpush1.bf16.msra.mxu1 %v14066_v22  ;;  %v14122_v19 = vcombine.low %v494_v6, %v498_v8  ;;  %v513_v22 = vld [vmem:[#allocation5 + $0xa20] sm:$0xff] }
 0x102   :  { %9533 = vmatprep.subr.bf16.mxu0 %v14073_v23  ;;  %10049 = vmatprep.subr.bf16.mxu1 %v14075_v28  ;;  %v510_v23 = vld [vmem:[#allocation5 + $0xa08] sm:$0xff]  ;;  %v14130_v28 = vcombine.low %v502_v14, %v506_v17  ;;  %v14137_v29 = vcombine.high %v509_v21, %v513_v22  ;;  %v14136_v36 = vcombine.low %v509_v21, %v513_v22 }
 0x103   :  { %v14138_v38 = vcombine.low %v510_v23, %v514_v26  ;;  %v570_v22 = vld [vmem:[#allocation5 + $0xbe8] sm:$0xff] }
 0x104   :  { %9523 = vmatmul.mubr.bf16.vlgmr.msra.gmra.mrb[0].mxu0 %v16684_v30  ;;  %10039 = vmatmul.mubr.bf16.vlgmr.msra.gmra.mrb[0].mxu1 %v16684_v30 }
 0x105   :  { %9534 = vmatpush1.bf16.msra.mxu0 %v14072_v31  ;;  %10050 = vmatpush1.bf16.msra.mxu1 %v14074_v32  ;;  %v517_v31 = vld [vmem:[#allocation5 + $0xa40] sm:$0xff] }
 0x106   :  { %9535 = vmatprep.subr.bf16.mxu0 %v14081_v33  ;;  %10051 = vmatprep.subr.bf16.mxu1 %v14083_v34  ;;  %v521_v32 = vld [vmem:[#allocation5 + $0xa60] sm:$0xff]  ;;  %v518_v33 = vld [vmem:[#allocation5 + $0xa48] sm:$0xff]  ;;  %v14139_v34 = vcombine.high %v510_v23, %v514_v26 }
 0x107   :  { %9565 = vmatprep.mubr.bf16.mxu0 %v16686_v37  ;;  %10081 = vmatprep.mubr.bf16.mxu1 %v16686_v37  ;;  %v14145_v39 = vcombine.high %v517_v31, %v521_v32  ;;  %v14147_v43 = vcombine.high %v518_v33, %v522_v35  ;;  %v14144_v45 = vcombine.low %v517_v31, %v521_v32  ;;  %v578_v31 = vld [vmem:[#allocation5 + $0xc28] sm:$0xff] }
 0x109   :  { %9536 = vmatpush1.bf16.msra.mxu0 %v14080_v40  ;;  %10052 = vmatpush1.bf16.msra.mxu1 %v14082_v41  ;;  %v525_v40 = vld [vmem:[#allocation5 + $0xa80] sm:$0xff] }
 0x10a   :  { %9537 = vmatprep.subr.bf16.mxu0 %v14089_v42  ;;  %10053 = vmatprep.subr.bf16.mxu1 %v14091_v46  ;;  %v529_v41 = vld [vmem:[#allocation5 + $0xaa0] sm:$0xff]  ;;  %v526_v42 = vld [vmem:[#allocation5 + $0xa88] sm:$0xff]  ;;  %v14146_v46 = vcombine.low %v518_v33, %v522_v35 }
 0x10b   :  { %v14153_v47 = vcombine.high %v525_v40, %v529_v41  ;;  %v14155_v51 = vcombine.high %v526_v42, %v530_v44  ;;  %v14152_v53 = vcombine.low %v525_v40, %v529_v41  ;;  %v121_v33 = vld [vmem:[#allocation2 + $0x20] sm:$0xff]  ;;  %v582_v41 = vld [vmem:[#allocation5 + $0xc48] sm:$0xff] }
 0x10d   :  { %9538 = vmatpush1.bf16.msra.mxu0 %v14088_v48  ;;  %10054 = vmatpush1.bf16.msra.mxu1 %v14090_v49  ;;  %v533_v48 = vld [vmem:[#allocation5 + $0xac0] sm:$0xff] }
 0x10e   :  { %9539 = vmatprep.subr.bf16.mxu0 %v14097_v50  ;;  %10055 = vmatprep.subr.bf16.mxu1 %v14099_v54  ;;  %v537_v49 = vld [vmem:[#allocation5 + $0xae0] sm:$0xff]  ;;  %v534_v50 = vld [vmem:[#allocation5 + $0xac8] sm:$0xff]  ;;  %v14154_v54 = vcombine.low %v526_v42, %v530_v44 }
 0x10f   :  { %v14161_v55 = vcombine.high %v533_v48, %v537_v49  ;;  %v14163_v60 = vcombine.high %v534_v50, %v538_v52  ;;  %v14160_v62 = vcombine.low %v533_v48, %v537_v49  ;;  %v586_v42 = vld [vmem:[#allocation5 + $0xc68] sm:$0xff] }
 0x111   :  { %9540 = vmatpush1.bf16.msra.mxu0 %v14096_v56  ;;  %10056 = vmatpush1.bf16.msra.mxu1 %v14098_v57  ;;  %v541_v56 = vld [vmem:[#allocation5 + $0xb00] sm:$0xff] }
 0x112   :  { %9541 = vmatprep.subr.bf16.mxu0 %v14105_v59  ;;  %10057 = vmatprep.subr.bf16.mxu1 %v14107_v63  ;;  %v545_v57 = vld [vmem:[#allocation5 + $0xb20] sm:$0xff]  ;;  %v542_v59 = vld [vmem:[#allocation5 + $0xb08] sm:$0xff]  ;;  %v14162_v63 = vcombine.low %v534_v50, %v538_v52  ;;  %v14211_v50 = vcombine.high %v582_v41, %v586_v42 }
 0x113   :  { %v14169_v0 = vcombine.high %v541_v56, %v545_v57  ;;  %v14171_v4 = vcombine.high %v542_v59, %v546_v61  ;;  %v14168_v6 = vcombine.low %v541_v56, %v545_v57  ;;  %v593_v52 = vld [vmem:[#allocation5 + $0xca0] sm:$0xff]  ;;  %v14210_v57 = vcombine.low %v582_v41, %v586_v42  ;;  %v638_v42 = vld [vmem:[#allocation5 + $0xe08] sm:$0xff] }
 0x114   :  { %v641_v41 = vld [vmem:[#allocation5 + $0xe20] sm:$0xff] }
 0x115   :  { %9542 = vmatpush1.bf16.msra.mxu0 %v14104_v1  ;;  %10058 = vmatpush1.bf16.msra.mxu1 %v14106_v2  ;;  %v549_v1 = vld [vmem:[#allocation5 + $0xb40] sm:$0xff] }
 0x116   :  { %9543 = vmatprep.subr.bf16.mxu0 %v14113_v3  ;;  %10059 = vmatprep.subr.bf16.mxu1 %v14115_v7  ;;  %v553_v2 = vld [vmem:[#allocation5 + $0xb60] sm:$0xff]  ;;  %v550_v3 = vld [vmem:[#allocation5 + $0xb48] sm:$0xff]  ;;  %v14170_v7 = vcombine.low %v542_v59, %v546_v61 }
 0x117   :  { %v14177_v8 = vcombine.high %v549_v1, %v553_v2  ;;  %v14179_v12 = vcombine.high %v550_v3, %v554_v5  ;;  %v14176_v14 = vcombine.low %v549_v1, %v553_v2  ;;  %v601_v61 = vld [vmem:[#allocation5 + $0xce0] sm:$0xff] }
 0x119   :  { %9544 = vmatpush1.bf16.msra.mxu0 %v14112_v9  ;;  %10060 = vmatpush1.bf16.msra.mxu1 %v14114_v10  ;;  %v557_v9 = vld [vmem:[#allocation5 + $0xb80] sm:$0xff] }
 0x11a   :  { %9545 = vmatprep.subr.bf16.mxu0 %v14121_v11  ;;  %10061 = vmatprep.subr.bf16.mxu1 %v14123_v16  ;;  %v561_v10 = vld [vmem:[#allocation5 + $0xba0] sm:$0xff]  ;;  %v558_v11 = vld [vmem:[#allocation5 + $0xb88] sm:$0xff]  ;;  %v14178_v16 = vcombine.low %v550_v3, %v554_v5 }
 0x11b   :  { %v14185_v17 = vcombine.high %v557_v9, %v561_v10  ;;  %v14187_v21 = vcombine.high %v558_v11, %v562_v13  ;;  %v14184_v23 = vcombine.low %v557_v9, %v561_v10  ;;  %v14186_v26 = vcombine.low %v558_v11, %v562_v13  ;;  %v609_v5 = vld [vmem:[#allocation5 + $0xd20] sm:$0xff] }
 0x11c   :  { %v617_v13 = vld [vmem:[#allocation5 + $0xd60] sm:$0xff] }
 0x11d   :  { %9546 = vmatpush1.bf16.msra.mxu0 %v14120_v18  ;;  %10062 = vmatpush1.bf16.msra.mxu1 %v14122_v19  ;;  %v565_v18 = vld [vmem:[#allocation5 + $0xbc0] sm:$0xff] }
 0x11e   :  { %9547 = vmatprep.subr.bf16.mxu0 %v14129_v20  ;;  %10063 = vmatprep.subr.bf16.mxu1 %v14131_v24  ;;  %v569_v19 = vld [vmem:[#allocation5 + $0xbe0] sm:$0xff]  ;;  %v566_v20 = vld [vmem:[#allocation5 + $0xbc8] sm:$0xff] }
 0x11f   :  { %v573_v24 = vld [vmem:[#allocation5 + $0xc00] sm:$0xff]  ;;  %v14195_v32 = vcombine.high %v566_v20, %v570_v22  ;;  %v14192_v35 = vcombine.low %v565_v18, %v569_v19 }
 0x121   :  { %9548 = vmatpush1.bf16.msra.mxu0 %v14128_v27  ;;  %10064 = vmatpush1.bf16.msra.mxu1 %v14130_v28  ;;  %v14193_v27 = vcombine.high %v565_v18, %v569_v19  ;;  %v577_v28 = vld [vmem:[#allocation5 + $0xc20] sm:$0xff] }
 0x122   :  { %9549 = vmatprep.subr.bf16.mxu0 %v14137_v29  ;;  %10065 = vmatprep.subr.bf16.mxu1 %v14139_v34  ;;  %v574_v29 = vld [vmem:[#allocation5 + $0xc08] sm:$0xff]  ;;  %v145_v34 = vld [vmem:[#allocation2 + $0xe0] sm:$0xff]  ;;  %v14201_v40 = vcombine.high %v573_v24, %v577_v28 }
 0x123   :  { %v14203_v44 = vcombine.high %v574_v29, %v578_v31  ;;  %v14202_v48 = vcombine.low %v574_v29, %v578_v31  ;;  %v629_v31 = vld [vmem:[#allocation5 + $0xdc0] sm:$0xff] }
 0x125   :  { %9550 = vmatpush1.bf16.msra.mxu0 %v14136_v36  ;;  %10066 = vmatpush1.bf16.msra.mxu1 %v14138_v38  ;;  %v581_v36 = vld [vmem:[#allocation5 + $0xc40] sm:$0xff] }
 0x126   :  { %9551 = vmatprep.subr.bf16.mxu0 %v14145_v39  ;;  %10067 = vmatprep.subr.bf16.mxu1 %v14147_v43  ;;  %v585_v38 = vld [vmem:[#allocation5 + $0xc60] sm:$0xff]  ;;  %v14194_v39 = vcombine.low %v566_v20, %v570_v22  ;;  %v124_v43 = vld [vmem:[#allocation2 + $0x38] sm:$0xff] }
 0x127   :  { %v14209_v49 = vcombine.high %v581_v36, %v585_v38  ;;  %v14208_v56 = vcombine.low %v581_v36, %v585_v38  ;;  %v625_v22 = vld [vmem:[#allocation5 + $0xda0] sm:$0xff] }
 0x129   :  { %9552 = vmatpush1.bf16.msra.mxu0 %v14144_v45  ;;  %10068 = vmatpush1.bf16.msra.mxu1 %v14146_v46  ;;  %v148_v45 = vld [vmem:[#allocation2 + $0xf8] sm:$0xff]  ;;  %v16692_v46 = vpack.c.bf16 %v145_v34, %v121_v33  ;;  %v630_v33 = vld [vmem:[#allocation5 + $0xdc8] sm:$0xff] }
 0x12a   :  { %9553 = vmatprep.subr.bf16.mxu0 %v14153_v47  ;;  %10069 = vmatprep.subr.bf16.mxu1 %v14155_v51  ;;  %v14200_v47 = vcombine.low %v573_v24, %v577_v28  ;;  %v589_v51 = vld [vmem:[#allocation5 + $0xc80] sm:$0xff] }
 0x12b   :  { %v14217_v59 = vcombine.high %v589_v51, %v593_v52  ;;  %v14216_v1 = vcombine.low %v589_v51, %v593_v52  ;;  %v646_v51 = vld [vmem:[#allocation5 + $0xe48] sm:$0xff] }
 0x12d   :  { %9554 = vmatpush1.bf16.msra.mxu0 %v14152_v53  ;;  %10070 = vmatpush1.bf16.msra.mxu1 %v14154_v54  ;;  %v16694_v53 = vpack.c.bf16 %v148_v45, %v124_v43  ;;  %v590_v54 = vld [vmem:[#allocation5 + $0xc88] sm:$0xff] }
 0x12e   :  { %9555 = vmatprep.subr.bf16.mxu0 %v14161_v55  ;;  %10071 = vmatprep.subr.bf16.mxu1 %v14163_v60  ;;  %v594_v55 = vld [vmem:[#allocation5 + $0xca8] sm:$0xff]  ;;  %v597_v60 = vld [vmem:[#allocation5 + $0xcc0] sm:$0xff] }
 0x12f   :  { %v14218_v2 = vcombine.low %v590_v54, %v594_v55  ;;  %v14225_v3 = vcombine.high %v597_v60, %v601_v61  ;;  %v14224_v9 = vcombine.low %v597_v60, %v601_v61  ;;  %v657_v60 = vld [vmem:[#allocation5 + $0xea0] sm:$0xff]  ;;  %v654_v61 = vld [vmem:[#allocation5 + $0xe88] sm:$0xff] }
 0x131   :  { %9556 = vmatpush1.bf16.msra.mxu0 %v14160_v62  ;;  %10072 = vmatpush1.bf16.msra.mxu1 %v14162_v63  ;;  %v598_v62 = vld [vmem:[#allocation5 + $0xcc8] sm:$0xff]  ;;  %v14219_v63 = vcombine.high %v590_v54, %v594_v55 }
 0x132   :  { %9557 = vmatprep.subr.bf16.mxu0 %v14169_v0  ;;  %10073 = vmatprep.subr.bf16.mxu1 %v14171_v4  ;;  %v602_v0 = vld [vmem:[#allocation5 + $0xce8] sm:$0xff]  ;;  %v605_v4 = vld [vmem:[#allocation5 + $0xd00] sm:$0xff] }
 0x133   :  { %v14226_v10 = vcombine.low %v598_v62, %v602_v0  ;;  %v14233_v11 = vcombine.high %v605_v4, %v609_v5  ;;  %v14232_v18 = vcombine.low %v605_v4, %v609_v5  ;;  %v650_v54 = vld [vmem:[#allocation5 + $0xe68] sm:$0xff]  ;;  %v665_v4 = vld [vmem:[#allocation5 + $0xee0] sm:$0xff] }
 0x134   :  { %v662_v5 = vld [vmem:[#allocation5 + $0xec8] sm:$0xff] }
 0x135   :  { %9558 = vmatpush1.bf16.msra.mxu0 %v14168_v6  ;;  %10074 = vmatpush1.bf16.msra.mxu1 %v14170_v7  ;;  %v606_v6 = vld [vmem:[#allocation5 + $0xd08] sm:$0xff]  ;;  %v14227_v7 = vcombine.high %v598_v62, %v602_v0  ;;  %v14275_v62 = vcombine.high %v646_v51, %v650_v54 }
 0x136   :  { %9559 = vmatprep.subr.bf16.mxu0 %v14177_v8  ;;  %10075 = vmatprep.subr.bf16.mxu1 %v14179_v12  ;;  %v610_v8 = vld [vmem:[#allocation5 + $0xd28] sm:$0xff]  ;;  %v613_v12 = vld [vmem:[#allocation5 + $0xd40] sm:$0xff] }
 0x137   :  { %v14234_v19 = vcombine.low %v606_v6, %v610_v8  ;;  %v14241_v20 = vcombine.high %v613_v12, %v617_v13 }
 0x139   :  { %9560 = vmatpush1.bf16.msra.mxu0 %v14176_v14  ;;  %10076 = vmatpush1.bf16.msra.mxu1 %v14178_v16  ;;  %v614_v14 = vld [vmem:[#allocation5 + $0xd48] sm:$0xff]  ;;  %v14235_v16 = vcombine.high %v606_v6, %v610_v8 }
 0x13a   :  { %9561 = vmatprep.subr.bf16.mxu0 %v14185_v17  ;;  %10077 = vmatprep.subr.bf16.mxu1 %v14187_v21  ;;  %v618_v17 = vld [vmem:[#allocation5 + $0xd68] sm:$0xff]  ;;  %v621_v21 = vld [vmem:[#allocation5 + $0xd80] sm:$0xff] }
 0x13b   :  { %v14243_v24 = vcombine.high %v614_v14, %v618_v17  ;;  %v14242_v28 = vcombine.low %v614_v14, %v618_v17  ;;  %v14249_v29 = vcombine.high %v621_v21, %v625_v22  ;;  %v14248_v36 = vcombine.low %v621_v21, %v625_v22  ;;  %v670_v14 = vld [vmem:[#allocation5 + $0xf08] sm:$0xff]  ;;  %v677_v21 = vld [vmem:[#allocation5 + $0xf40] sm:$0xff] }
 0x13c   :  { %v681_v22 = vld [vmem:[#allocation5 + $0xf60] sm:$0xff] }
 0x13d   :  { %9562 = vmatpush1.bf16.msra.mxu0 %v14184_v23  ;;  %10078 = vmatpush1.bf16.msra.mxu1 %v14186_v26  ;;  %v622_v23 = vld [vmem:[#allocation5 + $0xd88] sm:$0xff] }
 0x13e   :  { %9563 = vmatprep.subr.bf16.mxu0 %v14193_v27  ;;  %10079 = vmatprep.subr.bf16.mxu1 %v14195_v32  ;;  %v626_v26 = vld [vmem:[#allocation5 + $0xda8] sm:$0xff]  ;;  %v14240_v27 = vcombine.low %v613_v12, %v617_v13  ;;  %v633_v32 = vld [vmem:[#allocation5 + $0xde0] sm:$0xff] }
 0x13f   :  { %v14251_v34 = vcombine.high %v622_v23, %v626_v26  ;;  %v14250_v38 = vcombine.low %v622_v23, %v626_v26  ;;  %v14256_v45 = vcombine.low %v629_v31, %v633_v32  ;;  %v669_v12 = vld [vmem:[#allocation5 + $0xf00] sm:$0xff]  ;;  %v678_v23 = vld [vmem:[#allocation5 + $0xf48] sm:$0xff] }
 0x140   :  { %v673_v13 = vld [vmem:[#allocation5 + $0xf20] sm:$0xff] }
 0x141   :  { %9564 = vmatpush1.bf16.msra.mxu0 %v14192_v35  ;;  %10080 = vmatpush1.bf16.msra.mxu1 %v14194_v39  ;;  %v634_v35 = vld [vmem:[#allocation5 + $0xde8] sm:$0xff]  ;;  %v14257_v39 = vcombine.high %v629_v31, %v633_v32  ;;  %v14296_v26 = vcombine.low %v669_v12, %v673_v13  ;;  %v685_v31 = vld [vmem:[#allocation5 + $0xf80] sm:$0xff] }
 0x142   :  { %9576 = vmatprep.subr.bf16.mxu0 %v14201_v40  ;;  %10092 = vmatprep.subr.bf16.mxu1 %v14203_v44  ;;  %v637_v40 = vld [vmem:[#allocation5 + $0xe00] sm:$0xff]  ;;  %v14259_v43 = vcombine.high %v630_v33, %v634_v35  ;;  %v642_v44 = vld [vmem:[#allocation5 + $0xe28] sm:$0xff] }
 0x143   :  { %v14267_v52 = vcombine.high %v638_v42, %v642_v44  ;;  %v14264_v55 = vcombine.low %v637_v40, %v641_v41  ;;  %v689_v32 = vld [vmem:[#allocation5 + $0xfa0] sm:$0xff] }
 0x144   :  { %9566 = vmatmul.mubr.bf16.vlgmr.msra.gmra.mrb[0].mxu0 %v16692_v46  ;;  %10082 = vmatmul.mubr.bf16.vlgmr.msra.gmra.mrb[0].mxu1 %v16692_v46 }
 0x145   :  { %9577 = vmatpush1.bf16.msra.mxu0 %v14200_v47  ;;  %10093 = vmatpush1.bf16.msra.mxu1 %v14202_v48  ;;  %v14258_v47 = vcombine.low %v630_v33, %v634_v35  ;;  %v14265_v48 = vcombine.high %v637_v40, %v641_v41  ;;  %v686_v33 = vld [vmem:[#allocation5 + $0xf88] sm:$0xff]  ;;  %v14304_v35 = vcombine.low %v677_v21, %v681_v22  ;;  %v693_v40 = vld [vmem:[#allocation5 + $0xfc0] sm:$0xff] }
 0x146   :  { %9578 = vmatprep.subr.bf16.mxu0 %v14209_v49  ;;  %10094 = vmatprep.subr.bf16.mxu1 %v14211_v50  ;;  %v645_v49 = vld [vmem:[#allocation5 + $0xe40] sm:$0xff] }
 0x147   :  { %9608 = vmatprep.mubr.bf16.mxu0 %v16694_v53  ;;  %10124 = vmatprep.mubr.bf16.mxu1 %v16694_v53  ;;  %v649_v50 = vld [vmem:[#allocation5 + $0xe60] sm:$0xff] }
 0x148   :  { %v14272_v0 = vcombine.low %v645_v49, %v649_v50  ;;  %v697_v41 = vld [vmem:[#allocation5 + $0xfe0] sm:$0xff] }
 0x149   :  { %9579 = vmatpush1.bf16.msra.mxu0 %v14208_v56  ;;  %10095 = vmatpush1.bf16.msra.mxu1 %v14210_v57  ;;  %v14266_v56 = vcombine.low %v638_v42, %v642_v44  ;;  %v14273_v57 = vcombine.high %v645_v49, %v649_v50  ;;  %v694_v42 = vld [vmem:[#allocation5 + $0xfc8] sm:$0xff]  ;;  %v14312_v44 = vcombine.low %v685_v31, %v689_v32  ;;  %v701_v49 = vld [vmem:[#allocation5 + $0x1000] sm:$0xff] }
 0x14a   :  { %9580 = vmatprep.subr.bf16.mxu0 %v14217_v59  ;;  %10096 = vmatprep.subr.bf16.mxu1 %v14219_v63  ;;  %v653_v59 = vld [vmem:[#allocation5 + $0xe80] sm:$0xff]  ;;  %v658_v63 = vld [vmem:[#allocation5 + $0xea8] sm:$0xff] }
 0x14b   :  { %v14283_v6 = vcombine.high %v654_v61, %v658_v63  ;;  %v14280_v8 = vcombine.low %v653_v59, %v657_v60  ;;  %v705_v50 = vld [vmem:[#allocation5 + $0x1020] sm:$0xff] }
 0x14d   :  { %9581 = vmatpush1.bf16.msra.mxu0 %v14216_v1  ;;  %10097 = vmatpush1.bf16.msra.mxu1 %v14218_v2  ;;  %v14274_v1 = vcombine.low %v646_v51, %v650_v54  ;;  %v14281_v2 = vcombine.high %v653_v59, %v657_v60  ;;  %v702_v51 = vld [vmem:[#allocation5 + $0x1008] sm:$0xff]  ;;  %v14320_v54 = vcombine.low %v693_v40, %v697_v41 }
 0x14e   :  { %9582 = vmatprep.subr.bf16.mxu0 %v14225_v3  ;;  %10098 = vmatprep.subr.bf16.mxu1 %v14227_v7  ;;  %v661_v3 = vld [vmem:[#allocation5 + $0xec0] sm:$0xff]  ;;  %v666_v7 = vld [vmem:[#allocation5 + $0xee8] sm:$0xff]  ;;  %v14329_v59 = vcombine.high %v701_v49, %v705_v50 }
 0x14f   :  { %v14288_v17 = vcombine.low %v661_v3, %v665_v4 }
 0x151   :  { %9583 = vmatpush1.bf16.msra.mxu0 %v14224_v9  ;;  %10099 = vmatpush1.bf16.msra.mxu1 %v14226_v10  ;;  %v14282_v9 = vcombine.low %v654_v61, %v658_v63  ;;  %v14289_v10 = vcombine.high %v661_v3, %v665_v4  ;;  %v709_v61 = vld [vmem:[#allocation5 + $0x1040] sm:$0xff]  ;;  %v710_v63 = vld [vmem:[#allocation5 + $0x1048] sm:$0xff]  ;;  %v14328_v4 = vcombine.low %v701_v49, %v705_v50 }
 0x152   :  { %9584 = vmatprep.subr.bf16.mxu0 %v14233_v11  ;;  %10100 = vmatprep.subr.bf16.mxu1 %v14235_v16  ;;  %v14291_v11 = vcombine.high %v662_v5, %v666_v7  ;;  %v674_v16 = vld [vmem:[#allocation5 + $0xf28] sm:$0xff] }
 0x153   :  { %v150_v3 = vld [vmem:[#allocation2 + $0x108] sm:$0xff] }
 0x154   :  { %v754_v49 = vld [vmem:[#allocation5 + $0x11a8] sm:$0xff] }
 0x155   :  { %9585 = vmatpush1.bf16.msra.mxu0 %v14232_v18  ;;  %10101 = vmatpush1.bf16.msra.mxu1 %v14234_v19  ;;  %v14290_v18 = vcombine.low %v662_v5, %v666_v7  ;;  %v14297_v19 = vcombine.high %v669_v12, %v673_v13  ;;  %v722_v12 = vld [vmem:[#allocation5 + $0x10a8] sm:$0xff] }
 0x156   :  { %9586 = vmatprep.subr.bf16.mxu0 %v14241_v20  ;;  %10102 = vmatprep.subr.bf16.mxu1 %v14243_v24  ;;  %v14299_v20 = vcombine.high %v670_v14, %v674_v16  ;;  %v682_v24 = vld [vmem:[#allocation5 + $0xf68] sm:$0xff] }
 0x159   :  { %9587 = vmatpush1.bf16.msra.mxu0 %v14240_v27  ;;  %10103 = vmatpush1.bf16.msra.mxu1 %v14242_v28  ;;  %v14298_v27 = vcombine.low %v670_v14, %v674_v16  ;;  %v14305_v28 = vcombine.high %v677_v21, %v681_v22  ;;  %v730_v21 = vld [vmem:[#allocation5 + $0x10e8] sm:$0xff] }
 0x15a   :  { %9588 = vmatprep.subr.bf16.mxu0 %v14249_v29  ;;  %10104 = vmatprep.subr.bf16.mxu1 %v14251_v34  ;;  %v14307_v29 = vcombine.high %v678_v23, %v682_v24  ;;  %v690_v34 = vld [vmem:[#allocation5 + $0xfa8] sm:$0xff] }
 0x15d   :  { %9589 = vmatpush1.bf16.msra.mxu0 %v14248_v36  ;;  %10105 = vmatpush1.bf16.msra.mxu1 %v14250_v38  ;;  %v14306_v36 = vcombine.low %v678_v23, %v682_v24  ;;  %v14313_v38 = vcombine.high %v685_v31, %v689_v32  ;;  %v738_v31 = vld [vmem:[#allocation5 + $0x1128] sm:$0xff] }
 0x15e   :  { %9590 = vmatprep.subr.bf16.mxu0 %v14257_v39  ;;  %10106 = vmatprep.subr.bf16.mxu1 %v14259_v43  ;;  %v14315_v39 = vcombine.high %v686_v33, %v690_v34  ;;  %v698_v43 = vld [vmem:[#allocation5 + $0xfe8] sm:$0xff] }
 0x161   :  { %9591 = vmatpush1.bf16.msra.mxu0 %v14256_v45  ;;  %10107 = vmatpush1.bf16.msra.mxu1 %v14258_v47  ;;  %v14314_v45 = vcombine.low %v686_v33, %v690_v34  ;;  %v14321_v47 = vcombine.high %v693_v40, %v697_v41  ;;  %v746_v40 = vld [vmem:[#allocation5 + $0x1168] sm:$0xff] }
 0x162   :  { %9592 = vmatprep.subr.bf16.mxu0 %v14265_v48  ;;  %10108 = vmatprep.subr.bf16.mxu1 %v14267_v52  ;;  %v14323_v48 = vcombine.high %v694_v42, %v698_v43  ;;  %v706_v52 = vld [vmem:[#allocation5 + $0x1028] sm:$0xff] }
 0x163   :  { %v14331_v60 = vcombine.high %v702_v51, %v706_v52  ;;  %v14330_v5 = vcombine.low %v702_v51, %v706_v52 }
 0x165   :  { %9593 = vmatpush1.bf16.msra.mxu0 %v14264_v55  ;;  %10109 = vmatpush1.bf16.msra.mxu1 %v14266_v56  ;;  %v123_v55 = vld [vmem:[#allocation2 + $0x30] sm:$0xff] }
 0x166   :  { %9594 = vmatprep.subr.bf16.mxu0 %v14273_v57  ;;  %10110 = vmatprep.subr.bf16.mxu1 %v14275_v62  ;;  %v147_v56 = vld [vmem:[#allocation2 + $0xf0] sm:$0xff]  ;;  %v14322_v57 = vcombine.low %v694_v42, %v698_v43  ;;  %v713_v62 = vld [vmem:[#allocation5 + $0x1060] sm:$0xff] }
 0x167   :  { %v14336_v13 = vcombine.low %v709_v61, %v713_v62 }
 0x169   :  { %9595 = vmatpush1.bf16.msra.mxu0 %v14272_v0  ;;  %10111 = vmatpush1.bf16.msra.mxu1 %v14274_v1  ;;  %v16700_v0 = vpack.c.bf16 %v147_v56, %v123_v55  ;;  %v714_v1 = vld [vmem:[#allocation5 + $0x1068] sm:$0xff]  ;;  %v757_v55 = vld [vmem:[#allocation5 + $0x11c0] sm:$0xff] }
 0x16a   :  { %9596 = vmatprep.subr.bf16.mxu0 %v14281_v2  ;;  %10112 = vmatprep.subr.bf16.mxu1 %v14283_v6  ;;  %v126_v2 = vld [vmem:[#allocation2 + $0x48] sm:$0xff]  ;;  %v14337_v6 = vcombine.high %v709_v61, %v713_v62  ;;  %v14339_v7 = vcombine.high %v710_v63, %v714_v1  ;;  %v14338_v14 = vcombine.low %v710_v63, %v714_v1  ;;  %v761_v56 = vld [vmem:[#allocation5 + $0x11e0] sm:$0xff] }
 0x16b   :  { %v14385_v62 = vcombine.high %v757_v55, %v761_v56  ;;  %v765_v1 = vld [vmem:[#allocation5 + $0x1200] sm:$0xff] }
 0x16d   :  { %9597 = vmatpush1.bf16.msra.mxu0 %v14280_v8  ;;  %10113 = vmatpush1.bf16.msra.mxu1 %v14282_v9  ;;  %v717_v8 = vld [vmem:[#allocation5 + $0x1080] sm:$0xff] }
 0x16e   :  { %9598 = vmatprep.subr.bf16.mxu0 %v14289_v10  ;;  %10114 = vmatprep.subr.bf16.mxu1 %v14291_v11  ;;  %v721_v9 = vld [vmem:[#allocation5 + $0x10a0] sm:$0xff]  ;;  %v16702_v10 = vpack.c.bf16 %v150_v3, %v126_v2  ;;  %v718_v11 = vld [vmem:[#allocation5 + $0x1088] sm:$0xff] }
 0x16f   :  { %v14345_v16 = vcombine.high %v717_v8, %v721_v9  ;;  %v14344_v22 = vcombine.low %v717_v8, %v721_v9  ;;  %v14346_v23 = vcombine.low %v718_v11, %v722_v12  ;;  %v769_v2 = vld [vmem:[#allocation5 + $0x1220] sm:$0xff]  ;;  %v766_v3 = vld [vmem:[#allocation5 + $0x1208] sm:$0xff] }
 0x170   :  { %v773_v9 = vld [vmem:[#allocation5 + $0x1240] sm:$0xff] }
 0x171   :  { %9599 = vmatpush1.bf16.msra.mxu0 %v14288_v17  ;;  %10115 = vmatpush1.bf16.msra.mxu1 %v14290_v18  ;;  %v14347_v17 = vcombine.high %v718_v11, %v722_v12  ;;  %v725_v18 = vld [vmem:[#allocation5 + $0x10c0] sm:$0xff]  ;;  %v774_v12 = vld [vmem:[#allocation5 + $0x1248] sm:$0xff] }
 0x172   :  { %9600 = vmatprep.subr.bf16.mxu0 %v14297_v19  ;;  %10116 = vmatprep.subr.bf16.mxu1 %v14299_v20  ;;  %v729_v19 = vld [vmem:[#allocation5 + $0x10e0] sm:$0xff]  ;;  %v726_v20 = vld [vmem:[#allocation5 + $0x10c8] sm:$0xff] }
 0x173   :  { %v14353_v24 = vcombine.high %v725_v18, %v729_v19  ;;  %v14352_v32 = vcombine.low %v725_v18, %v729_v19  ;;  %v14354_v33 = vcombine.low %v726_v20, %v730_v21  ;;  %v777_v11 = vld [vmem:[#allocation5 + $0x1260] sm:$0xff] }
 0x174   :  { %v781_v19 = vld [vmem:[#allocation5 + $0x1280] sm:$0xff] }
 0x175   :  { %9601 = vmatpush1.bf16.msra.mxu0 %v14296_v26  ;;  %10117 = vmatpush1.bf16.msra.mxu1 %v14298_v27  ;;  %v14355_v26 = vcombine.high %v726_v20, %v730_v21  ;;  %v733_v27 = vld [vmem:[#allocation5 + $0x1100] sm:$0xff]  ;;  %v782_v21 = vld [vmem:[#allocation5 + $0x1288] sm:$0xff] }
 0x176   :  { %9602 = vmatprep.subr.bf16.mxu0 %v14305_v28  ;;  %10118 = vmatprep.subr.bf16.mxu1 %v14307_v29  ;;  %v737_v28 = vld [vmem:[#allocation5 + $0x1120] sm:$0xff]  ;;  %v734_v29 = vld [vmem:[#allocation5 + $0x1108] sm:$0xff] }
 0x177   :  { %v14361_v34 = vcombine.high %v733_v27, %v737_v28  ;;  %v14360_v41 = vcombine.low %v733_v27, %v737_v28  ;;  %v14362_v42 = vcombine.low %v734_v29, %v738_v31  ;;  %v785_v20 = vld [vmem:[#allocation5 + $0x12a0] sm:$0xff] }
 0x178   :  { %v789_v28 = vld [vmem:[#allocation5 + $0x12c0] sm:$0xff] }
 0x179   :  { %9603 = vmatpush1.bf16.msra.mxu0 %v14304_v35  ;;  %10119 = vmatpush1.bf16.msra.mxu1 %v14306_v36  ;;  %v14363_v35 = vcombine.high %v734_v29, %v738_v31  ;;  %v741_v36 = vld [vmem:[#allocation5 + $0x1140] sm:$0xff]  ;;  %v790_v31 = vld [vmem:[#allocation5 + $0x12c8] sm:$0xff] }
 0x17a   :  { %9604 = vmatprep.subr.bf16.mxu0 %v14313_v38  ;;  %10120 = vmatprep.subr.bf16.mxu1 %v14315_v39  ;;  %v745_v38 = vld [vmem:[#allocation5 + $0x1160] sm:$0xff]  ;;  %v742_v39 = vld [vmem:[#allocation5 + $0x1148] sm:$0xff] }
 0x17b   :  { %v14369_v43 = vcombine.high %v741_v36, %v745_v38  ;;  %v14368_v50 = vcombine.low %v741_v36, %v745_v38  ;;  %v14370_v51 = vcombine.low %v742_v39, %v746_v40  ;;  %v793_v29 = vld [vmem:[#allocation5 + $0x12e0] sm:$0xff] }
 0x17c   :  { %v797_v38 = vld [vmem:[#allocation5 + $0x1300] sm:$0xff] }
 0x17d   :  { %9605 = vmatpush1.bf16.msra.mxu0 %v14312_v44  ;;  %10121 = vmatpush1.bf16.msra.mxu1 %v14314_v45  ;;  %v14371_v44 = vcombine.high %v742_v39, %v746_v40  ;;  %v749_v45 = vld [vmem:[#allocation5 + $0x1180] sm:$0xff]  ;;  %v798_v40 = vld [vmem:[#allocation5 + $0x1308] sm:$0xff] }
 0x17e   :  { %9606 = vmatprep.subr.bf16.mxu0 %v14321_v47  ;;  %10122 = vmatprep.subr.bf16.mxu1 %v14323_v48  ;;  %v753_v47 = vld [vmem:[#allocation5 + $0x11a0] sm:$0xff]  ;;  %v750_v48 = vld [vmem:[#allocation5 + $0x1188] sm:$0xff] }
 0x17f   :  { %v14377_v52 = vcombine.high %v749_v45, %v753_v47  ;;  %v14378_v61 = vcombine.low %v750_v48, %v754_v49  ;;  %v801_v39 = vld [vmem:[#allocation5 + $0x1320] sm:$0xff] }
 0x181   :  { %9607 = vmatpush1.bf16.msra.mxu0 %v14320_v54  ;;  %10123 = vmatpush1.bf16.msra.mxu1 %v14322_v57  ;;  %v14379_v54 = vcombine.high %v750_v48, %v754_v49  ;;  %v758_v57 = vld [vmem:[#allocation5 + $0x11c8] sm:$0xff]  ;;  %v809_v48 = vld [vmem:[#allocation5 + $0x1360] sm:$0xff] }
 0x182   :  { %9619 = vmatprep.subr.bf16.mxu0 %v14329_v59  ;;  %10135 = vmatprep.subr.bf16.mxu1 %v14331_v60  ;;  %v762_v59 = vld [vmem:[#allocation5 + $0x11e8] sm:$0xff]  ;;  %v14376_v60 = vcombine.low %v749_v45, %v753_v47  ;;  %v805_v47 = vld [vmem:[#allocation5 + $0x1340] sm:$0xff] }
 0x183   :  { %v14387_v63 = vcombine.high %v758_v57, %v762_v59  ;;  %v806_v49 = vld [vmem:[#allocation5 + $0x1348] sm:$0xff] }
 0x184   :  { %9609 = vmatmul.mubr.bf16.vlgmr.msra.gmra.mrb[0].mxu0 %v16700_v0  ;;  %10125 = vmatmul.mubr.bf16.vlgmr.msra.gmra.mrb[0].mxu1 %v16700_v0 }
 0x185   :  { %9620 = vmatpush1.bf16.msra.mxu0 %v14328_v4  ;;  %10136 = vmatpush1.bf16.msra.mxu1 %v14330_v5  ;;  %v770_v4 = vld [vmem:[#allocation5 + $0x1228] sm:$0xff]  ;;  %v14384_v5 = vcombine.low %v757_v55, %v761_v56  ;;  %v813_v56 = vld [vmem:[#allocation5 + $0x1380] sm:$0xff] }
 0x186   :  { %9621 = vmatprep.subr.bf16.mxu0 %v14337_v6  ;;  %10137 = vmatprep.subr.bf16.mxu1 %v14339_v7  ;;  %v14386_v6 = vcombine.low %v758_v57, %v762_v59  ;;  %v14393_v7 = vcombine.high %v765_v1, %v769_v2  ;;  %v14395_v8 = vcombine.high %v766_v3, %v770_v4  ;;  %v817_v57 = vld [vmem:[#allocation5 + $0x13a0] sm:$0xff]  ;;  %v814_v59 = vld [vmem:[#allocation5 + $0x1388] sm:$0xff] }
 0x187   :  { %9651 = vmatprep.mubr.bf16.mxu0 %v16702_v10  ;;  %10167 = vmatprep.mubr.bf16.mxu1 %v16702_v10 }
 0x189   :  { %9622 = vmatpush1.bf16.msra.mxu0 %v14336_v13  ;;  %10138 = vmatpush1.bf16.msra.mxu1 %v14338_v14  ;;  %v778_v13 = vld [vmem:[#allocation5 + $0x1268] sm:$0xff]  ;;  %v14392_v14 = vcombine.low %v765_v1, %v769_v2  ;;  %v821_v2 = vld [vmem:[#allocation5 + $0x13c0] sm:$0xff] }
 0x18a   :  { %9623 = vmatprep.subr.bf16.mxu0 %v14345_v16  ;;  %10139 = vmatprep.subr.bf16.mxu1 %v14347_v17  ;;  %v14394_v16 = vcombine.low %v766_v3, %v770_v4  ;;  %v14401_v17 = vcombine.high %v773_v9, %v777_v11  ;;  %v14403_v18 = vcombine.high %v774_v12, %v778_v13  ;;  %v825_v3 = vld [vmem:[#allocation5 + $0x13e0] sm:$0xff]  ;;  %v822_v4 = vld [vmem:[#allocation5 + $0x13c8] sm:$0xff] }
 0x18d   :  { %9624 = vmatpush1.bf16.msra.mxu0 %v14344_v22  ;;  %10140 = vmatpush1.bf16.msra.mxu1 %v14346_v23  ;;  %v786_v22 = vld [vmem:[#allocation5 + $0x12a8] sm:$0xff]  ;;  %v14400_v23 = vcombine.low %v773_v9, %v777_v11  ;;  %v829_v11 = vld [vmem:[#allocation5 + $0x1400] sm:$0xff] }
 0x18e   :  { %9625 = vmatprep.subr.bf16.mxu0 %v14353_v24  ;;  %10141 = vmatprep.subr.bf16.mxu1 %v14355_v26  ;;  %v14402_v24 = vcombine.low %v774_v12, %v778_v13  ;;  %v14409_v26 = vcombine.high %v781_v19, %v785_v20  ;;  %v14411_v27 = vcombine.high %v782_v21, %v786_v22  ;;  %v833_v12 = vld [vmem:[#allocation5 + $0x1420] sm:$0xff]  ;;  %v830_v13 = vld [vmem:[#allocation5 + $0x1408] sm:$0xff] }
 0x191   :  { %9626 = vmatpush1.bf16.msra.mxu0 %v14352_v32  ;;  %10142 = vmatpush1.bf16.msra.mxu1 %v14354_v33  ;;  %v794_v32 = vld [vmem:[#allocation5 + $0x12e8] sm:$0xff]  ;;  %v14408_v33 = vcombine.low %v781_v19, %v785_v20  ;;  %v14457_v20 = vcombine.high %v829_v11, %v833_v12 }
 0x192   :  { %9627 = vmatprep.subr.bf16.mxu0 %v14361_v34  ;;  %10143 = vmatprep.subr.bf16.mxu1 %v14363_v35  ;;  %v14410_v34 = vcombine.low %v782_v21, %v786_v22  ;;  %v14417_v35 = vcombine.high %v789_v28, %v793_v29  ;;  %v14419_v36 = vcombine.high %v790_v31, %v794_v32  ;;  %v837_v22 = vld [vmem:[#allocation5 + $0x1440] sm:$0xff] }
 0x195   :  { %9628 = vmatpush1.bf16.msra.mxu0 %v14360_v41  ;;  %10144 = vmatpush1.bf16.msra.mxu1 %v14362_v42  ;;  %v802_v41 = vld [vmem:[#allocation5 + $0x1328] sm:$0xff]  ;;  %v14416_v42 = vcombine.low %v789_v28, %v793_v29  ;;  %v128_v28 = vld [vmem:[#allocation2 + $0x58] sm:$0xff] }
 0x196   :  { %9629 = vmatprep.subr.bf16.mxu0 %v14369_v43  ;;  %10145 = vmatprep.subr.bf16.mxu1 %v14371_v44  ;;  %v14418_v43 = vcombine.low %v790_v31, %v794_v32  ;;  %v14425_v44 = vcombine.high %v797_v38, %v801_v39  ;;  %v14427_v45 = vcombine.high %v798_v40, %v802_v41  ;;  %v152_v29 = vld [vmem:[#allocation2 + $0x118] sm:$0xff] }
 0x197   :  { %v14456_v31 = vcombine.low %v829_v11, %v833_v12  ;;  %v881_v11 = vld [vmem:[#allocation5 + $0x15a0] sm:$0xff]  ;;  %v878_v12 = vld [vmem:[#allocation5 + $0x1588] sm:$0xff] }
 0x199   :  { %9630 = vmatpush1.bf16.msra.mxu0 %v14368_v50  ;;  %10146 = vmatpush1.bf16.msra.mxu1 %v14370_v51  ;;  %v810_v50 = vld [vmem:[#allocation5 + $0x1368] sm:$0xff]  ;;  %v14424_v51 = vcombine.low %v797_v38, %v801_v39  ;;  %v16710_v38 = vpack.c.bf16 %v152_v29, %v128_v28  ;;  %v893_v29 = vld [vmem:[#allocation5 + $0x1600] sm:$0xff] }
 0x19a   :  { %9631 = vmatprep.subr.bf16.mxu0 %v14377_v52  ;;  %10147 = vmatprep.subr.bf16.mxu1 %v14379_v54  ;;  %v14426_v52 = vcombine.low %v798_v40, %v802_v41  ;;  %v14433_v54 = vcombine.high %v805_v47, %v809_v48  ;;  %v14435_v55 = vcombine.high %v806_v49, %v810_v50  ;;  %v846_v39 = vld [vmem:[#allocation5 + $0x1488] sm:$0xff] }
 0x19b   :  { %v850_v40 = vld [vmem:[#allocation5 + $0x14a8] sm:$0xff] }
 0x19d   :  { %9632 = vmatpush1.bf16.msra.mxu0 %v14376_v60  ;;  %10148 = vmatpush1.bf16.msra.mxu1 %v14378_v61  ;;  %v818_v60 = vld [vmem:[#allocation5 + $0x13a8] sm:$0xff]  ;;  %v14432_v61 = vcombine.low %v805_v47, %v809_v48  ;;  %v857_v47 = vld [vmem:[#allocation5 + $0x14e0] sm:$0xff] }
 0x19e   :  { %9633 = vmatprep.subr.bf16.mxu0 %v14385_v62  ;;  %10149 = vmatprep.subr.bf16.mxu1 %v14387_v63  ;;  %v14434_v62 = vcombine.low %v806_v49, %v810_v50  ;;  %v14441_v63 = vcombine.high %v813_v56, %v817_v57  ;;  %v14443_v1 = vcombine.high %v814_v59, %v818_v60  ;;  %v854_v48 = vld [vmem:[#allocation5 + $0x14c8] sm:$0xff] }
 0x19f   :  { %v858_v49 = vld [vmem:[#allocation5 + $0x14e8] sm:$0xff] }
 0x1a1   :  { %9634 = vmatpush1.bf16.msra.mxu0 %v14384_v5  ;;  %10150 = vmatpush1.bf16.msra.mxu1 %v14386_v6  ;;  %v826_v5 = vld [vmem:[#allocation5 + $0x13e8] sm:$0xff]  ;;  %v14440_v6 = vcombine.low %v813_v56, %v817_v57  ;;  %v865_v56 = vld [vmem:[#allocation5 + $0x1520] sm:$0xff] }
 0x1a2   :  { %9635 = vmatprep.subr.bf16.mxu0 %v14393_v7  ;;  %10151 = vmatprep.subr.bf16.mxu1 %v14395_v8  ;;  %v14442_v7 = vcombine.low %v814_v59, %v818_v60  ;;  %v14449_v8 = vcombine.high %v821_v2, %v825_v3  ;;  %v14451_v9 = vcombine.high %v822_v4, %v826_v5  ;;  %v862_v57 = vld [vmem:[#allocation5 + $0x1508] sm:$0xff] }
 0x1a3   :  { %v14450_v19 = vcombine.low %v822_v4, %v826_v5  ;;  %v866_v59 = vld [vmem:[#allocation5 + $0x1528] sm:$0xff] }
 0x1a4   :  { %v874_v4 = vld [vmem:[#allocation5 + $0x1568] sm:$0xff] }
 0x1a5   :  { %9636 = vmatpush1.bf16.msra.mxu0 %v14392_v14  ;;  %10152 = vmatpush1.bf16.msra.mxu1 %v14394_v16  ;;  %v834_v14 = vld [vmem:[#allocation5 + $0x1428] sm:$0xff]  ;;  %v14448_v16 = vcombine.low %v821_v2, %v825_v3  ;;  %v873_v2 = vld [vmem:[#allocation5 + $0x1560] sm:$0xff] }
 0x1a6   :  { %9637 = vmatprep.subr.bf16.mxu0 %v14401_v17  ;;  %10153 = vmatprep.subr.bf16.mxu1 %v14403_v18  ;;  %v125_v17 = vld [vmem:[#allocation2 + $0x40] sm:$0xff]  ;;  %v14459_v21 = vcombine.high %v830_v13, %v834_v14  ;;  %v14458_v32 = vcombine.low %v830_v13, %v834_v14  ;;  %v870_v3 = vld [vmem:[#allocation5 + $0x1548] sm:$0xff] }
 0x1a7   :  { %v149_v18 = vld [vmem:[#allocation2 + $0x100] sm:$0xff]  ;;  %v882_v13 = vld [vmem:[#allocation5 + $0x15a8] sm:$0xff] }
 0x1a9   :  { %9638 = vmatpush1.bf16.msra.mxu0 %v14400_v23  ;;  %10154 = vmatpush1.bf16.msra.mxu1 %v14402_v24  ;;  %v841_v23 = vld [vmem:[#allocation5 + $0x1460] sm:$0xff]  ;;  %v838_v24 = vld [vmem:[#allocation5 + $0x1448] sm:$0xff] }
 0x1aa   :  { %9639 = vmatprep.subr.bf16.mxu0 %v14409_v26  ;;  %10155 = vmatprep.subr.bf16.mxu1 %v14411_v27  ;;  %v16708_v26 = vpack.c.bf16 %v149_v18, %v125_v17  ;;  %v842_v27 = vld [vmem:[#allocation5 + $0x1468] sm:$0xff]  ;;  %v14464_v41 = vcombine.low %v837_v22, %v841_v23  ;;  %v14507_v18 = vcombine.high %v878_v12, %v882_v13 }
 0x1ad   :  { %9640 = vmatpush1.bf16.msra.mxu0 %v14408_v33  ;;  %10156 = vmatpush1.bf16.msra.mxu1 %v14410_v34  ;;  %v14465_v33 = vcombine.high %v837_v22, %v841_v23  ;;  %v14467_v34 = vcombine.high %v838_v24, %v842_v27  ;;  %v890_v22 = vld [vmem:[#allocation5 + $0x15e8] sm:$0xff] }
 0x1ae   :  { %9641 = vmatprep.subr.bf16.mxu0 %v14417_v35  ;;  %10157 = vmatprep.subr.bf16.mxu1 %v14419_v36  ;;  %v845_v35 = vld [vmem:[#allocation5 + $0x1480] sm:$0xff] }
 0x1af   :  { %v849_v36 = vld [vmem:[#allocation5 + $0x14a0] sm:$0xff] }
 0x1b0   :  { %v14472_v50 = vcombine.low %v845_v35, %v849_v36 }
 0x1b1   :  { %9642 = vmatpush1.bf16.msra.mxu0 %v14416_v42  ;;  %10158 = vmatpush1.bf16.msra.mxu1 %v14418_v43  ;;  %v14466_v42 = vcombine.low %v838_v24, %v842_v27  ;;  %v14473_v43 = vcombine.high %v845_v35, %v849_v36  ;;  %v14506_v24 = vcombine.low %v878_v12, %v882_v13  ;;  %v933_v13 = vld [vmem:[#allocation5 + $0x1740] sm:$0xff] }
 0x1b2   :  { %9643 = vmatprep.subr.bf16.mxu0 %v14425_v44  ;;  %10159 = vmatprep.subr.bf16.mxu1 %v14427_v45  ;;  %v14475_v44 = vcombine.high %v846_v39, %v850_v40  ;;  %v853_v45 = vld [vmem:[#allocation5 + $0x14c0] sm:$0xff] }
 0x1b3   :  { %v14480_v60 = vcombine.low %v853_v45, %v857_v47 }
 0x1b5   :  { %9644 = vmatpush1.bf16.msra.mxu0 %v14424_v51  ;;  %10160 = vmatpush1.bf16.msra.mxu1 %v14426_v52  ;;  %v14474_v51 = vcombine.low %v846_v39, %v850_v40  ;;  %v14481_v52 = vcombine.high %v853_v45, %v857_v47  ;;  %v901_v40 = vld [vmem:[#allocation5 + $0x1640] sm:$0xff] }
 0x1b6   :  { %9645 = vmatprep.subr.bf16.mxu0 %v14433_v54  ;;  %10161 = vmatprep.subr.bf16.mxu1 %v14435_v55  ;;  %v14483_v54 = vcombine.high %v854_v48, %v858_v49  ;;  %v861_v55 = vld [vmem:[#allocation5 + $0x1500] sm:$0xff] }
 0x1b7   :  { %v14488_v5 = vcombine.low %v861_v55, %v865_v56 }
 0x1b9   :  { %9646 = vmatpush1.bf16.msra.mxu0 %v14432_v61  ;;  %10162 = vmatpush1.bf16.msra.mxu1 %v14434_v62  ;;  %v14482_v61 = vcombine.low %v854_v48, %v858_v49  ;;  %v14489_v62 = vcombine.high %v861_v55, %v865_v56  ;;  %v909_v49 = vld [vmem:[#allocation5 + $0x1680] sm:$0xff] }
 0x1ba   :  { %9647 = vmatprep.subr.bf16.mxu0 %v14441_v63  ;;  %10163 = vmatprep.subr.bf16.mxu1 %v14443_v1  ;;  %v14491_v63 = vcombine.high %v862_v57, %v866_v59  ;;  %v869_v1 = vld [vmem:[#allocation5 + $0x1540] sm:$0xff] }
 0x1bb   :  { %v14496_v14 = vcombine.low %v869_v1, %v873_v2 }
 0x1bd   :  { %9648 = vmatpush1.bf16.msra.mxu0 %v14440_v6  ;;  %10164 = vmatpush1.bf16.msra.mxu1 %v14442_v7  ;;  %v14490_v6 = vcombine.low %v862_v57, %v866_v59  ;;  %v14497_v7 = vcombine.high %v869_v1, %v873_v2  ;;  %v917_v59 = vld [vmem:[#allocation5 + $0x16c0] sm:$0xff] }
 0x1be   :  { %9649 = vmatprep.subr.bf16.mxu0 %v14449_v8  ;;  %10165 = vmatprep.subr.bf16.mxu1 %v14451_v9  ;;  %v14499_v8 = vcombine.high %v870_v3, %v874_v4  ;;  %v877_v9 = vld [vmem:[#allocation5 + $0x1580] sm:$0xff] }
 0x1bf   :  { %v14505_v17 = vcombine.high %v877_v9, %v881_v11  ;;  %v14504_v23 = vcombine.low %v877_v9, %v881_v11 }
 0x1c1   :  { %9650 = vmatpush1.bf16.msra.mxu0 %v14448_v16  ;;  %10166 = vmatpush1.bf16.msra.mxu1 %v14450_v19  ;;  %v14498_v16 = vcombine.low %v870_v3, %v874_v4  ;;  %v885_v19 = vld [vmem:[#allocation5 + $0x15c0] sm:$0xff] }
 0x1c2   :  { %9662 = vmatprep.subr.bf16.mxu0 %v14457_v20  ;;  %10178 = vmatprep.subr.bf16.mxu1 %v14459_v21  ;;  %v889_v20 = vld [vmem:[#allocation5 + $0x15e0] sm:$0xff]  ;;  %v886_v21 = vld [vmem:[#allocation5 + $0x15c8] sm:$0xff] }
 0x1c3   :  { %v14513_v27 = vcombine.high %v885_v19, %v889_v20  ;;  %v14515_v28 = vcombine.high %v886_v21, %v890_v22  ;;  %v14514_v35 = vcombine.low %v886_v21, %v890_v22  ;;  %v925_v4 = vld [vmem:[#allocation5 + $0x1700] sm:$0xff] }
 0x1c4   :  { %9652 = vmatmul.mubr.bf16.vlgmr.msra.gmra.mrb[0].mxu0 %v16708_v26  ;;  %10168 = vmatmul.mubr.bf16.vlgmr.msra.gmra.mrb[0].mxu1 %v16708_v26  ;;  %v941_v22 = vld [vmem:[#allocation5 + $0x1780] sm:$0xff] }
 0x1c5   :  { %9663 = vmatpush1.bf16.msra.mxu0 %v14456_v31  ;;  %10179 = vmatpush1.bf16.msra.mxu1 %v14458_v32  ;;  %v897_v31 = vld [vmem:[#allocation5 + $0x1620] sm:$0xff]  ;;  %v894_v32 = vld [vmem:[#allocation5 + $0x1608] sm:$0xff] }
 0x1c6   :  { %9664 = vmatprep.subr.bf16.mxu0 %v14465_v33  ;;  %10180 = vmatprep.subr.bf16.mxu1 %v14467_v34  ;;  %v898_v33 = vld [vmem:[#allocation5 + $0x1628] sm:$0xff]  ;;  %v14512_v34 = vcombine.low %v885_v19, %v889_v20  ;;  %v14521_v36 = vcombine.high %v893_v29, %v897_v31 }
 0x1c7   :  { %9694 = vmatprep.mubr.bf16.mxu0 %v16710_v38  ;;  %10210 = vmatprep.mubr.bf16.mxu1 %v16710_v38  ;;  %v14523_v39 = vcombine.high %v894_v32, %v898_v33  ;;  %v14522_v45 = vcombine.low %v894_v32, %v898_v33  ;;  %v949_v33 = vld [vmem:[#allocation5 + $0x17c0] sm:$0xff] }
 0x1c9   :  { %9665 = vmatpush1.bf16.msra.mxu0 %v14464_v41  ;;  %10181 = vmatpush1.bf16.msra.mxu1 %v14466_v42  ;;  %v905_v41 = vld [vmem:[#allocation5 + $0x1660] sm:$0xff]  ;;  %v902_v42 = vld [vmem:[#allocation5 + $0x1648] sm:$0xff] }
 0x1ca   :  { %9666 = vmatprep.subr.bf16.mxu0 %v14473_v43  ;;  %10182 = vmatprep.subr.bf16.mxu1 %v14475_v44  ;;  %v906_v43 = vld [vmem:[#allocation5 + $0x1668] sm:$0xff]  ;;  %v14520_v44 = vcombine.low %v893_v29, %v897_v31  ;;  %v14529_v47 = vcombine.high %v901_v40, %v905_v41 }
 0x1cb   :  { %v14531_v48 = vcombine.high %v902_v42, %v906_v43  ;;  %v14530_v55 = vcombine.low %v902_v42, %v906_v43  ;;  %v957_v43 = vld [vmem:[#allocation5 + $0x1800] sm:$0xff] }
 0x1cd   :  { %9667 = vmatpush1.bf16.msra.mxu0 %v14472_v50  ;;  %10183 = vmatpush1.bf16.msra.mxu1 %v14474_v51  ;;  %v913_v50 = vld [vmem:[#allocation5 + $0x16a0] sm:$0xff]  ;;  %v910_v51 = vld [vmem:[#allocation5 + $0x1688] sm:$0xff] }
 0x1ce   :  { %9668 = vmatprep.subr.bf16.mxu0 %v14481_v52  ;;  %10184 = vmatprep.subr.bf16.mxu1 %v14483_v54  ;;  %v914_v52 = vld [vmem:[#allocation5 + $0x16a8] sm:$0xff]  ;;  %v14528_v54 = vcombine.low %v901_v40, %v905_v41  ;;  %v14537_v56 = vcombine.high %v909_v49, %v913_v50 }
 0x1cf   :  { %v14539_v57 = vcombine.high %v910_v51, %v914_v52  ;;  %v14538_v1 = vcombine.low %v910_v51, %v914_v52 }
 0x1d1   :  { %9669 = vmatpush1.bf16.msra.mxu0 %v14480_v60  ;;  %10185 = vmatpush1.bf16.msra.mxu1 %v14482_v61  ;;  %v921_v60 = vld [vmem:[#allocation5 + $0x16e0] sm:$0xff]  ;;  %v918_v61 = vld [vmem:[#allocation5 + $0x16c8] sm:$0xff] }
 0x1d2   :  { %9670 = vmatprep.subr.bf16.mxu0 %v14489_v62  ;;  %10186 = vmatprep.subr.bf16.mxu1 %v14491_v63  ;;  %v922_v62 = vld [vmem:[#allocation5 + $0x16e8] sm:$0xff]  ;;  %v14536_v63 = vcombine.low %v909_v49, %v913_v50  ;;  %v14545_v2 = vcombine.high %v917_v59, %v921_v60  ;;  %v127_v49 = vld [vmem:[#allocation2 + $0x50] sm:$0xff] }
 0x1d3   :  { %v14547_v3 = vcombine.high %v918_v61, %v922_v62  ;;  %v14546_v9 = vcombine.low %v918_v61, %v922_v62  ;;  %v151_v50 = vld [vmem:[#allocation2 + $0x110] sm:$0xff]  ;;  %v130_v61 = vld [vmem:[#allocation2 + $0x68] sm:$0xff] }
 0x1d4   :  { %v154_v62 = vld [vmem:[#allocation2 + $0x128] sm:$0xff] }
 0x1d5   :  { %9671 = vmatpush1.bf16.msra.mxu0 %v14488_v5  ;;  %10187 = vmatpush1.bf16.msra.mxu1 %v14490_v6  ;;  %v929_v5 = vld [vmem:[#allocation5 + $0x1720] sm:$0xff]  ;;  %v926_v6 = vld [vmem:[#allocation5 + $0x1708] sm:$0xff] }
 0x1d6   :  { %9672 = vmatprep.subr.bf16.mxu0 %v14497_v7  ;;  %10188 = vmatprep.subr.bf16.mxu1 %v14499_v8  ;;  %v930_v7 = vld [vmem:[#allocation5 + $0x1728] sm:$0xff]  ;;  %v14544_v8 = vcombine.low %v917_v59, %v921_v60  ;;  %v14553_v11 = vcombine.high %v925_v4, %v929_v5  ;;  %v16716_v59 = vpack.c.bf16 %v151_v50, %v127_v49 }
 0x1d7   :  { %v14555_v12 = vcombine.high %v926_v6, %v930_v7  ;;  %v14554_v19 = vcombine.low %v926_v6, %v930_v7  ;;  %v970_v60 = vld [vmem:[#allocation5 + $0x1868] sm:$0xff]  ;;  %v16718_v6 = vpack.c.bf16 %v154_v62, %v130_v61 }
 0x1d8   :  { %v974_v7 = vld [vmem:[#allocation5 + $0x1888] sm:$0xff] }
 0x1d9   :  { %9673 = vmatpush1.bf16.msra.mxu0 %v14496_v14  ;;  %10189 = vmatpush1.bf16.msra.mxu1 %v14498_v16  ;;  %v937_v14 = vld [vmem:[#allocation5 + $0x1760] sm:$0xff]  ;;  %v934_v16 = vld [vmem:[#allocation5 + $0x1748] sm:$0xff] }
 0x1da   :  { %9674 = vmatprep.subr.bf16.mxu0 %v14505_v17  ;;  %10190 = vmatprep.subr.bf16.mxu1 %v14507_v18  ;;  %v938_v17 = vld [vmem:[#allocation5 + $0x1768] sm:$0xff]  ;;  %v14552_v18 = vcombine.low %v925_v4, %v929_v5  ;;  %v14561_v20 = vcombine.high %v933_v13, %v937_v14  ;;  %v973_v4 = vld [vmem:[#allocation5 + $0x1880] sm:$0xff] }
 0x1db   :  { %v14563_v21 = vcombine.high %v934_v16, %v938_v17  ;;  %v14562_v29 = vcombine.low %v934_v16, %v938_v17  ;;  %v977_v5 = vld [vmem:[#allocation5 + $0x18a0] sm:$0xff]  ;;  %v982_v17 = vld [vmem:[#allocation5 + $0x18c8] sm:$0xff] }
 0x1dc   :  { %v985_v16 = vld [vmem:[#allocation5 + $0x18e0] sm:$0xff] }
 0x1dd   :  { %9675 = vmatpush1.bf16.msra.mxu0 %v14504_v23  ;;  %10191 = vmatpush1.bf16.msra.mxu1 %v14506_v24  ;;  %v945_v23 = vld [vmem:[#allocation5 + $0x17a0] sm:$0xff]  ;;  %v942_v24 = vld [vmem:[#allocation5 + $0x1788] sm:$0xff] }
 0x1de   :  { %9676 = vmatprep.subr.bf16.mxu0 %v14513_v27  ;;  %10192 = vmatprep.subr.bf16.mxu1 %v14515_v28  ;;  %v946_v27 = vld [vmem:[#allocation5 + $0x17a8] sm:$0xff]  ;;  %v14560_v28 = vcombine.low %v933_v13, %v937_v14  ;;  %v14569_v31 = vcombine.high %v941_v22, %v945_v23  ;;  %v981_v14 = vld [vmem:[#allocation5 + $0x18c0] sm:$0xff] }
 0x1df   :  { %v14571_v32 = vcombine.high %v942_v24, %v946_v27  ;;  %v14570_v40 = vcombine.low %v942_v24, %v946_v27  ;;  %v993_v24 = vld [vmem:[#allocation5 + $0x1920] sm:$0xff]  ;;  %v990_v27 = vld [vmem:[#allocation5 + $0x1908] sm:$0xff] }
 0x1e1   :  { %9677 = vmatpush1.bf16.msra.mxu0 %v14512_v34  ;;  %10193 = vmatpush1.bf16.msra.mxu1 %v14514_v35  ;;  %v953_v34 = vld [vmem:[#allocation5 + $0x17e0] sm:$0xff]  ;;  %v950_v35 = vld [vmem:[#allocation5 + $0x17c8] sm:$0xff] }
 0x1e2   :  { %9678 = vmatprep.subr.bf16.mxu0 %v14521_v36  ;;  %10194 = vmatprep.subr.bf16.mxu1 %v14523_v39  ;;  %v954_v36 = vld [vmem:[#allocation5 + $0x17e8] sm:$0xff]  ;;  %v14568_v39 = vcombine.low %v941_v22, %v945_v23  ;;  %v14577_v41 = vcombine.high %v949_v33, %v953_v34  ;;  %v989_v23 = vld [vmem:[#allocation5 + $0x1900] sm:$0xff] }
 0x1e3   :  { %v14579_v42 = vcombine.high %v950_v35, %v954_v36  ;;  %v14578_v51 = vcombine.low %v950_v35, %v954_v36  ;;  %v1001_v35 = vld [vmem:[#allocation5 + $0x1960] sm:$0xff]  ;;  %v998_v36 = vld [vmem:[#allocation5 + $0x1948] sm:$0xff] }
 0x1e5   :  { %9679 = vmatpush1.bf16.msra.mxu0 %v14520_v44  ;;  %10195 = vmatpush1.bf16.msra.mxu1 %v14522_v45  ;;  %v961_v44 = vld [vmem:[#allocation5 + $0x1820] sm:$0xff]  ;;  %v958_v45 = vld [vmem:[#allocation5 + $0x1808] sm:$0xff] }
 0x1e6   :  { %9680 = vmatprep.subr.bf16.mxu0 %v14529_v47  ;;  %10196 = vmatprep.subr.bf16.mxu1 %v14531_v48  ;;  %v962_v47 = vld [vmem:[#allocation5 + $0x1828] sm:$0xff]  ;;  %v14576_v48 = vcombine.low %v949_v33, %v953_v34  ;;  %v14585_v52 = vcombine.high %v957_v43, %v961_v44  ;;  %v997_v34 = vld [vmem:[#allocation5 + $0x1940] sm:$0xff] }
 0x1e7   :  { %v14624_v49 = vcombine.low %v997_v34, %v1001_v35 }
 0x1e9   :  { %9681 = vmatpush1.bf16.msra.mxu0 %v14528_v54  ;;  %10197 = vmatpush1.bf16.msra.mxu1 %v14530_v55  ;;  %v14587_v54 = vcombine.high %v958_v45, %v962_v47  ;;  %v965_v55 = vld [vmem:[#allocation5 + $0x1840] sm:$0xff] }
 0x1ea   :  { %9682 = vmatprep.subr.bf16.mxu0 %v14537_v56  ;;  %10198 = vmatprep.subr.bf16.mxu1 %v14539_v57  ;;  %v969_v56 = vld [vmem:[#allocation5 + $0x1860] sm:$0xff]  ;;  %v966_v57 = vld [vmem:[#allocation5 + $0x1848] sm:$0xff] }
 0x1ed   :  { %9683 = vmatpush1.bf16.msra.mxu0 %v14536_v63  ;;  %10199 = vmatpush1.bf16.msra.mxu1 %v14538_v1  ;;  %v14584_v63 = vcombine.low %v957_v43, %v961_v44  ;;  %v14586_v1 = vcombine.low %v958_v45, %v962_v47  ;;  %v1005_v44 = vld [vmem:[#allocation5 + $0x1980] sm:$0xff]  ;;  %v1006_v47 = vld [vmem:[#allocation5 + $0x1988] sm:$0xff] }
 0x1ee   :  { %9684 = vmatprep.subr.bf16.mxu0 %v14545_v2  ;;  %10200 = vmatprep.subr.bf16.mxu1 %v14547_v3  ;;  %v14593_v2 = vcombine.high %v965_v55, %v969_v56  ;;  %v14595_v3 = vcombine.high %v966_v57, %v970_v60  ;;  %v1009_v45 = vld [vmem:[#allocation5 + $0x19a0] sm:$0xff] }
 0x1f1   :  { %9685 = vmatpush1.bf16.msra.mxu0 %v14544_v8  ;;  %10201 = vmatpush1.bf16.msra.mxu1 %v14546_v9  ;;  %v978_v8 = vld [vmem:[#allocation5 + $0x18a8] sm:$0xff]  ;;  %v14592_v9 = vcombine.low %v965_v55, %v969_v56  ;;  %v1017_v55 = vld [vmem:[#allocation5 + $0x19e0] sm:$0xff] }
 0x1f2   :  { %9686 = vmatprep.subr.bf16.mxu0 %v14553_v11  ;;  %10202 = vmatprep.subr.bf16.mxu1 %v14555_v12  ;;  %v14594_v11 = vcombine.low %v966_v57, %v970_v60  ;;  %v14601_v12 = vcombine.high %v973_v4, %v977_v5  ;;  %v14603_v13 = vcombine.high %v974_v7, %v978_v8  ;;  %v1014_v56 = vld [vmem:[#allocation5 + $0x19c8] sm:$0xff] }
 0x1f3   :  { %v1018_v57 = vld [vmem:[#allocation5 + $0x19e8] sm:$0xff]  ;;  %v14632_v60 = vcombine.low %v1005_v44, %v1009_v45 }
 0x1f5   :  { %9687 = vmatpush1.bf16.msra.mxu0 %v14552_v18  ;;  %10203 = vmatpush1.bf16.msra.mxu1 %v14554_v19  ;;  %v986_v18 = vld [vmem:[#allocation5 + $0x18e8] sm:$0xff]  ;;  %v14600_v19 = vcombine.low %v973_v4, %v977_v5 }
 0x1f6   :  { %9688 = vmatprep.subr.bf16.mxu0 %v14561_v20  ;;  %10204 = vmatprep.subr.bf16.mxu1 %v14563_v21  ;;  %v14602_v20 = vcombine.low %v974_v7, %v978_v8  ;;  %v14609_v21 = vcombine.high %v981_v14, %v985_v16  ;;  %v14611_v22 = vcombine.high %v982_v17, %v986_v18  ;;  %v1026_v4 = vld [vmem:[#allocation5 + $0x1a28] sm:$0xff] }
 0x1f7   :  { %v14642_v7 = vcombine.low %v1014_v56, %v1018_v57 }
 0x1f9   :  { %9689 = vmatpush1.bf16.msra.mxu0 %v14560_v28  ;;  %10205 = vmatpush1.bf16.msra.mxu1 %v14562_v29  ;;  %v994_v28 = vld [vmem:[#allocation5 + $0x1928] sm:$0xff]  ;;  %v14608_v29 = vcombine.low %v981_v14, %v985_v16 }
 0x1fa   :  { %9690 = vmatprep.subr.bf16.mxu0 %v14569_v31  ;;  %10206 = vmatprep.subr.bf16.mxu1 %v14571_v32  ;;  %v14610_v31 = vcombine.low %v982_v17, %v986_v18  ;;  %v14617_v32 = vcombine.high %v989_v23, %v993_v24  ;;  %v14619_v33 = vcombine.high %v990_v27, %v994_v28  ;;  %v1034_v14 = vld [vmem:[#allocation5 + $0x1a68] sm:$0xff] }
 0x1fd   :  { %9691 = vmatpush1.bf16.msra.mxu0 %v14568_v39  ;;  %10207 = vmatpush1.bf16.msra.mxu1 %v14570_v40  ;;  %v1002_v39 = vld [vmem:[#allocation5 + $0x1968] sm:$0xff]  ;;  %v14616_v40 = vcombine.low %v989_v23, %v993_v24 }
 0x1fe   :  { %9692 = vmatprep.subr.bf16.mxu0 %v14577_v41  ;;  %10208 = vmatprep.subr.bf16.mxu1 %v14579_v42  ;;  %v14618_v41 = vcombine.low %v990_v27, %v994_v28  ;;  %v14625_v42 = vcombine.high %v997_v34, %v1001_v35  ;;  %v14627_v43 = vcombine.high %v998_v36, %v1002_v39  ;;  %v1042_v23 = vld [vmem:[#allocation5 + $0x1aa8] sm:$0xff] }
 0x1ff   :  { %v14626_v50 = vcombine.low %v998_v36, %v1002_v39  ;;  %v1050_v34 = vld [vmem:[#allocation5 + $0x1ae8] sm:$0xff] }
 0x201   :  { %9693 = vmatpush1.bf16.msra.mxu0 %v14576_v48  ;;  %10209 = vmatpush1.bf16.msra.mxu1 %v14578_v51  ;;  %v1010_v48 = vld [vmem:[#allocation5 + $0x19a8] sm:$0xff]  ;;  %v14633_v51 = vcombine.high %v1005_v44, %v1009_v45 }
 0x202   :  { %9705 = vmatprep.subr.bf16.mxu0 %v14585_v52  ;;  %10221 = vmatprep.subr.bf16.mxu1 %v14587_v54  ;;  %v14635_v52 = vcombine.high %v1006_v47, %v1010_v48  ;;  %v1013_v54 = vld [vmem:[#allocation5 + $0x19c0] sm:$0xff]  ;;  %v14634_v61 = vcombine.low %v1006_v47, %v1010_v48  ;;  %v1058_v44 = vld [vmem:[#allocation5 + $0x1b28] sm:$0xff] }
 0x203   :  { %v14641_v62 = vcombine.high %v1013_v54, %v1017_v55  ;;  %v14640_v5 = vcombine.low %v1013_v54, %v1017_v55  ;;  %v1066_v54 = vld [vmem:[#allocation5 + $0x1b68] sm:$0xff] }
 0x204   :  { %9695 = vmatmul.mubr.bf16.vlgmr.msra.gmra.mrb[0].mxu0 %v16716_v59  ;;  %10211 = vmatmul.mubr.bf16.vlgmr.msra.gmra.mrb[0].mxu1 %v16716_v59 }
 0x205   :  { %9706 = vmatpush1.bf16.msra.mxu0 %v14584_v63  ;;  %10222 = vmatpush1.bf16.msra.mxu1 %v14586_v1  ;;  %v14643_v63 = vcombine.high %v1014_v56, %v1018_v57  ;;  %v1021_v1 = vld [vmem:[#allocation5 + $0x1a00] sm:$0xff] }
 0x206   :  { %9707 = vmatprep.subr.bf16.mxu0 %v14593_v2  ;;  %10223 = vmatprep.subr.bf16.mxu1 %v14595_v3  ;;  %v1025_v2 = vld [vmem:[#allocation5 + $0x1a20] sm:$0xff]  ;;  %v1022_v3 = vld [vmem:[#allocation5 + $0x1a08] sm:$0xff] }
 0x207   :  { %9737 = vmatprep.mubr.bf16.mxu0 %v16718_v6  ;;  %10253 = vmatprep.mubr.bf16.mxu1 %v16718_v6  ;;  %v14649_v8 = vcombine.high %v1021_v1, %v1025_v2  ;;  %v14648_v16 = vcombine.low %v1021_v1, %v1025_v2  ;;  %v14650_v17 = vcombine.low %v1022_v3, %v1026_v4  ;;  %v1074_v1 = vld [vmem:[#allocation5 + $0x1ba8] sm:$0xff] }
 0x209   :  { %9708 = vmatpush1.bf16.msra.mxu0 %v14592_v9  ;;  %10224 = vmatpush1.bf16.msra.mxu1 %v14594_v11  ;;  %v14651_v9 = vcombine.high %v1022_v3, %v1026_v4  ;;  %v1029_v11 = vld [vmem:[#allocation5 + $0x1a40] sm:$0xff] }
 0x20a   :  { %9709 = vmatprep.subr.bf16.mxu0 %v14601_v12  ;;  %10225 = vmatprep.subr.bf16.mxu1 %v14603_v13  ;;  %v1033_v12 = vld [vmem:[#allocation5 + $0x1a60] sm:$0xff]  ;;  %v1030_v13 = vld [vmem:[#allocation5 + $0x1a48] sm:$0xff] }
 0x20b   :  { %v14657_v18 = vcombine.high %v1029_v11, %v1033_v12  ;;  %v14656_v24 = vcombine.low %v1029_v11, %v1033_v12  ;;  %v14658_v27 = vcombine.low %v1030_v13, %v1034_v14  ;;  %v1082_v11 = vld [vmem:[#allocation5 + $0x1be8] sm:$0xff] }
 0x20d   :  { %9710 = vmatpush1.bf16.msra.mxu0 %v14600_v19  ;;  %10226 = vmatpush1.bf16.msra.mxu1 %v14602_v20  ;;  %v14659_v19 = vcombine.high %v1030_v13, %v1034_v14  ;;  %v1037_v20 = vld [vmem:[#allocation5 + $0x1a80] sm:$0xff] }
 0x20e   :  { %9711 = vmatprep.subr.bf16.mxu0 %v14609_v21  ;;  %10227 = vmatprep.subr.bf16.mxu1 %v14611_v22  ;;  %v1041_v21 = vld [vmem:[#allocation5 + $0x1aa0] sm:$0xff]  ;;  %v1038_v22 = vld [vmem:[#allocation5 + $0x1a88] sm:$0xff] }
 0x20f   :  { %v14665_v28 = vcombine.high %v1037_v20, %v1041_v21  ;;  %v14664_v35 = vcombine.low %v1037_v20, %v1041_v21  ;;  %v14666_v36 = vcombine.low %v1038_v22, %v1042_v23  ;;  %v1090_v20 = vld [vmem:[#allocation5 + $0x1c28] sm:$0xff] }
 0x211   :  { %9712 = vmatpush1.bf16.msra.mxu0 %v14608_v29  ;;  %10228 = vmatpush1.bf16.msra.mxu1 %v14610_v31  ;;  %v14667_v29 = vcombine.high %v1038_v22, %v1042_v23  ;;  %v1045_v31 = vld [vmem:[#allocation5 + $0x1ac0] sm:$0xff] }
 0x212   :  { %9713 = vmatprep.subr.bf16.mxu0 %v14617_v32  ;;  %10229 = vmatprep.subr.bf16.mxu1 %v14619_v33  ;;  %v1049_v32 = vld [vmem:[#allocation5 + $0x1ae0] sm:$0xff]  ;;  %v1046_v33 = vld [vmem:[#allocation5 + $0x1ac8] sm:$0xff] }
 0x213   :  { %v14673_v39 = vcombine.high %v1045_v31, %v1049_v32  ;;  %v14672_v45 = vcombine.low %v1045_v31, %v1049_v32  ;;  %v14674_v47 = vcombine.low %v1046_v33, %v1050_v34  ;;  %v129_v22 = vld [vmem:[#allocation2 + $0x60] sm:$0xff]  ;;  %v1094_v32 = vld [vmem:[#allocation5 + $0x1c48] sm:$0xff] }
 0x214   :  { %v153_v23 = vld [vmem:[#allocation2 + $0x120] sm:$0xff] }
 0x215   :  { %9714 = vmatpush1.bf16.msra.mxu0 %v14616_v40  ;;  %10230 = vmatpush1.bf16.msra.mxu1 %v14618_v41  ;;  %v14675_v40 = vcombine.high %v1046_v33, %v1050_v34  ;;  %v1053_v41 = vld [vmem:[#allocation5 + $0x1b00] sm:$0xff]  ;;  %v16724_v33 = vpack.c.bf16 %v153_v23, %v129_v22  ;;  %v1098_v34 = vld [vmem:[#allocation5 + $0x1c68] sm:$0xff] }
 0x216   :  { %9715 = vmatprep.subr.bf16.mxu0 %v14625_v42  ;;  %10231 = vmatprep.subr.bf16.mxu1 %v14627_v43  ;;  %v1057_v42 = vld [vmem:[#allocation5 + $0x1b20] sm:$0xff]  ;;  %v1054_v43 = vld [vmem:[#allocation5 + $0x1b08] sm:$0xff] }
 0x217   :  { %v14681_v48 = vcombine.high %v1053_v41, %v1057_v42  ;;  %v14680_v55 = vcombine.low %v1053_v41, %v1057_v42  ;;  %v14682_v56 = vcombine.low %v1054_v43, %v1058_v44  ;;  %v1097_v31 = vld [vmem:[#allocation5 + $0x1c60] sm:$0xff]  ;;  %v14723_v42 = vcombine.high %v1094_v32, %v1098_v34  ;;  %v1134_v22 = vld [vmem:[#allocation5 + $0x1d88] sm:$0xff] }
 0x218   :  { %v1138_v23 = vld [vmem:[#allocation5 + $0x1da8] sm:$0xff] }
 0x219   :  { %9716 = vmatpush1.bf16.msra.mxu0 %v14624_v49  ;;  %10232 = vmatpush1.bf16.msra.mxu1 %v14626_v50  ;;  %v14683_v49 = vcombine.high %v1054_v43, %v1058_v44  ;;  %v1061_v50 = vld [vmem:[#allocation5 + $0x1b40] sm:$0xff] }
 0x21a   :  { %9717 = vmatprep.subr.bf16.mxu0 %v14633_v51  ;;  %10233 = vmatprep.subr.bf16.mxu1 %v14635_v52  ;;  %v1065_v51 = vld [vmem:[#allocation5 + $0x1b60] sm:$0xff]  ;;  %v1062_v52 = vld [vmem:[#allocation5 + $0x1b48] sm:$0xff] }
 0x21b   :  { %v14689_v57 = vcombine.high %v1061_v50, %v1065_v51  ;;  %v14688_v2 = vcombine.low %v1061_v50, %v1065_v51  ;;  %v14690_v3 = vcombine.low %v1062_v52, %v1066_v54  ;;  %v1101_v43 = vld [vmem:[#allocation5 + $0x1c80] sm:$0xff]  ;;  %v14722_v50 = vcombine.low %v1094_v32, %v1098_v34  ;;  %v1142_v34 = vld [vmem:[#allocation5 + $0x1dc8] sm:$0xff] }
 0x21c   :  { %v1105_v44 = vld [vmem:[#allocation5 + $0x1ca0] sm:$0xff] }
 0x21d   :  { %9718 = vmatpush1.bf16.msra.mxu0 %v14632_v60  ;;  %10234 = vmatpush1.bf16.msra.mxu1 %v14634_v61  ;;  %v14691_v60 = vcombine.high %v1062_v52, %v1066_v54  ;;  %v1069_v61 = vld [vmem:[#allocation5 + $0x1b80] sm:$0xff]  ;;  %v14729_v51 = vcombine.high %v1101_v43, %v1105_v44 }
 0x21e   :  { %9719 = vmatprep.subr.bf16.mxu0 %v14641_v62  ;;  %10235 = vmatprep.subr.bf16.mxu1 %v14643_v63  ;;  %v1073_v62 = vld [vmem:[#allocation5 + $0x1ba0] sm:$0xff]  ;;  %v1070_v63 = vld [vmem:[#allocation5 + $0x1b88] sm:$0xff] }
 0x21f   :  { %v14697_v4 = vcombine.high %v1069_v61, %v1073_v62  ;;  %v14696_v12 = vcombine.low %v1069_v61, %v1073_v62  ;;  %v14698_v13 = vcombine.low %v1070_v63, %v1074_v1  ;;  %v1109_v54 = vld [vmem:[#allocation5 + $0x1cc0] sm:$0xff] }
 0x220   :  { %v1145_v32 = vld [vmem:[#allocation5 + $0x1de0] sm:$0xff] }
 0x221   :  { %9720 = vmatpush1.bf16.msra.mxu0 %v14640_v5  ;;  %10236 = vmatpush1.bf16.msra.mxu1 %v14642_v7  ;;  %v14699_v5 = vcombine.high %v1070_v63, %v1074_v1  ;;  %v1077_v7 = vld [vmem:[#allocation5 + $0x1bc0] sm:$0xff] }
 0x222   :  { %9721 = vmatprep.subr.bf16.mxu0 %v14649_v8  ;;  %10237 = vmatprep.subr.bf16.mxu1 %v14651_v9  ;;  %v1081_v8 = vld [vmem:[#allocation5 + $0x1be0] sm:$0xff]  ;;  %v1078_v9 = vld [vmem:[#allocation5 + $0x1bc8] sm:$0xff] }
 0x223   :  { %v14705_v14 = vcombine.high %v1077_v7, %v1081_v8  ;;  %v14704_v21 = vcombine.low %v1077_v7, %v1081_v8  ;;  %v1117_v1 = vld [vmem:[#allocation5 + $0x1d00] sm:$0xff] }
 0x225   :  { %9722 = vmatpush1.bf16.msra.mxu0 %v14648_v16  ;;  %10238 = vmatpush1.bf16.msra.mxu1 %v14650_v17  ;;  %v14707_v16 = vcombine.high %v1078_v9, %v1082_v11  ;;  %v1085_v17 = vld [vmem:[#allocation5 + $0x1c00] sm:$0xff] }
 0x226   :  { %9723 = vmatprep.subr.bf16.mxu0 %v14657_v18  ;;  %10239 = vmatprep.subr.bf16.mxu1 %v14659_v19  ;;  %v1089_v18 = vld [vmem:[#allocation5 + $0x1c20] sm:$0xff]  ;;  %v1086_v19 = vld [vmem:[#allocation5 + $0x1c08] sm:$0xff] }
 0x229   :  { %9724 = vmatpush1.bf16.msra.mxu0 %v14656_v24  ;;  %10240 = vmatpush1.bf16.msra.mxu1 %v14658_v27  ;;  %v14706_v24 = vcombine.low %v1078_v9, %v1082_v11  ;;  %v14713_v27 = vcombine.high %v1085_v17, %v1089_v18  ;;  %v1125_v11 = vld [vmem:[#allocation5 + $0x1d40] sm:$0xff] }
 0x22a   :  { %9725 = vmatprep.subr.bf16.mxu0 %v14665_v28  ;;  %10241 = vmatprep.subr.bf16.mxu1 %v14667_v29  ;;  %v14715_v28 = vcombine.high %v1086_v19, %v1090_v20  ;;  %v1093_v29 = vld [vmem:[#allocation5 + $0x1c40] sm:$0xff] }
 0x22b   :  { %v14721_v41 = vcombine.high %v1093_v29, %v1097_v31 }
 0x22d   :  { %9726 = vmatpush1.bf16.msra.mxu0 %v14664_v35  ;;  %10242 = vmatpush1.bf16.msra.mxu1 %v14666_v36  ;;  %v132_v35 = vld [vmem:[#allocation2 + $0x78] sm:$0xff] }
 0x22e   :  { %9727 = vmatprep.subr.bf16.mxu0 %v14673_v39  ;;  %10243 = vmatprep.subr.bf16.mxu1 %v14675_v40  ;;  %v156_v36 = vld [vmem:[#allocation2 + $0x138] sm:$0xff]  ;;  %v14712_v39 = vcombine.low %v1085_v17, %v1089_v18  ;;  %v14714_v40 = vcombine.low %v1086_v19, %v1090_v20  ;;  %v1133_v20 = vld [vmem:[#allocation5 + $0x1d80] sm:$0xff] }
 0x231   :  { %9728 = vmatpush1.bf16.msra.mxu0 %v14672_v45  ;;  %10244 = vmatpush1.bf16.msra.mxu1 %v14674_v47  ;;  %v16726_v45 = vpack.c.bf16 %v156_v36, %v132_v35  ;;  %v1102_v47 = vld [vmem:[#allocation5 + $0x1c88] sm:$0xff] }
 0x232   :  { %9729 = vmatprep.subr.bf16.mxu0 %v14681_v48  ;;  %10245 = vmatprep.subr.bf16.mxu1 %v14683_v49  ;;  %v1106_v48 = vld [vmem:[#allocation5 + $0x1ca8] sm:$0xff]  ;;  %v14720_v49 = vcombine.low %v1093_v29, %v1097_v31  ;;  %v14763_v29 = vcombine.high %v1134_v22, %v1138_v23  ;;  %v1141_v31 = vld [vmem:[#allocation5 + $0x1dc0] sm:$0xff] }
 0x233   :  { %v14731_v52 = vcombine.high %v1102_v47, %v1106_v48  ;;  %v14730_v61 = vcombine.low %v1102_v47, %v1106_v48  ;;  %v1146_v35 = vld [vmem:[#allocation5 + $0x1de8] sm:$0xff]  ;;  %v14768_v48 = vcombine.low %v1141_v31, %v1145_v32 }
 0x234   :  { %v1154_v47 = vld [vmem:[#allocation5 + $0x1e28] sm:$0xff] }
 0x235   :  { %9730 = vmatpush1.bf16.msra.mxu0 %v14680_v55  ;;  %10246 = vmatpush1.bf16.msra.mxu1 %v14682_v56  ;;  %v1113_v55 = vld [vmem:[#allocation5 + $0x1ce0] sm:$0xff]  ;;  %v1110_v56 = vld [vmem:[#allocation5 + $0x1cc8] sm:$0xff] }
 0x236   :  { %9731 = vmatprep.subr.bf16.mxu0 %v14689_v57  ;;  %10247 = vmatprep.subr.bf16.mxu1 %v14691_v60  ;;  %v1114_v57 = vld [vmem:[#allocation5 + $0x1ce8] sm:$0xff]  ;;  %v14728_v60 = vcombine.low %v1101_v43, %v1105_v44  ;;  %v14737_v62 = vcombine.high %v1109_v54, %v1113_v55  ;;  %v1153_v43 = vld [vmem:[#allocation5 + $0x1e20] sm:$0xff] }
 0x237   :  { %v14739_v63 = vcombine.high %v1110_v56, %v1114_v57  ;;  %v14738_v7 = vcombine.low %v1110_v56, %v1114_v57  ;;  %v1150_v44 = vld [vmem:[#allocation5 + $0x1e08] sm:$0xff] }
 0x238   :  { %v1162_v56 = vld [vmem:[#allocation5 + $0x1e68] sm:$0xff] }
 0x239   :  { %9732 = vmatpush1.bf16.msra.mxu0 %v14688_v2  ;;  %10248 = vmatpush1.bf16.msra.mxu1 %v14690_v3  ;;  %v1121_v2 = vld [vmem:[#allocation5 + $0x1d20] sm:$0xff]  ;;  %v1118_v3 = vld [vmem:[#allocation5 + $0x1d08] sm:$0xff] }
 0x23a   :  { %9733 = vmatprep.subr.bf16.mxu0 %v14697_v4  ;;  %10249 = vmatprep.subr.bf16.mxu1 %v14699_v5  ;;  %v1122_v4 = vld [vmem:[#allocation5 + $0x1d28] sm:$0xff]  ;;  %v14736_v5 = vcombine.low %v1109_v54, %v1113_v55  ;;  %v14745_v8 = vcombine.high %v1117_v1, %v1121_v2  ;;  %v1161_v54 = vld [vmem:[#allocation5 + $0x1e60] sm:$0xff] }
 0x23b   :  { %v14747_v9 = vcombine.high %v1118_v3, %v1122_v4  ;;  %v14746_v17 = vcombine.low %v1118_v3, %v1122_v4  ;;  %v1158_v55 = vld [vmem:[#allocation5 + $0x1e48] sm:$0xff] }
 0x23c   :  { %v1170_v3 = vld [vmem:[#allocation5 + $0x1ea8] sm:$0xff] }
 0x23d   :  { %9734 = vmatpush1.bf16.msra.mxu0 %v14696_v12  ;;  %10250 = vmatpush1.bf16.msra.mxu1 %v14698_v13  ;;  %v1129_v12 = vld [vmem:[#allocation5 + $0x1d60] sm:$0xff]  ;;  %v1126_v13 = vld [vmem:[#allocation5 + $0x1d48] sm:$0xff] }
 0x23e   :  { %9735 = vmatprep.subr.bf16.mxu0 %v14705_v14  ;;  %10251 = vmatprep.subr.bf16.mxu1 %v14707_v16  ;;  %v1130_v14 = vld [vmem:[#allocation5 + $0x1d68] sm:$0xff]  ;;  %v14744_v16 = vcombine.low %v1117_v1, %v1121_v2  ;;  %v14753_v18 = vcombine.high %v1125_v11, %v1129_v12  ;;  %v1169_v1 = vld [vmem:[#allocation5 + $0x1ea0] sm:$0xff] }
 0x23f   :  { %v14755_v19 = vcombine.high %v1126_v13, %v1130_v14  ;;  %v1166_v2 = vld [vmem:[#allocation5 + $0x1e88] sm:$0xff] }
 0x241   :  { %9736 = vmatpush1.bf16.msra.mxu0 %v14704_v21  ;;  %10252 = vmatpush1.bf16.msra.mxu1 %v14706_v24  ;;  %v1137_v21 = vld [vmem:[#allocation5 + $0x1da0] sm:$0xff]  ;;  %v14752_v24 = vcombine.low %v1125_v11, %v1129_v12  ;;  %v1174_v12 = vld [vmem:[#allocation5 + $0x1ec8] sm:$0xff] }
 0x242   :  { %9748 = vmatprep.subr.bf16.mxu0 %v14713_v27  ;;  %10264 = vmatprep.subr.bf16.mxu1 %v14715_v28  ;;  %v14754_v27 = vcombine.low %v1126_v13, %v1130_v14  ;;  %v14761_v28 = vcombine.high %v1133_v20, %v1137_v21  ;;  %v14760_v36 = vcombine.low %v1133_v20, %v1137_v21  ;;  %v1177_v11 = vld [vmem:[#allocation5 + $0x1ee0] sm:$0xff]  ;;  %v1178_v13 = vld [vmem:[#allocation5 + $0x1ee8] sm:$0xff] }
 0x243   :  { %v1185_v20 = vld [vmem:[#allocation5 + $0x1f20] sm:$0xff]  ;;  %v1182_v21 = vld [vmem:[#allocation5 + $0x1f08] sm:$0xff] }
 0x244   :  { %9738 = vmatmul.mubr.bf16.vlgmr.msra.gmra.mrb[0].mxu0 %v16724_v33  ;;  %10254 = vmatmul.mubr.bf16.vlgmr.msra.gmra.mrb[0].mxu1 %v16724_v33 }
 0x245   :  { %9749 = vmatpush1.bf16.msra.mxu0 %v14712_v39  ;;  %10265 = vmatpush1.bf16.msra.mxu1 %v14714_v40  ;;  %v14762_v39 = vcombine.low %v1134_v22, %v1138_v23  ;;  %v14769_v40 = vcombine.high %v1141_v31, %v1145_v32  ;;  %v1186_v22 = vld [vmem:[#allocation5 + $0x1f28] sm:$0xff]  ;;  %v1193_v31 = vld [vmem:[#allocation5 + $0x1f60] sm:$0xff] }
 0x246   :  { %9750 = vmatprep.subr.bf16.mxu0 %v14721_v41  ;;  %10266 = vmatprep.subr.bf16.mxu1 %v14723_v42  ;;  %v14771_v41 = vcombine.high %v1142_v34, %v1146_v35  ;;  %v1149_v42 = vld [vmem:[#allocation5 + $0x1e00] sm:$0xff]  ;;  %v1190_v32 = vld [vmem:[#allocation5 + $0x1f48] sm:$0xff] }
 0x247   :  { %9780 = vmatprep.mubr.bf16.mxu0 %v16726_v45  ;;  %10296 = vmatprep.mubr.bf16.mxu1 %v16726_v45  ;;  %v14776_v57 = vcombine.low %v1149_v42, %v1153_v43 }
 0x249   :  { %9751 = vmatpush1.bf16.msra.mxu0 %v14720_v49  ;;  %10267 = vmatpush1.bf16.msra.mxu1 %v14722_v50  ;;  %v14770_v49 = vcombine.low %v1142_v34, %v1146_v35  ;;  %v14777_v50 = vcombine.high %v1149_v42, %v1153_v43  ;;  %v1194_v34 = vld [vmem:[#allocation5 + $0x1f68] sm:$0xff]  ;;  %v1201_v42 = vld [vmem:[#allocation5 + $0x1fa0] sm:$0xff] }
 0x24a   :  { %9752 = vmatprep.subr.bf16.mxu0 %v14729_v51  ;;  %10268 = vmatprep.subr.bf16.mxu1 %v14731_v52  ;;  %v14779_v51 = vcombine.high %v1150_v44, %v1154_v47  ;;  %v1157_v52 = vld [vmem:[#allocation5 + $0x1e40] sm:$0xff]  ;;  %v1198_v43 = vld [vmem:[#allocation5 + $0x1f88] sm:$0xff] }
 0x24b   :  { %v14784_v4 = vcombine.low %v1157_v52, %v1161_v54 }
 0x24d   :  { %9753 = vmatpush1.bf16.msra.mxu0 %v14728_v60  ;;  %10269 = vmatpush1.bf16.msra.mxu1 %v14730_v61  ;;  %v14778_v60 = vcombine.low %v1150_v44, %v1154_v47  ;;  %v14785_v61 = vcombine.high %v1157_v52, %v1161_v54  ;;  %v1202_v44 = vld [vmem:[#allocation5 + $0x1fa8] sm:$0xff]  ;;  %v1209_v52 = vld [vmem:[#allocation5 + $0x1fe0] sm:$0xff] }
 0x24e   :  { %9754 = vmatprep.subr.bf16.mxu0 %v14737_v62  ;;  %10270 = vmatprep.subr.bf16.mxu1 %v14739_v63  ;;  %v14787_v62 = vcombine.high %v1158_v55, %v1162_v56  ;;  %v1165_v63 = vld [vmem:[#allocation5 + $0x1e80] sm:$0xff]  ;;  %v1206_v54 = vld [vmem:[#allocation5 + $0x1fc8] sm:$0xff] }
 0x24f   :  { %v14792_v14 = vcombine.low %v1165_v63, %v1169_v1 }
 0x251   :  { %9755 = vmatpush1.bf16.msra.mxu0 %v14736_v5  ;;  %10271 = vmatpush1.bf16.msra.mxu1 %v14738_v7  ;;  %v14786_v5 = vcombine.low %v1158_v55, %v1162_v56  ;;  %v14793_v7 = vcombine.high %v1165_v63, %v1169_v1  ;;  %v1210_v55 = vld [vmem:[#allocation5 + $0x1fe8] sm:$0xff]  ;;  %v1217_v63 = vld [vmem:[#allocation5 + $0x2020] sm:$0xff] }
 0x252   :  { %9756 = vmatprep.subr.bf16.mxu0 %v14745_v8  ;;  %10272 = vmatprep.subr.bf16.mxu1 %v14747_v9  ;;  %v14795_v8 = vcombine.high %v1166_v2, %v1170_v3  ;;  %v1173_v9 = vld [vmem:[#allocation5 + $0x1ec0] sm:$0xff]  ;;  %v1214_v1 = vld [vmem:[#allocation5 + $0x2008] sm:$0xff] }
 0x253   :  { %v14800_v23 = vcombine.low %v1173_v9, %v1177_v11 }
 0x255   :  { %9757 = vmatpush1.bf16.msra.mxu0 %v14744_v16  ;;  %10273 = vmatpush1.bf16.msra.mxu1 %v14746_v17  ;;  %v14794_v16 = vcombine.low %v1166_v2, %v1170_v3  ;;  %v14801_v17 = vcombine.high %v1173_v9, %v1177_v11  ;;  %v1218_v2 = vld [vmem:[#allocation5 + $0x2028] sm:$0xff]  ;;  %v1221_v11 = vld [vmem:[#allocation5 + $0x2040] sm:$0xff] }
 0x256   :  { %9758 = vmatprep.subr.bf16.mxu0 %v14753_v18  ;;  %10274 = vmatprep.subr.bf16.mxu1 %v14755_v19  ;;  %v14803_v18 = vcombine.high %v1174_v12, %v1178_v13  ;;  %v1181_v19 = vld [vmem:[#allocation5 + $0x1f00] sm:$0xff]  ;;  %v14843_v9 = vcombine.high %v1214_v1, %v1218_v2 }
 0x257   :  { %v14808_v35 = vcombine.low %v1181_v19, %v1185_v20 }
 0x259   :  { %9759 = vmatpush1.bf16.msra.mxu0 %v14752_v24  ;;  %10275 = vmatpush1.bf16.msra.mxu1 %v14754_v27  ;;  %v14802_v24 = vcombine.low %v1174_v12, %v1178_v13  ;;  %v14809_v27 = vcombine.high %v1181_v19, %v1185_v20  ;;  %v1225_v12 = vld [vmem:[#allocation5 + $0x2060] sm:$0xff]  ;;  %v1222_v13 = vld [vmem:[#allocation5 + $0x2048] sm:$0xff]  ;;  %v14842_v20 = vcombine.low %v1214_v1, %v1218_v2 }
 0x25a   :  { %9760 = vmatprep.subr.bf16.mxu0 %v14761_v28  ;;  %10276 = vmatprep.subr.bf16.mxu1 %v14763_v29  ;;  %v14811_v28 = vcombine.high %v1182_v21, %v1186_v22  ;;  %v1189_v29 = vld [vmem:[#allocation5 + $0x1f40] sm:$0xff] }
 0x25b   :  { %v14816_v47 = vcombine.low %v1189_v29, %v1193_v31 }
 0x25d   :  { %9761 = vmatpush1.bf16.msra.mxu0 %v14760_v36  ;;  %10277 = vmatpush1.bf16.msra.mxu1 %v14762_v39  ;;  %v14810_v36 = vcombine.low %v1182_v21, %v1186_v22  ;;  %v14817_v39 = vcombine.high %v1189_v29, %v1193_v31  ;;  %v14849_v21 = vcombine.high %v1221_v11, %v1225_v12  ;;  %v1234_v29 = vld [vmem:[#allocation5 + $0x20a8] sm:$0xff] }
 0x25e   :  { %9762 = vmatprep.subr.bf16.mxu0 %v14769_v40  ;;  %10278 = vmatprep.subr.bf16.mxu1 %v14771_v41  ;;  %v14819_v40 = vcombine.high %v1190_v32, %v1194_v34  ;;  %v1197_v41 = vld [vmem:[#allocation5 + $0x1f80] sm:$0xff]  ;;  %v14848_v31 = vcombine.low %v1221_v11, %v1225_v12 }
 0x25f   :  { %v14824_v56 = vcombine.low %v1197_v41, %v1201_v42 }
 0x261   :  { %9763 = vmatpush1.bf16.msra.mxu0 %v14768_v48  ;;  %10279 = vmatpush1.bf16.msra.mxu1 %v14770_v49  ;;  %v14818_v48 = vcombine.low %v1190_v32, %v1194_v34  ;;  %v14825_v49 = vcombine.high %v1197_v41, %v1201_v42  ;;  %v1242_v41 = vld [vmem:[#allocation5 + $0x20e8] sm:$0xff] }
 0x262   :  { %9764 = vmatprep.subr.bf16.mxu0 %v14777_v50  ;;  %10280 = vmatprep.subr.bf16.mxu1 %v14779_v51  ;;  %v14827_v50 = vcombine.high %v1198_v43, %v1202_v44  ;;  %v1205_v51 = vld [vmem:[#allocation5 + $0x1fc0] sm:$0xff] }
 0x263   :  { %v14832_v3 = vcombine.low %v1205_v51, %v1209_v52 }
 0x265   :  { %9765 = vmatpush1.bf16.msra.mxu0 %v14776_v57  ;;  %10281 = vmatpush1.bf16.msra.mxu1 %v14778_v60  ;;  %v14826_v57 = vcombine.low %v1198_v43, %v1202_v44  ;;  %v14833_v60 = vcombine.high %v1205_v51, %v1209_v52  ;;  %v1250_v51 = vld [vmem:[#allocation5 + $0x2128] sm:$0xff] }
 0x266   :  { %9766 = vmatprep.subr.bf16.mxu0 %v14785_v61  ;;  %10282 = vmatprep.subr.bf16.mxu1 %v14787_v62  ;;  %v14835_v61 = vcombine.high %v1206_v54, %v1210_v55  ;;  %v1213_v62 = vld [vmem:[#allocation5 + $0x2000] sm:$0xff] }
 0x267   :  { %v14840_v19 = vcombine.low %v1213_v62, %v1217_v63 }
 0x269   :  { %9767 = vmatpush1.bf16.msra.mxu0 %v14784_v4  ;;  %10283 = vmatpush1.bf16.msra.mxu1 %v14786_v5  ;;  %v131_v4 = vld [vmem:[#allocation2 + $0x70] sm:$0xff] }
 0x26a   :  { %9768 = vmatprep.subr.bf16.mxu0 %v14793_v7  ;;  %10284 = vmatprep.subr.bf16.mxu1 %v14795_v8  ;;  %v155_v5 = vld [vmem:[#allocation2 + $0x130] sm:$0xff]  ;;  %v14834_v7 = vcombine.low %v1206_v54, %v1210_v55  ;;  %v14841_v8 = vcombine.high %v1213_v62, %v1217_v63  ;;  %v1258_v62 = vld [vmem:[#allocation5 + $0x2168] sm:$0xff] }
 0x26d   :  { %9769 = vmatpush1.bf16.msra.mxu0 %v14792_v14  ;;  %10285 = vmatpush1.bf16.msra.mxu1 %v14794_v16  ;;  %v16732_v14 = vpack.c.bf16 %v155_v5, %v131_v4  ;;  %v1226_v16 = vld [vmem:[#allocation5 + $0x2068] sm:$0xff]  ;;  %v1261_v4 = vld [vmem:[#allocation5 + $0x2180] sm:$0xff] }
 0x26e   :  { %9770 = vmatprep.subr.bf16.mxu0 %v14801_v17  ;;  %10286 = vmatprep.subr.bf16.mxu1 %v14803_v18  ;;  %v134_v17 = vld [vmem:[#allocation2 + $0x88] sm:$0xff]  ;;  %v14851_v22 = vcombine.high %v1222_v13, %v1226_v16  ;;  %v14850_v32 = vcombine.low %v1222_v13, %v1226_v16  ;;  %v1265_v5 = vld [vmem:[#allocation5 + $0x21a0] sm:$0xff] }
 0x26f   :  { %v158_v18 = vld [vmem:[#allocation2 + $0x148] sm:$0xff]  ;;  %v14889_v12 = vcombine.high %v1261_v4, %v1265_v5  ;;  %v1269_v16 = vld [vmem:[#allocation5 + $0x21c0] sm:$0xff] }
 0x271   :  { %9771 = vmatpush1.bf16.msra.mxu0 %v14800_v23  ;;  %10287 = vmatpush1.bf16.msra.mxu1 %v14802_v24  ;;  %v1229_v23 = vld [vmem:[#allocation5 + $0x2080] sm:$0xff] }
 0x272   :  { %9772 = vmatprep.subr.bf16.mxu0 %v14809_v27  ;;  %10288 = vmatprep.subr.bf16.mxu1 %v14811_v28  ;;  %v1233_v24 = vld [vmem:[#allocation5 + $0x20a0] sm:$0xff]  ;;  %v16734_v27 = vpack.c.bf16 %v158_v18, %v134_v17  ;;  %v1230_v28 = vld [vmem:[#allocation5 + $0x2088] sm:$0xff] }
 0x273   :  { %v14857_v34 = vcombine.high %v1229_v23, %v1233_v24  ;;  %v14856_v42 = vcombine.low %v1229_v23, %v1233_v24  ;;  %v14858_v43 = vcombine.low %v1230_v28, %v1234_v29  ;;  %v1273_v17 = vld [vmem:[#allocation5 + $0x21e0] sm:$0xff]  ;;  %v1270_v18 = vld [vmem:[#allocation5 + $0x21c8] sm:$0xff] }
 0x274   :  { %v1277_v24 = vld [vmem:[#allocation5 + $0x2200] sm:$0xff] }
 0x275   :  { %9773 = vmatpush1.bf16.msra.mxu0 %v14808_v35  ;;  %10289 = vmatpush1.bf16.msra.mxu1 %v14810_v36  ;;  %v14859_v35 = vcombine.high %v1230_v28, %v1234_v29  ;;  %v1237_v36 = vld [vmem:[#allocation5 + $0x20c0] sm:$0xff]  ;;  %v1278_v29 = vld [vmem:[#allocation5 + $0x2208] sm:$0xff] }
 0x276   :  { %9774 = vmatprep.subr.bf16.mxu0 %v14817_v39  ;;  %10290 = vmatprep.subr.bf16.mxu1 %v14819_v40  ;;  %v1241_v39 = vld [vmem:[#allocation5 + $0x20e0] sm:$0xff]  ;;  %v1238_v40 = vld [vmem:[#allocation5 + $0x20c8] sm:$0xff] }
 0x277   :  { %v14865_v44 = vcombine.high %v1237_v36, %v1241_v39  ;;  %v14864_v52 = vcombine.low %v1237_v36, %v1241_v39  ;;  %v14866_v54 = vcombine.low %v1238_v40, %v1242_v41  ;;  %v1281_v28 = vld [vmem:[#allocation5 + $0x2220] sm:$0xff] }
 0x278   :  { %v1285_v39 = vld [vmem:[#allocation5 + $0x2240] sm:$0xff] }
 0x279   :  { %9775 = vmatpush1.bf16.msra.mxu0 %v14816_v47  ;;  %10291 = vmatpush1.bf16.msra.mxu1 %v14818_v48  ;;  %v14867_v47 = vcombine.high %v1238_v40, %v1242_v41  ;;  %v1245_v48 = vld [vmem:[#allocation5 + $0x2100] sm:$0xff]  ;;  %v1286_v41 = vld [vmem:[#allocation5 + $0x2248] sm:$0xff] }
 0x27a   :  { %9776 = vmatprep.subr.bf16.mxu0 %v14825_v49  ;;  %10292 = vmatprep.subr.bf16.mxu1 %v14827_v50  ;;  %v1249_v49 = vld [vmem:[#allocation5 + $0x2120] sm:$0xff]  ;;  %v1246_v50 = vld [vmem:[#allocation5 + $0x2108] sm:$0xff] }
 0x27b   :  { %v14873_v55 = vcombine.high %v1245_v48, %v1249_v49  ;;  %v14872_v63 = vcombine.low %v1245_v48, %v1249_v49  ;;  %v14874_v1 = vcombine.low %v1246_v50, %v1250_v51  ;;  %v1289_v40 = vld [vmem:[#allocation5 + $0x2260] sm:$0xff] }
 0x27c   :  { %v1293_v49 = vld [vmem:[#allocation5 + $0x2280] sm:$0xff] }
 0x27d   :  { %9777 = vmatpush1.bf16.msra.mxu0 %v14824_v56  ;;  %10293 = vmatpush1.bf16.msra.mxu1 %v14826_v57  ;;  %v14875_v56 = vcombine.high %v1246_v50, %v1250_v51  ;;  %v1253_v57 = vld [vmem:[#allocation5 + $0x2140] sm:$0xff]  ;;  %v1294_v51 = vld [vmem:[#allocation5 + $0x2288] sm:$0xff] }
 0x27e   :  { %9778 = vmatprep.subr.bf16.mxu0 %v14833_v60  ;;  %10294 = vmatprep.subr.bf16.mxu1 %v14835_v61  ;;  %v1257_v60 = vld [vmem:[#allocation5 + $0x2160] sm:$0xff]  ;;  %v1254_v61 = vld [vmem:[#allocation5 + $0x2148] sm:$0xff] }
 0x27f   :  { %v14881_v2 = vcombine.high %v1253_v57, %v1257_v60  ;;  %v14882_v11 = vcombine.low %v1254_v61, %v1258_v62  ;;  %v1297_v50 = vld [vmem:[#allocation5 + $0x22a0] sm:$0xff] }
 0x281   :  { %9779 = vmatpush1.bf16.msra.mxu0 %v14832_v3  ;;  %10295 = vmatpush1.bf16.msra.mxu1 %v14834_v7  ;;  %v14883_v3 = vcombine.high %v1254_v61, %v1258_v62  ;;  %v1262_v7 = vld [vmem:[#allocation5 + $0x2188] sm:$0xff]  ;;  %v1305_v61 = vld [vmem:[#allocation5 + $0x22e0] sm:$0xff] }
 0x282   :  { %9791 = vmatprep.subr.bf16.mxu0 %v14841_v8  ;;  %10307 = vmatprep.subr.bf16.mxu1 %v14843_v9  ;;  %v1266_v8 = vld [vmem:[#allocation5 + $0x21a8] sm:$0xff]  ;;  %v14880_v9 = vcombine.low %v1253_v57, %v1257_v60  ;;  %v1301_v60 = vld [vmem:[#allocation5 + $0x22c0] sm:$0xff] }
 0x283   :  { %v14891_v13 = vcombine.high %v1262_v7, %v1266_v8  ;;  %v1302_v62 = vld [vmem:[#allocation5 + $0x22c8] sm:$0xff] }
 0x284   :  { %9781 = vmatmul.mubr.bf16.vlgmr.msra.gmra.mrb[0].mxu0 %v16732_v14  ;;  %10297 = vmatmul.mubr.bf16.vlgmr.msra.gmra.mrb[0].mxu1 %v16732_v14 }
 0x285   :  { %9792 = vmatpush1.bf16.msra.mxu0 %v14840_v19  ;;  %10308 = vmatpush1.bf16.msra.mxu1 %v14842_v20  ;;  %v1274_v19 = vld [vmem:[#allocation5 + $0x21e8] sm:$0xff]  ;;  %v14888_v20 = vcombine.low %v1261_v4, %v1265_v5  ;;  %v1309_v5 = vld [vmem:[#allocation5 + $0x2300] sm:$0xff] }
 0x286   :  { %9793 = vmatprep.subr.bf16.mxu0 %v14849_v21  ;;  %10309 = vmatprep.subr.bf16.mxu1 %v14851_v22  ;;  %v14890_v21 = vcombine.low %v1262_v7, %v1266_v8  ;;  %v14897_v22 = vcombine.high %v1269_v16, %v1273_v17  ;;  %v14899_v23 = vcombine.high %v1270_v18, %v1274_v19  ;;  %v1313_v7 = vld [vmem:[#allocation5 + $0x2320] sm:$0xff]  ;;  %v1310_v8 = vld [vmem:[#allocation5 + $0x2308] sm:$0xff] }
 0x287   :  { %9823 = vmatprep.mubr.bf16.mxu0 %v16734_v27  ;;  %10339 = vmatprep.mubr.bf16.mxu1 %v16734_v27 }
 0x289   :  { %9794 = vmatpush1.bf16.msra.mxu0 %v14848_v31  ;;  %10310 = vmatpush1.bf16.msra.mxu1 %v14850_v32  ;;  %v1282_v31 = vld [vmem:[#allocation5 + $0x2228] sm:$0xff]  ;;  %v14896_v32 = vcombine.low %v1269_v16, %v1273_v17  ;;  %v1317_v17 = vld [vmem:[#allocation5 + $0x2340] sm:$0xff] }
 0x28a   :  { %9795 = vmatprep.subr.bf16.mxu0 %v14857_v34  ;;  %10311 = vmatprep.subr.bf16.mxu1 %v14859_v35  ;;  %v14898_v34 = vcombine.low %v1270_v18, %v1274_v19  ;;  %v14905_v35 = vcombine.high %v1277_v24, %v1281_v28  ;;  %v14907_v36 = vcombine.high %v1278_v29, %v1282_v31  ;;  %v1321_v18 = vld [vmem:[#allocation5 + $0x2360] sm:$0xff]  ;;  %v1318_v19 = vld [vmem:[#allocation5 + $0x2348] sm:$0xff] }
 0x28d   :  { %9796 = vmatpush1.bf16.msra.mxu0 %v14856_v42  ;;  %10312 = vmatpush1.bf16.msra.mxu1 %v14858_v43  ;;  %v1290_v42 = vld [vmem:[#allocation5 + $0x2268] sm:$0xff]  ;;  %v14904_v43 = vcombine.low %v1277_v24, %v1281_v28  ;;  %v1325_v28 = vld [vmem:[#allocation5 + $0x2380] sm:$0xff] }
 0x28e   :  { %9797 = vmatprep.subr.bf16.mxu0 %v14865_v44  ;;  %10313 = vmatprep.subr.bf16.mxu1 %v14867_v47  ;;  %v14906_v44 = vcombine.low %v1278_v29, %v1282_v31  ;;  %v14913_v47 = vcombine.high %v1285_v39, %v1289_v40  ;;  %v14915_v48 = vcombine.high %v1286_v41, %v1290_v42  ;;  %v1329_v29 = vld [vmem:[#allocation5 + $0x23a0] sm:$0xff]  ;;  %v1326_v31 = vld [vmem:[#allocation5 + $0x2388] sm:$0xff] }
 0x291   :  { %9798 = vmatpush1.bf16.msra.mxu0 %v14864_v52  ;;  %10314 = vmatpush1.bf16.msra.mxu1 %v14866_v54  ;;  %v1298_v52 = vld [vmem:[#allocation5 + $0x22a8] sm:$0xff]  ;;  %v14912_v54 = vcombine.low %v1285_v39, %v1289_v40  ;;  %v1333_v40 = vld [vmem:[#allocation5 + $0x23c0] sm:$0xff] }
 0x292   :  { %9799 = vmatprep.subr.bf16.mxu0 %v14873_v55  ;;  %10315 = vmatprep.subr.bf16.mxu1 %v14875_v56  ;;  %v14914_v55 = vcombine.low %v1286_v41, %v1290_v42  ;;  %v14921_v56 = vcombine.high %v1293_v49, %v1297_v50  ;;  %v14923_v57 = vcombine.high %v1294_v51, %v1298_v52  ;;  %v1337_v41 = vld [vmem:[#allocation5 + $0x23e0] sm:$0xff]  ;;  %v1334_v42 = vld [vmem:[#allocation5 + $0x23c8] sm:$0xff] }
 0x295   :  { %9800 = vmatpush1.bf16.msra.mxu0 %v14872_v63  ;;  %10316 = vmatpush1.bf16.msra.mxu1 %v14874_v1  ;;  %v1306_v63 = vld [vmem:[#allocation5 + $0x22e8] sm:$0xff]  ;;  %v14920_v1 = vcombine.low %v1293_v49, %v1297_v50  ;;  %v1341_v50 = vld [vmem:[#allocation5 + $0x2400] sm:$0xff] }
 0x296   :  { %9801 = vmatprep.subr.bf16.mxu0 %v14881_v2  ;;  %10317 = vmatprep.subr.bf16.mxu1 %v14883_v3  ;;  %v14922_v2 = vcombine.low %v1294_v51, %v1298_v52  ;;  %v14929_v3 = vcombine.high %v1301_v60, %v1305_v61  ;;  %v14931_v4 = vcombine.high %v1302_v62, %v1306_v63  ;;  %v1345_v51 = vld [vmem:[#allocation5 + $0x2420] sm:$0xff]  ;;  %v1342_v52 = vld [vmem:[#allocation5 + $0x2408] sm:$0xff] }
 0x299   :  { %9802 = vmatpush1.bf16.msra.mxu0 %v14880_v9  ;;  %10318 = vmatpush1.bf16.msra.mxu1 %v14882_v11  ;;  %v1314_v9 = vld [vmem:[#allocation5 + $0x2328] sm:$0xff]  ;;  %v14928_v11 = vcombine.low %v1301_v60, %v1305_v61  ;;  %v14969_v61 = vcombine.high %v1341_v50, %v1345_v51 }
 0x29a   :  { %9803 = vmatprep.subr.bf16.mxu0 %v14889_v12  ;;  %10319 = vmatprep.subr.bf16.mxu1 %v14891_v13  ;;  %v14930_v12 = vcombine.low %v1302_v62, %v1306_v63  ;;  %v14937_v13 = vcombine.high %v1309_v5, %v1313_v7  ;;  %v14939_v16 = vcombine.high %v1310_v8, %v1314_v9  ;;  %v1349_v63 = vld [vmem:[#allocation5 + $0x2440] sm:$0xff] }
 0x29d   :  { %9804 = vmatpush1.bf16.msra.mxu0 %v14888_v20  ;;  %10320 = vmatpush1.bf16.msra.mxu1 %v14890_v21  ;;  %v1322_v20 = vld [vmem:[#allocation5 + $0x2368] sm:$0xff]  ;;  %v14936_v21 = vcombine.low %v1309_v5, %v1313_v7  ;;  %v136_v5 = vld [vmem:[#allocation2 + $0x98] sm:$0xff] }
 0x29e   :  { %9805 = vmatprep.subr.bf16.mxu0 %v14897_v22  ;;  %10321 = vmatprep.subr.bf16.mxu1 %v14899_v23  ;;  %v14938_v22 = vcombine.low %v1310_v8, %v1314_v9  ;;  %v14945_v23 = vcombine.high %v1317_v17, %v1321_v18  ;;  %v14947_v24 = vcombine.high %v1318_v19, %v1322_v20  ;;  %v160_v7 = vld [vmem:[#allocation2 + $0x158] sm:$0xff] }
 0x29f   :  { %v14968_v8 = vcombine.low %v1341_v50, %v1345_v51  ;;  %v1385_v50 = vld [vmem:[#allocation5 + $0x2560] sm:$0xff]  ;;  %v1382_v51 = vld [vmem:[#allocation5 + $0x2548] sm:$0xff] }
 0x2a1   :  { %9806 = vmatpush1.bf16.msra.mxu0 %v14896_v32  ;;  %10322 = vmatpush1.bf16.msra.mxu1 %v14898_v34  ;;  %v1330_v32 = vld [vmem:[#allocation5 + $0x23a8] sm:$0xff]  ;;  %v14944_v34 = vcombine.low %v1317_v17, %v1321_v18  ;;  %v16742_v17 = vpack.c.bf16 %v160_v7, %v136_v5  ;;  %v1397_v7 = vld [vmem:[#allocation5 + $0x25c0] sm:$0xff] }
 0x2a2   :  { %9807 = vmatprep.subr.bf16.mxu0 %v14905_v35  ;;  %10323 = vmatprep.subr.bf16.mxu1 %v14907_v36  ;;  %v14946_v35 = vcombine.low %v1318_v19, %v1322_v20  ;;  %v14953_v36 = vcombine.high %v1325_v28, %v1329_v29  ;;  %v14955_v39 = vcombine.high %v1326_v31, %v1330_v32  ;;  %v1358_v18 = vld [vmem:[#allocation5 + $0x2488] sm:$0xff] }
 0x2a3   :  { %v1362_v19 = vld [vmem:[#allocation5 + $0x24a8] sm:$0xff] }
 0x2a5   :  { %9808 = vmatpush1.bf16.msra.mxu0 %v14904_v43  ;;  %10324 = vmatpush1.bf16.msra.mxu1 %v14906_v44  ;;  %v1338_v43 = vld [vmem:[#allocation5 + $0x23e8] sm:$0xff]  ;;  %v14952_v44 = vcombine.low %v1325_v28, %v1329_v29  ;;  %v1369_v28 = vld [vmem:[#allocation5 + $0x24e0] sm:$0xff] }
 0x2a6   :  { %9809 = vmatprep.subr.bf16.mxu0 %v14913_v47  ;;  %10325 = vmatprep.subr.bf16.mxu1 %v14915_v48  ;;  %v14954_v47 = vcombine.low %v1326_v31, %v1330_v32  ;;  %v14961_v48 = vcombine.high %v1333_v40, %v1337_v41  ;;  %v14963_v49 = vcombine.high %v1334_v42, %v1338_v43  ;;  %v1366_v29 = vld [vmem:[#allocation5 + $0x24c8] sm:$0xff] }
 0x2a7   :  { %v14962_v60 = vcombine.low %v1334_v42, %v1338_v43  ;;  %v1370_v31 = vld [vmem:[#allocation5 + $0x24e8] sm:$0xff] }
 0x2a8   :  { %v1378_v42 = vld [vmem:[#allocation5 + $0x2528] sm:$0xff] }
 0x2a9   :  { %9810 = vmatpush1.bf16.msra.mxu0 %v14912_v54  ;;  %10326 = vmatpush1.bf16.msra.mxu1 %v14914_v55  ;;  %v1346_v54 = vld [vmem:[#allocation5 + $0x2428] sm:$0xff]  ;;  %v14960_v55 = vcombine.low %v1333_v40, %v1337_v41  ;;  %v1377_v40 = vld [vmem:[#allocation5 + $0x2520] sm:$0xff] }
 0x2aa   :  { %9811 = vmatprep.subr.bf16.mxu0 %v14921_v56  ;;  %10327 = vmatprep.subr.bf16.mxu1 %v14923_v57  ;;  %v133_v56 = vld [vmem:[#allocation2 + $0x80] sm:$0xff]  ;;  %v14971_v62 = vcombine.high %v1342_v52, %v1346_v54  ;;  %v14970_v9 = vcombine.low %v1342_v52, %v1346_v54  ;;  %v1374_v41 = vld [vmem:[#allocation5 + $0x2508] sm:$0xff] }
 0x2ab   :  { %v157_v57 = vld [vmem:[#allocation2 + $0x140] sm:$0xff]  ;;  %v1386_v52 = vld [vmem:[#allocation5 + $0x2568] sm:$0xff] }
 0x2ad   :  { %9812 = vmatpush1.bf16.msra.mxu0 %v14920_v1  ;;  %10328 = vmatpush1.bf16.msra.mxu1 %v14922_v2  ;;  %v1353_v1 = vld [vmem:[#allocation5 + $0x2460] sm:$0xff]  ;;  %v1350_v2 = vld [vmem:[#allocation5 + $0x2448] sm:$0xff] }
 0x2ae   :  { %9813 = vmatprep.subr.bf16.mxu0 %v14929_v3  ;;  %10329 = vmatprep.subr.bf16.mxu1 %v14931_v4  ;;  %v16740_v3 = vpack.c.bf16 %v157_v57, %v133_v56  ;;  %v1354_v4 = vld [vmem:[#allocation5 + $0x2468] sm:$0xff]  ;;  %v14976_v20 = vcombine.low %v1349_v63, %v1353_v1  ;;  %v15011_v57 = vcombine.high %v1382_v51, %v1386_v52 }
 0x2b1   :  { %9814 = vmatpush1.bf16.msra.mxu0 %v14928_v11  ;;  %10330 = vmatpush1.bf16.msra.mxu1 %v14930_v12  ;;  %v14977_v11 = vcombine.high %v1349_v63, %v1353_v1  ;;  %v14979_v12 = vcombine.high %v1350_v2, %v1354_v4  ;;  %v1394_v63 = vld [vmem:[#allocation5 + $0x25a8] sm:$0xff] }
 0x2b2   :  { %9815 = vmatprep.subr.bf16.mxu0 %v14937_v13  ;;  %10331 = vmatprep.subr.bf16.mxu1 %v14939_v16  ;;  %v1357_v13 = vld [vmem:[#allocation5 + $0x2480] sm:$0xff] }
 0x2b3   :  { %v1361_v16 = vld [vmem:[#allocation5 + $0x24a0] sm:$0xff] }
 0x2b4   :  { %v14984_v32 = vcombine.low %v1357_v13, %v1361_v16 }
 0x2b5   :  { %9816 = vmatpush1.bf16.msra.mxu0 %v14936_v21  ;;  %10332 = vmatpush1.bf16.msra.mxu1 %v14938_v22  ;;  %v14978_v21 = vcombine.low %v1350_v2, %v1354_v4  ;;  %v14985_v22 = vcombine.high %v1357_v13, %v1361_v16  ;;  %v15010_v2 = vcombine.low %v1382_v51, %v1386_v52  ;;  %v1429_v52 = vld [vmem:[#allocation5 + $0x26c0] sm:$0xff] }
 0x2b6   :  { %9817 = vmatprep.subr.bf16.mxu0 %v14945_v23  ;;  %10333 = vmatprep.subr.bf16.mxu1 %v14947_v24  ;;  %v14987_v23 = vcombine.high %v1358_v18, %v1362_v19  ;;  %v1365_v24 = vld [vmem:[#allocation5 + $0x24c0] sm:$0xff] }
 0x2b7   :  { %v14992_v43 = vcombine.low %v1365_v24, %v1369_v28 }
 0x2b9   :  { %9818 = vmatpush1.bf16.msra.mxu0 %v14944_v34  ;;  %10334 = vmatpush1.bf16.msra.mxu1 %v14946_v35  ;;  %v14986_v34 = vcombine.low %v1358_v18, %v1362_v19  ;;  %v14993_v35 = vcombine.high %v1365_v24, %v1369_v28  ;;  %v1405_v19 = vld [vmem:[#allocation5 + $0x2600] sm:$0xff] }
 0x2ba   :  { %9819 = vmatprep.subr.bf16.mxu0 %v14953_v36  ;;  %10335 = vmatprep.subr.bf16.mxu1 %v14955_v39  ;;  %v14995_v36 = vcombine.high %v1366_v29, %v1370_v31  ;;  %v1373_v39 = vld [vmem:[#allocation5 + $0x2500] sm:$0xff] }
 0x2bb   :  { %v15000_v54 = vcombine.low %v1373_v39, %v1377_v40 }
 0x2bd   :  { %9820 = vmatpush1.bf16.msra.mxu0 %v14952_v44  ;;  %10336 = vmatpush1.bf16.msra.mxu1 %v14954_v47  ;;  %v14994_v44 = vcombine.low %v1366_v29, %v1370_v31  ;;  %v15001_v47 = vcombine.high %v1373_v39, %v1377_v40  ;;  %v1413_v31 = vld [vmem:[#allocation5 + $0x2640] sm:$0xff] }
 0x2be   :  { %9821 = vmatprep.subr.bf16.mxu0 %v14961_v48  ;;  %10337 = vmatprep.subr.bf16.mxu1 %v14963_v49  ;;  %v15003_v48 = vcombine.high %v1374_v41, %v1378_v42  ;;  %v1381_v49 = vld [vmem:[#allocation5 + $0x2540] sm:$0xff] }
 0x2bf   :  { %v15009_v56 = vcombine.high %v1381_v49, %v1385_v50  ;;  %v15008_v1 = vcombine.low %v1381_v49, %v1385_v50 }
 0x2c1   :  { %9822 = vmatpush1.bf16.msra.mxu0 %v14960_v55  ;;  %10338 = vmatpush1.bf16.msra.mxu1 %v14962_v60  ;;  %v15002_v55 = vcombine.low %v1374_v41, %v1378_v42  ;;  %v1389_v60 = vld [vmem:[#allocation5 + $0x2580] sm:$0xff] }
 0x2c2   :  { %9834 = vmatprep.subr.bf16.mxu0 %v14969_v61  ;;  %10350 = vmatprep.subr.bf16.mxu1 %v14971_v62  ;;  %v1393_v61 = vld [vmem:[#allocation5 + $0x25a0] sm:$0xff]  ;;  %v1390_v62 = vld [vmem:[#allocation5 + $0x2588] sm:$0xff] }
 0x2c3   :  { %v15017_v4 = vcombine.high %v1389_v60, %v1393_v61  ;;  %v15019_v5 = vcombine.high %v1390_v62, %v1394_v63  ;;  %v15018_v13 = vcombine.low %v1390_v62, %v1394_v63  ;;  %v1421_v42 = vld [vmem:[#allocation5 + $0x2680] sm:$0xff] }
 0x2c4   :  { %9824 = vmatmul.mubr.bf16.vlgmr.msra.gmra.mrb[0].mxu0 %v16740_v3  ;;  %10340 = vmatmul.mubr.bf16.vlgmr.msra.gmra.mrb[0].mxu1 %v16740_v3  ;;  %v1437_v63 = vld [vmem:[#allocation5 + $0x2700] sm:$0xff] }
 0x2c5   :  { %9835 = vmatpush1.bf16.msra.mxu0 %v14968_v8  ;;  %10351 = vmatpush1.bf16.msra.mxu1 %v14970_v9  ;;  %v1401_v8 = vld [vmem:[#allocation5 + $0x25e0] sm:$0xff]  ;;  %v1398_v9 = vld [vmem:[#allocation5 + $0x25c8] sm:$0xff] }
 0x2c6   :  { %9836 = vmatprep.subr.bf16.mxu0 %v14977_v11  ;;  %10352 = vmatprep.subr.bf16.mxu1 %v14979_v12  ;;  %v1402_v11 = vld [vmem:[#allocation5 + $0x25e8] sm:$0xff]  ;;  %v15016_v12 = vcombine.low %v1389_v60, %v1393_v61  ;;  %v15025_v16 = vcombine.high %v1397_v7, %v1401_v8 }
 0x2c7   :  { %9866 = vmatprep.mubr.bf16.mxu0 %v16742_v17  ;;  %10382 = vmatprep.mubr.bf16.mxu1 %v16742_v17  ;;  %v15027_v18 = vcombine.high %v1398_v9, %v1402_v11  ;;  %v15026_v24 = vcombine.low %v1398_v9, %v1402_v11  ;;  %v1445_v11 = vld [vmem:[#allocation5 + $0x2740] sm:$0xff] }
 0x2c9   :  { %9837 = vmatpush1.bf16.msra.mxu0 %v14976_v20  ;;  %10353 = vmatpush1.bf16.msra.mxu1 %v14978_v21  ;;  %v1409_v20 = vld [vmem:[#allocation5 + $0x2620] sm:$0xff]  ;;  %v1406_v21 = vld [vmem:[#allocation5 + $0x2608] sm:$0xff] }
 0x2ca   :  { %9838 = vmatprep.subr.bf16.mxu0 %v14985_v22  ;;  %10354 = vmatprep.subr.bf16.mxu1 %v14987_v23  ;;  %v1410_v22 = vld [vmem:[#allocation5 + $0x2628] sm:$0xff]  ;;  %v15024_v23 = vcombine.low %v1397_v7, %v1401_v8  ;;  %v15033_v28 = vcombine.high %v1405_v19, %v1409_v20 }
 0x2cb   :  { %v15035_v29 = vcombine.high %v1406_v21, %v1410_v22  ;;  %v15034_v39 = vcombine.low %v1406_v21, %v1410_v22  ;;  %v1453_v22 = vld [vmem:[#allocation5 + $0x2780] sm:$0xff] }
 0x2cd   :  { %9839 = vmatpush1.bf16.msra.mxu0 %v14984_v32  ;;  %10355 = vmatpush1.bf16.msra.mxu1 %v14986_v34  ;;  %v1417_v32 = vld [vmem:[#allocation5 + $0x2660] sm:$0xff]  ;;  %v1414_v34 = vld [vmem:[#allocation5 + $0x2648] sm:$0xff] }
 0x2ce   :  { %9840 = vmatprep.subr.bf16.mxu0 %v14993_v35  ;;  %10356 = vmatprep.subr.bf16.mxu1 %v14995_v36  ;;  %v1418_v35 = vld [vmem:[#allocation5 + $0x2668] sm:$0xff]  ;;  %v15032_v36 = vcombine.low %v1405_v19, %v1409_v20  ;;  %v15041_v40 = vcombine.high %v1413_v31, %v1417_v32 }
 0x2cf   :  { %v15043_v41 = vcombine.high %v1414_v34, %v1418_v35  ;;  %v15042_v49 = vcombine.low %v1414_v34, %v1418_v35  ;;  %v1461_v35 = vld [vmem:[#allocation5 + $0x27c0] sm:$0xff] }
 0x2d1   :  { %9841 = vmatpush1.bf16.msra.mxu0 %v14992_v43  ;;  %10357 = vmatpush1.bf16.msra.mxu1 %v14994_v44  ;;  %v1425_v43 = vld [vmem:[#allocation5 + $0x26a0] sm:$0xff]  ;;  %v1422_v44 = vld [vmem:[#allocation5 + $0x2688] sm:$0xff] }
 0x2d2   :  { %9842 = vmatprep.subr.bf16.mxu0 %v15001_v47  ;;  %10358 = vmatprep.subr.bf16.mxu1 %v15003_v48  ;;  %v1426_v47 = vld [vmem:[#allocation5 + $0x26a8] sm:$0xff]  ;;  %v15040_v48 = vcombine.low %v1413_v31, %v1417_v32  ;;  %v15049_v50 = vcombine.high %v1421_v42, %v1425_v43 }
 0x2d3   :  { %v15051_v51 = vcombine.high %v1422_v44, %v1426_v47  ;;  %v15050_v60 = vcombine.low %v1422_v44, %v1426_v47  ;;  %v1469_v47 = vld [vmem:[#allocation5 + $0x2800] sm:$0xff] }
 0x2d5   :  { %9843 = vmatpush1.bf16.msra.mxu0 %v15000_v54  ;;  %10359 = vmatpush1.bf16.msra.mxu1 %v15002_v55  ;;  %v1433_v54 = vld [vmem:[#allocation5 + $0x26e0] sm:$0xff]  ;;  %v1430_v55 = vld [vmem:[#allocation5 + $0x26c8] sm:$0xff] }
 0x2d6   :  { %9844 = vmatprep.subr.bf16.mxu0 %v15009_v56  ;;  %10360 = vmatprep.subr.bf16.mxu1 %v15011_v57  ;;  %v1434_v56 = vld [vmem:[#allocation5 + $0x26e8] sm:$0xff]  ;;  %v15048_v57 = vcombine.low %v1421_v42, %v1425_v43  ;;  %v15057_v61 = vcombine.high %v1429_v52, %v1433_v54 }
 0x2d7   :  { %v15059_v62 = vcombine.high %v1430_v55, %v1434_v56  ;;  %v15058_v7 = vcombine.low %v1430_v55, %v1434_v56 }
 0x2d9   :  { %9845 = vmatpush1.bf16.msra.mxu0 %v15008_v1  ;;  %10361 = vmatpush1.bf16.msra.mxu1 %v15010_v2  ;;  %v1441_v1 = vld [vmem:[#allocation5 + $0x2720] sm:$0xff]  ;;  %v1438_v2 = vld [vmem:[#allocation5 + $0x2708] sm:$0xff] }
 0x2da   :  { %9846 = vmatprep.subr.bf16.mxu0 %v15017_v4  ;;  %10362 = vmatprep.subr.bf16.mxu1 %v15019_v5  ;;  %v1442_v4 = vld [vmem:[#allocation5 + $0x2728] sm:$0xff]  ;;  %v15056_v5 = vcombine.low %v1429_v52, %v1433_v54  ;;  %v15065_v8 = vcombine.high %v1437_v63, %v1441_v1  ;;  %v135_v52 = vld [vmem:[#allocation2 + $0x90] sm:$0xff] }
 0x2db   :  { %v15067_v9 = vcombine.high %v1438_v2, %v1442_v4  ;;  %v15066_v19 = vcombine.low %v1438_v2, %v1442_v4  ;;  %v159_v54 = vld [vmem:[#allocation2 + $0x150] sm:$0xff]  ;;  %v138_v2 = vld [vmem:[#allocation2 + $0xa8] sm:$0xff] }
 0x2dc   :  { %v162_v4 = vld [vmem:[#allocation2 + $0x168] sm:$0xff] }
 0x2dd   :  { %9847 = vmatpush1.bf16.msra.mxu0 %v15016_v12  ;;  %10363 = vmatpush1.bf16.msra.mxu1 %v15018_v13  ;;  %v1449_v12 = vld [vmem:[#allocation5 + $0x2760] sm:$0xff]  ;;  %v1446_v13 = vld [vmem:[#allocation5 + $0x2748] sm:$0xff] }
 0x2de   :  { %9848 = vmatprep.subr.bf16.mxu0 %v15025_v16  ;;  %10364 = vmatprep.subr.bf16.mxu1 %v15027_v18  ;;  %v1450_v16 = vld [vmem:[#allocation5 + $0x2768] sm:$0xff]  ;;  %v15064_v18 = vcombine.low %v1437_v63, %v1441_v1  ;;  %v15073_v20 = vcombine.high %v1445_v11, %v1449_v12  ;;  %v16748_v63 = vpack.c.bf16 %v159_v54, %v135_v52 }
 0x2df   :  { %v15075_v21 = vcombine.high %v1446_v13, %v1450_v16  ;;  %v15074_v31 = vcombine.low %v1446_v13, %v1450_v16  ;;  %v1482_v1 = vld [vmem:[#allocation5 + $0x2868] sm:$0xff]  ;;  %v16750_v13 = vpack.c.bf16 %v162_v4, %v138_v2 }
 0x2e0   :  { %v1486_v16 = vld [vmem:[#allocation5 + $0x2888] sm:$0xff] }
 0x2e1   :  { %9849 = vmatpush1.bf16.msra.mxu0 %v15024_v23  ;;  %10365 = vmatpush1.bf16.msra.mxu1 %v15026_v24  ;;  %v1457_v23 = vld [vmem:[#allocation5 + $0x27a0] sm:$0xff]  ;;  %v1454_v24 = vld [vmem:[#allocation5 + $0x2788] sm:$0xff] }
 0x2e2   :  { %9850 = vmatprep.subr.bf16.mxu0 %v15033_v28  ;;  %10366 = vmatprep.subr.bf16.mxu1 %v15035_v29  ;;  %v1458_v28 = vld [vmem:[#allocation5 + $0x27a8] sm:$0xff]  ;;  %v15072_v29 = vcombine.low %v1445_v11, %v1449_v12  ;;  %v15081_v32 = vcombine.high %v1453_v22, %v1457_v23  ;;  %v1485_v11 = vld [vmem:[#allocation5 + $0x2880] sm:$0xff] }
 0x2e3   :  { %v15083_v34 = vcombine.high %v1454_v24, %v1458_v28  ;;  %v15082_v42 = vcombine.low %v1454_v24, %v1458_v28  ;;  %v1489_v12 = vld [vmem:[#allocation5 + $0x28a0] sm:$0xff]  ;;  %v1494_v28 = vld [vmem:[#allocation5 + $0x28c8] sm:$0xff] }
 0x2e4   :  { %v1497_v24 = vld [vmem:[#allocation5 + $0x28e0] sm:$0xff] }
 0x2e5   :  { %9851 = vmatpush1.bf16.msra.mxu0 %v15032_v36  ;;  %10367 = vmatpush1.bf16.msra.mxu1 %v15034_v39  ;;  %v1465_v36 = vld [vmem:[#allocation5 + $0x27e0] sm:$0xff]  ;;  %v1462_v39 = vld [vmem:[#allocation5 + $0x27c8] sm:$0xff] }
 0x2e6   :  { %9852 = vmatprep.subr.bf16.mxu0 %v15041_v40  ;;  %10368 = vmatprep.subr.bf16.mxu1 %v15043_v41  ;;  %v1466_v40 = vld [vmem:[#allocation5 + $0x27e8] sm:$0xff]  ;;  %v15080_v41 = vcombine.low %v1453_v22, %v1457_v23  ;;  %v15089_v43 = vcombine.high %v1461_v35, %v1465_v36  ;;  %v1493_v23 = vld [vmem:[#allocation5 + $0x28c0] sm:$0xff] }
 0x2e7   :  { %v15091_v44 = vcombine.high %v1462_v39, %v1466_v40  ;;  %v15090_v55 = vcombine.low %v1462_v39, %v1466_v40  ;;  %v1505_v39 = vld [vmem:[#allocation5 + $0x2920] sm:$0xff]  ;;  %v1502_v40 = vld [vmem:[#allocation5 + $0x2908] sm:$0xff] }
 0x2e9   :  { %9853 = vmatpush1.bf16.msra.mxu0 %v15040_v48  ;;  %10369 = vmatpush1.bf16.msra.mxu1 %v15042_v49  ;;  %v1473_v48 = vld [vmem:[#allocation5 + $0x2820] sm:$0xff]  ;;  %v1470_v49 = vld [vmem:[#allocation5 + $0x2808] sm:$0xff] }
 0x2ea   :  { %9854 = vmatprep.subr.bf16.mxu0 %v15049_v50  ;;  %10370 = vmatprep.subr.bf16.mxu1 %v15051_v51  ;;  %v1474_v50 = vld [vmem:[#allocation5 + $0x2828] sm:$0xff]  ;;  %v15088_v51 = vcombine.low %v1461_v35, %v1465_v36  ;;  %v15097_v56 = vcombine.high %v1469_v47, %v1473_v48  ;;  %v1501_v36 = vld [vmem:[#allocation5 + $0x2900] sm:$0xff] }
 0x2eb   :  { %v15128_v52 = vcombine.low %v1501_v36, %v1505_v39 }
 0x2ed   :  { %9855 = vmatpush1.bf16.msra.mxu0 %v15048_v57  ;;  %10371 = vmatpush1.bf16.msra.mxu1 %v15050_v60  ;;  %v15099_v57 = vcombine.high %v1470_v49, %v1474_v50  ;;  %v1477_v60 = vld [vmem:[#allocation5 + $0x2840] sm:$0xff] }
 0x2ee   :  { %9856 = vmatprep.subr.bf16.mxu0 %v15057_v61  ;;  %10372 = vmatprep.subr.bf16.mxu1 %v15059_v62  ;;  %v1481_v61 = vld [vmem:[#allocation5 + $0x2860] sm:$0xff]  ;;  %v1478_v62 = vld [vmem:[#allocation5 + $0x2848] sm:$0xff] }
 0x2f1   :  { %9857 = vmatpush1.bf16.msra.mxu0 %v15056_v5  ;;  %10373 = vmatpush1.bf16.msra.mxu1 %v15058_v7  ;;  %v15096_v5 = vcombine.low %v1469_v47, %v1473_v48  ;;  %v15098_v7 = vcombine.low %v1470_v49, %v1474_v50  ;;  %v1509_v48 = vld [vmem:[#allocation5 + $0x2940] sm:$0xff]  ;;  %v1510_v50 = vld [vmem:[#allocation5 + $0x2948] sm:$0xff] }
 0x2f2   :  { %9858 = vmatprep.subr.bf16.mxu0 %v15065_v8  ;;  %10374 = vmatprep.subr.bf16.mxu1 %v15067_v9  ;;  %v15105_v8 = vcombine.high %v1477_v60, %v1481_v61  ;;  %v15107_v9 = vcombine.high %v1478_v62, %v1482_v1  ;;  %v1513_v49 = vld [vmem:[#allocation5 + $0x2960] sm:$0xff] }
 0x2f5   :  { %9859 = vmatpush1.bf16.msra.mxu0 %v15064_v18  ;;  %10375 = vmatpush1.bf16.msra.mxu1 %v15066_v19  ;;  %v1490_v18 = vld [vmem:[#allocation5 + $0x28a8] sm:$0xff]  ;;  %v15104_v19 = vcombine.low %v1477_v60, %v1481_v61  ;;  %v1521_v60 = vld [vmem:[#allocation5 + $0x29a0] sm:$0xff] }
 0x2f6   :  { %9860 = vmatprep.subr.bf16.mxu0 %v15073_v20  ;;  %10376 = vmatprep.subr.bf16.mxu1 %v15075_v21  ;;  %v15106_v20 = vcombine.low %v1478_v62, %v1482_v1  ;;  %v15113_v21 = vcombine.high %v1485_v11, %v1489_v12  ;;  %v15115_v22 = vcombine.high %v1486_v16, %v1490_v18  ;;  %v1518_v61 = vld [vmem:[#allocation5 + $0x2988] sm:$0xff] }
 0x2f7   :  { %v1522_v62 = vld [vmem:[#allocation5 + $0x29a8] sm:$0xff]  ;;  %v15136_v1 = vcombine.low %v1509_v48, %v1513_v49 }
 0x2f9   :  { %9861 = vmatpush1.bf16.msra.mxu0 %v15072_v29  ;;  %10377 = vmatpush1.bf16.msra.mxu1 %v15074_v31  ;;  %v1498_v29 = vld [vmem:[#allocation5 + $0x28e8] sm:$0xff]  ;;  %v15112_v31 = vcombine.low %v1485_v11, %v1489_v12 }
 0x2fa   :  { %9862 = vmatprep.subr.bf16.mxu0 %v15081_v32  ;;  %10378 = vmatprep.subr.bf16.mxu1 %v15083_v34  ;;  %v15114_v32 = vcombine.low %v1486_v16, %v1490_v18  ;;  %v15121_v34 = vcombine.high %v1493_v23, %v1497_v24  ;;  %v15123_v35 = vcombine.high %v1494_v28, %v1498_v29  ;;  %v1530_v11 = vld [vmem:[#allocation5 + $0x29e8] sm:$0xff] }
 0x2fb   :  { %v15146_v16 = vcombine.low %v1518_v61, %v1522_v62 }
 0x2fd   :  { %9863 = vmatpush1.bf16.msra.mxu0 %v15080_v41  ;;  %10379 = vmatpush1.bf16.msra.mxu1 %v15082_v42  ;;  %v1506_v41 = vld [vmem:[#allocation5 + $0x2928] sm:$0xff]  ;;  %v15120_v42 = vcombine.low %v1493_v23, %v1497_v24 }
 0x2fe   :  { %9864 = vmatprep.subr.bf16.mxu0 %v15089_v43  ;;  %10380 = vmatprep.subr.bf16.mxu1 %v15091_v44  ;;  %v15122_v43 = vcombine.low %v1494_v28, %v1498_v29  ;;  %v15129_v44 = vcombine.high %v1501_v36, %v1505_v39  ;;  %v15131_v47 = vcombine.high %v1502_v40, %v1506_v41  ;;  %v1538_v23 = vld [vmem:[#allocation5 + $0x2a28] sm:$0xff] }
 0x2ff   :  { %v15130_v54 = vcombine.low %v1502_v40, %v1506_v41  ;;  %v1546_v36 = vld [vmem:[#allocation5 + $0x2a68] sm:$0xff] }
 0x301   :  { %9865 = vmatpush1.bf16.msra.mxu0 %v15088_v51  ;;  %10381 = vmatpush1.bf16.msra.mxu1 %v15090_v55  ;;  %v1514_v51 = vld [vmem:[#allocation5 + $0x2968] sm:$0xff]  ;;  %v15137_v55 = vcombine.high %v1509_v48, %v1513_v49 }
 0x302   :  { %9877 = vmatprep.subr.bf16.mxu0 %v15097_v56  ;;  %10393 = vmatprep.subr.bf16.mxu1 %v15099_v57  ;;  %v15139_v56 = vcombine.high %v1510_v50, %v1514_v51  ;;  %v1517_v57 = vld [vmem:[#allocation5 + $0x2980] sm:$0xff]  ;;  %v15138_v2 = vcombine.low %v1510_v50, %v1514_v51  ;;  %v1554_v48 = vld [vmem:[#allocation5 + $0x2aa8] sm:$0xff] }
 0x303   :  { %v15145_v4 = vcombine.high %v1517_v57, %v1521_v60  ;;  %v15144_v12 = vcombine.low %v1517_v57, %v1521_v60  ;;  %v1562_v57 = vld [vmem:[#allocation5 + $0x2ae8] sm:$0xff] }
 0x304   :  { %9867 = vmatmul.mubr.bf16.vlgmr.msra.gmra.mrb[0].mxu0 %v16748_v63  ;;  %10383 = vmatmul.mubr.bf16.vlgmr.msra.gmra.mrb[0].mxu1 %v16748_v63 }
 0x305   :  { %9878 = vmatpush1.bf16.msra.mxu0 %v15096_v5  ;;  %10394 = vmatpush1.bf16.msra.mxu1 %v15098_v7  ;;  %v15147_v5 = vcombine.high %v1518_v61, %v1522_v62  ;;  %v1525_v7 = vld [vmem:[#allocation5 + $0x29c0] sm:$0xff] }
 0x306   :  { %9879 = vmatprep.subr.bf16.mxu0 %v15105_v8  ;;  %10395 = vmatprep.subr.bf16.mxu1 %v15107_v9  ;;  %v1529_v8 = vld [vmem:[#allocation5 + $0x29e0] sm:$0xff]  ;;  %v1526_v9 = vld [vmem:[#allocation5 + $0x29c8] sm:$0xff] }
 0x307   :  { %9909 = vmatprep.mubr.bf16.mxu0 %v16750_v13  ;;  %10425 = vmatprep.mubr.bf16.mxu1 %v16750_v13  ;;  %v15153_v18 = vcombine.high %v1525_v7, %v1529_v8  ;;  %v15152_v24 = vcombine.low %v1525_v7, %v1529_v8  ;;  %v15154_v28 = vcombine.low %v1526_v9, %v1530_v11  ;;  %v1570_v7 = vld [vmem:[#allocation5 + $0x2b28] sm:$0xff] }
 0x309   :  { %9880 = vmatpush1.bf16.msra.mxu0 %v15104_v19  ;;  %10396 = vmatpush1.bf16.msra.mxu1 %v15106_v20  ;;  %v15155_v19 = vcombine.high %v1526_v9, %v1530_v11  ;;  %v1533_v20 = vld [vmem:[#allocation5 + $0x2a00] sm:$0xff] }
 0x30a   :  { %9881 = vmatprep.subr.bf16.mxu0 %v15113_v21  ;;  %10397 = vmatprep.subr.bf16.mxu1 %v15115_v22  ;;  %v1537_v21 = vld [vmem:[#allocation5 + $0x2a20] sm:$0xff]  ;;  %v1534_v22 = vld [vmem:[#allocation5 + $0x2a08] sm:$0xff] }
 0x30b   :  { %v15161_v29 = vcombine.high %v1533_v20, %v1537_v21  ;;  %v15160_v39 = vcombine.low %v1533_v20, %v1537_v21  ;;  %v15162_v40 = vcombine.low %v1534_v22, %v1538_v23  ;;  %v1578_v20 = vld [vmem:[#allocation5 + $0x2b68] sm:$0xff] }
 0x30d   :  { %9882 = vmatpush1.bf16.msra.mxu0 %v15112_v31  ;;  %10398 = vmatpush1.bf16.msra.mxu1 %v15114_v32  ;;  %v15163_v31 = vcombine.high %v1534_v22, %v1538_v23  ;;  %v1541_v32 = vld [vmem:[#allocation5 + $0x2a40] sm:$0xff] }
 0x30e   :  { %9883 = vmatprep.subr.bf16.mxu0 %v15121_v34  ;;  %10399 = vmatprep.subr.bf16.mxu1 %v15123_v35  ;;  %v1545_v34 = vld [vmem:[#allocation5 + $0x2a60] sm:$0xff]  ;;  %v1542_v35 = vld [vmem:[#allocation5 + $0x2a48] sm:$0xff] }
 0x30f   :  { %v15169_v41 = vcombine.high %v1541_v32, %v1545_v34  ;;  %v15168_v49 = vcombine.low %v1541_v32, %v1545_v34  ;;  %v15170_v50 = vcombine.low %v1542_v35, %v1546_v36  ;;  %v1586_v32 = vld [vmem:[#allocation5 + $0x2ba8] sm:$0xff] }
 0x311   :  { %9884 = vmatpush1.bf16.msra.mxu0 %v15120_v42  ;;  %10400 = vmatpush1.bf16.msra.mxu1 %v15122_v43  ;;  %v15171_v42 = vcombine.high %v1542_v35, %v1546_v36  ;;  %v1549_v43 = vld [vmem:[#allocation5 + $0x2a80] sm:$0xff] }
 0x312   :  { %9885 = vmatprep.subr.bf16.mxu0 %v15129_v44  ;;  %10401 = vmatprep.subr.bf16.mxu1 %v15131_v47  ;;  %v1553_v44 = vld [vmem:[#allocation5 + $0x2aa0] sm:$0xff]  ;;  %v1550_v47 = vld [vmem:[#allocation5 + $0x2a88] sm:$0xff] }
 0x313   :  { %v15177_v51 = vcombine.high %v1549_v43, %v1553_v44  ;;  %v15176_v60 = vcombine.low %v1549_v43, %v1553_v44  ;;  %v15178_v61 = vcombine.low %v1550_v47, %v1554_v48  ;;  %v1594_v43 = vld [vmem:[#allocation5 + $0x2be8] sm:$0xff] }
 0x315   :  { %9886 = vmatpush1.bf16.msra.mxu0 %v15128_v52  ;;  %10402 = vmatpush1.bf16.msra.mxu1 %v15130_v54  ;;  %v15179_v52 = vcombine.high %v1550_v47, %v1554_v48  ;;  %v1557_v54 = vld [vmem:[#allocation5 + $0x2ac0] sm:$0xff] }
 0x316   :  { %9887 = vmatprep.subr.bf16.mxu0 %v15137_v55  ;;  %10403 = vmatprep.subr.bf16.mxu1 %v15139_v56  ;;  %v1561_v55 = vld [vmem:[#allocation5 + $0x2ae0] sm:$0xff]  ;;  %v1558_v56 = vld [vmem:[#allocation5 + $0x2ac8] sm:$0xff] }
 0x317   :  { %v15185_v62 = vcombine.high %v1557_v54, %v1561_v55  ;;  %v15184_v8 = vcombine.low %v1557_v54, %v1561_v55  ;;  %v15186_v9 = vcombine.low %v1558_v56, %v1562_v57  ;;  %v1602_v54 = vld [vmem:[#allocation5 + $0x2c28] sm:$0xff] }
 0x319   :  { %9888 = vmatpush1.bf16.msra.mxu0 %v15136_v1  ;;  %10404 = vmatpush1.bf16.msra.mxu1 %v15138_v2  ;;  %v15187_v1 = vcombine.high %v1558_v56, %v1562_v57  ;;  %v1565_v2 = vld [vmem:[#allocation5 + $0x2b00] sm:$0xff] }
 0x31a   :  { %9889 = vmatprep.subr.bf16.mxu0 %v15145_v4  ;;  %10405 = vmatprep.subr.bf16.mxu1 %v15147_v5  ;;  %v1569_v4 = vld [vmem:[#allocation5 + $0x2b20] sm:$0xff]  ;;  %v1566_v5 = vld [vmem:[#allocation5 + $0x2b08] sm:$0xff] }
 0x31b   :  { %v15193_v11 = vcombine.high %v1565_v2, %v1569_v4  ;;  %v15192_v21 = vcombine.low %v1565_v2, %v1569_v4  ;;  %v15194_v22 = vcombine.low %v1566_v5, %v1570_v7  ;;  %v137_v56 = vld [vmem:[#allocation2 + $0xa0] sm:$0xff]  ;;  %v1606_v4 = vld [vmem:[#allocation5 + $0x2c48] sm:$0xff] }
 0x31c   :  { %v161_v57 = vld [vmem:[#allocation2 + $0x160] sm:$0xff] }
 0x31d   :  { %9890 = vmatpush1.bf16.msra.mxu0 %v15144_v12  ;;  %10406 = vmatpush1.bf16.msra.mxu1 %v15146_v16  ;;  %v15195_v12 = vcombine.high %v1566_v5, %v1570_v7  ;;  %v1573_v16 = vld [vmem:[#allocation5 + $0x2b40] sm:$0xff]  ;;  %v16756_v5 = vpack.c.bf16 %v161_v57, %v137_v56  ;;  %v1610_v7 = vld [vmem:[#allocation5 + $0x2c68] sm:$0xff] }
 0x31e   :  { %9891 = vmatprep.subr.bf16.mxu0 %v15153_v18  ;;  %10407 = vmatprep.subr.bf16.mxu1 %v15155_v19  ;;  %v1577_v18 = vld [vmem:[#allocation5 + $0x2b60] sm:$0xff]  ;;  %v1574_v19 = vld [vmem:[#allocation5 + $0x2b48] sm:$0xff] }
 0x31f   :  { %v15201_v23 = vcombine.high %v1573_v16, %v1577_v18  ;;  %v15200_v34 = vcombine.low %v1573_v16, %v1577_v18  ;;  %v15202_v35 = vcombine.low %v1574_v19, %v1578_v20  ;;  %v1609_v2 = vld [vmem:[#allocation5 + $0x2c60] sm:$0xff]  ;;  %v15235_v18 = vcombine.high %v1606_v4, %v1610_v7  ;;  %v1638_v56 = vld [vmem:[#allocation5 + $0x2d48] sm:$0xff] }
 0x320   :  { %v1642_v57 = vld [vmem:[#allocation5 + $0x2d68] sm:$0xff] }
 0x321   :  { %9892 = vmatpush1.bf16.msra.mxu0 %v15152_v24  ;;  %10408 = vmatpush1.bf16.msra.mxu1 %v15154_v28  ;;  %v15203_v24 = vcombine.high %v1574_v19, %v1578_v20  ;;  %v1581_v28 = vld [vmem:[#allocation5 + $0x2b80] sm:$0xff] }
 0x322   :  { %9893 = vmatprep.subr.bf16.mxu0 %v15161_v29  ;;  %10409 = vmatprep.subr.bf16.mxu1 %v15163_v31  ;;  %v1585_v29 = vld [vmem:[#allocation5 + $0x2ba0] sm:$0xff]  ;;  %v1582_v31 = vld [vmem:[#allocation5 + $0x2b88] sm:$0xff] }
 0x323   :  { %v15209_v36 = vcombine.high %v1581_v28, %v1585_v29  ;;  %v15208_v44 = vcombine.low %v1581_v28, %v1585_v29  ;;  %v15210_v47 = vcombine.low %v1582_v31, %v1586_v32  ;;  %v1613_v19 = vld [vmem:[#allocation5 + $0x2c80] sm:$0xff]  ;;  %v15234_v28 = vcombine.low %v1606_v4, %v1610_v7  ;;  %v1646_v7 = vld [vmem:[#allocation5 + $0x2d88] sm:$0xff] }
 0x324   :  { %v1617_v20 = vld [vmem:[#allocation5 + $0x2ca0] sm:$0xff] }
 0x325   :  { %9894 = vmatpush1.bf16.msra.mxu0 %v15160_v39  ;;  %10410 = vmatpush1.bf16.msra.mxu1 %v15162_v40  ;;  %v15211_v39 = vcombine.high %v1582_v31, %v1586_v32  ;;  %v1589_v40 = vld [vmem:[#allocation5 + $0x2bc0] sm:$0xff]  ;;  %v15241_v29 = vcombine.high %v1613_v19, %v1617_v20 }
 0x326   :  { %9895 = vmatprep.subr.bf16.mxu0 %v15169_v41  ;;  %10411 = vmatprep.subr.bf16.mxu1 %v15171_v42  ;;  %v1593_v41 = vld [vmem:[#allocation5 + $0x2be0] sm:$0xff]  ;;  %v1590_v42 = vld [vmem:[#allocation5 + $0x2bc8] sm:$0xff] }
 0x327   :  { %v15217_v48 = vcombine.high %v1589_v40, %v1593_v41  ;;  %v15216_v55 = vcombine.low %v1589_v40, %v1593_v41  ;;  %v1621_v32 = vld [vmem:[#allocation5 + $0x2cc0] sm:$0xff] }
 0x328   :  { %v1649_v4 = vld [vmem:[#allocation5 + $0x2da0] sm:$0xff] }
 0x329   :  { %9896 = vmatpush1.bf16.msra.mxu0 %v15168_v49  ;;  %10412 = vmatpush1.bf16.msra.mxu1 %v15170_v50  ;;  %v15219_v49 = vcombine.high %v1590_v42, %v1594_v43  ;;  %v1597_v50 = vld [vmem:[#allocation5 + $0x2c00] sm:$0xff] }
 0x32a   :  { %9897 = vmatprep.subr.bf16.mxu0 %v15177_v51  ;;  %10413 = vmatprep.subr.bf16.mxu1 %v15179_v52  ;;  %v1601_v51 = vld [vmem:[#allocation5 + $0x2c20] sm:$0xff]  ;;  %v1598_v52 = vld [vmem:[#allocation5 + $0x2c08] sm:$0xff] }
 0x32d   :  { %9898 = vmatpush1.bf16.msra.mxu0 %v15176_v60  ;;  %10414 = vmatpush1.bf16.msra.mxu1 %v15178_v61  ;;  %v15218_v60 = vcombine.low %v1590_v42, %v1594_v43  ;;  %v15225_v61 = vcombine.high %v1597_v50, %v1601_v51  ;;  %v1629_v43 = vld [vmem:[#allocation5 + $0x2d00] sm:$0xff] }
 0x32e   :  { %9899 = vmatprep.subr.bf16.mxu0 %v15185_v62  ;;  %10415 = vmatprep.subr.bf16.mxu1 %v15187_v1  ;;  %v15227_v62 = vcombine.high %v1598_v52, %v1602_v54  ;;  %v1605_v1 = vld [vmem:[#allocation5 + $0x2c40] sm:$0xff] }
 0x32f   :  { %v15233_v16 = vcombine.high %v1605_v1, %v1609_v2 }
 0x331   :  { %9900 = vmatpush1.bf16.msra.mxu0 %v15184_v8  ;;  %10416 = vmatpush1.bf16.msra.mxu1 %v15186_v9  ;;  %v140_v8 = vld [vmem:[#allocation2 + $0xb8] sm:$0xff] }
 0x332   :  { %9901 = vmatprep.subr.bf16.mxu0 %v15193_v11  ;;  %10417 = vmatprep.subr.bf16.mxu1 %v15195_v12  ;;  %v164_v9 = vld [vmem:[#allocation2 + $0x178] sm:$0xff]  ;;  %v15224_v11 = vcombine.low %v1597_v50, %v1601_v51  ;;  %v15226_v12 = vcombine.low %v1598_v52, %v1602_v54  ;;  %v1637_v54 = vld [vmem:[#allocation5 + $0x2d40] sm:$0xff] }
 0x335   :  { %9902 = vmatpush1.bf16.msra.mxu0 %v15192_v21  ;;  %10418 = vmatpush1.bf16.msra.mxu1 %v15194_v22  ;;  %v16758_v21 = vpack.c.bf16 %v164_v9, %v140_v8  ;;  %v1614_v22 = vld [vmem:[#allocation5 + $0x2c88] sm:$0xff] }
 0x336   :  { %9903 = vmatprep.subr.bf16.mxu0 %v15201_v23  ;;  %10419 = vmatprep.subr.bf16.mxu1 %v15203_v24  ;;  %v1618_v23 = vld [vmem:[#allocation5 + $0x2ca8] sm:$0xff]  ;;  %v15232_v24 = vcombine.low %v1605_v1, %v1609_v2  ;;  %v15267_v1 = vcombine.high %v1638_v56, %v1642_v57  ;;  %v1645_v2 = vld [vmem:[#allocation5 + $0x2d80] sm:$0xff] }
 0x337   :  { %v15243_v31 = vcombine.high %v1614_v22, %v1618_v23  ;;  %v15242_v40 = vcombine.low %v1614_v22, %v1618_v23  ;;  %v1650_v8 = vld [vmem:[#allocation5 + $0x2da8] sm:$0xff]  ;;  %v15272_v23 = vcombine.low %v1645_v2, %v1649_v4 }
 0x338   :  { %v1658_v22 = vld [vmem:[#allocation5 + $0x2de8] sm:$0xff] }
 0x339   :  { %9904 = vmatpush1.bf16.msra.mxu0 %v15200_v34  ;;  %10420 = vmatpush1.bf16.msra.mxu1 %v15202_v35  ;;  %v1625_v34 = vld [vmem:[#allocation5 + $0x2ce0] sm:$0xff]  ;;  %v1622_v35 = vld [vmem:[#allocation5 + $0x2cc8] sm:$0xff] }
 0x33a   :  { %9905 = vmatprep.subr.bf16.mxu0 %v15209_v36  ;;  %10421 = vmatprep.subr.bf16.mxu1 %v15211_v39  ;;  %v1626_v36 = vld [vmem:[#allocation5 + $0x2ce8] sm:$0xff]  ;;  %v15240_v39 = vcombine.low %v1613_v19, %v1617_v20  ;;  %v15249_v41 = vcombine.high %v1621_v32, %v1625_v34  ;;  %v1657_v19 = vld [vmem:[#allocation5 + $0x2de0] sm:$0xff] }
 0x33b   :  { %v15251_v42 = vcombine.high %v1622_v35, %v1626_v36  ;;  %v15250_v50 = vcombine.low %v1622_v35, %v1626_v36  ;;  %v1654_v20 = vld [vmem:[#allocation5 + $0x2dc8] sm:$0xff] }
 0x33c   :  { %v1666_v35 = vld [vmem:[#allocation5 + $0x2e28] sm:$0xff] }
 0x33d   :  { %9906 = vmatpush1.bf16.msra.mxu0 %v15208_v44  ;;  %10422 = vmatpush1.bf16.msra.mxu1 %v15210_v47  ;;  %v1633_v44 = vld [vmem:[#allocation5 + $0x2d20] sm:$0xff]  ;;  %v1630_v47 = vld [vmem:[#allocation5 + $0x2d08] sm:$0xff] }
 0x33e   :  { %9907 = vmatprep.subr.bf16.mxu0 %v15217_v48  ;;  %10423 = vmatprep.subr.bf16.mxu1 %v15219_v49  ;;  %v1634_v48 = vld [vmem:[#allocation5 + $0x2d28] sm:$0xff]  ;;  %v15248_v49 = vcombine.low %v1621_v32, %v1625_v34  ;;  %v15257_v51 = vcombine.high %v1629_v43, %v1633_v44  ;;  %v1665_v32 = vld [vmem:[#allocation5 + $0x2e20] sm:$0xff] }
 0x33f   :  { %v15259_v52 = vcombine.high %v1630_v47, %v1634_v48  ;;  %v1662_v34 = vld [vmem:[#allocation5 + $0x2e08] sm:$0xff] }
 0x341   :  { %9908 = vmatpush1.bf16.msra.mxu0 %v15216_v55  ;;  %10424 = vmatpush1.bf16.msra.mxu1 %v15218_v60  ;;  %v1641_v55 = vld [vmem:[#allocation5 + $0x2d60] sm:$0xff]  ;;  %v15256_v60 = vcombine.low %v1629_v43, %v1633_v44  ;;  %v1670_v44 = vld [vmem:[#allocation5 + $0x2e48] sm:$0xff] }
 0x342   :  { %9920 = vmatprep.subr.bf16.mxu0 %v15225_v61  ;;  %10436 = vmatprep.subr.bf16.mxu1 %v15227_v62  ;;  %v15258_v61 = vcombine.low %v1630_v47, %v1634_v48  ;;  %v15265_v62 = vcombine.high %v1637_v54, %v1641_v55  ;;  %v15264_v9 = vcombine.low %v1637_v54, %v1641_v55  ;;  %v1673_v43 = vld [vmem:[#allocation5 + $0x2e60] sm:$0xff]  ;;  %v1674_v47 = vld [vmem:[#allocation5 + $0x2e68] sm:$0xff] }
 0x343   :  { %v1681_v54 = vld [vmem:[#allocation5 + $0x2ea0] sm:$0xff]  ;;  %v1678_v55 = vld [vmem:[#allocation5 + $0x2e88] sm:$0xff] }
 0x344   :  { %9910 = vmatmul.mubr.bf16.vlgmr.msra.gmra.mrb[0].mxu0 %v16756_v5  ;;  %10426 = vmatmul.mubr.bf16.vlgmr.msra.gmra.mrb[0].mxu1 %v16756_v5 }
 0x345   :  { %9921 = vmatpush1.bf16.msra.mxu0 %v15224_v11  ;;  %10437 = vmatpush1.bf16.msra.mxu1 %v15226_v12  ;;  %v15266_v11 = vcombine.low %v1638_v56, %v1642_v57  ;;  %v15273_v12 = vcombine.high %v1645_v2, %v1649_v4  ;;  %v1682_v56 = vld [vmem:[#allocation5 + $0x2ea8] sm:$0xff]  ;;  %v1689_v2 = vld [vmem:[#allocation5 + $0x2ee0] sm:$0xff] }
 0x346   :  { %9922 = vmatprep.subr.bf16.mxu0 %v15233_v16  ;;  %10438 = vmatprep.subr.bf16.mxu1 %v15235_v18  ;;  %v15275_v16 = vcombine.high %v1646_v7, %v1650_v8  ;;  %v1653_v18 = vld [vmem:[#allocation5 + $0x2dc0] sm:$0xff]  ;;  %v1686_v4 = vld [vmem:[#allocation5 + $0x2ec8] sm:$0xff] }
 0x347   :  { %9952 = vmatprep.mubr.bf16.mxu0 %v16758_v21  ;;  %10468 = vmatprep.mubr.bf16.mxu1 %v16758_v21  ;;  %v15280_v36 = vcombine.low %v1653_v18, %v1657_v19 }
 0x349   :  { %9923 = vmatpush1.bf16.msra.mxu0 %v15232_v24  ;;  %10439 = vmatpush1.bf16.msra.mxu1 %v15234_v28  ;;  %v15274_v24 = vcombine.low %v1646_v7, %v1650_v8  ;;  %v15281_v28 = vcombine.high %v1653_v18, %v1657_v19  ;;  %v1690_v7 = vld [vmem:[#allocation5 + $0x2ee8] sm:$0xff]  ;;  %v1697_v18 = vld [vmem:[#allocation5 + $0x2f20] sm:$0xff] }
 0x34a   :  { %9924 = vmatprep.subr.bf16.mxu0 %v15241_v29  ;;  %10440 = vmatprep.subr.bf16.mxu1 %v15243_v31  ;;  %v15283_v29 = vcombine.high %v1654_v20, %v1658_v22  ;;  %v1661_v31 = vld [vmem:[#allocation5 + $0x2e00] sm:$0xff]  ;;  %v1694_v19 = vld [vmem:[#allocation5 + $0x2f08] sm:$0xff] }
 0x34b   :  { %v15288_v48 = vcombine.low %v1661_v31, %v1665_v32 }
 0x34d   :  { %9925 = vmatpush1.bf16.msra.mxu0 %v15240_v39  ;;  %10441 = vmatpush1.bf16.msra.mxu1 %v15242_v40  ;;  %v15282_v39 = vcombine.low %v1654_v20, %v1658_v22  ;;  %v15289_v40 = vcombine.high %v1661_v31, %v1665_v32  ;;  %v1698_v20 = vld [vmem:[#allocation5 + $0x2f28] sm:$0xff]  ;;  %v1705_v31 = vld [vmem:[#allocation5 + $0x2f60] sm:$0xff] }
 0x34e   :  { %9926 = vmatprep.subr.bf16.mxu0 %v15249_v41  ;;  %10442 = vmatprep.subr.bf16.mxu1 %v15251_v42  ;;  %v15291_v41 = vcombine.high %v1662_v34, %v1666_v35  ;;  %v1669_v42 = vld [vmem:[#allocation5 + $0x2e40] sm:$0xff]  ;;  %v1702_v32 = vld [vmem:[#allocation5 + $0x2f48] sm:$0xff] }
 0x34f   :  { %v15296_v57 = vcombine.low %v1669_v42, %v1673_v43 }
 0x351   :  { %9927 = vmatpush1.bf16.msra.mxu0 %v15248_v49  ;;  %10443 = vmatpush1.bf16.msra.mxu1 %v15250_v50  ;;  %v15290_v49 = vcombine.low %v1662_v34, %v1666_v35  ;;  %v15297_v50 = vcombine.high %v1669_v42, %v1673_v43  ;;  %v1706_v34 = vld [vmem:[#allocation5 + $0x2f68] sm:$0xff]  ;;  %v1713_v42 = vld [vmem:[#allocation5 + $0x2fa0] sm:$0xff] }
 0x352   :  { %9928 = vmatprep.subr.bf16.mxu0 %v15257_v51  ;;  %10444 = vmatprep.subr.bf16.mxu1 %v15259_v52  ;;  %v15299_v51 = vcombine.high %v1670_v44, %v1674_v47  ;;  %v1677_v52 = vld [vmem:[#allocation5 + $0x2e80] sm:$0xff]  ;;  %v1710_v43 = vld [vmem:[#allocation5 + $0x2f88] sm:$0xff] }
 0x353   :  { %v15304_v8 = vcombine.low %v1677_v52, %v1681_v54 }
 0x355   :  { %9929 = vmatpush1.bf16.msra.mxu0 %v15256_v60  ;;  %10445 = vmatpush1.bf16.msra.mxu1 %v15258_v61  ;;  %v15298_v60 = vcombine.low %v1670_v44, %v1674_v47  ;;  %v15305_v61 = vcombine.high %v1677_v52, %v1681_v54  ;;  %v1714_v44 = vld [vmem:[#allocation5 + $0x2fa8] sm:$0xff]  ;;  %v1721_v52 = vld [vmem:[#allocation5 + $0x2fe0] sm:$0xff] }
 0x356   :  { %9930 = vmatprep.subr.bf16.mxu0 %v15265_v62  ;;  %10446 = vmatprep.subr.bf16.mxu1 %v15267_v1  ;;  %v15307_v62 = vcombine.high %v1678_v55, %v1682_v56  ;;  %v1685_v1 = vld [vmem:[#allocation5 + $0x2ec0] sm:$0xff]  ;;  %v1718_v54 = vld [vmem:[#allocation5 + $0x2fc8] sm:$0xff] }
 0x357   :  { %v15312_v22 = vcombine.low %v1685_v1, %v1689_v2 }
 0x359   :  { %9931 = vmatpush1.bf16.msra.mxu0 %v15264_v9  ;;  %10447 = vmatpush1.bf16.msra.mxu1 %v15266_v11  ;;  %v15306_v9 = vcombine.low %v1678_v55, %v1682_v56  ;;  %v15313_v11 = vcombine.high %v1685_v1, %v1689_v2  ;;  %v1722_v55 = vld [vmem:[#allocation5 + $0x2fe8] sm:$0xff]  ;;  %v195_v1 = vld [vmem:[#allocation5 + $0x30] sm:$0xff]  ;;  %v192_v2 = vld [vmem:[#allocation5 + $0x18] sm:$0xff] }
 0x35a   :  { %9932 = vmatprep.subr.bf16.mxu0 %v15273_v12  ;;  %10448 = vmatprep.subr.bf16.mxu1 %v15275_v16  ;;  %v15315_v12 = vcombine.high %v1686_v4, %v1690_v7  ;;  %v1693_v16 = vld [vmem:[#allocation5 + $0x2f00] sm:$0xff] }
 0x35b   :  { %v15320_v35 = vcombine.low %v1693_v16, %v1697_v18 }
 0x35d   :  { %9933 = vmatpush1.bf16.msra.mxu0 %v15272_v23  ;;  %10449 = vmatpush1.bf16.msra.mxu1 %v15274_v24  ;;  %v15314_v23 = vcombine.low %v1686_v4, %v1690_v7  ;;  %v15321_v24 = vcombine.high %v1693_v16, %v1697_v18  ;;  %v196_v4 = vld [vmem:[#allocation5 + $0x38] sm:$0xff]  ;;  %v199_v18 = vld [vmem:[#allocation5 + $0x50] sm:$0xff] }
 0x35e   :  { %9934 = vmatprep.subr.bf16.mxu0 %v15281_v28  ;;  %10450 = vmatprep.subr.bf16.mxu1 %v15283_v29  ;;  %v15323_v28 = vcombine.high %v1694_v19, %v1698_v20  ;;  %v1701_v29 = vld [vmem:[#allocation5 + $0x2f40] sm:$0xff]  ;;  %v13823_v16 = vcombine.high %v192_v2, %v196_v4 }
 0x35f   :  { %v15328_v47 = vcombine.low %v1701_v29, %v1705_v31 }
 0x361   :  { %9935 = vmatpush1.bf16.msra.mxu0 %v15280_v36  ;;  %10451 = vmatpush1.bf16.msra.mxu1 %v15282_v39  ;;  %v15322_v36 = vcombine.low %v1694_v19, %v1698_v20  ;;  %v15329_v39 = vcombine.high %v1701_v29, %v1705_v31  ;;  %v203_v19 = vld [vmem:[#allocation5 + $0x70] sm:$0xff] }
 0x362   :  { %9936 = vmatprep.subr.bf16.mxu0 %v15289_v40  ;;  %10452 = vmatprep.subr.bf16.mxu1 %v15291_v41  ;;  %v15331_v40 = vcombine.high %v1702_v32, %v1706_v34  ;;  %v1709_v41 = vld [vmem:[#allocation5 + $0x2f80] sm:$0xff]  ;;  %v13829_v29 = vcombine.high %v199_v18, %v203_v19 }
 0x363   :  { %v15336_v56 = vcombine.low %v1709_v41, %v1713_v42 }
 0x365   :  { %9937 = vmatpush1.bf16.msra.mxu0 %v15288_v48  ;;  %10453 = vmatpush1.bf16.msra.mxu1 %v15290_v49  ;;  %v15330_v48 = vcombine.low %v1702_v32, %v1706_v34  ;;  %v15337_v49 = vcombine.high %v1709_v41, %v1713_v42  ;;  %v207_v32 = vld [vmem:[#allocation5 + $0x90] sm:$0xff] }
 0x366   :  { %9938 = vmatprep.subr.bf16.mxu0 %v15297_v50  ;;  %10454 = vmatprep.subr.bf16.mxu1 %v15299_v51  ;;  %v15339_v50 = vcombine.high %v1710_v43, %v1714_v44  ;;  %v1717_v51 = vld [vmem:[#allocation5 + $0x2fc0] sm:$0xff]  ;;  %v211_v34 = vld [vmem:[#allocation5 + $0xb0] sm:$0xff] }
 0x367   :  { %v15344_v7 = vcombine.low %v1717_v51, %v1721_v52  ;;  %v13837_v41 = vcombine.high %v207_v32, %v211_v34 }
 0x369   :  { %9939 = vmatpush1.bf16.msra.mxu0 %v15296_v57  ;;  %10455 = vmatpush1.bf16.msra.mxu1 %v15298_v60  ;;  %v15338_v57 = vcombine.low %v1710_v43, %v1714_v44  ;;  %v15345_v60 = vcombine.high %v1717_v51, %v1721_v52  ;;  %v215_v43 = vld [vmem:[#allocation5 + $0xd0] sm:$0xff] }
 0x36a   :  { %9940 = vmatprep.subr.bf16.mxu0 %v15305_v61  ;;  %10456 = vmatprep.subr.bf16.mxu1 %v15307_v62  ;;  %v15347_v61 = vcombine.high %v1718_v54, %v1722_v55  ;;  %v191_v62 = vld [vmem:[#allocation5 + $0x10] sm:$0xff] }
 0x36b   :  { %v219_v44 = vld [vmem:[#allocation5 + $0xf0] sm:$0xff] }
 0x36c   :  { %v13845_v51 = vcombine.high %v215_v43, %v219_v44 }
 0x36d   :  { %9941 = vmatpush1.bf16.msra.mxu0 %v15304_v8  ;;  %10457 = vmatpush1.bf16.msra.mxu1 %v15306_v9  ;;  %v139_v8 = vld [vmem:[#allocation2 + $0xb0] sm:$0xff] }
 0x36e   :  { %9942 = vmatprep.subr.bf16.mxu0 %v15313_v11  ;;  %10458 = vmatprep.subr.bf16.mxu1 %v15315_v12  ;;  %v163_v9 = vld [vmem:[#allocation2 + $0x170] sm:$0xff]  ;;  %v15346_v11 = vcombine.low %v1718_v54, %v1722_v55  ;;  %v13821_v12 = vcombine.high %v191_v62, %v195_v1 }
 0x36f   :  { %v16764_v20 = vpack.c.bf16 %v163_v9, %v139_v8  ;;  %v223_v54 = vld [vmem:[#allocation5 + $0x110] sm:$0xff] }
 0x370   :  { %v227_v55 = vld [vmem:[#allocation5 + $0x130] sm:$0xff] }
 0x371   :  { %9943 = vmatpush1.bf16.msra.mxu0 %v15312_v22  ;;  %10459 = vmatpush1.bf16.msra.mxu1 %v15314_v23  ;;  %v200_v22 = vld [vmem:[#allocation5 + $0x58] sm:$0xff]  ;;  %v13852_v8 = vcombine.low %v223_v54, %v227_v55 }
 0x372   :  { %9944 = vmatprep.subr.bf16.mxu0 %v15321_v24  ;;  %10460 = vmatprep.subr.bf16.mxu1 %v15323_v28  ;;  %v204_v23 = vld [vmem:[#allocation5 + $0x78] sm:$0xff]  ;;  %v13820_v24 = vcombine.low %v191_v62, %v195_v1  ;;  %v13822_v28 = vcombine.low %v192_v2, %v196_v4  ;;  %v13853_v62 = vcombine.high %v223_v54, %v227_v55  ;;  %v231_v1 = vld [vmem:[#allocation5 + $0x150] sm:$0xff] }
 0x373   :  { %v13831_v31 = vcombine.high %v200_v22, %v204_v23  ;;  %v235_v2 = vld [vmem:[#allocation5 + $0x170] sm:$0xff]  ;;  %v232_v4 = vld [vmem:[#allocation5 + $0x158] sm:$0xff] }
 0x374   :  { %v267_v54 = vld [vmem:[#allocation5 + $0x270] sm:$0xff]  ;;  %v264_v55 = vld [vmem:[#allocation5 + $0x258] sm:$0xff] }
 0x375   :  { %9945 = vmatpush1.bf16.msra.mxu0 %v15320_v35  ;;  %10461 = vmatpush1.bf16.msra.mxu1 %v15322_v36  ;;  %v208_v35 = vld [vmem:[#allocation5 + $0x98] sm:$0xff] }
 0x376   :  { %9946 = vmatprep.subr.bf16.mxu0 %v15329_v39  ;;  %10462 = vmatprep.subr.bf16.mxu1 %v15331_v40  ;;  %v212_v36 = vld [vmem:[#allocation5 + $0xb8] sm:$0xff]  ;;  %v13828_v39 = vcombine.low %v199_v18, %v203_v19  ;;  %v13830_v40 = vcombine.low %v200_v22, %v204_v23  ;;  %v243_v18 = vld [vmem:[#allocation5 + $0x1b0] sm:$0xff]  ;;  %v13860_v23 = vcombine.low %v231_v1, %v235_v2 }
 0x377   :  { %v13839_v42 = vcombine.high %v208_v35, %v212_v36  ;;  %v240_v19 = vld [vmem:[#allocation5 + $0x198] sm:$0xff] }
 0x378   :  { %v244_v22 = vld [vmem:[#allocation5 + $0x1b8] sm:$0xff] }
 0x379   :  { %9947 = vmatpush1.bf16.msra.mxu0 %v15328_v47  ;;  %10463 = vmatpush1.bf16.msra.mxu1 %v15330_v48  ;;  %v216_v47 = vld [vmem:[#allocation5 + $0xd8] sm:$0xff] }
 0x37a   :  { %9948 = vmatprep.subr.bf16.mxu0 %v15337_v49  ;;  %10464 = vmatprep.subr.bf16.mxu1 %v15339_v50  ;;  %v220_v48 = vld [vmem:[#allocation5 + $0xf8] sm:$0xff]  ;;  %v13836_v49 = vcombine.low %v207_v32, %v211_v34  ;;  %v13838_v50 = vcombine.low %v208_v35, %v212_v36  ;;  %v251_v32 = vld [vmem:[#allocation5 + $0x1f0] sm:$0xff] }
 0x37b   :  { %v13847_v52 = vcombine.high %v216_v47, %v220_v48  ;;  %v248_v34 = vld [vmem:[#allocation5 + $0x1d8] sm:$0xff] }
 0x37c   :  { %v252_v35 = vld [vmem:[#allocation5 + $0x1f8] sm:$0xff] }
 0x37d   :  { %9949 = vmatpush1.bf16.msra.mxu0 %v15336_v56  ;;  %10465 = vmatpush1.bf16.msra.mxu1 %v15338_v57  ;;  %v224_v56 = vld [vmem:[#allocation5 + $0x118] sm:$0xff] }
 0x37e   :  { %9950 = vmatprep.subr.bf16.mxu0 %v15345_v60  ;;  %10466 = vmatprep.subr.bf16.mxu1 %v15347_v61  ;;  %v228_v57 = vld [vmem:[#allocation5 + $0x138] sm:$0xff]  ;;  %v13844_v60 = vcombine.low %v215_v43, %v219_v44  ;;  %v13846_v61 = vcombine.low %v216_v47, %v220_v48  ;;  %v259_v43 = vld [vmem:[#allocation5 + $0x230] sm:$0xff] }
 0x37f   :  { %v13854_v9 = vcombine.low %v224_v56, %v228_v57  ;;  %v256_v44 = vld [vmem:[#allocation5 + $0x218] sm:$0xff] }
 0x380   :  { %v260_v47 = vld [vmem:[#allocation5 + $0x238] sm:$0xff] }
 0x381   :  { %9951 = vmatpush1.bf16.msra.mxu0 %v15344_v7  ;;  %10467 = vmatpush1.bf16.msra.mxu1 %v15346_v11  ;;  %v236_v7 = vld [vmem:[#allocation5 + $0x178] sm:$0xff]  ;;  %v13861_v11 = vcombine.high %v231_v1, %v235_v2  ;;  %v275_v1 = vld [vmem:[#allocation5 + $0x2b0] sm:$0xff] }
 0x382   :  { %10479 = vmatprep.subr.bf16.mxu0 %v13821_v12  ;;  %10995 = vmatprep.subr.bf16.mxu1 %v13823_v16  ;;  %v13863_v12 = vcombine.high %v232_v4, %v236_v7  ;;  %v239_v16 = vld [vmem:[#allocation5 + $0x190] sm:$0xff]  ;;  %v272_v2 = vld [vmem:[#allocation5 + $0x298] sm:$0xff] }
 0x383   :  { %v13868_v36 = vcombine.low %v239_v16, %v243_v18 }
 0x384   :  { %9953 = vmatmul.mubr.bf16.vlgmr.msra.gmra.mrb[0].mxu0 %v16764_v20  ;;  %10469 = vmatmul.mubr.bf16.vlgmr.msra.gmra.mrb[0].mxu1 %v16764_v20 }
 0x385   :  { %10480 = vmatpush1.bf16.msra.mxu0 %v13820_v24  ;;  %10996 = vmatpush1.bf16.msra.mxu1 %v13822_v28  ;;  %v13862_v24 = vcombine.low %v232_v4, %v236_v7  ;;  %v13869_v28 = vcombine.high %v239_v16, %v243_v18  ;;  %v276_v4 = vld [vmem:[#allocation5 + $0x2b8] sm:$0xff]  ;;  %v283_v16 = vld [vmem:[#allocation5 + $0x2f0] sm:$0xff] }
 0x386   :  { %10481 = vmatprep.subr.bf16.mxu0 %v13829_v29  ;;  %10997 = vmatprep.subr.bf16.mxu1 %v13831_v31  ;;  %v13871_v29 = vcombine.high %v240_v19, %v244_v22  ;;  %v247_v31 = vld [vmem:[#allocation5 + $0x1d0] sm:$0xff]  ;;  %v280_v18 = vld [vmem:[#allocation5 + $0x2d8] sm:$0xff] }
 0x387   :  { %10511 = vmatprep.mubr.bf16.mxu0 %v16672_v58  ;;  %11027 = vmatprep.mubr.bf16.mxu1 %v16672_v58  ;;  %v13855_v58 = vcombine.high %v224_v56, %v228_v57  ;;  %v13876_v48 = vcombine.low %v247_v31, %v251_v32  ;;  %v268_v56 = vld [vmem:[#allocation5 + $0x278] sm:$0xff] }
 0x389   :  { %10482 = vmatpush1.bf16.msra.mxu0 %v13828_v39  ;;  %10998 = vmatpush1.bf16.msra.mxu1 %v13830_v40  ;;  %v13870_v39 = vcombine.low %v240_v19, %v244_v22  ;;  %v13877_v40 = vcombine.high %v247_v31, %v251_v32  ;;  %v284_v19 = vld [vmem:[#allocation5 + $0x2f8] sm:$0xff]  ;;  %v291_v31 = vld [vmem:[#allocation5 + $0x330] sm:$0xff] }
 0x38a   :  { %10483 = vmatprep.subr.bf16.mxu0 %v13837_v41  ;;  %10999 = vmatprep.subr.bf16.mxu1 %v13839_v42  ;;  %v13879_v41 = vcombine.high %v248_v34, %v252_v35  ;;  %v255_v42 = vld [vmem:[#allocation5 + $0x210] sm:$0xff]  ;;  %v288_v32 = vld [vmem:[#allocation5 + $0x318] sm:$0xff] }
 0x38b   :  { %v13884_v57 = vcombine.low %v255_v42, %v259_v43 }
 0x38d   :  { %10484 = vmatpush1.bf16.msra.mxu0 %v13836_v49  ;;  %11000 = vmatpush1.bf16.msra.mxu1 %v13838_v50  ;;  %v13878_v49 = vcombine.low %v248_v34, %v252_v35  ;;  %v13885_v50 = vcombine.high %v255_v42, %v259_v43  ;;  %v292_v34 = vld [vmem:[#allocation5 + $0x338] sm:$0xff]  ;;  %v299_v42 = vld [vmem:[#allocation5 + $0x370] sm:$0xff] }
 0x38e   :  { %10485 = vmatprep.subr.bf16.mxu0 %v13845_v51  ;;  %11001 = vmatprep.subr.bf16.mxu1 %v13847_v52  ;;  %v13887_v51 = vcombine.high %v256_v44, %v260_v47  ;;  %v263_v52 = vld [vmem:[#allocation5 + $0x250] sm:$0xff]  ;;  %v296_v43 = vld [vmem:[#allocation5 + $0x358] sm:$0xff] }
 0x38f   :  { %v13892_v7 = vcombine.low %v263_v52, %v267_v54 }
 0x391   :  { %10486 = vmatpush1.bf16.msra.mxu0 %v13844_v60  ;;  %11002 = vmatpush1.bf16.msra.mxu1 %v13846_v61  ;;  %v13886_v60 = vcombine.low %v256_v44, %v260_v47  ;;  %v13893_v61 = vcombine.high %v263_v52, %v267_v54  ;;  %v300_v44 = vld [vmem:[#allocation5 + $0x378] sm:$0xff]  ;;  %v307_v52 = vld [vmem:[#allocation5 + $0x3b0] sm:$0xff] }
 0x392   :  { %10487 = vmatprep.subr.bf16.mxu0 %v13853_v62  ;;  %11003 = vmatprep.subr.bf16.mxu1 %v13855_v58  ;;  %v13895_v62 = vcombine.high %v264_v55, %v268_v56  ;;  %v271_v58 = vld [vmem:[#allocation5 + $0x290] sm:$0xff]  ;;  %v304_v54 = vld [vmem:[#allocation5 + $0x398] sm:$0xff] }
 0x393   :  { %v13900_v22 = vcombine.low %v271_v58, %v275_v1 }
 0x395   :  { %10488 = vmatpush1.bf16.msra.mxu0 %v13852_v8  ;;  %11004 = vmatpush1.bf16.msra.mxu1 %v13854_v9  ;;  %v13894_v8 = vcombine.low %v264_v55, %v268_v56  ;;  %v13901_v9 = vcombine.high %v271_v58, %v275_v1  ;;  %v308_v55 = vld [vmem:[#allocation5 + $0x3b8] sm:$0xff]  ;;  %v315_v58 = vld [vmem:[#allocation5 + $0x3f0] sm:$0xff] }
 0x396   :  { %10489 = vmatprep.subr.bf16.mxu0 %v13861_v11  ;;  %11005 = vmatprep.subr.bf16.mxu1 %v13863_v12  ;;  %v13903_v11 = vcombine.high %v272_v2, %v276_v4  ;;  %v279_v12 = vld [vmem:[#allocation5 + $0x2d0] sm:$0xff]  ;;  %v312_v1 = vld [vmem:[#allocation5 + $0x3d8] sm:$0xff] }
 0x397   :  { %v13908_v35 = vcombine.low %v279_v12, %v283_v16 }
 0x399   :  { %10490 = vmatpush1.bf16.msra.mxu0 %v13860_v23  ;;  %11006 = vmatpush1.bf16.msra.mxu1 %v13862_v24  ;;  %v13902_v23 = vcombine.low %v272_v2, %v276_v4  ;;  %v13909_v24 = vcombine.high %v279_v12, %v283_v16  ;;  %v316_v2 = vld [vmem:[#allocation5 + $0x3f8] sm:$0xff]  ;;  %v323_v12 = vld [vmem:[#allocation5 + $0x430] sm:$0xff] }
 0x39a   :  { %10491 = vmatprep.subr.bf16.mxu0 %v13869_v28  ;;  %11007 = vmatprep.subr.bf16.mxu1 %v13871_v29  ;;  %v13911_v28 = vcombine.high %v280_v18, %v284_v19  ;;  %v287_v29 = vld [vmem:[#allocation5 + $0x310] sm:$0xff]  ;;  %v320_v16 = vld [vmem:[#allocation5 + $0x418] sm:$0xff] }
 0x39b   :  { %v13916_v47 = vcombine.low %v287_v29, %v291_v31 }
 0x39d   :  { %10492 = vmatpush1.bf16.msra.mxu0 %v13868_v36  ;;  %11008 = vmatpush1.bf16.msra.mxu1 %v13870_v39  ;;  %v13910_v36 = vcombine.low %v280_v18, %v284_v19  ;;  %v13917_v39 = vcombine.high %v287_v29, %v291_v31  ;;  %v324_v18 = vld [vmem:[#allocation5 + $0x438] sm:$0xff]  ;;  %v331_v29 = vld [vmem:[#allocation5 + $0x470] sm:$0xff] }
 0x39e   :  { %10493 = vmatprep.subr.bf16.mxu0 %v13877_v40  ;;  %11009 = vmatprep.subr.bf16.mxu1 %v13879_v41  ;;  %v13919_v40 = vcombine.high %v288_v32, %v292_v34  ;;  %v295_v41 = vld [vmem:[#allocation5 + $0x350] sm:$0xff]  ;;  %v328_v31 = vld [vmem:[#allocation5 + $0x458] sm:$0xff] }
 0x39f   :  { %v13924_v56 = vcombine.low %v295_v41, %v299_v42 }
 0x3a1   :  { %10494 = vmatpush1.bf16.msra.mxu0 %v13876_v48  ;;  %11010 = vmatpush1.bf16.msra.mxu1 %v13878_v49  ;;  %v13918_v48 = vcombine.low %v288_v32, %v292_v34  ;;  %v13925_v49 = vcombine.high %v295_v41, %v299_v42  ;;  %v332_v32 = vld [vmem:[#allocation5 + $0x478] sm:$0xff]  ;;  %v339_v41 = vld [vmem:[#allocation5 + $0x4b0] sm:$0xff] }
 0x3a2   :  { %10495 = vmatprep.subr.bf16.mxu0 %v13885_v50  ;;  %11011 = vmatprep.subr.bf16.mxu1 %v13887_v51  ;;  %v13927_v50 = vcombine.high %v296_v43, %v300_v44  ;;  %v303_v51 = vld [vmem:[#allocation5 + $0x390] sm:$0xff]  ;;  %v336_v42 = vld [vmem:[#allocation5 + $0x498] sm:$0xff] }
 0x3a3   :  { %v13932_v4 = vcombine.low %v303_v51, %v307_v52 }
 0x3a5   :  { %10496 = vmatpush1.bf16.msra.mxu0 %v13884_v57  ;;  %11012 = vmatpush1.bf16.msra.mxu1 %v13886_v60  ;;  %v13926_v57 = vcombine.low %v296_v43, %v300_v44  ;;  %v13933_v60 = vcombine.high %v303_v51, %v307_v52  ;;  %v340_v43 = vld [vmem:[#allocation5 + $0x4b8] sm:$0xff]  ;;  %v347_v51 = vld [vmem:[#allocation5 + $0x4f0] sm:$0xff] }
 0x3a6   :  { %10497 = vmatprep.subr.bf16.mxu0 %v13893_v61  ;;  %11013 = vmatprep.subr.bf16.mxu1 %v13895_v62  ;;  %v13935_v61 = vcombine.high %v304_v54, %v308_v55  ;;  %v311_v62 = vld [vmem:[#allocation5 + $0x3d0] sm:$0xff]  ;;  %v344_v52 = vld [vmem:[#allocation5 + $0x4d8] sm:$0xff] }
 0x3a7   :  { %v13940_v19 = vcombine.low %v311_v62, %v315_v58 }
 0x3a9   :  { %10498 = vmatpush1.bf16.msra.mxu0 %v13892_v7  ;;  %11014 = vmatpush1.bf16.msra.mxu1 %v13894_v8  ;;  %v13934_v7 = vcombine.low %v304_v54, %v308_v55  ;;  %v13941_v8 = vcombine.high %v311_v62, %v315_v58  ;;  %v348_v54 = vld [vmem:[#allocation5 + $0x4f8] sm:$0xff] }
 0x3aa   :  { %10499 = vmatprep.subr.bf16.mxu0 %v13901_v9  ;;  %11015 = vmatprep.subr.bf16.mxu1 %v13903_v11  ;;  %v13943_v9 = vcombine.high %v312_v1, %v316_v2  ;;  %v319_v11 = vld [vmem:[#allocation5 + $0x410] sm:$0xff]  ;;  %v352_v62 = vld [vmem:[#allocation5 + $0x518] sm:$0xff] }
 0x3ab   :  { %v13948_v34 = vcombine.low %v319_v11, %v323_v12  ;;  %v356_v58 = vld [vmem:[#allocation5 + $0x538] sm:$0xff] }
 0x3ad   :  { %10500 = vmatpush1.bf16.msra.mxu0 %v13900_v22  ;;  %11016 = vmatpush1.bf16.msra.mxu1 %v13902_v23  ;;  %v13942_v22 = vcombine.low %v312_v1, %v316_v2  ;;  %v13949_v23 = vcombine.high %v319_v11, %v323_v12  ;;  %v13974_v2 = vcombine.low %v344_v52, %v348_v54  ;;  %v364_v11 = vld [vmem:[#allocation5 + $0x578] sm:$0xff] }
 0x3ae   :  { %10501 = vmatprep.subr.bf16.mxu0 %v13909_v24  ;;  %11017 = vmatprep.subr.bf16.mxu1 %v13911_v28  ;;  %v13951_v24 = vcombine.high %v320_v16, %v324_v18  ;;  %v327_v28 = vld [vmem:[#allocation5 + $0x450] sm:$0xff] }
 0x3af   :  { %v13956_v44 = vcombine.low %v327_v28, %v331_v29 }
 0x3b1   :  { %10502 = vmatpush1.bf16.msra.mxu0 %v13908_v35  ;;  %11018 = vmatpush1.bf16.msra.mxu1 %v13910_v36  ;;  %v13950_v35 = vcombine.low %v320_v16, %v324_v18  ;;  %v13957_v36 = vcombine.high %v327_v28, %v331_v29  ;;  %v13982_v16 = vcombine.low %v352_v62, %v356_v58  ;;  %v372_v28 = vld [vmem:[#allocation5 + $0x5b8] sm:$0xff] }
 0x3b2   :  { %10503 = vmatprep.subr.bf16.mxu0 %v13917_v39  ;;  %11019 = vmatprep.subr.bf16.mxu1 %v13919_v40  ;;  %v13959_v39 = vcombine.high %v328_v31, %v332_v32  ;;  %v335_v40 = vld [vmem:[#allocation5 + $0x490] sm:$0xff] }
 0x3b3   :  { %v13964_v55 = vcombine.low %v335_v40, %v339_v41 }
 0x3b5   :  { %10504 = vmatpush1.bf16.msra.mxu0 %v13916_v47  ;;  %11020 = vmatpush1.bf16.msra.mxu1 %v13918_v48  ;;  %v13958_v47 = vcombine.low %v328_v31, %v332_v32  ;;  %v13965_v48 = vcombine.high %v335_v40, %v339_v41  ;;  %v380_v40 = vld [vmem:[#allocation5 + $0x5f8] sm:$0xff] }
 0x3b6   :  { %10505 = vmatprep.subr.bf16.mxu0 %v13925_v49  ;;  %11021 = vmatprep.subr.bf16.mxu1 %v13927_v50  ;;  %v13967_v49 = vcombine.high %v336_v42, %v340_v43  ;;  %v343_v50 = vld [vmem:[#allocation5 + $0x4d0] sm:$0xff] }
 0x3b7   :  { %v13972_v1 = vcombine.low %v343_v50, %v347_v51 }
 0x3b9   :  { %10506 = vmatpush1.bf16.msra.mxu0 %v13924_v56  ;;  %11022 = vmatpush1.bf16.msra.mxu1 %v13926_v57  ;;  %v13973_v56 = vcombine.high %v343_v50, %v347_v51  ;;  %v13975_v57 = vcombine.high %v344_v52, %v348_v54  ;;  %v388_v50 = vld [vmem:[#allocation5 + $0x638] sm:$0xff] }
 0x3ba   :  { %10507 = vmatprep.subr.bf16.mxu0 %v13933_v60  ;;  %11023 = vmatprep.subr.bf16.mxu1 %v13935_v61  ;;  %v351_v60 = vld [vmem:[#allocation5 + $0x510] sm:$0xff] }
 0x3bb   :  { %v355_v61 = vld [vmem:[#allocation5 + $0x530] sm:$0xff] }
 0x3bc   :  { %v13980_v12 = vcombine.low %v351_v60, %v355_v61 }
 0x3bd   :  { %10508 = vmatpush1.bf16.msra.mxu0 %v13932_v4  ;;  %11024 = vmatpush1.bf16.msra.mxu1 %v13934_v7  ;;  %v13981_v4 = vcombine.high %v351_v60, %v355_v61  ;;  %v359_v7 = vld [vmem:[#allocation5 + $0x550] sm:$0xff]  ;;  %v396_v60 = vld [vmem:[#allocation5 + $0x678] sm:$0xff] }
 0x3be   :  { %10509 = vmatprep.subr.bf16.mxu0 %v13941_v8  ;;  %11025 = vmatprep.subr.bf16.mxu1 %v13943_v9  ;;  %v363_v8 = vld [vmem:[#allocation5 + $0x570] sm:$0xff]  ;;  %v360_v9 = vld [vmem:[#allocation5 + $0x558] sm:$0xff] }
 0x3bf   :  { %v13989_v18 = vcombine.high %v359_v7, %v363_v8  ;;  %v13988_v29 = vcombine.low %v359_v7, %v363_v8  ;;  %v13990_v31 = vcombine.low %v360_v9, %v364_v11  ;;  %v404_v7 = vld [vmem:[#allocation5 + $0x6b8] sm:$0xff] }
 0x3c1   :  { %10510 = vmatpush1.bf16.msra.mxu0 %v13940_v19  ;;  %11026 = vmatpush1.bf16.msra.mxu1 %v13942_v22  ;;  %v13991_v19 = vcombine.high %v360_v9, %v364_v11  ;;  %v367_v22 = vld [vmem:[#allocation5 + $0x590] sm:$0xff] }
 0x3c2   :  { %10522 = vmatprep.subr.bf16.mxu0 %v13949_v23  ;;  %11038 = vmatprep.subr.bf16.mxu1 %v13951_v24  ;;  %v371_v23 = vld [vmem:[#allocation5 + $0x5b0] sm:$0xff]  ;;  %v368_v24 = vld [vmem:[#allocation5 + $0x598] sm:$0xff] }
 0x3c3   :  { %v13997_v32 = vcombine.high %v367_v22, %v371_v23  ;;  %v13996_v41 = vcombine.low %v367_v22, %v371_v23  ;;  %v412_v22 = vld [vmem:[#allocation5 + $0x6f8] sm:$0xff] }
 0x3c4   :  { %10512 = vmatmul.mubr.bf16.vlgmr.msra.gmra.mrb[4].mxu0 %v16676_v15  ;;  %11028 = vmatmul.mubr.bf16.vlgmr.msra.gmra.mrb[4].mxu1 %v16676_v15  ;;  %v13966_v15 = vcombine.low %v336_v42, %v340_v43  ;;  %v13998_v42 = vcombine.low %v368_v24, %v372_v28 }
 0x3c5   :  { %10523 = vmatpush1.bf16.msra.mxu0 %v13948_v34  ;;  %11039 = vmatpush1.bf16.msra.mxu1 %v13950_v35  ;;  %v13999_v34 = vcombine.high %v368_v24, %v372_v28  ;;  %v375_v35 = vld [vmem:[#allocation5 + $0x5d0] sm:$0xff] }
 0x3c6   :  { %10524 = vmatprep.subr.bf16.mxu0 %v13957_v36  ;;  %11040 = vmatprep.subr.bf16.mxu1 %v13959_v39  ;;  %v379_v36 = vld [vmem:[#allocation5 + $0x5f0] sm:$0xff]  ;;  %v376_v39 = vld [vmem:[#allocation5 + $0x5d8] sm:$0xff] }
 0x3c7   :  { %10554 = vmatprep.mubr.bf16.mxu0 %v16678_v25  ;;  %11070 = vmatprep.mubr.bf16.mxu1 %v16678_v25  ;;  %v13983_v25 = vcombine.high %v352_v62, %v356_v58  ;;  %v14005_v43 = vcombine.high %v375_v35, %v379_v36  ;;  %v14004_v51 = vcombine.low %v375_v35, %v379_v36  ;;  %v420_v35 = vld [vmem:[#allocation5 + $0x738] sm:$0xff] }
 0x3c8   :  { %v14006_v52 = vcombine.low %v376_v39, %v380_v40 }
 0x3c9   :  { %10525 = vmatpush1.bf16.msra.mxu0 %v13956_v44  ;;  %11041 = vmatpush1.bf16.msra.mxu1 %v13958_v47  ;;  %v14007_v44 = vcombine.high %v376_v39, %v380_v40  ;;  %v383_v47 = vld [vmem:[#allocation5 + $0x610] sm:$0xff] }
 0x3ca   :  { %10526 = vmatprep.subr.bf16.mxu0 %v13965_v48  ;;  %11042 = vmatprep.subr.bf16.mxu1 %v13967_v49  ;;  %v387_v48 = vld [vmem:[#allocation5 + $0x630] sm:$0xff]  ;;  %v384_v49 = vld [vmem:[#allocation5 + $0x618] sm:$0xff] }
 0x3cb   :  { %v14013_v54 = vcombine.high %v383_v47, %v387_v48  ;;  %v14012_v61 = vcombine.low %v383_v47, %v387_v48  ;;  %v14014_v62 = vcombine.low %v384_v49, %v388_v50  ;;  %v428_v47 = vld [vmem:[#allocation5 + $0x778] sm:$0xff] }
 0x3cd   :  { %10527 = vmatpush1.bf16.msra.mxu0 %v13964_v55  ;;  %11043 = vmatpush1.bf16.msra.mxu1 %v13966_v15  ;;  %v14015_v55 = vcombine.high %v384_v49, %v388_v50  ;;  %v391_v15 = vld [vmem:[#allocation5 + $0x650] sm:$0xff] }
 0x3ce   :  { %10528 = vmatprep.subr.bf16.mxu0 %v13973_v56  ;;  %11044 = vmatprep.subr.bf16.mxu1 %v13975_v57  ;;  %v395_v56 = vld [vmem:[#allocation5 + $0x670] sm:$0xff]  ;;  %v392_v57 = vld [vmem:[#allocation5 + $0x658] sm:$0xff] }
 0x3cf   :  { %v14021_v58 = vcombine.high %v391_v15, %v395_v56  ;;  %v14020_v8 = vcombine.low %v391_v15, %v395_v56  ;;  %v14022_v9 = vcombine.low %v392_v57, %v396_v60  ;;  %v436_v15 = vld [vmem:[#allocation5 + $0x7b8] sm:$0xff] }
 0x3d1   :  { %10529 = vmatpush1.bf16.msra.mxu0 %v13972_v1  ;;  %11045 = vmatpush1.bf16.msra.mxu1 %v13974_v2  ;;  %v14023_v1 = vcombine.high %v392_v57, %v396_v60  ;;  %v399_v2 = vld [vmem:[#allocation5 + $0x690] sm:$0xff] }
 0x3d2   :  { %10530 = vmatprep.subr.bf16.mxu0 %v13981_v4  ;;  %11046 = vmatprep.subr.bf16.mxu1 %v13983_v25  ;;  %v403_v4 = vld [vmem:[#allocation5 + $0x6b0] sm:$0xff]  ;;  %v400_v25 = vld [vmem:[#allocation5 + $0x698] sm:$0xff] }
 0x3d3   :  { %v14029_v11 = vcombine.high %v399_v2, %v403_v4  ;;  %v14028_v23 = vcombine.low %v399_v2, %v403_v4  ;;  %v14030_v24 = vcombine.low %v400_v25, %v404_v7  ;;  %v444_v2 = vld [vmem:[#allocation5 + $0x7f8] sm:$0xff] }
 0x3d5   :  { %10531 = vmatpush1.bf16.msra.mxu0 %v13980_v12  ;;  %11047 = vmatpush1.bf16.msra.mxu1 %v13982_v16  ;;  %v14031_v12 = vcombine.high %v400_v25, %v404_v7  ;;  %v407_v16 = vld [vmem:[#allocation5 + $0x6d0] sm:$0xff] }
 0x3d6   :  { %10532 = vmatprep.subr.bf16.mxu0 %v13989_v18  ;;  %11048 = vmatprep.subr.bf16.mxu1 %v13991_v19  ;;  %v411_v18 = vld [vmem:[#allocation5 + $0x6f0] sm:$0xff]  ;;  %v408_v19 = vld [vmem:[#allocation5 + $0x6d8] sm:$0xff] }
 0x3d7   :  { %v14037_v28 = vcombine.high %v407_v16, %v411_v18  ;;  %v14036_v36 = vcombine.low %v407_v16, %v411_v18  ;;  %v14038_v39 = vcombine.low %v408_v19, %v412_v22  ;;  %v452_v16 = vld [vmem:[#allocation5 + $0x838] sm:$0xff] }
 0x3d9   :  { %10533 = vmatpush1.bf16.msra.mxu0 %v13988_v29  ;;  %11049 = vmatpush1.bf16.msra.mxu1 %v13990_v31  ;;  %v14039_v29 = vcombine.high %v408_v19, %v412_v22  ;;  %v415_v31 = vld [vmem:[#allocation5 + $0x710] sm:$0xff] }
 0x3da   :  { %10534 = vmatprep.subr.bf16.mxu0 %v13997_v32  ;;  %11050 = vmatprep.subr.bf16.mxu1 %v13999_v34  ;;  %v419_v32 = vld [vmem:[#allocation5 + $0x730] sm:$0xff]  ;;  %v416_v34 = vld [vmem:[#allocation5 + $0x718] sm:$0xff] }
 0x3db   :  { %v14045_v40 = vcombine.high %v415_v31, %v419_v32  ;;  %v14044_v48 = vcombine.low %v415_v31, %v419_v32  ;;  %v14046_v49 = vcombine.low %v416_v34, %v420_v35  ;;  %v460_v31 = vld [vmem:[#allocation5 + $0x878] sm:$0xff] }
 0x3dd   :  { %10535 = vmatpush1.bf16.msra.mxu0 %v13996_v41  ;;  %11051 = vmatpush1.bf16.msra.mxu1 %v13998_v42  ;;  %v14047_v41 = vcombine.high %v416_v34, %v420_v35  ;;  %v423_v42 = vld [vmem:[#allocation5 + $0x750] sm:$0xff] }
 0x3de   :  { %10536 = vmatprep.subr.bf16.mxu0 %v14005_v43  ;;  %11052 = vmatprep.subr.bf16.mxu1 %v14007_v44  ;;  %v427_v43 = vld [vmem:[#allocation5 + $0x770] sm:$0xff]  ;;  %v424_v44 = vld [vmem:[#allocation5 + $0x758] sm:$0xff] }
 0x3df   :  { %v14053_v50 = vcombine.high %v423_v42, %v427_v43  ;;  %v14052_v56 = vcombine.low %v423_v42, %v427_v43  ;;  %v14054_v57 = vcombine.low %v424_v44, %v428_v47  ;;  %v468_v42 = vld [vmem:[#allocation5 + $0x8b8] sm:$0xff] }
 0x3e1   :  { %10537 = vmatpush1.bf16.msra.mxu0 %v14004_v51  ;;  %11053 = vmatpush1.bf16.msra.mxu1 %v14006_v52  ;;  %v14055_v51 = vcombine.high %v424_v44, %v428_v47  ;;  %v431_v52 = vld [vmem:[#allocation5 + $0x790] sm:$0xff] }
 0x3e2   :  { %10538 = vmatprep.subr.bf16.mxu0 %v14013_v54  ;;  %11054 = vmatprep.subr.bf16.mxu1 %v14015_v55  ;;  %v435_v54 = vld [vmem:[#allocation5 + $0x7b0] sm:$0xff]  ;;  %v432_v55 = vld [vmem:[#allocation5 + $0x798] sm:$0xff] }
 0x3e3   :  { %v14061_v60 = vcombine.high %v431_v52, %v435_v54  ;;  %v14060_v4 = vcombine.low %v431_v52, %v435_v54  ;;  %v14062_v25 = vcombine.low %v432_v55, %v436_v15  ;;  %v476_v52 = vld [vmem:[#allocation5 + $0x8f8] sm:$0xff] }
 0x3e5   :  { %10539 = vmatpush1.bf16.msra.mxu0 %v14012_v61  ;;  %11055 = vmatpush1.bf16.msra.mxu1 %v14014_v62  ;;  %v14063_v61 = vcombine.high %v432_v55, %v436_v15  ;;  %v439_v62 = vld [vmem:[#allocation5 + $0x7d0] sm:$0xff] }
 0x3e6   :  { %10540 = vmatprep.subr.bf16.mxu0 %v14021_v58  ;;  %11056 = vmatprep.subr.bf16.mxu1 %v14023_v1  ;;  %v443_v58 = vld [vmem:[#allocation5 + $0x7f0] sm:$0xff]  ;;  %v440_v1 = vld [vmem:[#allocation5 + $0x7d8] sm:$0xff] }
 0x3e7   :  { %v14069_v7 = vcombine.high %v439_v62, %v443_v58  ;;  %v14068_v18 = vcombine.low %v439_v62, %v443_v58  ;;  %v14070_v19 = vcombine.low %v440_v1, %v444_v2 }
 0x3e9   :  { %10541 = vmatpush1.bf16.msra.mxu0 %v14020_v8  ;;  %11057 = vmatpush1.bf16.msra.mxu1 %v14022_v9  ;;  %v14071_v8 = vcombine.high %v440_v1, %v444_v2  ;;  %v447_v9 = vld [vmem:[#allocation5 + $0x810] sm:$0xff] }
 0x3ea   :  { %10542 = vmatprep.subr.bf16.mxu0 %v14029_v11  ;;  %11058 = vmatprep.subr.bf16.mxu1 %v14031_v12  ;;  %v451_v11 = vld [vmem:[#allocation5 + $0x830] sm:$0xff]  ;;  %v448_v12 = vld [vmem:[#allocation5 + $0x818] sm:$0xff] }
 0x3eb   :  { %v14077_v22 = vcombine.high %v447_v9, %v451_v11  ;;  %v14076_v32 = vcombine.low %v447_v9, %v451_v11  ;;  %v14078_v34 = vcombine.low %v448_v12, %v452_v16  ;;  %v487_v2 = vld [vmem:[#allocation5 + $0x950] sm:$0xff] }
 0x3ed   :  { %10543 = vmatpush1.bf16.msra.mxu0 %v14028_v23  ;;  %11059 = vmatpush1.bf16.msra.mxu1 %v14030_v24  ;;  %v14079_v23 = vcombine.high %v448_v12, %v452_v16  ;;  %v455_v24 = vld [vmem:[#allocation5 + $0x850] sm:$0xff] }
 0x3ee   :  { %10544 = vmatprep.subr.bf16.mxu0 %v14037_v28  ;;  %11060 = vmatprep.subr.bf16.mxu1 %v14039_v29  ;;  %v459_v28 = vld [vmem:[#allocation5 + $0x870] sm:$0xff]  ;;  %v456_v29 = vld [vmem:[#allocation5 + $0x858] sm:$0xff] }
 0x3ef   :  { %v14085_v35 = vcombine.high %v455_v24, %v459_v28  ;;  %v14084_v43 = vcombine.low %v455_v24, %v459_v28  ;;  %v14086_v44 = vcombine.low %v456_v29, %v460_v31  ;;  %v495_v16 = vld [vmem:[#allocation5 + $0x990] sm:$0xff] }
 0x3f1   :  { %10545 = vmatpush1.bf16.msra.mxu0 %v14036_v36  ;;  %11061 = vmatpush1.bf16.msra.mxu1 %v14038_v39  ;;  %v14087_v36 = vcombine.high %v456_v29, %v460_v31  ;;  %v463_v39 = vld [vmem:[#allocation5 + $0x890] sm:$0xff] }
 0x3f2   :  { %10546 = vmatprep.subr.bf16.mxu0 %v14045_v40  ;;  %11062 = vmatprep.subr.bf16.mxu1 %v14047_v41  ;;  %v467_v40 = vld [vmem:[#allocation5 + $0x8b0] sm:$0xff]  ;;  %v464_v41 = vld [vmem:[#allocation5 + $0x898] sm:$0xff] }
 0x3f3   :  { %v14093_v47 = vcombine.high %v463_v39, %v467_v40  ;;  %v14092_v54 = vcombine.low %v463_v39, %v467_v40  ;;  %v503_v31 = vld [vmem:[#allocation5 + $0x9d0] sm:$0xff] }
 0x3f5   :  { %10547 = vmatpush1.bf16.msra.mxu0 %v14044_v48  ;;  %11063 = vmatpush1.bf16.msra.mxu1 %v14046_v49  ;;  %v14095_v48 = vcombine.high %v464_v41, %v468_v42  ;;  %v471_v49 = vld [vmem:[#allocation5 + $0x8d0] sm:$0xff] }
 0x3f6   :  { %10548 = vmatprep.subr.bf16.mxu0 %v14053_v50  ;;  %11064 = vmatprep.subr.bf16.mxu1 %v14055_v51  ;;  %v475_v50 = vld [vmem:[#allocation5 + $0x8f0] sm:$0xff]  ;;  %v472_v51 = vld [vmem:[#allocation5 + $0x8d8] sm:$0xff] }
 0x3f7   :  { %v14101_v55 = vcombine.high %v471_v49, %v475_v50  ;;  %v14103_v15 = vcombine.high %v472_v51, %v476_v52  ;;  %v14100_v62 = vcombine.low %v471_v49, %v475_v50  ;;  %v14102_v58 = vcombine.low %v472_v51, %v476_v52  ;;  %v519_v52 = vld [vmem:[#allocation5 + $0xa50] sm:$0xff] }
 0x3f9   :  { %10549 = vmatpush1.bf16.msra.mxu0 %v14052_v56  ;;  %11065 = vmatpush1.bf16.msra.mxu1 %v14054_v57  ;;  %v479_v56 = vld [vmem:[#allocation5 + $0x910] sm:$0xff] }
 0x3fa   :  { %10550 = vmatprep.subr.bf16.mxu0 %v14061_v60  ;;  %11066 = vmatprep.subr.bf16.mxu1 %v14063_v61  ;;  %v483_v57 = vld [vmem:[#allocation5 + $0x930] sm:$0xff]  ;;  %v480_v60 = vld [vmem:[#allocation5 + $0x918] sm:$0xff] }
 0x3fb   :  { %v484_v61 = vld [vmem:[#allocation5 + $0x938] sm:$0xff]  ;;  %v14109_v1 = vcombine.high %v479_v56, %v483_v57 }
 0x3fc   :  { %v14110_v9 = vcombine.low %v480_v60, %v484_v61 }
 0x3fd   :  { %10551 = vmatpush1.bf16.msra.mxu0 %v14060_v4  ;;  %11067 = vmatpush1.bf16.msra.mxu1 %v14062_v25  ;;  %v491_v4 = vld [vmem:[#allocation5 + $0x970] sm:$0xff]  ;;  %v488_v25 = vld [vmem:[#allocation5 + $0x958] sm:$0xff] }
 0x3fe   :  { %10552 = vmatprep.subr.bf16.mxu0 %v14069_v7  ;;  %11068 = vmatprep.subr.bf16.mxu1 %v14071_v8  ;;  %v492_v7 = vld [vmem:[#allocation5 + $0x978] sm:$0xff]  ;;  %v14108_v8 = vcombine.low %v479_v56, %v483_v57  ;;  %v14117_v11 = vcombine.high %v487_v2, %v491_v4 }
 0x3ff   :  { %v14119_v12 = vcombine.high %v488_v25, %v492_v7  ;;  %v14118_v24 = vcombine.low %v488_v25, %v492_v7  ;;  %v535_v7 = vld [vmem:[#allocation5 + $0xad0] sm:$0xff] }
 0x401   :  { %10553 = vmatpush1.bf16.msra.mxu0 %v14068_v18  ;;  %11069 = vmatpush1.bf16.msra.mxu1 %v14070_v19  ;;  %v499_v18 = vld [vmem:[#allocation5 + $0x9b0] sm:$0xff]  ;;  %v496_v19 = vld [vmem:[#allocation5 + $0x998] sm:$0xff] }
 0x402   :  { %10565 = vmatprep.subr.bf16.mxu0 %v14077_v22  ;;  %11081 = vmatprep.subr.bf16.mxu1 %v14079_v23  ;;  %v500_v22 = vld [vmem:[#allocation5 + $0x9b8] sm:$0xff]  ;;  %v14116_v23 = vcombine.low %v487_v2, %v491_v4  ;;  %v14125_v28 = vcombine.high %v495_v16, %v499_v18 }
 0x403   :  { %v14127_v29 = vcombine.high %v496_v19, %v500_v22  ;;  %v14126_v39 = vcombine.low %v496_v19, %v500_v22  ;;  %v543_v22 = vld [vmem:[#allocation5 + $0xb10] sm:$0xff] }
 0x404   :  { %10555 = vmatmul.mubr.bf16.vlgmr.msra.gmra.mrb[4].mxu0 %v16684_v30  ;;  %11071 = vmatmul.mubr.bf16.vlgmr.msra.gmra.mrb[4].mxu1 %v16684_v30  ;;  %v14094_v30 = vcombine.low %v464_v41, %v468_v42  ;;  %v511_v42 = vld [vmem:[#allocation5 + $0xa10] sm:$0xff] }
 0x405   :  { %10566 = vmatpush1.bf16.msra.mxu0 %v14076_v32  ;;  %11082 = vmatpush1.bf16.msra.mxu1 %v14078_v34  ;;  %v507_v32 = vld [vmem:[#allocation5 + $0x9f0] sm:$0xff]  ;;  %v504_v34 = vld [vmem:[#allocation5 + $0x9d8] sm:$0xff] }
 0x406   :  { %10567 = vmatprep.subr.bf16.mxu0 %v14085_v35  ;;  %11083 = vmatprep.subr.bf16.mxu1 %v14087_v36  ;;  %v508_v35 = vld [vmem:[#allocation5 + $0x9f8] sm:$0xff]  ;;  %v14124_v36 = vcombine.low %v495_v16, %v499_v18  ;;  %v14133_v40 = vcombine.high %v503_v31, %v507_v32 }
 0x407   :  { %10597 = vmatprep.mubr.bf16.mxu0 %v16686_v37  ;;  %11113 = vmatprep.mubr.bf16.mxu1 %v16686_v37  ;;  %v14111_v37 = vcombine.high %v480_v60, %v484_v61  ;;  %v14135_v41 = vcombine.high %v504_v34, %v508_v35  ;;  %v14134_v49 = vcombine.low %v504_v34, %v508_v35  ;;  %v527_v61 = vld [vmem:[#allocation5 + $0xa90] sm:$0xff] }
 0x408   :  { %v551_v35 = vld [vmem:[#allocation5 + $0xb50] sm:$0xff] }
 0x409   :  { %10568 = vmatpush1.bf16.msra.mxu0 %v14084_v43  ;;  %11084 = vmatpush1.bf16.msra.mxu1 %v14086_v44  ;;  %v515_v43 = vld [vmem:[#allocation5 + $0xa30] sm:$0xff]  ;;  %v512_v44 = vld [vmem:[#allocation5 + $0xa18] sm:$0xff] }
 0x40a   :  { %10569 = vmatprep.subr.bf16.mxu0 %v14093_v47  ;;  %11085 = vmatprep.subr.bf16.mxu1 %v14095_v48  ;;  %v516_v47 = vld [vmem:[#allocation5 + $0xa38] sm:$0xff]  ;;  %v14132_v48 = vcombine.low %v503_v31, %v507_v32  ;;  %v14141_v50 = vcombine.high %v511_v42, %v515_v43 }
 0x40b   :  { %v14143_v51 = vcombine.high %v512_v44, %v516_v47  ;;  %v14142_v56 = vcombine.low %v512_v44, %v516_v47  ;;  %v559_v47 = vld [vmem:[#allocation5 + $0xb90] sm:$0xff] }
 0x40d   :  { %10570 = vmatpush1.bf16.msra.mxu0 %v14092_v54  ;;  %11086 = vmatpush1.bf16.msra.mxu1 %v14094_v30  ;;  %v523_v54 = vld [vmem:[#allocation5 + $0xa70] sm:$0xff]  ;;  %v520_v30 = vld [vmem:[#allocation5 + $0xa58] sm:$0xff] }
 0x40e   :  { %10571 = vmatprep.subr.bf16.mxu0 %v14101_v55  ;;  %11087 = vmatprep.subr.bf16.mxu1 %v14103_v15  ;;  %v524_v55 = vld [vmem:[#allocation5 + $0xa78] sm:$0xff]  ;;  %v14140_v15 = vcombine.low %v511_v42, %v515_v43  ;;  %v14149_v57 = vcombine.high %v519_v52, %v523_v54 }
 0x40f   :  { %v14151_v60 = vcombine.high %v520_v30, %v524_v55  ;;  %v14150_v2 = vcombine.low %v520_v30, %v524_v55  ;;  %v567_v55 = vld [vmem:[#allocation5 + $0xbd0] sm:$0xff] }
 0x411   :  { %10572 = vmatpush1.bf16.msra.mxu0 %v14100_v62  ;;  %11088 = vmatpush1.bf16.msra.mxu1 %v14102_v58  ;;  %v531_v62 = vld [vmem:[#allocation5 + $0xab0] sm:$0xff]  ;;  %v528_v58 = vld [vmem:[#allocation5 + $0xa98] sm:$0xff] }
 0x412   :  { %10573 = vmatprep.subr.bf16.mxu0 %v14109_v1  ;;  %11089 = vmatprep.subr.bf16.mxu1 %v14111_v37  ;;  %v532_v1 = vld [vmem:[#allocation5 + $0xab8] sm:$0xff]  ;;  %v14148_v37 = vcombine.low %v519_v52, %v523_v54  ;;  %v14157_v4 = vcombine.high %v527_v61, %v531_v62 }
 0x413   :  { %v14159_v25 = vcombine.high %v528_v58, %v532_v1  ;;  %v14158_v16 = vcombine.low %v528_v58, %v532_v1  ;;  %v575_v1 = vld [vmem:[#allocation5 + $0xc10] sm:$0xff] }
 0x415   :  { %10574 = vmatpush1.bf16.msra.mxu0 %v14108_v8  ;;  %11090 = vmatpush1.bf16.msra.mxu1 %v14110_v9  ;;  %v539_v8 = vld [vmem:[#allocation5 + $0xaf0] sm:$0xff]  ;;  %v536_v9 = vld [vmem:[#allocation5 + $0xad8] sm:$0xff] }
 0x416   :  { %10575 = vmatprep.subr.bf16.mxu0 %v14117_v11  ;;  %11091 = vmatprep.subr.bf16.mxu1 %v14119_v12  ;;  %v540_v11 = vld [vmem:[#allocation5 + $0xaf8] sm:$0xff]  ;;  %v14156_v12 = vcombine.low %v527_v61, %v531_v62  ;;  %v14165_v18 = vcombine.high %v535_v7, %v539_v8 }
 0x417   :  { %v14167_v19 = vcombine.high %v536_v9, %v540_v11  ;;  %v14166_v31 = vcombine.low %v536_v9, %v540_v11  ;;  %v583_v11 = vld [vmem:[#allocation5 + $0xc50] sm:$0xff] }
 0x419   :  { %10576 = vmatpush1.bf16.msra.mxu0 %v14116_v23  ;;  %11092 = vmatpush1.bf16.msra.mxu1 %v14118_v24  ;;  %v547_v23 = vld [vmem:[#allocation5 + $0xb30] sm:$0xff]  ;;  %v544_v24 = vld [vmem:[#allocation5 + $0xb18] sm:$0xff] }
 0x41a   :  { %10577 = vmatprep.subr.bf16.mxu0 %v14125_v28  ;;  %11093 = vmatprep.subr.bf16.mxu1 %v14127_v29  ;;  %v548_v28 = vld [vmem:[#allocation5 + $0xb38] sm:$0xff]  ;;  %v14164_v29 = vcombine.low %v535_v7, %v539_v8  ;;  %v14173_v32 = vcombine.high %v543_v22, %v547_v23 }
 0x41b   :  { %v14175_v34 = vcombine.high %v544_v24, %v548_v28  ;;  %v14174_v42 = vcombine.low %v544_v24, %v548_v28  ;;  %v591_v28 = vld [vmem:[#allocation5 + $0xc90] sm:$0xff] }
 0x41d   :  { %10578 = vmatpush1.bf16.msra.mxu0 %v14124_v36  ;;  %11094 = vmatpush1.bf16.msra.mxu1 %v14126_v39  ;;  %v555_v36 = vld [vmem:[#allocation5 + $0xb70] sm:$0xff]  ;;  %v552_v39 = vld [vmem:[#allocation5 + $0xb58] sm:$0xff] }
 0x41e   :  { %10579 = vmatprep.subr.bf16.mxu0 %v14133_v40  ;;  %11095 = vmatprep.subr.bf16.mxu1 %v14135_v41  ;;  %v556_v40 = vld [vmem:[#allocation5 + $0xb78] sm:$0xff]  ;;  %v14172_v41 = vcombine.low %v543_v22, %v547_v23  ;;  %v14181_v43 = vcombine.high %v551_v35, %v555_v36 }
 0x41f   :  { %v14183_v44 = vcombine.high %v552_v39, %v556_v40  ;;  %v14182_v52 = vcombine.low %v552_v39, %v556_v40  ;;  %v599_v40 = vld [vmem:[#allocation5 + $0xcd0] sm:$0xff] }
 0x421   :  { %10580 = vmatpush1.bf16.msra.mxu0 %v14132_v48  ;;  %11096 = vmatpush1.bf16.msra.mxu1 %v14134_v49  ;;  %v563_v48 = vld [vmem:[#allocation5 + $0xbb0] sm:$0xff]  ;;  %v560_v49 = vld [vmem:[#allocation5 + $0xb98] sm:$0xff] }
 0x422   :  { %10581 = vmatprep.subr.bf16.mxu0 %v14141_v50  ;;  %11097 = vmatprep.subr.bf16.mxu1 %v14143_v51  ;;  %v564_v50 = vld [vmem:[#allocation5 + $0xbb8] sm:$0xff]  ;;  %v14180_v51 = vcombine.low %v551_v35, %v555_v36  ;;  %v14189_v54 = vcombine.high %v559_v47, %v563_v48 }
 0x423   :  { %v14191_v30 = vcombine.high %v560_v49, %v564_v50  ;;  %v14190_v61 = vcombine.low %v560_v49, %v564_v50  ;;  %v607_v50 = vld [vmem:[#allocation5 + $0xd10] sm:$0xff] }
 0x425   :  { %10582 = vmatpush1.bf16.msra.mxu0 %v14140_v15  ;;  %11098 = vmatpush1.bf16.msra.mxu1 %v14142_v56  ;;  %v571_v15 = vld [vmem:[#allocation5 + $0xbf0] sm:$0xff]  ;;  %v568_v56 = vld [vmem:[#allocation5 + $0xbd8] sm:$0xff] }
 0x426   :  { %10583 = vmatprep.subr.bf16.mxu0 %v14149_v57  ;;  %11099 = vmatprep.subr.bf16.mxu1 %v14151_v60  ;;  %v572_v57 = vld [vmem:[#allocation5 + $0xbf8] sm:$0xff]  ;;  %v14188_v60 = vcombine.low %v559_v47, %v563_v48  ;;  %v14197_v62 = vcombine.high %v567_v55, %v571_v15 }
 0x427   :  { %v14199_v58 = vcombine.high %v568_v56, %v572_v57  ;;  %v14198_v7 = vcombine.low %v568_v56, %v572_v57  ;;  %v615_v57 = vld [vmem:[#allocation5 + $0xd50] sm:$0xff] }
 0x429   :  { %10584 = vmatpush1.bf16.msra.mxu0 %v14148_v37  ;;  %11100 = vmatpush1.bf16.msra.mxu1 %v14150_v2  ;;  %v579_v37 = vld [vmem:[#allocation5 + $0xc30] sm:$0xff]  ;;  %v576_v2 = vld [vmem:[#allocation5 + $0xc18] sm:$0xff] }
 0x42a   :  { %10585 = vmatprep.subr.bf16.mxu0 %v14157_v4  ;;  %11101 = vmatprep.subr.bf16.mxu1 %v14159_v25  ;;  %v580_v4 = vld [vmem:[#allocation5 + $0xc38] sm:$0xff]  ;;  %v14196_v25 = vcombine.low %v567_v55, %v571_v15  ;;  %v14205_v8 = vcombine.high %v575_v1, %v579_v37 }
 0x42b   :  { %v14207_v9 = vcombine.high %v576_v2, %v580_v4  ;;  %v14206_v22 = vcombine.low %v576_v2, %v580_v4 }
 0x42d   :  { %10586 = vmatpush1.bf16.msra.mxu0 %v14156_v12  ;;  %11102 = vmatpush1.bf16.msra.mxu1 %v14158_v16  ;;  %v587_v12 = vld [vmem:[#allocation5 + $0xc70] sm:$0xff]  ;;  %v584_v16 = vld [vmem:[#allocation5 + $0xc58] sm:$0xff] }
 0x42e   :  { %10587 = vmatprep.subr.bf16.mxu0 %v14165_v18  ;;  %11103 = vmatprep.subr.bf16.mxu1 %v14167_v19  ;;  %v588_v18 = vld [vmem:[#allocation5 + $0xc78] sm:$0xff]  ;;  %v14204_v19 = vcombine.low %v575_v1, %v579_v37  ;;  %v14213_v23 = vcombine.high %v583_v11, %v587_v12  ;;  %v1725_v37 = vld [vmem:[#allocation7] sm:$0xff] }
 0x42f   :  { %v14215_v24 = vcombine.high %v584_v16, %v588_v18  ;;  %v14214_v35 = vcombine.low %v584_v16, %v588_v18  ;;  %v624_v18 = vld [vmem:[#allocation5 + $0xd98] sm:$0xff] }
 0x431   :  { %10588 = vmatpush1.bf16.msra.mxu0 %v14164_v29  ;;  %11104 = vmatpush1.bf16.msra.mxu1 %v14166_v31  ;;  %v595_v29 = vld [vmem:[#allocation5 + $0xcb0] sm:$0xff]  ;;  %v592_v31 = vld [vmem:[#allocation5 + $0xc98] sm:$0xff] }
 0x432   :  { %10589 = vmatprep.subr.bf16.mxu0 %v14173_v32  ;;  %11105 = vmatprep.subr.bf16.mxu1 %v14175_v34  ;;  %v596_v32 = vld [vmem:[#allocation5 + $0xcb8] sm:$0xff]  ;;  %v14212_v34 = vcombine.low %v583_v11, %v587_v12  ;;  %v14221_v36 = vcombine.high %v591_v28, %v595_v29  ;;  %v14220_v47 = vcombine.low %v591_v28, %v595_v29  ;;  %v623_v11 = vld [vmem:[#allocation5 + $0xd90] sm:$0xff] }
 0x433   :  { %v14223_v39 = vcombine.high %v592_v31, %v596_v32  ;;  %v627_v12 = vld [vmem:[#allocation5 + $0xdb0] sm:$0xff] }
 0x435   :  { %10590 = vmatpush1.bf16.msra.mxu0 %v14172_v41  ;;  %11106 = vmatpush1.bf16.msra.mxu1 %v14174_v42  ;;  %v603_v41 = vld [vmem:[#allocation5 + $0xcf0] sm:$0xff]  ;;  %v600_v42 = vld [vmem:[#allocation5 + $0xcd8] sm:$0xff] }
 0x436   :  { %10591 = vmatprep.subr.bf16.mxu0 %v14181_v43  ;;  %11107 = vmatprep.subr.bf16.mxu1 %v14183_v44  ;;  %v604_v43 = vld [vmem:[#allocation5 + $0xcf8] sm:$0xff]  ;;  %v1727_v44 = vlaneseq  ;;  %v14229_v48 = vcombine.high %v599_v40, %v603_v41  ;;  %v14228_v55 = vcombine.low %v599_v40, %v603_v41 }
 0x437   :  { %v14231_v49 = vcombine.high %v600_v42, %v604_v43  ;;  %v14230_v15 = vcombine.low %v600_v42, %v604_v43  ;;  %v632_v42 = vld [vmem:[#allocation5 + $0xdd8] sm:$0xff] }
 0x438   :  { %v636_v43 = vld [vmem:[#allocation5 + $0xdf8] sm:$0xff] }
 0x439   :  { %10592 = vmatpush1.bf16.msra.mxu0 %v14180_v51  ;;  %11108 = vmatpush1.bf16.msra.mxu1 %v14182_v52  ;;  %v611_v51 = vld [vmem:[#allocation5 + $0xd30] sm:$0xff]  ;;  %v608_v52 = vld [vmem:[#allocation5 + $0xd18] sm:$0xff] }
 0x43a   :  { %10593 = vmatprep.subr.bf16.mxu0 %v14189_v54  ;;  %11109 = vmatprep.subr.bf16.mxu1 %v14191_v30  ;;  %v612_v54 = vld [vmem:[#allocation5 + $0xd38] sm:$0xff]  ;;  %v16782_v30 = vshrl.u32 %v1727_v44, 7  ;;  %v14236_v1 = vcombine.low %v607_v50, %v611_v51 }
 0x43b   :  { %v14239_v56 = vcombine.high %v608_v52, %v612_v54 }
 0x43c   :  { %v1737_v2 = vsub.s32 2, %v16782_v30  ;;  %v1733_v4 = vsub.s32 1, %v16782_v30 }
 0x43d   :  { %10594 = vmatpush1.bf16.msra.mxu0 %v14188_v60  ;;  %11110 = vmatpush1.bf16.msra.mxu1 %v14190_v61  ;;  %v619_v60 = vld [vmem:[#allocation5 + $0xd70] sm:$0xff]  ;;  %v1729_v61 = vsub.s32 0, %v16782_v30 }
 0x43e   :  { %10595 = vmatprep.subr.bf16.mxu0 %v14197_v62  ;;  %11111 = vmatprep.subr.bf16.mxu1 %v14199_v58  ;;  %v616_v62 = vld [vmem:[#allocation5 + $0xd58] sm:$0xff] }
 0x43f   :  { %v620_v58 = vld [vmem:[#allocation5 + $0xd78] sm:$0xff]  ;;  %v1730_v16 = vrot.slane %v1725_v37, %v1729_v61 }
 0x440   :  { %v14246_v29 = vcombine.low %v616_v62, %v620_v58 }
 0x441   :  { %10596 = vmatpush1.bf16.msra.mxu0 %v14196_v25  ;;  %11112 = vmatpush1.bf16.msra.mxu1 %v14198_v7  ;;  %v14238_v25 = vcombine.low %v608_v52, %v612_v54  ;;  %v1741_v7 = vsub.s32 3, %v16782_v30 }
 0x442   :  { %10608 = vmatprep.subr.bf16.mxu0 %v14205_v8  ;;  %11124 = vmatprep.subr.bf16.mxu1 %v14207_v9  ;;  %v14245_v8 = vcombine.high %v615_v57, %v619_v60  ;;  %v14247_v9 = vcombine.high %v616_v62, %v620_v58  ;;  %v14263_v62 = vcombine.high %v632_v42, %v636_v43  ;;  %v639_v58 = vld [vmem:[#allocation5 + $0xe10] sm:$0xff] }
 0x443   :  { %v1742_v28 = vrot.slane %v1725_v37, %v1741_v7 }
 0x444   :  { %10598 = vmatmul.mubr.bf16.vlgmr.msra.gmra.mrb[4].mxu0 %v16692_v46  ;;  %11114 = vmatmul.mubr.bf16.vlgmr.msra.gmra.mrb[4].mxu1 %v16692_v46  ;;  %v14222_v46 = vcombine.low %v592_v31, %v596_v32  ;;  %v14253_v31 = vcombine.high %v623_v11, %v627_v12 }
 0x445   :  { %10609 = vmatpush1.bf16.msra.mxu0 %v14204_v19  ;;  %11125 = vmatpush1.bf16.msra.mxu1 %v14206_v22  ;;  %v628_v19 = vld [vmem:[#allocation5 + $0xdb8] sm:$0xff]  ;;  %v1738_v22 = vrot.slane %v1725_v37, %v1737_v2 }
 0x446   :  { %10610 = vmatprep.subr.bf16.mxu0 %v14213_v23  ;;  %11126 = vmatprep.subr.bf16.mxu1 %v14215_v24  ;;  %v1734_v23 = vrot.slane %v1725_v37, %v1733_v4  ;;  %v14244_v24 = vcombine.low %v615_v57, %v619_v60 }
 0x447   :  { %10640 = vmatprep.mubr.bf16.mxu0 %v16694_v53  ;;  %11156 = vmatprep.mubr.bf16.mxu1 %v16694_v53  ;;  %v14237_v53 = vcombine.high %v607_v50, %v611_v51  ;;  %v14254_v50 = vcombine.low %v624_v18, %v628_v19 }
 0x449   :  { %10611 = vmatpush1.bf16.msra.mxu0 %v14212_v34  ;;  %11127 = vmatpush1.bf16.msra.mxu1 %v14214_v35  ;;  %v14255_v34 = vcombine.high %v624_v18, %v628_v19  ;;  %v631_v35 = vld [vmem:[#allocation5 + $0xdd0] sm:$0xff] }
 0x44a   :  { %10612 = vmatprep.subr.bf16.mxu0 %v14221_v36  ;;  %11128 = vmatprep.subr.bf16.mxu1 %v14223_v39  ;;  %v635_v36 = vld [vmem:[#allocation5 + $0xdf0] sm:$0xff] }
 0x44b   :  { %v14260_v60 = vcombine.low %v631_v35, %v635_v36 }
 0x44d   :  { %10613 = vmatpush1.bf16.msra.mxu0 %v14220_v47  ;;  %11129 = vmatpush1.bf16.msra.mxu1 %v14222_v46 }
 0x44e   :  { %10614 = vmatprep.subr.bf16.mxu0 %v14229_v48  ;;  %11130 = vmatprep.subr.bf16.mxu1 %v14231_v49  ;;  %v14252_v49 = vcombine.low %v623_v11, %v627_v12  ;;  %v640_v11 = vld [vmem:[#allocation5 + $0xe18] sm:$0xff] }
 0x44f   :  { %v644_v12 = vld [vmem:[#allocation5 + $0xe38] sm:$0xff] }
 0x451   :  { %10615 = vmatpush1.bf16.msra.mxu0 %v14228_v55  ;;  %11131 = vmatpush1.bf16.msra.mxu1 %v14230_v15  ;;  %v14261_v15 = vcombine.high %v631_v35, %v635_v36  ;;  %v647_v35 = vld [vmem:[#allocation5 + $0xe50] sm:$0xff] }
 0x452   :  { %10616 = vmatprep.subr.bf16.mxu0 %v14237_v53  ;;  %11132 = vmatprep.subr.bf16.mxu1 %v14239_v56  ;;  %v651_v36 = vld [vmem:[#allocation5 + $0xe70] sm:$0xff] }
 0x455   :  { %10617 = vmatpush1.bf16.msra.mxu0 %v14236_v1  ;;  %11133 = vmatpush1.bf16.msra.mxu1 %v14238_v25  ;;  %v643_v1 = vld [vmem:[#allocation5 + $0xe30] sm:$0xff] }
 0x456   :  { %10618 = vmatprep.subr.bf16.mxu0 %v14245_v8  ;;  %11134 = vmatprep.subr.bf16.mxu1 %v14247_v9  ;;  %v14262_v9 = vcombine.low %v632_v42, %v636_v43  ;;  %v14268_v42 = vcombine.low %v639_v58, %v643_v1  ;;  %v14270_v43 = vcombine.low %v640_v11, %v644_v12 }
 0x457   :  { %v9954_v32 = vpop.f32.mrb[0].mxu0  ;;  %v10470_v40 = vpop.f32.mrb[0].mxu1 }
 0x458   :  { %v15685_v39 = vadd.f32 %v9954_v32, %v1730_v16  ;;  %v9956_v41 = vpop.f32.mrb[1].mxu0  ;;  %v15689_v44 = vadd.f32 %v10470_v40, %v1738_v22  ;;  %v10472_v46 = vpop.f32.mrb[1].mxu1  ;;  %v648_v40 = vld [vmem:[#allocation5 + $0xe58] sm:$0xff] }
 0x459   :  { %v15686_v47 = vadd.f32 %v9956_v41, %v1734_v23  ;;  %v9958_v48 = vpop.f32.mrb[2].mxu0  ;;  %10619 = vmatpush1.bf16.msra.mxu0 %v14244_v24  ;;  %v15690_v51 = vadd.f32 %v10472_v46, %v1742_v28  ;;  %v10474_v54 = vpop.f32.mrb[2].mxu1  ;;  %11135 = vmatpush1.bf16.msra.mxu1 %v14246_v29  ;;  %v652_v41 = vld [vmem:[#allocation5 + $0xe78] sm:$0xff]  ;;  %v655_v46 = vld [vmem:[#allocation5 + $0xe90] sm:$0xff] }
 0x45a   :  { %v15687_v52 = vadd.f32 %v9958_v48, %v1730_v16  ;;  %v9960_v55 = vpop.f32.mrb[3].mxu0  ;;  %10620 = vmatprep.subr.bf16.mxu0 %v14253_v31  ;;  %v15691_v53 = vadd.f32 %v10474_v54, %v1738_v22  ;;  %v10476_v57 = vpop.f32.mrb[3].mxu1  ;;  %11136 = vmatprep.subr.bf16.mxu1 %v14255_v34  ;;  %v11511_v37 = vmax.f32 %v15685_v39, 0.0  ;;  %v11513_v16 = vmax.f32 %v15689_v44, 0.0  ;;  %v659_v48 = vld [vmem:[#allocation5 + $0xeb0] sm:$0xff] }
 0x45b   :  { %v15688_v56 = vadd.f32 %v9960_v55, %v1734_v23  ;;  %v15692_v8 = vadd.f32 %v10476_v57, %v1742_v28  ;;  %v11512_v18 = vmax.f32 %v15686_v47, 0.0  ;;  %v11514_v29 = vmax.f32 %v15690_v51, 0.0  ;;  %v668_v57 = vld [vmem:[#allocation5 + $0xef8] sm:$0xff] }
 0x45c   :  { %v11519_v25 = vmax.f32 %v15687_v52, 0.0  ;;  %v11521_v19 = vmax.f32 %v15691_v53, 0.0  ;;  %v14269_v31 = vcombine.high %v639_v58, %v643_v1  ;;  %v14271_v28 = vcombine.high %v640_v11, %v644_v12  ;;  %v667_v53 = vld [vmem:[#allocation5 + $0xef0] sm:$0xff] }
 0x45d   :  { %v11520_v24 = vmax.f32 %v15688_v56, 0.0  ;;  %10621 = vmatpush1.bf16.msra.mxu0 %v14252_v49  ;;  %v11522_v23 = vmax.f32 %v15692_v8, 0.0  ;;  %11137 = vmatpush1.bf16.msra.mxu1 %v14254_v50  ;;  %v14277_v44 = vcombine.high %v647_v35, %v651_v36  ;;  %v14279_v47 = vcombine.high %v648_v40, %v652_v41  ;;  %v656_v49 = vld [vmem:[#allocation5 + $0xe98] sm:$0xff] }
 0x45e   :  { %v16796_v22 = vpack.c.bf16 %v11519_v25, %v11511_v37  ;;  %10622 = vmatprep.subr.bf16.mxu0 %v14261_v15  ;;  %v16798_v32 = vpack.c.bf16 %v11521_v19, %v11513_v16  ;;  %11138 = vmatprep.subr.bf16.mxu1 %v14263_v62  ;;  %v660_v50 = vld [vmem:[#allocation5 + $0xeb8] sm:$0xff]  ;;  %v14276_v51 = vcombine.low %v647_v35, %v651_v36  ;;  %v663_v15 = vld [vmem:[#allocation5 + $0xed0] sm:$0xff] }
 0x45f   :  { %v16800_v34 = vpack.c.bf16 %v11520_v24, %v11512_v18  ;;  %v16802_v39 = vpack.c.bf16 %v11522_v23, %v11514_v29  ;;  %v14278_v52 = vcombine.low %v648_v40, %v652_v41  ;;  %v14285_v54 = vcombine.high %v655_v46, %v659_v48  ;;  %v664_v56 = vld [vmem:[#allocation5 + $0xed8] sm:$0xff]  ;;  %v671_v37 = vld [vmem:[#allocation5 + $0xf10] sm:$0xff] }
 0x460   :  { %v14287_v55 = vcombine.high %v656_v49, %v660_v50  ;;  %v14286_v62 = vcombine.low %v656_v49, %v660_v50  ;;  %v14293_v58 = vcombine.high %v663_v15, %v667_v53  ;;  %v14295_v1 = vcombine.high %v664_v56, %v668_v57  ;;  %v675_v25 = vld [vmem:[#allocation5 + $0xf30] sm:$0xff]  ;;  %v672_v8 = vld [vmem:[#allocation5 + $0xf18] sm:$0xff] }
 0x461   :  { %10623 = vmatpush1.bf16.msra.mxu0 %v14260_v60  ;;  %11139 = vmatpush1.bf16.msra.mxu1 %v14262_v9  ;;  %v14284_v60 = vcombine.low %v655_v46, %v659_v48  ;;  %v676_v9 = vld [vmem:[#allocation5 + $0xf38] sm:$0xff]  ;;  %v14292_v11 = vcombine.low %v663_v15, %v667_v53  ;;  %v14294_v12 = vcombine.low %v664_v56, %v668_v57  ;;  %v679_v19 = vld [vmem:[#allocation5 + $0xf50] sm:$0xff] }
 0x462   :  { %10624 = vmatprep.subr.bf16.mxu0 %v14269_v31  ;;  %11140 = vmatprep.subr.bf16.mxu1 %v14271_v28  ;;  %v14301_v16 = vcombine.high %v671_v37, %v675_v25  ;;  %v14303_v18 = vcombine.high %v672_v8, %v676_v9  ;;  %v683_v24 = vld [vmem:[#allocation5 + $0xf70] sm:$0xff]  ;;  %v680_v29 = vld [vmem:[#allocation5 + $0xf58] sm:$0xff]  ;;  %v14300_v31 = vcombine.low %v671_v37, %v675_v25 }
 0x463   :  { %v684_v23 = vld [vmem:[#allocation5 + $0xf78] sm:$0xff]  ;;  %v14302_v28 = vcombine.low %v672_v8, %v676_v9  ;;  %v14309_v35 = vcombine.high %v679_v19, %v683_v24  ;;  %v687_v40 = vld [vmem:[#allocation5 + $0xf90] sm:$0xff] }
 0x464   :  { %v14311_v36 = vcombine.high %v680_v29, %v684_v23  ;;  %v691_v41 = vld [vmem:[#allocation5 + $0xfb0] sm:$0xff] }
 0x465   :  { %10625 = vmatpush1.bf16.msra.mxu0 %v14268_v42  ;;  %11141 = vmatpush1.bf16.msra.mxu1 %v14270_v43  ;;  %v688_v42 = vld [vmem:[#allocation5 + $0xf98] sm:$0xff]  ;;  %v14317_v46 = vcombine.high %v687_v40, %v691_v41  ;;  %v695_v49 = vld [vmem:[#allocation5 + $0xfd0] sm:$0xff] }
 0x466   :  { %10626 = vmatprep.subr.bf16.mxu0 %v14277_v44  ;;  %11142 = vmatprep.subr.bf16.mxu1 %v14279_v47  ;;  %v692_v43 = vld [vmem:[#allocation5 + $0xfb8] sm:$0xff]  ;;  %v14308_v44 = vcombine.low %v679_v19, %v683_v24  ;;  %v14310_v47 = vcombine.low %v680_v29, %v684_v23  ;;  %v699_v50 = vld [vmem:[#allocation5 + $0xff0] sm:$0xff] }
 0x467   :  { %v14319_v48 = vcombine.high %v688_v42, %v692_v43  ;;  %v14325_v15 = vcombine.high %v695_v49, %v699_v50  ;;  %v703_v56 = vld [vmem:[#allocation5 + $0x1010] sm:$0xff] }
 0x468   :  { %v707_v57 = vld [vmem:[#allocation5 + $0x1030] sm:$0xff] }
 0x469   :  { %10627 = vmatpush1.bf16.msra.mxu0 %v14276_v51  ;;  %11143 = vmatpush1.bf16.msra.mxu1 %v14278_v52  ;;  %v696_v51 = vld [vmem:[#allocation5 + $0xfd8] sm:$0xff]  ;;  %v14333_v37 = vcombine.high %v703_v56, %v707_v57  ;;  %v711_v8 = vld [vmem:[#allocation5 + $0x1050] sm:$0xff] }
 0x46a   :  { %10628 = vmatprep.subr.bf16.mxu0 %v14285_v54  ;;  %11144 = vmatprep.subr.bf16.mxu1 %v14287_v55  ;;  %v700_v52 = vld [vmem:[#allocation5 + $0xff8] sm:$0xff]  ;;  %v14316_v54 = vcombine.low %v687_v40, %v691_v41  ;;  %v14318_v55 = vcombine.low %v688_v42, %v692_v43  ;;  %v715_v9 = vld [vmem:[#allocation5 + $0x1070] sm:$0xff] }
 0x46b   :  { %v14327_v53 = vcombine.high %v696_v51, %v700_v52  ;;  %v14341_v19 = vcombine.high %v711_v8, %v715_v9  ;;  %v719_v29 = vld [vmem:[#allocation5 + $0x1090] sm:$0xff] }
 0x46c   :  { %v723_v23 = vld [vmem:[#allocation5 + $0x10b0] sm:$0xff] }
 0x46d   :  { %10629 = vmatpush1.bf16.msra.mxu0 %v14284_v60  ;;  %11145 = vmatpush1.bf16.msra.mxu1 %v14286_v62  ;;  %v704_v60 = vld [vmem:[#allocation5 + $0x1018] sm:$0xff]  ;;  %v14349_v40 = vcombine.high %v719_v29, %v723_v23  ;;  %v727_v42 = vld [vmem:[#allocation5 + $0x10d0] sm:$0xff] }
 0x46e   :  { %10630 = vmatprep.subr.bf16.mxu0 %v14293_v58  ;;  %11146 = vmatprep.subr.bf16.mxu1 %v14295_v1  ;;  %v708_v62 = vld [vmem:[#allocation5 + $0x1038] sm:$0xff]  ;;  %v14324_v58 = vcombine.low %v695_v49, %v699_v50  ;;  %v14326_v1 = vcombine.low %v696_v51, %v700_v52  ;;  %v731_v43 = vld [vmem:[#allocation5 + $0x10f0] sm:$0xff] }
 0x46f   :  { %v14335_v25 = vcombine.high %v704_v60, %v708_v62  ;;  %v735_v50 = vld [vmem:[#allocation5 + $0x1110] sm:$0xff]  ;;  %v736_v52 = vld [vmem:[#allocation5 + $0x1118] sm:$0xff] }
 0x470   :  { %v739_v51 = vld [vmem:[#allocation5 + $0x1130] sm:$0xff] }
 0x471   :  { %10631 = vmatpush1.bf16.msra.mxu0 %v14292_v11  ;;  %11147 = vmatpush1.bf16.msra.mxu1 %v14294_v12  ;;  %v712_v11 = vld [vmem:[#allocation5 + $0x1058] sm:$0xff] }
 0x472   :  { %10632 = vmatprep.subr.bf16.mxu0 %v14301_v16  ;;  %11148 = vmatprep.subr.bf16.mxu1 %v14303_v18  ;;  %v716_v12 = vld [vmem:[#allocation5 + $0x1078] sm:$0xff]  ;;  %v14332_v16 = vcombine.low %v703_v56, %v707_v57  ;;  %v14334_v18 = vcombine.low %v704_v60, %v708_v62  ;;  %v743_v56 = vld [vmem:[#allocation5 + $0x1150] sm:$0xff] }
 0x473   :  { %v14343_v24 = vcombine.high %v712_v11, %v716_v12  ;;  %v747_v57 = vld [vmem:[#allocation5 + $0x1170] sm:$0xff]  ;;  %v744_v60 = vld [vmem:[#allocation5 + $0x1158] sm:$0xff] }
 0x474   :  { %v748_v62 = vld [vmem:[#allocation5 + $0x1178] sm:$0xff] }
 0x475   :  { %10633 = vmatpush1.bf16.msra.mxu0 %v14300_v31  ;;  %11149 = vmatpush1.bf16.msra.mxu1 %v14302_v28  ;;  %v720_v31 = vld [vmem:[#allocation5 + $0x1098] sm:$0xff] }
 0x476   :  { %10634 = vmatprep.subr.bf16.mxu0 %v14309_v35  ;;  %11150 = vmatprep.subr.bf16.mxu1 %v14311_v36  ;;  %v724_v28 = vld [vmem:[#allocation5 + $0x10b8] sm:$0xff]  ;;  %v14340_v35 = vcombine.low %v711_v8, %v715_v9  ;;  %v14342_v36 = vcombine.low %v712_v11, %v716_v12  ;;  %v751_v8 = vld [vmem:[#allocation5 + $0x1190] sm:$0xff] }
 0x477   :  { %v14351_v41 = vcombine.high %v720_v31, %v724_v28  ;;  %v755_v9 = vld [vmem:[#allocation5 + $0x11b0] sm:$0xff]  ;;  %v752_v11 = vld [vmem:[#allocation5 + $0x1198] sm:$0xff] }
 0x478   :  { %v756_v12 = vld [vmem:[#allocation5 + $0x11b8] sm:$0xff] }
 0x479   :  { %10635 = vmatpush1.bf16.msra.mxu0 %v14308_v44  ;;  %11151 = vmatpush1.bf16.msra.mxu1 %v14310_v47  ;;  %v728_v44 = vld [vmem:[#allocation5 + $0x10d8] sm:$0xff] }
 0x47a   :  { %10636 = vmatprep.subr.bf16.mxu0 %v14317_v46  ;;  %11152 = vmatprep.subr.bf16.mxu1 %v14319_v48  ;;  %v732_v47 = vld [vmem:[#allocation5 + $0x10f8] sm:$0xff]  ;;  %v14348_v46 = vcombine.low %v719_v29, %v723_v23  ;;  %v14357_v48 = vcombine.high %v727_v42, %v731_v43  ;;  %v759_v29 = vld [vmem:[#allocation5 + $0x11d0] sm:$0xff] }
 0x47b   :  { %v14359_v49 = vcombine.high %v728_v44, %v732_v47  ;;  %v763_v23 = vld [vmem:[#allocation5 + $0x11f0] sm:$0xff] }
 0x47d   :  { %10637 = vmatpush1.bf16.msra.mxu0 %v14316_v54  ;;  %11153 = vmatpush1.bf16.msra.mxu1 %v14318_v55  ;;  %v740_v54 = vld [vmem:[#allocation5 + $0x1138] sm:$0xff]  ;;  %v14356_v55 = vcombine.low %v727_v42, %v731_v43  ;;  %v767_v42 = vld [vmem:[#allocation5 + $0x1210] sm:$0xff] }
 0x47e   :  { %10638 = vmatprep.subr.bf16.mxu0 %v14325_v15  ;;  %11154 = vmatprep.subr.bf16.mxu1 %v14327_v53  ;;  %v14358_v15 = vcombine.low %v728_v44, %v732_v47  ;;  %v14365_v53 = vcombine.high %v735_v50, %v739_v51  ;;  %v771_v43 = vld [vmem:[#allocation5 + $0x1230] sm:$0xff]  ;;  %v768_v44 = vld [vmem:[#allocation5 + $0x1218] sm:$0xff] }
 0x47f   :  { %v772_v47 = vld [vmem:[#allocation5 + $0x1238] sm:$0xff] }
 0x481   :  { %10639 = vmatpush1.bf16.msra.mxu0 %v14324_v58  ;;  %11155 = vmatpush1.bf16.msra.mxu1 %v14326_v1  ;;  %v14364_v58 = vcombine.low %v735_v50, %v739_v51  ;;  %v14366_v1 = vcombine.low %v736_v52, %v740_v54  ;;  %v775_v50 = vld [vmem:[#allocation5 + $0x1250] sm:$0xff] }
 0x482   :  { %10651 = vmatprep.subr.bf16.mxu0 %v14333_v37  ;;  %11167 = vmatprep.subr.bf16.mxu1 %v14335_v25  ;;  %v14373_v37 = vcombine.high %v743_v56, %v747_v57  ;;  %v14375_v25 = vcombine.high %v744_v60, %v748_v62  ;;  %v779_v51 = vld [vmem:[#allocation5 + $0x1270] sm:$0xff] }
 0x484   :  { %10641 = vmatmul.mubr.bf16.vlgmr.msra.gmra.mrb[4].mxu0 %v16700_v0  ;;  %11157 = vmatmul.mubr.bf16.vlgmr.msra.gmra.mrb[4].mxu1 %v16700_v0  ;;  %v14350_v0 = vcombine.low %v720_v31, %v724_v28  ;;  %v760_v31 = vld [vmem:[#allocation5 + $0x11d8] sm:$0xff] }
 0x485   :  { %10652 = vmatpush1.bf16.msra.mxu0 %v14332_v16  ;;  %11168 = vmatpush1.bf16.msra.mxu1 %v14334_v18  ;;  %v14372_v16 = vcombine.low %v743_v56, %v747_v57  ;;  %v14374_v18 = vcombine.low %v744_v60, %v748_v62  ;;  %v764_v28 = vld [vmem:[#allocation5 + $0x11f8] sm:$0xff]  ;;  %v783_v56 = vld [vmem:[#allocation5 + $0x1290] sm:$0xff] }
 0x486   :  { %10653 = vmatprep.subr.bf16.mxu0 %v14341_v19  ;;  %11169 = vmatprep.subr.bf16.mxu1 %v14343_v24  ;;  %v14381_v19 = vcombine.high %v751_v8, %v755_v9  ;;  %v14383_v24 = vcombine.high %v752_v11, %v756_v12  ;;  %v787_v57 = vld [vmem:[#allocation5 + $0x12b0] sm:$0xff]  ;;  %v784_v60 = vld [vmem:[#allocation5 + $0x1298] sm:$0xff] }
 0x487   :  { %10683 = vmatprep.mubr.bf16.mxu0 %v16702_v10  ;;  %11199 = vmatprep.mubr.bf16.mxu1 %v16702_v10  ;;  %v14367_v10 = vcombine.high %v736_v52, %v740_v54  ;;  %v776_v52 = vld [vmem:[#allocation5 + $0x1258] sm:$0xff] }
 0x488   :  { %v780_v54 = vld [vmem:[#allocation5 + $0x1278] sm:$0xff] }
 0x489   :  { %10654 = vmatpush1.bf16.msra.mxu0 %v14340_v35  ;;  %11170 = vmatpush1.bf16.msra.mxu1 %v14342_v36  ;;  %v14380_v35 = vcombine.low %v751_v8, %v755_v9  ;;  %v14382_v36 = vcombine.low %v752_v11, %v756_v12  ;;  %v788_v62 = vld [vmem:[#allocation5 + $0x12b8] sm:$0xff]  ;;  %v791_v8 = vld [vmem:[#allocation5 + $0x12d0] sm:$0xff] }
 0x48a   :  { %10655 = vmatprep.subr.bf16.mxu0 %v14349_v40  ;;  %11171 = vmatprep.subr.bf16.mxu1 %v14351_v41  ;;  %v14389_v40 = vcombine.high %v759_v29, %v763_v23  ;;  %v14391_v41 = vcombine.high %v760_v31, %v764_v28  ;;  %v795_v9 = vld [vmem:[#allocation5 + $0x12f0] sm:$0xff]  ;;  %v792_v11 = vld [vmem:[#allocation5 + $0x12d8] sm:$0xff] }
 0x48b   :  { %v796_v12 = vld [vmem:[#allocation5 + $0x12f8] sm:$0xff] }
 0x48d   :  { %10656 = vmatpush1.bf16.msra.mxu0 %v14348_v46  ;;  %11172 = vmatpush1.bf16.msra.mxu1 %v14350_v0  ;;  %v14388_v46 = vcombine.low %v759_v29, %v763_v23  ;;  %v14390_v0 = vcombine.low %v760_v31, %v764_v28  ;;  %v799_v29 = vld [vmem:[#allocation5 + $0x1310] sm:$0xff]  ;;  %v800_v31 = vld [vmem:[#allocation5 + $0x1318] sm:$0xff] }
 0x48e   :  { %10657 = vmatprep.subr.bf16.mxu0 %v14357_v48  ;;  %11173 = vmatprep.subr.bf16.mxu1 %v14359_v49  ;;  %v14397_v48 = vcombine.high %v767_v42, %v771_v43  ;;  %v14399_v49 = vcombine.high %v768_v44, %v772_v47  ;;  %v803_v23 = vld [vmem:[#allocation5 + $0x1330] sm:$0xff]  ;;  %v804_v28 = vld [vmem:[#allocation5 + $0x1338] sm:$0xff] }
 0x491   :  { %10658 = vmatpush1.bf16.msra.mxu0 %v14356_v55  ;;  %11174 = vmatpush1.bf16.msra.mxu1 %v14358_v15  ;;  %v14396_v55 = vcombine.low %v767_v42, %v771_v43  ;;  %v14398_v15 = vcombine.low %v768_v44, %v772_v47  ;;  %v807_v42 = vld [vmem:[#allocation5 + $0x1350] sm:$0xff]  ;;  %v808_v44 = vld [vmem:[#allocation5 + $0x1358] sm:$0xff] }
 0x492   :  { %10659 = vmatprep.subr.bf16.mxu0 %v14365_v53  ;;  %11175 = vmatprep.subr.bf16.mxu1 %v14367_v10  ;;  %v14405_v53 = vcombine.high %v775_v50, %v779_v51  ;;  %v14407_v10 = vcombine.high %v776_v52, %v780_v54  ;;  %v811_v43 = vld [vmem:[#allocation5 + $0x1370] sm:$0xff]  ;;  %v812_v47 = vld [vmem:[#allocation5 + $0x1378] sm:$0xff] }
 0x495   :  { %10660 = vmatpush1.bf16.msra.mxu0 %v14364_v58  ;;  %11176 = vmatpush1.bf16.msra.mxu1 %v14366_v1  ;;  %v14404_v58 = vcombine.low %v775_v50, %v779_v51  ;;  %v14406_v1 = vcombine.low %v776_v52, %v780_v54  ;;  %v815_v50 = vld [vmem:[#allocation5 + $0x1390] sm:$0xff]  ;;  %v816_v52 = vld [vmem:[#allocation5 + $0x1398] sm:$0xff] }
 0x496   :  { %10661 = vmatprep.subr.bf16.mxu0 %v14373_v37  ;;  %11177 = vmatprep.subr.bf16.mxu1 %v14375_v25  ;;  %v14413_v37 = vcombine.high %v783_v56, %v787_v57  ;;  %v14415_v25 = vcombine.high %v784_v60, %v788_v62  ;;  %v819_v51 = vld [vmem:[#allocation5 + $0x13b0] sm:$0xff]  ;;  %v820_v54 = vld [vmem:[#allocation5 + $0x13b8] sm:$0xff] }
 0x499   :  { %10662 = vmatpush1.bf16.msra.mxu0 %v14372_v16  ;;  %11178 = vmatpush1.bf16.msra.mxu1 %v14374_v18  ;;  %v14412_v16 = vcombine.low %v783_v56, %v787_v57  ;;  %v14414_v18 = vcombine.low %v784_v60, %v788_v62  ;;  %v823_v56 = vld [vmem:[#allocation5 + $0x13d0] sm:$0xff]  ;;  %v824_v60 = vld [vmem:[#allocation5 + $0x13d8] sm:$0xff] }
 0x49a   :  { %10663 = vmatprep.subr.bf16.mxu0 %v14381_v19  ;;  %11179 = vmatprep.subr.bf16.mxu1 %v14383_v24  ;;  %v14421_v19 = vcombine.high %v791_v8, %v795_v9  ;;  %v14423_v24 = vcombine.high %v792_v11, %v796_v12  ;;  %v827_v57 = vld [vmem:[#allocation5 + $0x13f0] sm:$0xff]  ;;  %v828_v62 = vld [vmem:[#allocation5 + $0x13f8] sm:$0xff] }
 0x49d   :  { %10664 = vmatpush1.bf16.msra.mxu0 %v14380_v35  ;;  %11180 = vmatpush1.bf16.msra.mxu1 %v14382_v36  ;;  %v14420_v35 = vcombine.low %v791_v8, %v795_v9  ;;  %v14422_v36 = vcombine.low %v792_v11, %v796_v12  ;;  %v831_v8 = vld [vmem:[#allocation5 + $0x1410] sm:$0xff]  ;;  %v832_v11 = vld [vmem:[#allocation5 + $0x1418] sm:$0xff] }
 0x49e   :  { %10665 = vmatprep.subr.bf16.mxu0 %v14389_v40  ;;  %11181 = vmatprep.subr.bf16.mxu1 %v14391_v41  ;;  %v14429_v40 = vcombine.high %v799_v29, %v803_v23  ;;  %v14431_v41 = vcombine.high %v800_v31, %v804_v28  ;;  %v835_v9 = vld [vmem:[#allocation5 + $0x1430] sm:$0xff]  ;;  %v836_v12 = vld [vmem:[#allocation5 + $0x1438] sm:$0xff] }
 0x4a1   :  { %10666 = vmatpush1.bf16.msra.mxu0 %v14388_v46  ;;  %11182 = vmatpush1.bf16.msra.mxu1 %v14390_v0  ;;  %v14428_v46 = vcombine.low %v799_v29, %v803_v23  ;;  %v14430_v0 = vcombine.low %v800_v31, %v804_v28  ;;  %v839_v29 = vld [vmem:[#allocation5 + $0x1450] sm:$0xff]  ;;  %v840_v31 = vld [vmem:[#allocation5 + $0x1458] sm:$0xff] }
 0x4a2   :  { %10667 = vmatprep.subr.bf16.mxu0 %v14397_v48  ;;  %11183 = vmatprep.subr.bf16.mxu1 %v14399_v49  ;;  %v14437_v48 = vcombine.high %v807_v42, %v811_v43  ;;  %v14439_v49 = vcombine.high %v808_v44, %v812_v47  ;;  %v843_v23 = vld [vmem:[#allocation5 + $0x1470] sm:$0xff]  ;;  %v844_v28 = vld [vmem:[#allocation5 + $0x1478] sm:$0xff] }
 0x4a5   :  { %10668 = vmatpush1.bf16.msra.mxu0 %v14396_v55  ;;  %11184 = vmatpush1.bf16.msra.mxu1 %v14398_v15  ;;  %v14436_v55 = vcombine.low %v807_v42, %v811_v43  ;;  %v14438_v15 = vcombine.low %v808_v44, %v812_v47  ;;  %v847_v42 = vld [vmem:[#allocation5 + $0x1490] sm:$0xff]  ;;  %v848_v44 = vld [vmem:[#allocation5 + $0x1498] sm:$0xff] }
 0x4a6   :  { %10669 = vmatprep.subr.bf16.mxu0 %v14405_v53  ;;  %11185 = vmatprep.subr.bf16.mxu1 %v14407_v10  ;;  %v14445_v53 = vcombine.high %v815_v50, %v819_v51  ;;  %v14447_v10 = vcombine.high %v816_v52, %v820_v54  ;;  %v851_v43 = vld [vmem:[#allocation5 + $0x14b0] sm:$0xff]  ;;  %v852_v47 = vld [vmem:[#allocation5 + $0x14b8] sm:$0xff] }
 0x4a9   :  { %10670 = vmatpush1.bf16.msra.mxu0 %v14404_v58  ;;  %11186 = vmatpush1.bf16.msra.mxu1 %v14406_v1  ;;  %v14444_v58 = vcombine.low %v815_v50, %v819_v51  ;;  %v14446_v1 = vcombine.low %v816_v52, %v820_v54  ;;  %v855_v50 = vld [vmem:[#allocation5 + $0x14d0] sm:$0xff]  ;;  %v856_v52 = vld [vmem:[#allocation5 + $0x14d8] sm:$0xff] }
 0x4aa   :  { %10671 = vmatprep.subr.bf16.mxu0 %v14413_v37  ;;  %11187 = vmatprep.subr.bf16.mxu1 %v14415_v25  ;;  %v14453_v37 = vcombine.high %v823_v56, %v827_v57  ;;  %v14455_v25 = vcombine.high %v824_v60, %v828_v62  ;;  %v859_v51 = vld [vmem:[#allocation5 + $0x14f0] sm:$0xff]  ;;  %v860_v54 = vld [vmem:[#allocation5 + $0x14f8] sm:$0xff] }
 0x4ad   :  { %10672 = vmatpush1.bf16.msra.mxu0 %v14412_v16  ;;  %11188 = vmatpush1.bf16.msra.mxu1 %v14414_v18  ;;  %v14452_v16 = vcombine.low %v823_v56, %v827_v57  ;;  %v14454_v18 = vcombine.low %v824_v60, %v828_v62  ;;  %v867_v56 = vld [vmem:[#allocation5 + $0x1530] sm:$0xff]  ;;  %v864_v57 = vld [vmem:[#allocation5 + $0x1518] sm:$0xff]  ;;  %v14484_v62 = vcombine.low %v855_v50, %v859_v51 }
 0x4ae   :  { %10673 = vmatprep.subr.bf16.mxu0 %v14421_v19  ;;  %11189 = vmatprep.subr.bf16.mxu1 %v14423_v24  ;;  %v14461_v19 = vcombine.high %v831_v8, %v835_v9  ;;  %v14463_v24 = vcombine.high %v832_v11, %v836_v12  ;;  %v868_v60 = vld [vmem:[#allocation5 + $0x1538] sm:$0xff] }
 0x4b1   :  { %10674 = vmatpush1.bf16.msra.mxu0 %v14420_v35  ;;  %11190 = vmatpush1.bf16.msra.mxu1 %v14422_v36  ;;  %v14460_v35 = vcombine.low %v831_v8, %v835_v9  ;;  %v14462_v36 = vcombine.low %v832_v11, %v836_v12  ;;  %v872_v8 = vld [vmem:[#allocation5 + $0x1558] sm:$0xff]  ;;  %v14494_v12 = vcombine.low %v864_v57, %v868_v60 }
 0x4b2   :  { %10675 = vmatprep.subr.bf16.mxu0 %v14429_v40  ;;  %11191 = vmatprep.subr.bf16.mxu1 %v14431_v41  ;;  %v14469_v40 = vcombine.high %v839_v29, %v843_v23  ;;  %v14471_v41 = vcombine.high %v840_v31, %v844_v28  ;;  %v876_v9 = vld [vmem:[#allocation5 + $0x1578] sm:$0xff] }
 0x4b5   :  { %10676 = vmatpush1.bf16.msra.mxu0 %v14428_v46  ;;  %11192 = vmatpush1.bf16.msra.mxu1 %v14430_v0  ;;  %v14468_v46 = vcombine.low %v839_v29, %v843_v23  ;;  %v14470_v0 = vcombine.low %v840_v31, %v844_v28  ;;  %v880_v29 = vld [vmem:[#allocation5 + $0x1598] sm:$0xff]  ;;  %v14502_v28 = vcombine.low %v872_v8, %v876_v9 }
 0x4b6   :  { %10677 = vmatprep.subr.bf16.mxu0 %v14437_v48  ;;  %11193 = vmatprep.subr.bf16.mxu1 %v14439_v49  ;;  %v14477_v48 = vcombine.high %v847_v42, %v851_v43  ;;  %v14479_v49 = vcombine.high %v848_v44, %v852_v47  ;;  %v884_v23 = vld [vmem:[#allocation5 + $0x15b8] sm:$0xff] }
 0x4b9   :  { %10678 = vmatpush1.bf16.msra.mxu0 %v14436_v55  ;;  %11194 = vmatpush1.bf16.msra.mxu1 %v14438_v15  ;;  %v14476_v55 = vcombine.low %v847_v42, %v851_v43  ;;  %v14485_v15 = vcombine.high %v855_v50, %v859_v51  ;;  %v888_v42 = vld [vmem:[#allocation5 + $0x15d8] sm:$0xff] }
 0x4ba   :  { %10679 = vmatprep.subr.bf16.mxu0 %v14445_v53  ;;  %11195 = vmatprep.subr.bf16.mxu1 %v14447_v10  ;;  %v14487_v53 = vcombine.high %v856_v52, %v860_v54  ;;  %v863_v10 = vld [vmem:[#allocation5 + $0x1510] sm:$0xff]  ;;  %v892_v43 = vld [vmem:[#allocation5 + $0x15f8] sm:$0xff] }
 0x4bb   :  { %v14492_v11 = vcombine.low %v863_v10, %v867_v56  ;;  %v896_v50 = vld [vmem:[#allocation5 + $0x1618] sm:$0xff] }
 0x4bc   :  { %v900_v51 = vld [vmem:[#allocation5 + $0x1638] sm:$0xff] }
 0x4bd   :  { %10680 = vmatpush1.bf16.msra.mxu0 %v14444_v58  ;;  %11196 = vmatpush1.bf16.msra.mxu1 %v14446_v1  ;;  %v14486_v58 = vcombine.low %v856_v52, %v860_v54  ;;  %v14493_v1 = vcombine.high %v863_v10, %v867_v56  ;;  %v14518_v54 = vcombine.low %v888_v42, %v892_v43  ;;  %v904_v10 = vld [vmem:[#allocation5 + $0x1658] sm:$0xff] }
 0x4be   :  { %10681 = vmatprep.subr.bf16.mxu0 %v14453_v37  ;;  %11197 = vmatprep.subr.bf16.mxu1 %v14455_v25  ;;  %v871_v37 = vld [vmem:[#allocation5 + $0x1550] sm:$0xff]  ;;  %v908_v56 = vld [vmem:[#allocation5 + $0x1678] sm:$0xff] }
 0x4bf   :  { %v875_v25 = vld [vmem:[#allocation5 + $0x1570] sm:$0xff] }
 0x4c0   :  { %v14500_v31 = vcombine.low %v871_v37, %v875_v25 }
 0x4c1   :  { %10682 = vmatpush1.bf16.msra.mxu0 %v14452_v16  ;;  %11198 = vmatpush1.bf16.msra.mxu1 %v14454_v18  ;;  %v14501_v16 = vcombine.high %v871_v37, %v875_v25  ;;  %v14503_v18 = vcombine.high %v872_v8, %v876_v9  ;;  %v912_v37 = vld [vmem:[#allocation5 + $0x1698] sm:$0xff]  ;;  %v14534_v9 = vcombine.low %v904_v10, %v908_v56 }
 0x4c2   :  { %10694 = vmatprep.subr.bf16.mxu0 %v14461_v19  ;;  %11210 = vmatprep.subr.bf16.mxu1 %v14463_v24  ;;  %v879_v19 = vld [vmem:[#allocation5 + $0x1590] sm:$0xff]  ;;  %v916_v25 = vld [vmem:[#allocation5 + $0x16b8] sm:$0xff] }
 0x4c3   :  { %v883_v24 = vld [vmem:[#allocation5 + $0x15b0] sm:$0xff] }
 0x4c4   :  { %10684 = vmatmul.mubr.bf16.vlgmr.msra.gmra.mrb[4].mxu0 %v16708_v26  ;;  %11200 = vmatmul.mubr.bf16.vlgmr.msra.gmra.mrb[4].mxu1 %v16708_v26  ;;  %v14478_v26 = vcombine.low %v848_v44, %v852_v47  ;;  %v14508_v44 = vcombine.low %v879_v19, %v883_v24  ;;  %v14510_v47 = vcombine.low %v880_v29, %v884_v23 }
 0x4c5   :  { %10695 = vmatpush1.bf16.msra.mxu0 %v14460_v35  ;;  %11211 = vmatpush1.bf16.msra.mxu1 %v14462_v36  ;;  %v14509_v35 = vcombine.high %v879_v19, %v883_v24  ;;  %v14511_v36 = vcombine.high %v880_v29, %v884_v23  ;;  %v920_v19 = vld [vmem:[#allocation5 + $0x16d8] sm:$0xff]  ;;  %v14542_v23 = vcombine.low %v912_v37, %v916_v25 }
 0x4c6   :  { %10696 = vmatprep.subr.bf16.mxu0 %v14469_v40  ;;  %11212 = vmatprep.subr.bf16.mxu1 %v14471_v41  ;;  %v887_v40 = vld [vmem:[#allocation5 + $0x15d0] sm:$0xff]  ;;  %v924_v24 = vld [vmem:[#allocation5 + $0x16f8] sm:$0xff] }
 0x4c7   :  { %10726 = vmatprep.mubr.bf16.mxu0 %v16710_v38  ;;  %11242 = vmatprep.mubr.bf16.mxu1 %v16710_v38  ;;  %v14495_v38 = vcombine.high %v864_v57, %v868_v60  ;;  %v891_v41 = vld [vmem:[#allocation5 + $0x15f0] sm:$0xff]  ;;  %v14526_v60 = vcombine.low %v896_v50, %v900_v51 }
 0x4c8   :  { %v14516_v52 = vcombine.low %v887_v40, %v891_v41 }
 0x4c9   :  { %10697 = vmatpush1.bf16.msra.mxu0 %v14468_v46  ;;  %11213 = vmatpush1.bf16.msra.mxu1 %v14470_v0  ;;  %v14517_v46 = vcombine.high %v887_v40, %v891_v41  ;;  %v14519_v0 = vcombine.high %v888_v42, %v892_v43  ;;  %v928_v40 = vld [vmem:[#allocation5 + $0x1718] sm:$0xff]  ;;  %v14550_v43 = vcombine.low %v920_v19, %v924_v24 }
 0x4ca   :  { %10698 = vmatprep.subr.bf16.mxu0 %v14477_v48  ;;  %11214 = vmatprep.subr.bf16.mxu1 %v14479_v49  ;;  %v895_v48 = vld [vmem:[#allocation5 + $0x1610] sm:$0xff]  ;;  %v932_v41 = vld [vmem:[#allocation5 + $0x1738] sm:$0xff] }
 0x4cb   :  { %v899_v49 = vld [vmem:[#allocation5 + $0x1630] sm:$0xff] }
 0x4cc   :  { %v14524_v57 = vcombine.low %v895_v48, %v899_v49 }
 0x4cd   :  { %10699 = vmatpush1.bf16.msra.mxu0 %v14476_v55  ;;  %11215 = vmatpush1.bf16.msra.mxu1 %v14478_v26  ;;  %v14525_v55 = vcombine.high %v895_v48, %v899_v49  ;;  %v14527_v26 = vcombine.high %v896_v50, %v900_v51  ;;  %v936_v48 = vld [vmem:[#allocation5 + $0x1758] sm:$0xff]  ;;  %v14558_v51 = vcombine.low %v928_v40, %v932_v41 }
 0x4ce   :  { %10700 = vmatprep.subr.bf16.mxu0 %v14485_v15  ;;  %11216 = vmatprep.subr.bf16.mxu1 %v14487_v53  ;;  %v903_v15 = vld [vmem:[#allocation5 + $0x1650] sm:$0xff]  ;;  %v940_v49 = vld [vmem:[#allocation5 + $0x1778] sm:$0xff] }
 0x4cf   :  { %v907_v53 = vld [vmem:[#allocation5 + $0x1670] sm:$0xff] }
 0x4d0   :  { %v14532_v8 = vcombine.low %v903_v15, %v907_v53 }
 0x4d1   :  { %10701 = vmatpush1.bf16.msra.mxu0 %v14484_v62  ;;  %11217 = vmatpush1.bf16.msra.mxu1 %v14486_v58  ;;  %v14533_v62 = vcombine.high %v903_v15, %v907_v53  ;;  %v14535_v58 = vcombine.high %v904_v10, %v908_v56  ;;  %v944_v15 = vld [vmem:[#allocation5 + $0x1798] sm:$0xff]  ;;  %v14566_v56 = vcombine.low %v936_v48, %v940_v49 }
 0x4d2   :  { %10702 = vmatprep.subr.bf16.mxu0 %v14493_v1  ;;  %11218 = vmatprep.subr.bf16.mxu1 %v14495_v38  ;;  %v911_v1 = vld [vmem:[#allocation5 + $0x1690] sm:$0xff]  ;;  %v948_v53 = vld [vmem:[#allocation5 + $0x17b8] sm:$0xff] }
 0x4d3   :  { %v915_v38 = vld [vmem:[#allocation5 + $0x16b0] sm:$0xff] }
 0x4d4   :  { %v14540_v29 = vcombine.low %v911_v1, %v915_v38 }
 0x4d5   :  { %10703 = vmatpush1.bf16.msra.mxu0 %v14492_v11  ;;  %11219 = vmatpush1.bf16.msra.mxu1 %v14494_v12  ;;  %v14541_v11 = vcombine.high %v911_v1, %v915_v38  ;;  %v14543_v12 = vcombine.high %v912_v37, %v916_v25  ;;  %v952_v1 = vld [vmem:[#allocation5 + $0x17d8] sm:$0xff]  ;;  %v14574_v25 = vcombine.low %v944_v15, %v948_v53 }
 0x4d6   :  { %10704 = vmatprep.subr.bf16.mxu0 %v14501_v16  ;;  %11220 = vmatprep.subr.bf16.mxu1 %v14503_v18  ;;  %v919_v16 = vld [vmem:[#allocation5 + $0x16d0] sm:$0xff]  ;;  %v956_v38 = vld [vmem:[#allocation5 + $0x17f8] sm:$0xff] }
 0x4d7   :  { %v923_v18 = vld [vmem:[#allocation5 + $0x16f0] sm:$0xff] }
 0x4d8   :  { %v14548_v42 = vcombine.low %v919_v16, %v923_v18 }
 0x4d9   :  { %10705 = vmatpush1.bf16.msra.mxu0 %v14500_v31  ;;  %11221 = vmatpush1.bf16.msra.mxu1 %v14502_v28  ;;  %v14549_v31 = vcombine.high %v919_v16, %v923_v18  ;;  %v14551_v28 = vcombine.high %v920_v19, %v924_v24  ;;  %v960_v16 = vld [vmem:[#allocation5 + $0x1818] sm:$0xff]  ;;  %v14582_v24 = vcombine.low %v952_v1, %v956_v38 }
 0x4da   :  { %10706 = vmatprep.subr.bf16.mxu0 %v14509_v35  ;;  %11222 = vmatprep.subr.bf16.mxu1 %v14511_v36  ;;  %v927_v35 = vld [vmem:[#allocation5 + $0x1710] sm:$0xff]  ;;  %v964_v18 = vld [vmem:[#allocation5 + $0x1838] sm:$0xff] }
 0x4db   :  { %v931_v36 = vld [vmem:[#allocation5 + $0x1730] sm:$0xff] }
 0x4dc   :  { %v14556_v50 = vcombine.low %v927_v35, %v931_v36 }
 0x4dd   :  { %10707 = vmatpush1.bf16.msra.mxu0 %v14508_v44  ;;  %11223 = vmatpush1.bf16.msra.mxu1 %v14510_v47  ;;  %v14557_v44 = vcombine.high %v927_v35, %v931_v36  ;;  %v14559_v47 = vcombine.high %v928_v40, %v932_v41  ;;  %v968_v35 = vld [vmem:[#allocation5 + $0x1858] sm:$0xff]  ;;  %v14590_v41 = vcombine.low %v960_v16, %v964_v18 }
 0x4de   :  { %10708 = vmatprep.subr.bf16.mxu0 %v14517_v46  ;;  %11224 = vmatprep.subr.bf16.mxu1 %v14519_v0  ;;  %v935_v46 = vld [vmem:[#allocation5 + $0x1750] sm:$0xff]  ;;  %v972_v36 = vld [vmem:[#allocation5 + $0x1878] sm:$0xff] }
 0x4df   :  { %v939_v0 = vld [vmem:[#allocation5 + $0x1770] sm:$0xff] }
 0x4e0   :  { %v14564_v10 = vcombine.low %v935_v46, %v939_v0 }
 0x4e1   :  { %10709 = vmatpush1.bf16.msra.mxu0 %v14516_v52  ;;  %11225 = vmatpush1.bf16.msra.mxu1 %v14518_v54  ;;  %v14565_v52 = vcombine.high %v935_v46, %v939_v0  ;;  %v14567_v54 = vcombine.high %v936_v48, %v940_v49  ;;  %v976_v46 = vld [vmem:[#allocation5 + $0x1898] sm:$0xff]  ;;  %v14598_v49 = vcombine.low %v968_v35, %v972_v36 }
 0x4e2   :  { %10710 = vmatprep.subr.bf16.mxu0 %v14525_v55  ;;  %11226 = vmatprep.subr.bf16.mxu1 %v14527_v26  ;;  %v943_v55 = vld [vmem:[#allocation5 + $0x1790] sm:$0xff]  ;;  %v980_v0 = vld [vmem:[#allocation5 + $0x18b8] sm:$0xff] }
 0x4e3   :  { %v947_v26 = vld [vmem:[#allocation5 + $0x17b0] sm:$0xff] }
 0x4e4   :  { %v14572_v37 = vcombine.low %v943_v55, %v947_v26 }
 0x4e5   :  { %10711 = vmatpush1.bf16.msra.mxu0 %v14524_v57  ;;  %11227 = vmatpush1.bf16.msra.mxu1 %v14526_v60  ;;  %v14573_v57 = vcombine.high %v943_v55, %v947_v26  ;;  %v14575_v60 = vcombine.high %v944_v15, %v948_v53  ;;  %v984_v55 = vld [vmem:[#allocation5 + $0x18d8] sm:$0xff] }
 0x4e6   :  { %10712 = vmatprep.subr.bf16.mxu0 %v14533_v62  ;;  %11228 = vmatprep.subr.bf16.mxu1 %v14535_v58  ;;  %v951_v62 = vld [vmem:[#allocation5 + $0x17d0] sm:$0xff]  ;;  %v988_v26 = vld [vmem:[#allocation5 + $0x18f8] sm:$0xff] }
 0x4e7   :  { %v955_v58 = vld [vmem:[#allocation5 + $0x17f0] sm:$0xff] }
 0x4e8   :  { %v14580_v19 = vcombine.low %v951_v62, %v955_v58 }
 0x4e9   :  { %10713 = vmatpush1.bf16.msra.mxu0 %v14532_v8  ;;  %11229 = vmatpush1.bf16.msra.mxu1 %v14534_v9  ;;  %v14581_v8 = vcombine.high %v951_v62, %v955_v58  ;;  %v14583_v9 = vcombine.high %v952_v1, %v956_v38  ;;  %v996_v62 = vld [vmem:[#allocation5 + $0x1938] sm:$0xff]  ;;  %v14614_v1 = vcombine.low %v984_v55, %v988_v26 }
 0x4ea   :  { %10714 = vmatprep.subr.bf16.mxu0 %v14541_v11  ;;  %11230 = vmatprep.subr.bf16.mxu1 %v14543_v12  ;;  %v959_v11 = vld [vmem:[#allocation5 + $0x1810] sm:$0xff] }
 0x4eb   :  { %v963_v12 = vld [vmem:[#allocation5 + $0x1830] sm:$0xff] }
 0x4ec   :  { %v14588_v40 = vcombine.low %v959_v11, %v963_v12 }
 0x4ed   :  { %10715 = vmatpush1.bf16.msra.mxu0 %v14540_v29  ;;  %11231 = vmatpush1.bf16.msra.mxu1 %v14542_v23  ;;  %v14589_v29 = vcombine.high %v959_v11, %v963_v12  ;;  %v14591_v23 = vcombine.high %v960_v16, %v964_v18 }
 0x4ee   :  { %10716 = vmatprep.subr.bf16.mxu0 %v14549_v31  ;;  %11232 = vmatprep.subr.bf16.mxu1 %v14551_v28  ;;  %v967_v31 = vld [vmem:[#allocation5 + $0x1850] sm:$0xff] }
 0x4ef   :  { %v971_v28 = vld [vmem:[#allocation5 + $0x1870] sm:$0xff] }
 0x4f0   :  { %v14596_v48 = vcombine.low %v967_v31, %v971_v28 }
 0x4f1   :  { %10717 = vmatpush1.bf16.msra.mxu0 %v14548_v42  ;;  %11233 = vmatpush1.bf16.msra.mxu1 %v14550_v43  ;;  %v14597_v42 = vcombine.high %v967_v31, %v971_v28  ;;  %v14599_v43 = vcombine.high %v968_v35, %v972_v36 }
 0x4f2   :  { %10718 = vmatprep.subr.bf16.mxu0 %v14557_v44  ;;  %11234 = vmatprep.subr.bf16.mxu1 %v14559_v47  ;;  %v975_v44 = vld [vmem:[#allocation5 + $0x1890] sm:$0xff] }
 0x4f3   :  { %v979_v47 = vld [vmem:[#allocation5 + $0x18b0] sm:$0xff] }
 0x4f4   :  { %v14604_v15 = vcombine.low %v975_v44, %v979_v47 }
 0x4f5   :  { %10719 = vmatpush1.bf16.msra.mxu0 %v14556_v50  ;;  %11235 = vmatpush1.bf16.msra.mxu1 %v14558_v51  ;;  %v14605_v50 = vcombine.high %v975_v44, %v979_v47  ;;  %v14607_v51 = vcombine.high %v976_v46, %v980_v0 }
 0x4f6   :  { %10720 = vmatprep.subr.bf16.mxu0 %v14565_v52  ;;  %11236 = vmatprep.subr.bf16.mxu1 %v14567_v54  ;;  %v983_v52 = vld [vmem:[#allocation5 + $0x18d0] sm:$0xff] }
 0x4f7   :  { %v987_v54 = vld [vmem:[#allocation5 + $0x18f0] sm:$0xff] }
 0x4f8   :  { %v14613_v53 = vcombine.high %v983_v52, %v987_v54  ;;  %v14612_v58 = vcombine.low %v983_v52, %v987_v54 }
 0x4f9   :  { %10721 = vmatpush1.bf16.msra.mxu0 %v14564_v10  ;;  %11237 = vmatpush1.bf16.msra.mxu1 %v14566_v56  ;;  %v14615_v10 = vcombine.high %v984_v55, %v988_v26  ;;  %v991_v56 = vld [vmem:[#allocation5 + $0x1910] sm:$0xff] }
 0x4fa   :  { %10722 = vmatprep.subr.bf16.mxu0 %v14573_v57  ;;  %11238 = vmatprep.subr.bf16.mxu1 %v14575_v60  ;;  %v995_v57 = vld [vmem:[#allocation5 + $0x1930] sm:$0xff]  ;;  %v992_v60 = vld [vmem:[#allocation5 + $0x1918] sm:$0xff] }
 0x4fb   :  { %v14621_v38 = vcombine.high %v991_v56, %v995_v57  ;;  %v14620_v11 = vcombine.low %v991_v56, %v995_v57  ;;  %v14622_v12 = vcombine.low %v992_v60, %v996_v62 }
 0x4fd   :  { %10723 = vmatpush1.bf16.msra.mxu0 %v14572_v37  ;;  %11239 = vmatpush1.bf16.msra.mxu1 %v14574_v25  ;;  %v999_v37 = vld [vmem:[#allocation5 + $0x1950] sm:$0xff] }
 0x4fe   :  { %10724 = vmatprep.subr.bf16.mxu0 %v14581_v8  ;;  %11240 = vmatprep.subr.bf16.mxu1 %v14583_v9  ;;  %v1003_v25 = vld [vmem:[#allocation5 + $0x1970] sm:$0xff]  ;;  %v1000_v8 = vld [vmem:[#allocation5 + $0x1958] sm:$0xff] }
 0x4ff   :  { %v1004_v9 = vld [vmem:[#allocation5 + $0x1978] sm:$0xff]  ;;  %v14629_v16 = vcombine.high %v999_v37, %v1003_v25  ;;  %v14628_v31 = vcombine.low %v999_v37, %v1003_v25 }
 0x500   :  { %v14631_v18 = vcombine.high %v1000_v8, %v1004_v9  ;;  %v14630_v28 = vcombine.low %v1000_v8, %v1004_v9 }
 0x501   :  { %10725 = vmatpush1.bf16.msra.mxu0 %v14580_v19  ;;  %11241 = vmatpush1.bf16.msra.mxu1 %v14582_v24  ;;  %v1007_v19 = vld [vmem:[#allocation5 + $0x1990] sm:$0xff] }
 0x502   :  { %10737 = vmatprep.subr.bf16.mxu0 %v14589_v29  ;;  %11253 = vmatprep.subr.bf16.mxu1 %v14591_v23  ;;  %v1011_v24 = vld [vmem:[#allocation5 + $0x19b0] sm:$0xff]  ;;  %v1008_v29 = vld [vmem:[#allocation5 + $0x1998] sm:$0xff] }
 0x503   :  { %v1012_v23 = vld [vmem:[#allocation5 + $0x19b8] sm:$0xff]  ;;  %v14637_v35 = vcombine.high %v1007_v19, %v1011_v24  ;;  %v14636_v44 = vcombine.low %v1007_v19, %v1011_v24 }
 0x504   :  { %10727 = vmatmul.mubr.bf16.vlgmr.msra.gmra.mrb[4].mxu0 %v16716_v59  ;;  %11243 = vmatmul.mubr.bf16.vlgmr.msra.gmra.mrb[4].mxu1 %v16716_v59  ;;  %v14606_v59 = vcombine.low %v976_v46, %v980_v0  ;;  %v14639_v36 = vcombine.high %v1008_v29, %v1012_v23  ;;  %v14638_v47 = vcombine.low %v1008_v29, %v1012_v23 }
 0x505   :  { %10738 = vmatpush1.bf16.msra.mxu0 %v14588_v40  ;;  %11254 = vmatpush1.bf16.msra.mxu1 %v14590_v41  ;;  %v1015_v40 = vld [vmem:[#allocation5 + $0x19d0] sm:$0xff] }
 0x506   :  { %10739 = vmatprep.subr.bf16.mxu0 %v14597_v42  ;;  %11255 = vmatprep.subr.bf16.mxu1 %v14599_v43  ;;  %v1019_v41 = vld [vmem:[#allocation5 + $0x19f0] sm:$0xff]  ;;  %v1016_v42 = vld [vmem:[#allocation5 + $0x19d8] sm:$0xff] }
 0x507   :  { %10769 = vmatprep.mubr.bf16.mxu0 %v16718_v6  ;;  %11285 = vmatprep.mubr.bf16.mxu1 %v16718_v6  ;;  %v14623_v6 = vcombine.high %v992_v60, %v996_v62  ;;  %v1020_v43 = vld [vmem:[#allocation5 + $0x19f8] sm:$0xff]  ;;  %v14645_v46 = vcombine.high %v1015_v40, %v1019_v41  ;;  %v14644_v52 = vcombine.low %v1015_v40, %v1019_v41 }
 0x508   :  { %v14647_v0 = vcombine.high %v1016_v42, %v1020_v43  ;;  %v14646_v54 = vcombine.low %v1016_v42, %v1020_v43 }
 0x509   :  { %10740 = vmatpush1.bf16.msra.mxu0 %v14596_v48  ;;  %11256 = vmatpush1.bf16.msra.mxu1 %v14598_v49  ;;  %v1023_v48 = vld [vmem:[#allocation5 + $0x1a10] sm:$0xff] }
 0x50a   :  { %10741 = vmatprep.subr.bf16.mxu0 %v14605_v50  ;;  %11257 = vmatprep.subr.bf16.mxu1 %v14607_v51  ;;  %v1027_v49 = vld [vmem:[#allocation5 + $0x1a30] sm:$0xff]  ;;  %v1024_v50 = vld [vmem:[#allocation5 + $0x1a18] sm:$0xff] }
 0x50b   :  { %v1028_v51 = vld [vmem:[#allocation5 + $0x1a38] sm:$0xff]  ;;  %v14653_v55 = vcombine.high %v1023_v48, %v1027_v49  ;;  %v14652_v56 = vcombine.low %v1023_v48, %v1027_v49 }
 0x50c   :  { %v14655_v26 = vcombine.high %v1024_v50, %v1028_v51  ;;  %v14654_v57 = vcombine.low %v1024_v50, %v1028_v51 }
 0x50d   :  { %10742 = vmatpush1.bf16.msra.mxu0 %v14604_v15  ;;  %11258 = vmatpush1.bf16.msra.mxu1 %v14606_v59  ;;  %v1031_v15 = vld [vmem:[#allocation5 + $0x1a50] sm:$0xff] }
 0x50e   :  { %10743 = vmatprep.subr.bf16.mxu0 %v14613_v53  ;;  %11259 = vmatprep.subr.bf16.mxu1 %v14615_v10  ;;  %v1035_v59 = vld [vmem:[#allocation5 + $0x1a70] sm:$0xff]  ;;  %v1032_v53 = vld [vmem:[#allocation5 + $0x1a58] sm:$0xff] }
 0x50f   :  { %v1036_v10 = vld [vmem:[#allocation5 + $0x1a78] sm:$0xff]  ;;  %v14661_v60 = vcombine.high %v1031_v15, %v1035_v59  ;;  %v14660_v37 = vcombine.low %v1031_v15, %v1035_v59 }
 0x510   :  { %v14663_v62 = vcombine.high %v1032_v53, %v1036_v10  ;;  %v14662_v25 = vcombine.low %v1032_v53, %v1036_v10 }
 0x511   :  { %10744 = vmatpush1.bf16.msra.mxu0 %v14612_v58  ;;  %11260 = vmatpush1.bf16.msra.mxu1 %v14614_v1  ;;  %v1039_v58 = vld [vmem:[#allocation5 + $0x1a90] sm:$0xff] }
 0x512   :  { %10745 = vmatprep.subr.bf16.mxu0 %v14621_v38  ;;  %11261 = vmatprep.subr.bf16.mxu1 %v14623_v6  ;;  %v1043_v1 = vld [vmem:[#allocation5 + $0x1ab0] sm:$0xff]  ;;  %v1040_v38 = vld [vmem:[#allocation5 + $0x1a98] sm:$0xff] }
 0x513   :  { %v1044_v6 = vld [vmem:[#allocation5 + $0x1ab8] sm:$0xff]  ;;  %v14669_v8 = vcombine.high %v1039_v58, %v1043_v1  ;;  %v14668_v19 = vcombine.low %v1039_v58, %v1043_v1 }
 0x514   :  { %v14671_v9 = vcombine.high %v1040_v38, %v1044_v6  ;;  %v14670_v24 = vcombine.low %v1040_v38, %v1044_v6 }
 0x515   :  { %10746 = vmatpush1.bf16.msra.mxu0 %v14620_v11  ;;  %11262 = vmatpush1.bf16.msra.mxu1 %v14622_v12  ;;  %v1047_v11 = vld [vmem:[#allocation5 + $0x1ad0] sm:$0xff] }
 0x516   :  { %10747 = vmatprep.subr.bf16.mxu0 %v14629_v16  ;;  %11263 = vmatprep.subr.bf16.mxu1 %v14631_v18  ;;  %v1051_v12 = vld [vmem:[#allocation5 + $0x1af0] sm:$0xff]  ;;  %v1048_v16 = vld [vmem:[#allocation5 + $0x1ad8] sm:$0xff] }
 0x517   :  { %v1052_v18 = vld [vmem:[#allocation5 + $0x1af8] sm:$0xff]  ;;  %v14677_v29 = vcombine.high %v1047_v11, %v1051_v12  ;;  %v14676_v40 = vcombine.low %v1047_v11, %v1051_v12 }
 0x518   :  { %v14679_v23 = vcombine.high %v1048_v16, %v1052_v18  ;;  %v14678_v41 = vcombine.low %v1048_v16, %v1052_v18 }
 0x519   :  { %10748 = vmatpush1.bf16.msra.mxu0 %v14628_v31  ;;  %11264 = vmatpush1.bf16.msra.mxu1 %v14630_v28  ;;  %v1055_v31 = vld [vmem:[#allocation5 + $0x1b10] sm:$0xff] }
 0x51a   :  { %10749 = vmatprep.subr.bf16.mxu0 %v14637_v35  ;;  %11265 = vmatprep.subr.bf16.mxu1 %v14639_v36  ;;  %v1059_v28 = vld [vmem:[#allocation5 + $0x1b30] sm:$0xff]  ;;  %v1056_v35 = vld [vmem:[#allocation5 + $0x1b18] sm:$0xff] }
 0x51b   :  { %v1060_v36 = vld [vmem:[#allocation5 + $0x1b38] sm:$0xff]  ;;  %v14685_v42 = vcombine.high %v1055_v31, %v1059_v28  ;;  %v14684_v48 = vcombine.low %v1055_v31, %v1059_v28 }
 0x51c   :  { %v14687_v43 = vcombine.high %v1056_v35, %v1060_v36  ;;  %v14686_v49 = vcombine.low %v1056_v35, %v1060_v36 }
 0x51d   :  { %10750 = vmatpush1.bf16.msra.mxu0 %v14636_v44  ;;  %11266 = vmatpush1.bf16.msra.mxu1 %v14638_v47  ;;  %v1063_v44 = vld [vmem:[#allocation5 + $0x1b50] sm:$0xff] }
 0x51e   :  { %10751 = vmatprep.subr.bf16.mxu0 %v14645_v46  ;;  %11267 = vmatprep.subr.bf16.mxu1 %v14647_v0  ;;  %v1067_v47 = vld [vmem:[#allocation5 + $0x1b70] sm:$0xff]  ;;  %v1064_v46 = vld [vmem:[#allocation5 + $0x1b58] sm:$0xff] }
 0x51f   :  { %v1068_v0 = vld [vmem:[#allocation5 + $0x1b78] sm:$0xff]  ;;  %v14693_v50 = vcombine.high %v1063_v44, %v1067_v47  ;;  %v14692_v15 = vcombine.low %v1063_v44, %v1067_v47 }
 0x520   :  { %v14695_v51 = vcombine.high %v1064_v46, %v1068_v0  ;;  %v14694_v59 = vcombine.low %v1064_v46, %v1068_v0 }
 0x521   :  { %10752 = vmatpush1.bf16.msra.mxu0 %v14644_v52  ;;  %11268 = vmatpush1.bf16.msra.mxu1 %v14646_v54  ;;  %v1071_v52 = vld [vmem:[#allocation5 + $0x1b90] sm:$0xff] }
 0x522   :  { %10753 = vmatprep.subr.bf16.mxu0 %v14653_v55  ;;  %11269 = vmatprep.subr.bf16.mxu1 %v14655_v26  ;;  %v1075_v54 = vld [vmem:[#allocation5 + $0x1bb0] sm:$0xff]  ;;  %v1072_v55 = vld [vmem:[#allocation5 + $0x1b98] sm:$0xff] }
 0x523   :  { %v1076_v26 = vld [vmem:[#allocation5 + $0x1bb8] sm:$0xff]  ;;  %v14701_v53 = vcombine.high %v1071_v52, %v1075_v54  ;;  %v14700_v58 = vcombine.low %v1071_v52, %v1075_v54 }
 0x524   :  { %v14703_v10 = vcombine.high %v1072_v55, %v1076_v26  ;;  %v14702_v1 = vcombine.low %v1072_v55, %v1076_v26  ;;  %v1119_v26 = vld [vmem:[#allocation5 + $0x1d10] sm:$0xff] }
 0x525   :  { %10754 = vmatpush1.bf16.msra.mxu0 %v14652_v56  ;;  %11270 = vmatpush1.bf16.msra.mxu1 %v14654_v57  ;;  %v1079_v56 = vld [vmem:[#allocation5 + $0x1bd0] sm:$0xff] }
 0x526   :  { %10755 = vmatprep.subr.bf16.mxu0 %v14661_v60  ;;  %11271 = vmatprep.subr.bf16.mxu1 %v14663_v62  ;;  %v1083_v57 = vld [vmem:[#allocation5 + $0x1bf0] sm:$0xff]  ;;  %v1080_v60 = vld [vmem:[#allocation5 + $0x1bd8] sm:$0xff] }
 0x527   :  { %v1084_v62 = vld [vmem:[#allocation5 + $0x1bf8] sm:$0xff]  ;;  %v14709_v38 = vcombine.high %v1079_v56, %v1083_v57  ;;  %v14708_v11 = vcombine.low %v1079_v56, %v1083_v57 }
 0x528   :  { %v14711_v6 = vcombine.high %v1080_v60, %v1084_v62  ;;  %v14710_v12 = vcombine.low %v1080_v60, %v1084_v62  ;;  %v1127_v60 = vld [vmem:[#allocation5 + $0x1d50] sm:$0xff] }
 0x529   :  { %10756 = vmatpush1.bf16.msra.mxu0 %v14660_v37  ;;  %11272 = vmatpush1.bf16.msra.mxu1 %v14662_v25  ;;  %v1087_v37 = vld [vmem:[#allocation5 + $0x1c10] sm:$0xff] }
 0x52a   :  { %10757 = vmatprep.subr.bf16.mxu0 %v14669_v8  ;;  %11273 = vmatprep.subr.bf16.mxu1 %v14671_v9  ;;  %v1091_v25 = vld [vmem:[#allocation5 + $0x1c30] sm:$0xff]  ;;  %v1088_v8 = vld [vmem:[#allocation5 + $0x1c18] sm:$0xff] }
 0x52b   :  { %v1092_v9 = vld [vmem:[#allocation5 + $0x1c38] sm:$0xff]  ;;  %v14717_v16 = vcombine.high %v1087_v37, %v1091_v25  ;;  %v14716_v31 = vcombine.low %v1087_v37, %v1091_v25  ;;  %v1131_v62 = vld [vmem:[#allocation5 + $0x1d70] sm:$0xff] }
 0x52c   :  { %v14719_v18 = vcombine.high %v1088_v8, %v1092_v9  ;;  %v14718_v28 = vcombine.low %v1088_v8, %v1092_v9  ;;  %v14757_v37 = vcombine.high %v1127_v60, %v1131_v62  ;;  %v1135_v8 = vld [vmem:[#allocation5 + $0x1d90] sm:$0xff] }
 0x52d   :  { %10758 = vmatpush1.bf16.msra.mxu0 %v14668_v19  ;;  %11274 = vmatpush1.bf16.msra.mxu1 %v14670_v24  ;;  %v1095_v19 = vld [vmem:[#allocation5 + $0x1c50] sm:$0xff] }
 0x52e   :  { %10759 = vmatprep.subr.bf16.mxu0 %v14677_v29  ;;  %11275 = vmatprep.subr.bf16.mxu1 %v14679_v23  ;;  %v1099_v24 = vld [vmem:[#allocation5 + $0x1c70] sm:$0xff]  ;;  %v1096_v29 = vld [vmem:[#allocation5 + $0x1c58] sm:$0xff] }
 0x52f   :  { %v1100_v23 = vld [vmem:[#allocation5 + $0x1c78] sm:$0xff]  ;;  %v14725_v35 = vcombine.high %v1095_v19, %v1099_v24  ;;  %v14724_v44 = vcombine.low %v1095_v19, %v1099_v24  ;;  %v1139_v9 = vld [vmem:[#allocation5 + $0x1db0] sm:$0xff] }
 0x530   :  { %v14727_v36 = vcombine.high %v1096_v29, %v1100_v23  ;;  %v14726_v47 = vcombine.low %v1096_v29, %v1100_v23  ;;  %v14765_v19 = vcombine.high %v1135_v8, %v1139_v9  ;;  %v1143_v29 = vld [vmem:[#allocation5 + $0x1dd0] sm:$0xff] }
 0x531   :  { %10760 = vmatpush1.bf16.msra.mxu0 %v14676_v40  ;;  %11276 = vmatpush1.bf16.msra.mxu1 %v14678_v41  ;;  %v1103_v40 = vld [vmem:[#allocation5 + $0x1c90] sm:$0xff] }
 0x532   :  { %10761 = vmatprep.subr.bf16.mxu0 %v14685_v42  ;;  %11277 = vmatprep.subr.bf16.mxu1 %v14687_v43  ;;  %v1107_v41 = vld [vmem:[#allocation5 + $0x1cb0] sm:$0xff]  ;;  %v1104_v42 = vld [vmem:[#allocation5 + $0x1c98] sm:$0xff] }
 0x533   :  { %v1108_v43 = vld [vmem:[#allocation5 + $0x1cb8] sm:$0xff]  ;;  %v14733_v46 = vcombine.high %v1103_v40, %v1107_v41  ;;  %v14732_v52 = vcombine.low %v1103_v40, %v1107_v41  ;;  %v1147_v23 = vld [vmem:[#allocation5 + $0x1df0] sm:$0xff] }
 0x534   :  { %v14735_v0 = vcombine.high %v1104_v42, %v1108_v43  ;;  %v14773_v40 = vcombine.high %v1143_v29, %v1147_v23 }
 0x535   :  { %10762 = vmatpush1.bf16.msra.mxu0 %v14684_v48  ;;  %11278 = vmatpush1.bf16.msra.mxu1 %v14686_v49  ;;  %v1111_v48 = vld [vmem:[#allocation5 + $0x1cd0] sm:$0xff] }
 0x536   :  { %10763 = vmatprep.subr.bf16.mxu0 %v14693_v50  ;;  %11279 = vmatprep.subr.bf16.mxu1 %v14695_v51  ;;  %v1115_v49 = vld [vmem:[#allocation5 + $0x1cf0] sm:$0xff]  ;;  %v1112_v50 = vld [vmem:[#allocation5 + $0x1cd8] sm:$0xff] }
 0x537   :  { %v1116_v51 = vld [vmem:[#allocation5 + $0x1cf8] sm:$0xff]  ;;  %v14741_v54 = vcombine.high %v1111_v48, %v1115_v49 }
 0x538   :  { %v14743_v55 = vcombine.high %v1112_v50, %v1116_v51  ;;  %v14742_v56 = vcombine.low %v1112_v50, %v1116_v51  ;;  %v1159_v50 = vld [vmem:[#allocation5 + $0x1e50] sm:$0xff] }
 0x539   :  { %10764 = vmatpush1.bf16.msra.mxu0 %v14692_v15  ;;  %11280 = vmatpush1.bf16.msra.mxu1 %v14694_v59  ;;  %v1123_v15 = vld [vmem:[#allocation5 + $0x1d30] sm:$0xff]  ;;  %v1120_v59 = vld [vmem:[#allocation5 + $0x1d18] sm:$0xff] }
 0x53a   :  { %10765 = vmatprep.subr.bf16.mxu0 %v14701_v53  ;;  %11281 = vmatprep.subr.bf16.mxu1 %v14703_v10  ;;  %v1124_v53 = vld [vmem:[#allocation5 + $0x1d38] sm:$0xff]  ;;  %v14740_v10 = vcombine.low %v1111_v48, %v1115_v49  ;;  %v14749_v57 = vcombine.high %v1119_v26, %v1123_v15  ;;  %v1163_v51 = vld [vmem:[#allocation5 + $0x1e70] sm:$0xff] }
 0x53d   :  { %10766 = vmatpush1.bf16.msra.mxu0 %v14700_v58  ;;  %11282 = vmatpush1.bf16.msra.mxu1 %v14702_v1  ;;  %v1128_v58 = vld [vmem:[#allocation5 + $0x1d58] sm:$0xff] }
 0x53e   :  { %10767 = vmatprep.subr.bf16.mxu0 %v14709_v38  ;;  %11283 = vmatprep.subr.bf16.mxu1 %v14711_v6  ;;  %v1132_v1 = vld [vmem:[#allocation5 + $0x1d78] sm:$0xff]  ;;  %v14748_v38 = vcombine.low %v1119_v26, %v1123_v15  ;;  %v14750_v6 = vcombine.low %v1120_v59, %v1124_v53  ;;  %v14789_v26 = vcombine.high %v1159_v50, %v1163_v51 }
 0x53f   :  { %v14759_v25 = vcombine.high %v1128_v58, %v1132_v1 }
 0x541   :  { %10768 = vmatpush1.bf16.msra.mxu0 %v14708_v11  ;;  %11284 = vmatpush1.bf16.msra.mxu1 %v14710_v12  ;;  %v1136_v11 = vld [vmem:[#allocation5 + $0x1d98] sm:$0xff] }
 0x542   :  { %10780 = vmatprep.subr.bf16.mxu0 %v14717_v16  ;;  %11296 = vmatprep.subr.bf16.mxu1 %v14719_v18  ;;  %v1140_v12 = vld [vmem:[#allocation5 + $0x1db8] sm:$0xff]  ;;  %v14756_v16 = vcombine.low %v1127_v60, %v1131_v62  ;;  %v14758_v18 = vcombine.low %v1128_v58, %v1132_v1  ;;  %v1175_v58 = vld [vmem:[#allocation5 + $0x1ed0] sm:$0xff] }
 0x543   :  { %v14767_v24 = vcombine.high %v1136_v11, %v1140_v12  ;;  %v1179_v1 = vld [vmem:[#allocation5 + $0x1ef0] sm:$0xff] }
 0x544   :  { %10770 = vmatmul.mubr.bf16.vlgmr.msra.gmra.mrb[4].mxu0 %v16724_v33  ;;  %11286 = vmatmul.mubr.bf16.vlgmr.msra.gmra.mrb[4].mxu1 %v16724_v33  ;;  %v14734_v33 = vcombine.low %v1104_v42, %v1108_v43  ;;  %v1151_v42 = vld [vmem:[#allocation5 + $0x1e10] sm:$0xff] }
 0x545   :  { %10781 = vmatpush1.bf16.msra.mxu0 %v14716_v31  ;;  %11297 = vmatpush1.bf16.msra.mxu1 %v14718_v28  ;;  %v1144_v31 = vld [vmem:[#allocation5 + $0x1dd8] sm:$0xff]  ;;  %v1155_v43 = vld [vmem:[#allocation5 + $0x1e30] sm:$0xff] }
 0x546   :  { %10782 = vmatprep.subr.bf16.mxu0 %v14725_v35  ;;  %11298 = vmatprep.subr.bf16.mxu1 %v14727_v36  ;;  %v1148_v28 = vld [vmem:[#allocation5 + $0x1df8] sm:$0xff]  ;;  %v14764_v35 = vcombine.low %v1135_v8, %v1139_v9  ;;  %v14766_v36 = vcombine.low %v1136_v11, %v1140_v12  ;;  %v14781_v48 = vcombine.high %v1151_v42, %v1155_v43  ;;  %v1183_v11 = vld [vmem:[#allocation5 + $0x1f10] sm:$0xff] }
 0x547   :  { %10812 = vmatprep.mubr.bf16.mxu0 %v16726_v45  ;;  %11328 = vmatprep.mubr.bf16.mxu1 %v16726_v45  ;;  %v14751_v45 = vcombine.high %v1120_v59, %v1124_v53  ;;  %v14775_v41 = vcombine.high %v1144_v31, %v1148_v28  ;;  %v1167_v59 = vld [vmem:[#allocation5 + $0x1e90] sm:$0xff]  ;;  %v14805_v8 = vcombine.high %v1175_v58, %v1179_v1 }
 0x548   :  { %v1171_v53 = vld [vmem:[#allocation5 + $0x1eb0] sm:$0xff] }
 0x549   :  { %10783 = vmatpush1.bf16.msra.mxu0 %v14724_v44  ;;  %11299 = vmatpush1.bf16.msra.mxu1 %v14726_v47  ;;  %v1152_v44 = vld [vmem:[#allocation5 + $0x1e18] sm:$0xff]  ;;  %v14797_v60 = vcombine.high %v1167_v59, %v1171_v53  ;;  %v1187_v12 = vld [vmem:[#allocation5 + $0x1f30] sm:$0xff] }
 0x54a   :  { %10784 = vmatprep.subr.bf16.mxu0 %v14733_v46  ;;  %11300 = vmatprep.subr.bf16.mxu1 %v14735_v0  ;;  %v1156_v47 = vld [vmem:[#allocation5 + $0x1e38] sm:$0xff]  ;;  %v14772_v46 = vcombine.low %v1143_v29, %v1147_v23  ;;  %v14774_v0 = vcombine.low %v1144_v31, %v1148_v28  ;;  %v14813_v29 = vcombine.high %v1183_v11, %v1187_v12  ;;  %v1191_v31 = vld [vmem:[#allocation5 + $0x1f50] sm:$0xff] }
 0x54b   :  { %v14783_v49 = vcombine.high %v1152_v44, %v1156_v47  ;;  %v1195_v28 = vld [vmem:[#allocation5 + $0x1f70] sm:$0xff] }
 0x54d   :  { %10785 = vmatpush1.bf16.msra.mxu0 %v14732_v52  ;;  %11301 = vmatpush1.bf16.msra.mxu1 %v14734_v33  ;;  %v1160_v52 = vld [vmem:[#allocation5 + $0x1e58] sm:$0xff] }
 0x54e   :  { %10786 = vmatprep.subr.bf16.mxu0 %v14741_v54  ;;  %11302 = vmatprep.subr.bf16.mxu1 %v14743_v55  ;;  %v1164_v33 = vld [vmem:[#allocation5 + $0x1e78] sm:$0xff]  ;;  %v14780_v54 = vcombine.low %v1151_v42, %v1155_v43  ;;  %v14782_v55 = vcombine.low %v1152_v44, %v1156_v47  ;;  %v14821_v42 = vcombine.high %v1191_v31, %v1195_v28  ;;  %v1199_v44 = vld [vmem:[#allocation5 + $0x1f90] sm:$0xff] }
 0x54f   :  { %v14791_v15 = vcombine.high %v1160_v52, %v1164_v33  ;;  %v1203_v47 = vld [vmem:[#allocation5 + $0x1fb0] sm:$0xff] }
 0x551   :  { %10787 = vmatpush1.bf16.msra.mxu0 %v14740_v10  ;;  %11303 = vmatpush1.bf16.msra.mxu1 %v14742_v56  ;;  %v1168_v10 = vld [vmem:[#allocation5 + $0x1e98] sm:$0xff] }
 0x552   :  { %10788 = vmatprep.subr.bf16.mxu0 %v14749_v57  ;;  %11304 = vmatprep.subr.bf16.mxu1 %v14751_v45  ;;  %v1172_v56 = vld [vmem:[#allocation5 + $0x1eb8] sm:$0xff]  ;;  %v14788_v57 = vcombine.low %v1159_v50, %v1163_v51  ;;  %v14790_v45 = vcombine.low %v1160_v52, %v1164_v33  ;;  %v14829_v50 = vcombine.high %v1199_v44, %v1203_v47  ;;  %v1207_v52 = vld [vmem:[#allocation5 + $0x1fd0] sm:$0xff] }
 0x553   :  { %v14799_v62 = vcombine.high %v1168_v10, %v1172_v56  ;;  %v1211_v33 = vld [vmem:[#allocation5 + $0x1ff0] sm:$0xff] }
 0x555   :  { %10789 = vmatpush1.bf16.msra.mxu0 %v14748_v38  ;;  %11305 = vmatpush1.bf16.msra.mxu1 %v14750_v6  ;;  %v1176_v38 = vld [vmem:[#allocation5 + $0x1ed8] sm:$0xff] }
 0x556   :  { %10790 = vmatprep.subr.bf16.mxu0 %v14757_v37  ;;  %11306 = vmatprep.subr.bf16.mxu1 %v14759_v25  ;;  %v1180_v6 = vld [vmem:[#allocation5 + $0x1ef8] sm:$0xff]  ;;  %v14796_v37 = vcombine.low %v1167_v59, %v1171_v53  ;;  %v14798_v25 = vcombine.low %v1168_v10, %v1172_v56  ;;  %v14837_v59 = vcombine.high %v1207_v52, %v1211_v33  ;;  %v1215_v10 = vld [vmem:[#allocation5 + $0x2010] sm:$0xff] }
 0x557   :  { %v14807_v9 = vcombine.high %v1176_v38, %v1180_v6  ;;  %v1219_v56 = vld [vmem:[#allocation5 + $0x2030] sm:$0xff] }
 0x559   :  { %10791 = vmatpush1.bf16.msra.mxu0 %v14756_v16  ;;  %11307 = vmatpush1.bf16.msra.mxu1 %v14758_v18  ;;  %v1184_v16 = vld [vmem:[#allocation5 + $0x1f18] sm:$0xff] }
 0x55a   :  { %10792 = vmatprep.subr.bf16.mxu0 %v14765_v19  ;;  %11308 = vmatprep.subr.bf16.mxu1 %v14767_v24  ;;  %v1188_v18 = vld [vmem:[#allocation5 + $0x1f38] sm:$0xff]  ;;  %v14804_v19 = vcombine.low %v1175_v58, %v1179_v1  ;;  %v14806_v24 = vcombine.low %v1176_v38, %v1180_v6  ;;  %v14845_v58 = vcombine.high %v1215_v10, %v1219_v56  ;;  %v1223_v38 = vld [vmem:[#allocation5 + $0x2050] sm:$0xff] }
 0x55b   :  { %v14815_v23 = vcombine.high %v1184_v16, %v1188_v18  ;;  %v1227_v6 = vld [vmem:[#allocation5 + $0x2070] sm:$0xff] }
 0x55d   :  { %10793 = vmatpush1.bf16.msra.mxu0 %v14764_v35  ;;  %11309 = vmatpush1.bf16.msra.mxu1 %v14766_v36  ;;  %v1192_v35 = vld [vmem:[#allocation5 + $0x1f58] sm:$0xff] }
 0x55e   :  { %10794 = vmatprep.subr.bf16.mxu0 %v14773_v40  ;;  %11310 = vmatprep.subr.bf16.mxu1 %v14775_v41  ;;  %v1196_v36 = vld [vmem:[#allocation5 + $0x1f78] sm:$0xff]  ;;  %v14812_v40 = vcombine.low %v1183_v11, %v1187_v12  ;;  %v14814_v41 = vcombine.low %v1184_v16, %v1188_v18  ;;  %v14853_v11 = vcombine.high %v1223_v38, %v1227_v6  ;;  %v1231_v16 = vld [vmem:[#allocation5 + $0x2090] sm:$0xff] }
 0x55f   :  { %v14823_v43 = vcombine.high %v1192_v35, %v1196_v36  ;;  %v1235_v18 = vld [vmem:[#allocation5 + $0x20b0] sm:$0xff] }
 0x561   :  { %10795 = vmatpush1.bf16.msra.mxu0 %v14772_v46  ;;  %11311 = vmatpush1.bf16.msra.mxu1 %v14774_v0  ;;  %v1200_v46 = vld [vmem:[#allocation5 + $0x1f98] sm:$0xff] }
 0x562   :  { %10796 = vmatprep.subr.bf16.mxu0 %v14781_v48  ;;  %11312 = vmatprep.subr.bf16.mxu1 %v14783_v49  ;;  %v1204_v0 = vld [vmem:[#allocation5 + $0x1fb8] sm:$0xff]  ;;  %v14820_v48 = vcombine.low %v1191_v31, %v1195_v28  ;;  %v14822_v49 = vcombine.low %v1192_v35, %v1196_v36  ;;  %v14861_v31 = vcombine.high %v1231_v16, %v1235_v18  ;;  %v1239_v35 = vld [vmem:[#allocation5 + $0x20d0] sm:$0xff] }
 0x563   :  { %v14831_v51 = vcombine.high %v1200_v46, %v1204_v0  ;;  %v1243_v36 = vld [vmem:[#allocation5 + $0x20f0] sm:$0xff] }
 0x565   :  { %10797 = vmatpush1.bf16.msra.mxu0 %v14780_v54  ;;  %11313 = vmatpush1.bf16.msra.mxu1 %v14782_v55  ;;  %v1208_v54 = vld [vmem:[#allocation5 + $0x1fd8] sm:$0xff] }
 0x566   :  { %10798 = vmatprep.subr.bf16.mxu0 %v14789_v26  ;;  %11314 = vmatprep.subr.bf16.mxu1 %v14791_v15  ;;  %v1212_v55 = vld [vmem:[#allocation5 + $0x1ff8] sm:$0xff]  ;;  %v14828_v26 = vcombine.low %v1199_v44, %v1203_v47  ;;  %v14830_v15 = vcombine.low %v1200_v46, %v1204_v0  ;;  %v1247_v47 = vld [vmem:[#allocation5 + $0x2110] sm:$0xff] }
 0x567   :  { %v14839_v53 = vcombine.high %v1208_v54, %v1212_v55  ;;  %v1251_v46 = vld [vmem:[#allocation5 + $0x2130] sm:$0xff]  ;;  %v1248_v0 = vld [vmem:[#allocation5 + $0x2118] sm:$0xff] }
 0x569   :  { %10799 = vmatpush1.bf16.msra.mxu0 %v14788_v57  ;;  %11315 = vmatpush1.bf16.msra.mxu1 %v14790_v45  ;;  %v1216_v57 = vld [vmem:[#allocation5 + $0x2018] sm:$0xff] }
 0x56a   :  { %10800 = vmatprep.subr.bf16.mxu0 %v14797_v60  ;;  %11316 = vmatprep.subr.bf16.mxu1 %v14799_v62  ;;  %v1220_v45 = vld [vmem:[#allocation5 + $0x2038] sm:$0xff]  ;;  %v14836_v60 = vcombine.low %v1207_v52, %v1211_v33  ;;  %v14838_v62 = vcombine.low %v1208_v54, %v1212_v55  ;;  %v1255_v52 = vld [vmem:[#allocation5 + $0x2150] sm:$0xff] }
 0x56b   :  { %v14847_v1 = vcombine.high %v1216_v57, %v1220_v45  ;;  %v1259_v33 = vld [vmem:[#allocation5 + $0x2170] sm:$0xff]  ;;  %v1256_v54 = vld [vmem:[#allocation5 + $0x2158] sm:$0xff] }
 0x56c   :  { %v1260_v55 = vld [vmem:[#allocation5 + $0x2178] sm:$0xff] }
 0x56d   :  { %10801 = vmatpush1.bf16.msra.mxu0 %v14796_v37  ;;  %11317 = vmatpush1.bf16.msra.mxu1 %v14798_v25  ;;  %v1224_v37 = vld [vmem:[#allocation5 + $0x2058] sm:$0xff] }
 0x56e   :  { %10802 = vmatprep.subr.bf16.mxu0 %v14805_v8  ;;  %11318 = vmatprep.subr.bf16.mxu1 %v14807_v9  ;;  %v1228_v25 = vld [vmem:[#allocation5 + $0x2078] sm:$0xff]  ;;  %v14844_v8 = vcombine.low %v1215_v10, %v1219_v56  ;;  %v14846_v9 = vcombine.low %v1216_v57, %v1220_v45  ;;  %v1263_v10 = vld [vmem:[#allocation5 + $0x2190] sm:$0xff] }
 0x56f   :  { %v14855_v12 = vcombine.high %v1224_v37, %v1228_v25  ;;  %v1267_v56 = vld [vmem:[#allocation5 + $0x21b0] sm:$0xff]  ;;  %v1264_v57 = vld [vmem:[#allocation5 + $0x2198] sm:$0xff] }
 0x570   :  { %v1268_v45 = vld [vmem:[#allocation5 + $0x21b8] sm:$0xff] }
 0x571   :  { %10803 = vmatpush1.bf16.msra.mxu0 %v14804_v19  ;;  %11319 = vmatpush1.bf16.msra.mxu1 %v14806_v24  ;;  %v1232_v19 = vld [vmem:[#allocation5 + $0x2098] sm:$0xff] }
 0x572   :  { %10804 = vmatprep.subr.bf16.mxu0 %v14813_v29  ;;  %11320 = vmatprep.subr.bf16.mxu1 %v14815_v23  ;;  %v1236_v24 = vld [vmem:[#allocation5 + $0x20b8] sm:$0xff]  ;;  %v14852_v29 = vcombine.low %v1223_v38, %v1227_v6  ;;  %v14854_v23 = vcombine.low %v1224_v37, %v1228_v25  ;;  %v1271_v38 = vld [vmem:[#allocation5 + $0x21d0] sm:$0xff] }
 0x573   :  { %v14863_v28 = vcombine.high %v1232_v19, %v1236_v24  ;;  %v1275_v6 = vld [vmem:[#allocation5 + $0x21f0] sm:$0xff]  ;;  %v1272_v37 = vld [vmem:[#allocation5 + $0x21d8] sm:$0xff] }
 0x574   :  { %v1276_v25 = vld [vmem:[#allocation5 + $0x21f8] sm:$0xff] }
 0x575   :  { %10805 = vmatpush1.bf16.msra.mxu0 %v14812_v40  ;;  %11321 = vmatpush1.bf16.msra.mxu1 %v14814_v41  ;;  %v1240_v40 = vld [vmem:[#allocation5 + $0x20d8] sm:$0xff] }
 0x576   :  { %10806 = vmatprep.subr.bf16.mxu0 %v14821_v42  ;;  %11322 = vmatprep.subr.bf16.mxu1 %v14823_v43  ;;  %v1244_v41 = vld [vmem:[#allocation5 + $0x20f8] sm:$0xff]  ;;  %v14860_v42 = vcombine.low %v1231_v16, %v1235_v18  ;;  %v14869_v43 = vcombine.high %v1239_v35, %v1243_v36  ;;  %v1279_v16 = vld [vmem:[#allocation5 + $0x2210] sm:$0xff] }
 0x577   :  { %v14871_v44 = vcombine.high %v1240_v40, %v1244_v41  ;;  %v1283_v18 = vld [vmem:[#allocation5 + $0x2230] sm:$0xff] }
 0x579   :  { %10807 = vmatpush1.bf16.msra.mxu0 %v14820_v48  ;;  %11323 = vmatpush1.bf16.msra.mxu1 %v14822_v49  ;;  %v1252_v48 = vld [vmem:[#allocation5 + $0x2138] sm:$0xff]  ;;  %v14868_v49 = vcombine.low %v1239_v35, %v1243_v36  ;;  %v1287_v35 = vld [vmem:[#allocation5 + $0x2250] sm:$0xff] }
 0x57a   :  { %10808 = vmatprep.subr.bf16.mxu0 %v14829_v50  ;;  %11324 = vmatprep.subr.bf16.mxu1 %v14831_v51  ;;  %v14870_v50 = vcombine.low %v1240_v40, %v1244_v41  ;;  %v14877_v51 = vcombine.high %v1247_v47, %v1251_v46  ;;  %v1291_v36 = vld [vmem:[#allocation5 + $0x2270] sm:$0xff]  ;;  %v1288_v40 = vld [vmem:[#allocation5 + $0x2258] sm:$0xff] }
 0x57b   :  { %v1292_v41 = vld [vmem:[#allocation5 + $0x2278] sm:$0xff] }
 0x57d   :  { %10809 = vmatpush1.bf16.msra.mxu0 %v14828_v26  ;;  %11325 = vmatpush1.bf16.msra.mxu1 %v14830_v15  ;;  %v14876_v26 = vcombine.low %v1247_v47, %v1251_v46  ;;  %v14878_v15 = vcombine.low %v1248_v0, %v1252_v48  ;;  %v1295_v47 = vld [vmem:[#allocation5 + $0x2290] sm:$0xff] }
 0x57e   :  { %10810 = vmatprep.subr.bf16.mxu0 %v14837_v59  ;;  %11326 = vmatprep.subr.bf16.mxu1 %v14839_v53  ;;  %v14885_v59 = vcombine.high %v1255_v52, %v1259_v33  ;;  %v14887_v53 = vcombine.high %v1256_v54, %v1260_v55  ;;  %v1299_v46 = vld [vmem:[#allocation5 + $0x22b0] sm:$0xff] }
 0x581   :  { %10811 = vmatpush1.bf16.msra.mxu0 %v14836_v60  ;;  %11327 = vmatpush1.bf16.msra.mxu1 %v14838_v62  ;;  %v14884_v60 = vcombine.low %v1255_v52, %v1259_v33  ;;  %v14886_v62 = vcombine.low %v1256_v54, %v1260_v55  ;;  %v1303_v52 = vld [vmem:[#allocation5 + $0x22d0] sm:$0xff]  ;;  %v1304_v54 = vld [vmem:[#allocation5 + $0x22d8] sm:$0xff] }
 0x582   :  { %10823 = vmatprep.subr.bf16.mxu0 %v14845_v58  ;;  %11339 = vmatprep.subr.bf16.mxu1 %v14847_v1  ;;  %v14893_v58 = vcombine.high %v1263_v10, %v1267_v56  ;;  %v14895_v1 = vcombine.high %v1264_v57, %v1268_v45  ;;  %v1307_v33 = vld [vmem:[#allocation5 + $0x22f0] sm:$0xff]  ;;  %v1308_v55 = vld [vmem:[#allocation5 + $0x22f8] sm:$0xff] }
 0x584   :  { %10813 = vmatmul.mubr.bf16.vlgmr.msra.gmra.mrb[4].mxu0 %v16732_v14  ;;  %11329 = vmatmul.mubr.bf16.vlgmr.msra.gmra.mrb[4].mxu1 %v16732_v14  ;;  %v14862_v14 = vcombine.low %v1232_v19, %v1236_v24  ;;  %v1280_v19 = vld [vmem:[#allocation5 + $0x2218] sm:$0xff] }
 0x585   :  { %10824 = vmatpush1.bf16.msra.mxu0 %v14844_v8  ;;  %11340 = vmatpush1.bf16.msra.mxu1 %v14846_v9  ;;  %v14892_v8 = vcombine.low %v1263_v10, %v1267_v56  ;;  %v14894_v9 = vcombine.low %v1264_v57, %v1268_v45  ;;  %v1284_v24 = vld [vmem:[#allocation5 + $0x2238] sm:$0xff]  ;;  %v1311_v10 = vld [vmem:[#allocation5 + $0x2310] sm:$0xff] }
 0x586   :  { %10825 = vmatprep.subr.bf16.mxu0 %v14853_v11  ;;  %11341 = vmatprep.subr.bf16.mxu1 %v14855_v12  ;;  %v14901_v11 = vcombine.high %v1271_v38, %v1275_v6  ;;  %v14903_v12 = vcombine.high %v1272_v37, %v1276_v25  ;;  %v1315_v56 = vld [vmem:[#allocation5 + $0x2330] sm:$0xff]  ;;  %v1312_v57 = vld [vmem:[#allocation5 + $0x2318] sm:$0xff] }
 0x587   :  { %10855 = vmatprep.mubr.bf16.mxu0 %v16734_v27  ;;  %11371 = vmatprep.mubr.bf16.mxu1 %v16734_v27  ;;  %v14879_v27 = vcombine.high %v1248_v0, %v1252_v48  ;;  %v1296_v0 = vld [vmem:[#allocation5 + $0x2298] sm:$0xff] }
 0x588   :  { %v1300_v48 = vld [vmem:[#allocation5 + $0x22b8] sm:$0xff] }
 0x589   :  { %10826 = vmatpush1.bf16.msra.mxu0 %v14852_v29  ;;  %11342 = vmatpush1.bf16.msra.mxu1 %v14854_v23  ;;  %v14900_v29 = vcombine.low %v1271_v38, %v1275_v6  ;;  %v14902_v23 = vcombine.low %v1272_v37, %v1276_v25  ;;  %v1316_v45 = vld [vmem:[#allocation5 + $0x2338] sm:$0xff]  ;;  %v1319_v38 = vld [vmem:[#allocation5 + $0x2350] sm:$0xff] }
 0x58a   :  { %10827 = vmatprep.subr.bf16.mxu0 %v14861_v31  ;;  %11343 = vmatprep.subr.bf16.mxu1 %v14863_v28  ;;  %v14909_v31 = vcombine.high %v1279_v16, %v1283_v18  ;;  %v14911_v28 = vcombine.high %v1280_v19, %v1284_v24  ;;  %v1323_v6 = vld [vmem:[#allocation5 + $0x2370] sm:$0xff]  ;;  %v1320_v37 = vld [vmem:[#allocation5 + $0x2358] sm:$0xff] }
 0x58b   :  { %v1324_v25 = vld [vmem:[#allocation5 + $0x2378] sm:$0xff] }
 0x58d   :  { %10828 = vmatpush1.bf16.msra.mxu0 %v14860_v42  ;;  %11344 = vmatpush1.bf16.msra.mxu1 %v14862_v14  ;;  %v14908_v42 = vcombine.low %v1279_v16, %v1283_v18  ;;  %v14910_v14 = vcombine.low %v1280_v19, %v1284_v24  ;;  %v1327_v16 = vld [vmem:[#allocation5 + $0x2390] sm:$0xff]  ;;  %v1328_v19 = vld [vmem:[#allocation5 + $0x2398] sm:$0xff] }
 0x58e   :  { %10829 = vmatprep.subr.bf16.mxu0 %v14869_v43  ;;  %11345 = vmatprep.subr.bf16.mxu1 %v14871_v44  ;;  %v14917_v43 = vcombine.high %v1287_v35, %v1291_v36  ;;  %v14919_v44 = vcombine.high %v1288_v40, %v1292_v41  ;;  %v1331_v18 = vld [vmem:[#allocation5 + $0x23b0] sm:$0xff]  ;;  %v1332_v24 = vld [vmem:[#allocation5 + $0x23b8] sm:$0xff] }
 0x591   :  { %10830 = vmatpush1.bf16.msra.mxu0 %v14868_v49  ;;  %11346 = vmatpush1.bf16.msra.mxu1 %v14870_v50  ;;  %v14916_v49 = vcombine.low %v1287_v35, %v1291_v36  ;;  %v14918_v50 = vcombine.low %v1288_v40, %v1292_v41  ;;  %v1335_v35 = vld [vmem:[#allocation5 + $0x23d0] sm:$0xff]  ;;  %v1336_v40 = vld [vmem:[#allocation5 + $0x23d8] sm:$0xff] }
 0x592   :  { %10831 = vmatprep.subr.bf16.mxu0 %v14877_v51  ;;  %11347 = vmatprep.subr.bf16.mxu1 %v14879_v27  ;;  %v14925_v51 = vcombine.high %v1295_v47, %v1299_v46  ;;  %v14927_v27 = vcombine.high %v1296_v0, %v1300_v48  ;;  %v1339_v36 = vld [vmem:[#allocation5 + $0x23f0] sm:$0xff]  ;;  %v1340_v41 = vld [vmem:[#allocation5 + $0x23f8] sm:$0xff] }
 0x595   :  { %10832 = vmatpush1.bf16.msra.mxu0 %v14876_v26  ;;  %11348 = vmatpush1.bf16.msra.mxu1 %v14878_v15  ;;  %v14924_v26 = vcombine.low %v1295_v47, %v1299_v46  ;;  %v14926_v15 = vcombine.low %v1296_v0, %v1300_v48  ;;  %v1343_v47 = vld [vmem:[#allocation5 + $0x2410] sm:$0xff]  ;;  %v1344_v0 = vld [vmem:[#allocation5 + $0x2418] sm:$0xff] }
 0x596   :  { %10833 = vmatprep.subr.bf16.mxu0 %v14885_v59  ;;  %11349 = vmatprep.subr.bf16.mxu1 %v14887_v53  ;;  %v14933_v59 = vcombine.high %v1303_v52, %v1307_v33  ;;  %v14935_v53 = vcombine.high %v1304_v54, %v1308_v55  ;;  %v1347_v46 = vld [vmem:[#allocation5 + $0x2430] sm:$0xff]  ;;  %v1348_v48 = vld [vmem:[#allocation5 + $0x2438] sm:$0xff] }
 0x599   :  { %10834 = vmatpush1.bf16.msra.mxu0 %v14884_v60  ;;  %11350 = vmatpush1.bf16.msra.mxu1 %v14886_v62  ;;  %v14932_v60 = vcombine.low %v1303_v52, %v1307_v33  ;;  %v14934_v62 = vcombine.low %v1304_v54, %v1308_v55  ;;  %v1351_v52 = vld [vmem:[#allocation5 + $0x2450] sm:$0xff]  ;;  %v1352_v54 = vld [vmem:[#allocation5 + $0x2458] sm:$0xff] }
 0x59a   :  { %10835 = vmatprep.subr.bf16.mxu0 %v14893_v58  ;;  %11351 = vmatprep.subr.bf16.mxu1 %v14895_v1  ;;  %v14941_v58 = vcombine.high %v1311_v10, %v1315_v56  ;;  %v14943_v1 = vcombine.high %v1312_v57, %v1316_v45  ;;  %v1355_v33 = vld [vmem:[#allocation5 + $0x2470] sm:$0xff]  ;;  %v1356_v55 = vld [vmem:[#allocation5 + $0x2478] sm:$0xff] }
 0x59d   :  { %10836 = vmatpush1.bf16.msra.mxu0 %v14892_v8  ;;  %11352 = vmatpush1.bf16.msra.mxu1 %v14894_v9  ;;  %v14940_v8 = vcombine.low %v1311_v10, %v1315_v56  ;;  %v14942_v9 = vcombine.low %v1312_v57, %v1316_v45  ;;  %v1359_v10 = vld [vmem:[#allocation5 + $0x2490] sm:$0xff]  ;;  %v1360_v57 = vld [vmem:[#allocation5 + $0x2498] sm:$0xff] }
 0x59e   :  { %10837 = vmatprep.subr.bf16.mxu0 %v14901_v11  ;;  %11353 = vmatprep.subr.bf16.mxu1 %v14903_v12  ;;  %v14949_v11 = vcombine.high %v1319_v38, %v1323_v6  ;;  %v14951_v12 = vcombine.high %v1320_v37, %v1324_v25  ;;  %v1363_v56 = vld [vmem:[#allocation5 + $0x24b0] sm:$0xff]  ;;  %v1364_v45 = vld [vmem:[#allocation5 + $0x24b8] sm:$0xff] }
 0x5a1   :  { %10838 = vmatpush1.bf16.msra.mxu0 %v14900_v29  ;;  %11354 = vmatpush1.bf16.msra.mxu1 %v14902_v23  ;;  %v14948_v29 = vcombine.low %v1319_v38, %v1323_v6  ;;  %v14950_v23 = vcombine.low %v1320_v37, %v1324_v25  ;;  %v1367_v38 = vld [vmem:[#allocation5 + $0x24d0] sm:$0xff]  ;;  %v1368_v37 = vld [vmem:[#allocation5 + $0x24d8] sm:$0xff] }
 0x5a2   :  { %10839 = vmatprep.subr.bf16.mxu0 %v14909_v31  ;;  %11355 = vmatprep.subr.bf16.mxu1 %v14911_v28  ;;  %v14957_v31 = vcombine.high %v1327_v16, %v1331_v18  ;;  %v14959_v28 = vcombine.high %v1328_v19, %v1332_v24  ;;  %v1371_v6 = vld [vmem:[#allocation5 + $0x24f0] sm:$0xff]  ;;  %v1372_v25 = vld [vmem:[#allocation5 + $0x24f8] sm:$0xff] }
 0x5a5   :  { %10840 = vmatpush1.bf16.msra.mxu0 %v14908_v42  ;;  %11356 = vmatpush1.bf16.msra.mxu1 %v14910_v14  ;;  %v14956_v42 = vcombine.low %v1327_v16, %v1331_v18  ;;  %v14958_v14 = vcombine.low %v1328_v19, %v1332_v24  ;;  %v1379_v16 = vld [vmem:[#allocation5 + $0x2530] sm:$0xff]  ;;  %v1376_v18 = vld [vmem:[#allocation5 + $0x2518] sm:$0xff]  ;;  %v14996_v24 = vcombine.low %v1367_v38, %v1371_v6 }
 0x5a6   :  { %10841 = vmatprep.subr.bf16.mxu0 %v14917_v43  ;;  %11357 = vmatprep.subr.bf16.mxu1 %v14919_v44  ;;  %v14965_v43 = vcombine.high %v1335_v35, %v1339_v36  ;;  %v14967_v44 = vcombine.high %v1336_v40, %v1340_v41  ;;  %v1380_v19 = vld [vmem:[#allocation5 + $0x2538] sm:$0xff] }
 0x5a9   :  { %10842 = vmatpush1.bf16.msra.mxu0 %v14916_v49  ;;  %11358 = vmatpush1.bf16.msra.mxu1 %v14918_v50  ;;  %v14964_v49 = vcombine.low %v1335_v35, %v1339_v36  ;;  %v14966_v50 = vcombine.low %v1336_v40, %v1340_v41  ;;  %v1384_v35 = vld [vmem:[#allocation5 + $0x2558] sm:$0xff]  ;;  %v15006_v41 = vcombine.low %v1376_v18, %v1380_v19 }
 0x5aa   :  { %10843 = vmatprep.subr.bf16.mxu0 %v14925_v51  ;;  %11359 = vmatprep.subr.bf16.mxu1 %v14927_v27  ;;  %v14973_v51 = vcombine.high %v1343_v47, %v1347_v46  ;;  %v14975_v27 = vcombine.high %v1344_v0, %v1348_v48  ;;  %v1388_v36 = vld [vmem:[#allocation5 + $0x2578] sm:$0xff] }
 0x5ad   :  { %10844 = vmatpush1.bf16.msra.mxu0 %v14924_v26  ;;  %11360 = vmatpush1.bf16.msra.mxu1 %v14926_v15  ;;  %v14972_v26 = vcombine.low %v1343_v47, %v1347_v46  ;;  %v14974_v15 = vcombine.low %v1344_v0, %v1348_v48  ;;  %v1392_v47 = vld [vmem:[#allocation5 + $0x2598] sm:$0xff]  ;;  %v15014_v48 = vcombine.low %v1384_v35, %v1388_v36 }
 0x5ae   :  { %10845 = vmatprep.subr.bf16.mxu0 %v14933_v59  ;;  %11361 = vmatprep.subr.bf16.mxu1 %v14935_v53  ;;  %v14981_v59 = vcombine.high %v1351_v52, %v1355_v33  ;;  %v14983_v53 = vcombine.high %v1352_v54, %v1356_v55  ;;  %v1396_v46 = vld [vmem:[#allocation5 + $0x25b8] sm:$0xff] }
 0x5b1   :  { %10846 = vmatpush1.bf16.msra.mxu0 %v14932_v60  ;;  %11362 = vmatpush1.bf16.msra.mxu1 %v14934_v62  ;;  %v14980_v60 = vcombine.low %v1351_v52, %v1355_v33  ;;  %v14982_v62 = vcombine.low %v1352_v54, %v1356_v55  ;;  %v1400_v52 = vld [vmem:[#allocation5 + $0x25d8] sm:$0xff]  ;;  %v15022_v55 = vcombine.low %v1392_v47, %v1396_v46 }
 0x5b2   :  { %10847 = vmatprep.subr.bf16.mxu0 %v14941_v58  ;;  %11363 = vmatprep.subr.bf16.mxu1 %v14943_v1  ;;  %v14989_v58 = vcombine.high %v1359_v10, %v1363_v56  ;;  %v14991_v1 = vcombine.high %v1360_v57, %v1364_v45  ;;  %v1404_v33 = vld [vmem:[#allocation5 + $0x25f8] sm:$0xff] }
 0x5b5   :  { %10848 = vmatpush1.bf16.msra.mxu0 %v14940_v8  ;;  %11364 = vmatpush1.bf16.msra.mxu1 %v14942_v9  ;;  %v14988_v8 = vcombine.low %v1359_v10, %v1363_v56  ;;  %v14997_v9 = vcombine.high %v1367_v38, %v1371_v6  ;;  %v1408_v10 = vld [vmem:[#allocation5 + $0x2618] sm:$0xff] }
 0x5b6   :  { %10849 = vmatprep.subr.bf16.mxu0 %v14949_v11  ;;  %11365 = vmatprep.subr.bf16.mxu1 %v14951_v12  ;;  %v14999_v11 = vcombine.high %v1368_v37, %v1372_v25  ;;  %v1375_v12 = vld [vmem:[#allocation5 + $0x2510] sm:$0xff]  ;;  %v1412_v56 = vld [vmem:[#allocation5 + $0x2638] sm:$0xff] }
 0x5b7   :  { %v15004_v40 = vcombine.low %v1375_v12, %v1379_v16  ;;  %v1416_v38 = vld [vmem:[#allocation5 + $0x2658] sm:$0xff] }
 0x5b8   :  { %v1420_v6 = vld [vmem:[#allocation5 + $0x2678] sm:$0xff] }
 0x5b9   :  { %10850 = vmatpush1.bf16.msra.mxu0 %v14948_v29  ;;  %11366 = vmatpush1.bf16.msra.mxu1 %v14950_v23  ;;  %v14998_v29 = vcombine.low %v1368_v37, %v1372_v25  ;;  %v15005_v23 = vcombine.high %v1375_v12, %v1379_v16  ;;  %v15038_v25 = vcombine.low %v1408_v10, %v1412_v56  ;;  %v1424_v12 = vld [vmem:[#allocation5 + $0x2698] sm:$0xff] }
 0x5ba   :  { %10851 = vmatprep.subr.bf16.mxu0 %v14957_v31  ;;  %11367 = vmatprep.subr.bf16.mxu1 %v14959_v28  ;;  %v1383_v31 = vld [vmem:[#allocation5 + $0x2550] sm:$0xff]  ;;  %v1428_v16 = vld [vmem:[#allocation5 + $0x26b8] sm:$0xff] }
 0x5bb   :  { %v1387_v28 = vld [vmem:[#allocation5 + $0x2570] sm:$0xff] }
 0x5bc   :  { %v15012_v0 = vcombine.low %v1383_v31, %v1387_v28 }
 0x5bd   :  { %10852 = vmatpush1.bf16.msra.mxu0 %v14956_v42  ;;  %11368 = vmatpush1.bf16.msra.mxu1 %v14958_v14  ;;  %v15013_v42 = vcombine.high %v1383_v31, %v1387_v28  ;;  %v15015_v14 = vcombine.high %v1384_v35, %v1388_v36  ;;  %v1432_v31 = vld [vmem:[#allocation5 + $0x26d8] sm:$0xff]  ;;  %v15054_v36 = vcombine.low %v1424_v12, %v1428_v16 }
 0x5be   :  { %10853 = vmatprep.subr.bf16.mxu0 %v14965_v43  ;;  %11369 = vmatprep.subr.bf16.mxu1 %v14967_v44  ;;  %v1391_v43 = vld [vmem:[#allocation5 + $0x2590] sm:$0xff]  ;;  %v1436_v28 = vld [vmem:[#allocation5 + $0x26f8] sm:$0xff] }
 0x5bf   :  { %v1395_v44 = vld [vmem:[#allocation5 + $0x25b0] sm:$0xff] }
 0x5c0   :  { %v15020_v54 = vcombine.low %v1391_v43, %v1395_v44 }
 0x5c1   :  { %10854 = vmatpush1.bf16.msra.mxu0 %v14964_v49  ;;  %11370 = vmatpush1.bf16.msra.mxu1 %v14966_v50  ;;  %v15021_v49 = vcombine.high %v1391_v43, %v1395_v44  ;;  %v15023_v50 = vcombine.high %v1392_v47, %v1396_v46  ;;  %v1440_v43 = vld [vmem:[#allocation5 + $0x2718] sm:$0xff]  ;;  %v15062_v46 = vcombine.low %v1432_v31, %v1436_v28 }
 0x5c2   :  { %10866 = vmatprep.subr.bf16.mxu0 %v14973_v51  ;;  %11382 = vmatprep.subr.bf16.mxu1 %v14975_v27  ;;  %v1399_v51 = vld [vmem:[#allocation5 + $0x25d0] sm:$0xff]  ;;  %v1444_v44 = vld [vmem:[#allocation5 + $0x2738] sm:$0xff] }
 0x5c3   :  { %v1403_v27 = vld [vmem:[#allocation5 + $0x25f0] sm:$0xff] }
 0x5c4   :  { %10856 = vmatmul.mubr.bf16.vlgmr.msra.gmra.mrb[4].mxu0 %v16740_v3  ;;  %11372 = vmatmul.mubr.bf16.vlgmr.msra.gmra.mrb[4].mxu1 %v16740_v3  ;;  %v14990_v3 = vcombine.low %v1360_v57, %v1364_v45  ;;  %v15028_v57 = vcombine.low %v1399_v51, %v1403_v27  ;;  %v15030_v45 = vcombine.low %v1400_v52, %v1404_v33 }
 0x5c5   :  { %10867 = vmatpush1.bf16.msra.mxu0 %v14972_v26  ;;  %11383 = vmatpush1.bf16.msra.mxu1 %v14974_v15  ;;  %v15029_v26 = vcombine.high %v1399_v51, %v1403_v27  ;;  %v15031_v15 = vcombine.high %v1400_v52, %v1404_v33  ;;  %v1448_v51 = vld [vmem:[#allocation5 + $0x2758] sm:$0xff]  ;;  %v15070_v33 = vcombine.low %v1440_v43, %v1444_v44 }
 0x5c6   :  { %10868 = vmatprep.subr.bf16.mxu0 %v14981_v59  ;;  %11384 = vmatprep.subr.bf16.mxu1 %v14983_v53  ;;  %v1407_v59 = vld [vmem:[#allocation5 + $0x2610] sm:$0xff]  ;;  %v1452_v27 = vld [vmem:[#allocation5 + $0x2778] sm:$0xff] }
 0x5c7   :  { %10898 = vmatprep.mubr.bf16.mxu0 %v16742_v17  ;;  %11414 = vmatprep.mubr.bf16.mxu1 %v16742_v17  ;;  %v15007_v17 = vcombine.high %v1376_v18, %v1380_v19  ;;  %v1411_v53 = vld [vmem:[#allocation5 + $0x2630] sm:$0xff]  ;;  %v15046_v19 = vcombine.low %v1416_v38, %v1420_v6 }
 0x5c8   :  { %v15036_v37 = vcombine.low %v1407_v59, %v1411_v53 }
 0x5c9   :  { %10869 = vmatpush1.bf16.msra.mxu0 %v14980_v60  ;;  %11385 = vmatpush1.bf16.msra.mxu1 %v14982_v62  ;;  %v15037_v60 = vcombine.high %v1407_v59, %v1411_v53  ;;  %v15039_v62 = vcombine.high %v1408_v10, %v1412_v56  ;;  %v1456_v59 = vld [vmem:[#allocation5 + $0x2798] sm:$0xff]  ;;  %v15078_v56 = vcombine.low %v1448_v51, %v1452_v27 }
 0x5ca   :  { %10870 = vmatprep.subr.bf16.mxu0 %v14989_v58  ;;  %11386 = vmatprep.subr.bf16.mxu1 %v14991_v1  ;;  %v1415_v58 = vld [vmem:[#allocation5 + $0x2650] sm:$0xff]  ;;  %v1460_v53 = vld [vmem:[#allocation5 + $0x27b8] sm:$0xff] }
 0x5cb   :  { %v1419_v1 = vld [vmem:[#allocation5 + $0x2670] sm:$0xff] }
 0x5cc   :  { %v15044_v18 = vcombine.low %v1415_v58, %v1419_v1 }
 0x5cd   :  { %10871 = vmatpush1.bf16.msra.mxu0 %v14988_v8  ;;  %11387 = vmatpush1.bf16.msra.mxu1 %v14990_v3  ;;  %v15045_v8 = vcombine.high %v1415_v58, %v1419_v1  ;;  %v15047_v3 = vcombine.high %v1416_v38, %v1420_v6  ;;  %v1464_v58 = vld [vmem:[#allocation5 + $0x27d8] sm:$0xff]  ;;  %v15086_v6 = vcombine.low %v1456_v59, %v1460_v53 }
 0x5ce   :  { %10872 = vmatprep.subr.bf16.mxu0 %v14997_v9  ;;  %11388 = vmatprep.subr.bf16.mxu1 %v14999_v11  ;;  %v1423_v9 = vld [vmem:[#allocation5 + $0x2690] sm:$0xff]  ;;  %v1468_v1 = vld [vmem:[#allocation5 + $0x27f8] sm:$0xff] }
 0x5cf   :  { %v1427_v11 = vld [vmem:[#allocation5 + $0x26b0] sm:$0xff] }
 0x5d0   :  { %v15052_v35 = vcombine.low %v1423_v9, %v1427_v11 }
 0x5d1   :  { %10873 = vmatpush1.bf16.msra.mxu0 %v14996_v24  ;;  %11389 = vmatpush1.bf16.msra.mxu1 %v14998_v29  ;;  %v15053_v24 = vcombine.high %v1423_v9, %v1427_v11  ;;  %v15055_v29 = vcombine.high %v1424_v12, %v1428_v16  ;;  %v1472_v9 = vld [vmem:[#allocation5 + $0x2818] sm:$0xff]  ;;  %v15094_v16 = vcombine.low %v1464_v58, %v1468_v1 }
 0x5d2   :  { %10874 = vmatprep.subr.bf16.mxu0 %v15005_v23  ;;  %11390 = vmatprep.subr.bf16.mxu1 %v15007_v17  ;;  %v1431_v23 = vld [vmem:[#allocation5 + $0x26d0] sm:$0xff]  ;;  %v1476_v11 = vld [vmem:[#allocation5 + $0x2838] sm:$0xff] }
 0x5d3   :  { %v1435_v17 = vld [vmem:[#allocation5 + $0x26f0] sm:$0xff] }
 0x5d4   :  { %v15060_v47 = vcombine.low %v1431_v23, %v1435_v17 }
 0x5d5   :  { %10875 = vmatpush1.bf16.msra.mxu0 %v15004_v40  ;;  %11391 = vmatpush1.bf16.msra.mxu1 %v15006_v41  ;;  %v15061_v40 = vcombine.high %v1431_v23, %v1435_v17  ;;  %v15063_v41 = vcombine.high %v1432_v31, %v1436_v28  ;;  %v1480_v23 = vld [vmem:[#allocation5 + $0x2858] sm:$0xff]  ;;  %v15102_v28 = vcombine.low %v1472_v9, %v1476_v11 }
 0x5d6   :  { %10876 = vmatprep.subr.bf16.mxu0 %v15013_v42  ;;  %11392 = vmatprep.subr.bf16.mxu1 %v15015_v14  ;;  %v1439_v42 = vld [vmem:[#allocation5 + $0x2710] sm:$0xff]  ;;  %v1484_v17 = vld [vmem:[#allocation5 + $0x2878] sm:$0xff] }
 0x5d7   :  { %v1443_v14 = vld [vmem:[#allocation5 + $0x2730] sm:$0xff] }
 0x5d8   :  { %v15068_v52 = vcombine.low %v1439_v42, %v1443_v14 }
 0x5d9   :  { %10877 = vmatpush1.bf16.msra.mxu0 %v15012_v0  ;;  %11393 = vmatpush1.bf16.msra.mxu1 %v15014_v48  ;;  %v15069_v0 = vcombine.high %v1439_v42, %v1443_v14  ;;  %v15071_v48 = vcombine.high %v1440_v43, %v1444_v44  ;;  %v1488_v42 = vld [vmem:[#allocation5 + $0x2898] sm:$0xff]  ;;  %v15110_v44 = vcombine.low %v1480_v23, %v1484_v17 }
 0x5da   :  { %10878 = vmatprep.subr.bf16.mxu0 %v15021_v49  ;;  %11394 = vmatprep.subr.bf16.mxu1 %v15023_v50  ;;  %v1447_v49 = vld [vmem:[#allocation5 + $0x2750] sm:$0xff]  ;;  %v1492_v14 = vld [vmem:[#allocation5 + $0x28b8] sm:$0xff] }
 0x5db   :  { %v1451_v50 = vld [vmem:[#allocation5 + $0x2770] sm:$0xff] }
 0x5dc   :  { %v15076_v10 = vcombine.low %v1447_v49, %v1451_v50 }
 0x5dd   :  { %10879 = vmatpush1.bf16.msra.mxu0 %v15020_v54  ;;  %11395 = vmatpush1.bf16.msra.mxu1 %v15022_v55  ;;  %v15077_v54 = vcombine.high %v1447_v49, %v1451_v50  ;;  %v15079_v55 = vcombine.high %v1448_v51, %v1452_v27  ;;  %v1496_v49 = vld [vmem:[#allocation5 + $0x28d8] sm:$0xff] }
 0x5de   :  { %10880 = vmatprep.subr.bf16.mxu0 %v15029_v26  ;;  %11396 = vmatprep.subr.bf16.mxu1 %v15031_v15  ;;  %v1455_v26 = vld [vmem:[#allocation5 + $0x2790] sm:$0xff]  ;;  %v1500_v50 = vld [vmem:[#allocation5 + $0x28f8] sm:$0xff] }
 0x5df   :  { %v1459_v15 = vld [vmem:[#allocation5 + $0x27b0] sm:$0xff] }
 0x5e0   :  { %v15084_v38 = vcombine.low %v1455_v26, %v1459_v15 }
 0x5e1   :  { %10881 = vmatpush1.bf16.msra.mxu0 %v15028_v57  ;;  %11397 = vmatpush1.bf16.msra.mxu1 %v15030_v45  ;;  %v15085_v57 = vcombine.high %v1455_v26, %v1459_v15  ;;  %v15087_v45 = vcombine.high %v1456_v59, %v1460_v53  ;;  %v1508_v26 = vld [vmem:[#allocation5 + $0x2938] sm:$0xff]  ;;  %v15126_v59 = vcombine.low %v1496_v49, %v1500_v50 }
 0x5e2   :  { %10882 = vmatprep.subr.bf16.mxu0 %v15037_v60  ;;  %11398 = vmatprep.subr.bf16.mxu1 %v15039_v62  ;;  %v1463_v60 = vld [vmem:[#allocation5 + $0x27d0] sm:$0xff] }
 0x5e3   :  { %v1467_v62 = vld [vmem:[#allocation5 + $0x27f0] sm:$0xff] }
 0x5e4   :  { %v15092_v12 = vcombine.low %v1463_v60, %v1467_v62 }
 0x5e5   :  { %10883 = vmatpush1.bf16.msra.mxu0 %v15036_v37  ;;  %11399 = vmatpush1.bf16.msra.mxu1 %v15038_v25  ;;  %v15093_v37 = vcombine.high %v1463_v60, %v1467_v62  ;;  %v15095_v25 = vcombine.high %v1464_v58, %v1468_v1 }
 0x5e6   :  { %10884 = vmatprep.subr.bf16.mxu0 %v15045_v8  ;;  %11400 = vmatprep.subr.bf16.mxu1 %v15047_v3  ;;  %v1471_v8 = vld [vmem:[#allocation5 + $0x2810] sm:$0xff] }
 0x5e7   :  { %v1475_v3 = vld [vmem:[#allocation5 + $0x2830] sm:$0xff] }
 0x5e8   :  { %v15100_v31 = vcombine.low %v1471_v8, %v1475_v3 }
 0x5e9   :  { %10885 = vmatpush1.bf16.msra.mxu0 %v15044_v18  ;;  %11401 = vmatpush1.bf16.msra.mxu1 %v15046_v19  ;;  %v15101_v18 = vcombine.high %v1471_v8, %v1475_v3  ;;  %v15103_v19 = vcombine.high %v1472_v9, %v1476_v11 }
 0x5ea   :  { %10886 = vmatprep.subr.bf16.mxu0 %v15053_v24  ;;  %11402 = vmatprep.subr.bf16.mxu1 %v15055_v29  ;;  %v1479_v24 = vld [vmem:[#allocation5 + $0x2850] sm:$0xff] }
 0x5eb   :  { %v1483_v29 = vld [vmem:[#allocation5 + $0x2870] sm:$0xff] }
 0x5ec   :  { %v15108_v43 = vcombine.low %v1479_v24, %v1483_v29 }
 0x5ed   :  { %10887 = vmatpush1.bf16.msra.mxu0 %v15052_v35  ;;  %11403 = vmatpush1.bf16.msra.mxu1 %v15054_v36  ;;  %v15109_v35 = vcombine.high %v1479_v24, %v1483_v29  ;;  %v15111_v36 = vcombine.high %v1480_v23, %v1484_v17 }
 0x5ee   :  { %10888 = vmatprep.subr.bf16.mxu0 %v15061_v40  ;;  %11404 = vmatprep.subr.bf16.mxu1 %v15063_v41  ;;  %v1487_v40 = vld [vmem:[#allocation5 + $0x2890] sm:$0xff] }
 0x5ef   :  { %v1491_v41 = vld [vmem:[#allocation5 + $0x28b0] sm:$0xff] }
 0x5f0   :  { %v15116_v51 = vcombine.low %v1487_v40, %v1491_v41 }
 0x5f1   :  { %10889 = vmatpush1.bf16.msra.mxu0 %v15060_v47  ;;  %11405 = vmatpush1.bf16.msra.mxu1 %v15062_v46  ;;  %v15117_v47 = vcombine.high %v1487_v40, %v1491_v41  ;;  %v15119_v46 = vcombine.high %v1488_v42, %v1492_v14 }
 0x5f2   :  { %10890 = vmatprep.subr.bf16.mxu0 %v15069_v0  ;;  %11406 = vmatprep.subr.bf16.mxu1 %v15071_v48  ;;  %v1495_v0 = vld [vmem:[#allocation5 + $0x28d0] sm:$0xff] }
 0x5f3   :  { %v1499_v48 = vld [vmem:[#allocation5 + $0x28f0] sm:$0xff] }
 0x5f4   :  { %v15125_v27 = vcombine.high %v1495_v0, %v1499_v48  ;;  %v15124_v15 = vcombine.low %v1495_v0, %v1499_v48 }
 0x5f5   :  { %10891 = vmatpush1.bf16.msra.mxu0 %v15068_v52  ;;  %11407 = vmatpush1.bf16.msra.mxu1 %v15070_v33  ;;  %v15127_v52 = vcombine.high %v1496_v49, %v1500_v50  ;;  %v1503_v33 = vld [vmem:[#allocation5 + $0x2910] sm:$0xff] }
 0x5f6   :  { %10892 = vmatprep.subr.bf16.mxu0 %v15077_v54  ;;  %11408 = vmatprep.subr.bf16.mxu1 %v15079_v55  ;;  %v1507_v54 = vld [vmem:[#allocation5 + $0x2930] sm:$0xff]  ;;  %v1504_v55 = vld [vmem:[#allocation5 + $0x2918] sm:$0xff] }
 0x5f7   :  { %v15133_v53 = vcombine.high %v1503_v33, %v1507_v54  ;;  %v15132_v60 = vcombine.low %v1503_v33, %v1507_v54  ;;  %v15134_v62 = vcombine.low %v1504_v55, %v1508_v26 }
 0x5f9   :  { %10893 = vmatpush1.bf16.msra.mxu0 %v15076_v10  ;;  %11409 = vmatpush1.bf16.msra.mxu1 %v15078_v56  ;;  %v1511_v10 = vld [vmem:[#allocation5 + $0x2950] sm:$0xff] }
 0x5fa   :  { %10894 = vmatprep.subr.bf16.mxu0 %v15085_v57  ;;  %11410 = vmatprep.subr.bf16.mxu1 %v15087_v45  ;;  %v1515_v56 = vld [vmem:[#allocation5 + $0x2970] sm:$0xff]  ;;  %v1512_v57 = vld [vmem:[#allocation5 + $0x2958] sm:$0xff] }
 0x5fb   :  { %v1516_v45 = vld [vmem:[#allocation5 + $0x2978] sm:$0xff]  ;;  %v15141_v58 = vcombine.high %v1511_v10, %v1515_v56  ;;  %v15140_v8 = vcombine.low %v1511_v10, %v1515_v56 }
 0x5fc   :  { %v15143_v1 = vcombine.high %v1512_v57, %v1516_v45  ;;  %v15142_v3 = vcombine.low %v1512_v57, %v1516_v45 }
 0x5fd   :  { %10895 = vmatpush1.bf16.msra.mxu0 %v15084_v38  ;;  %11411 = vmatpush1.bf16.msra.mxu1 %v15086_v6  ;;  %v1519_v38 = vld [vmem:[#allocation5 + $0x2990] sm:$0xff] }
 0x5fe   :  { %10896 = vmatprep.subr.bf16.mxu0 %v15093_v37  ;;  %11412 = vmatprep.subr.bf16.mxu1 %v15095_v25  ;;  %v1523_v6 = vld [vmem:[#allocation5 + $0x29b0] sm:$0xff]  ;;  %v1520_v37 = vld [vmem:[#allocation5 + $0x2998] sm:$0xff] }
 0x5ff   :  { %v1524_v25 = vld [vmem:[#allocation5 + $0x29b8] sm:$0xff]  ;;  %v15149_v9 = vcombine.high %v1519_v38, %v1523_v6  ;;  %v15148_v24 = vcombine.low %v1519_v38, %v1523_v6 }
 0x600   :  { %v15151_v11 = vcombine.high %v1520_v37, %v1524_v25  ;;  %v15150_v29 = vcombine.low %v1520_v37, %v1524_v25 }
 0x601   :  { %10897 = vmatpush1.bf16.msra.mxu0 %v15092_v12  ;;  %11413 = vmatpush1.bf16.msra.mxu1 %v15094_v16  ;;  %v1527_v12 = vld [vmem:[#allocation5 + $0x29d0] sm:$0xff] }
 0x602   :  { %10909 = vmatprep.subr.bf16.mxu0 %v15101_v18  ;;  %11425 = vmatprep.subr.bf16.mxu1 %v15103_v19  ;;  %v1531_v16 = vld [vmem:[#allocation5 + $0x29f0] sm:$0xff]  ;;  %v1528_v18 = vld [vmem:[#allocation5 + $0x29d8] sm:$0xff] }
 0x603   :  { %v1532_v19 = vld [vmem:[#allocation5 + $0x29f8] sm:$0xff]  ;;  %v15157_v23 = vcombine.high %v1527_v12, %v1531_v16  ;;  %v15156_v40 = vcombine.low %v1527_v12, %v1531_v16 }
 0x604   :  { %10899 = vmatmul.mubr.bf16.vlgmr.msra.gmra.mrb[4].mxu0 %v16748_v63  ;;  %11415 = vmatmul.mubr.bf16.vlgmr.msra.gmra.mrb[4].mxu1 %v16748_v63  ;;  %v15118_v63 = vcombine.low %v1488_v42, %v1492_v14  ;;  %v15159_v17 = vcombine.high %v1528_v18, %v1532_v19  ;;  %v15158_v41 = vcombine.low %v1528_v18, %v1532_v19 }
 0x605   :  { %10910 = vmatpush1.bf16.msra.mxu0 %v15100_v31  ;;  %11426 = vmatpush1.bf16.msra.mxu1 %v15102_v28  ;;  %v1535_v31 = vld [vmem:[#allocation5 + $0x2a10] sm:$0xff] }
 0x606   :  { %10911 = vmatprep.subr.bf16.mxu0 %v15109_v35  ;;  %11427 = vmatprep.subr.bf16.mxu1 %v15111_v36  ;;  %v1539_v28 = vld [vmem:[#allocation5 + $0x2a30] sm:$0xff]  ;;  %v1536_v35 = vld [vmem:[#allocation5 + $0x2a18] sm:$0xff] }
 0x607   :  { %10941 = vmatprep.mubr.bf16.mxu0 %v16750_v13  ;;  %11457 = vmatprep.mubr.bf16.mxu1 %v16750_v13  ;;  %v15135_v13 = vcombine.high %v1504_v55, %v1508_v26  ;;  %v1540_v36 = vld [vmem:[#allocation5 + $0x2a38] sm:$0xff]  ;;  %v15165_v42 = vcombine.high %v1535_v31, %v1539_v28  ;;  %v15164_v0 = vcombine.low %v1535_v31, %v1539_v28 }
 0x608   :  { %v15167_v14 = vcombine.high %v1536_v35, %v1540_v36  ;;  %v15166_v48 = vcombine.low %v1536_v35, %v1540_v36 }
 0x609   :  { %10912 = vmatpush1.bf16.msra.mxu0 %v15108_v43  ;;  %11428 = vmatpush1.bf16.msra.mxu1 %v15110_v44  ;;  %v1543_v43 = vld [vmem:[#allocation5 + $0x2a50] sm:$0xff] }
 0x60a   :  { %10913 = vmatprep.subr.bf16.mxu0 %v15117_v47  ;;  %11429 = vmatprep.subr.bf16.mxu1 %v15119_v46  ;;  %v1547_v44 = vld [vmem:[#allocation5 + $0x2a70] sm:$0xff]  ;;  %v1544_v47 = vld [vmem:[#allocation5 + $0x2a58] sm:$0xff] }
 0x60b   :  { %v1548_v46 = vld [vmem:[#allocation5 + $0x2a78] sm:$0xff]  ;;  %v15173_v49 = vcombine.high %v1543_v43, %v1547_v44  ;;  %v15172_v33 = vcombine.low %v1543_v43, %v1547_v44 }
 0x60c   :  { %v15175_v50 = vcombine.high %v1544_v47, %v1548_v46  ;;  %v15174_v54 = vcombine.low %v1544_v47, %v1548_v46 }
 0x60d   :  { %10914 = vmatpush1.bf16.msra.mxu0 %v15116_v51  ;;  %11430 = vmatpush1.bf16.msra.mxu1 %v15118_v63  ;;  %v1551_v51 = vld [vmem:[#allocation5 + $0x2a90] sm:$0xff] }
 0x60e   :  { %10915 = vmatprep.subr.bf16.mxu0 %v15125_v27  ;;  %11431 = vmatprep.subr.bf16.mxu1 %v15127_v52  ;;  %v1555_v63 = vld [vmem:[#allocation5 + $0x2ab0] sm:$0xff]  ;;  %v1552_v27 = vld [vmem:[#allocation5 + $0x2a98] sm:$0xff] }
 0x60f   :  { %v1556_v52 = vld [vmem:[#allocation5 + $0x2ab8] sm:$0xff]  ;;  %v15181_v55 = vcombine.high %v1551_v51, %v1555_v63  ;;  %v15180_v10 = vcombine.low %v1551_v51, %v1555_v63 }
 0x610   :  { %v15183_v26 = vcombine.high %v1552_v27, %v1556_v52  ;;  %v15182_v56 = vcombine.low %v1552_v27, %v1556_v52 }
 0x611   :  { %10916 = vmatpush1.bf16.msra.mxu0 %v15124_v15  ;;  %11432 = vmatpush1.bf16.msra.mxu1 %v15126_v59  ;;  %v1559_v15 = vld [vmem:[#allocation5 + $0x2ad0] sm:$0xff] }
 0x612   :  { %10917 = vmatprep.subr.bf16.mxu0 %v15133_v53  ;;  %11433 = vmatprep.subr.bf16.mxu1 %v15135_v13  ;;  %v1563_v59 = vld [vmem:[#allocation5 + $0x2af0] sm:$0xff]  ;;  %v1560_v53 = vld [vmem:[#allocation5 + $0x2ad8] sm:$0xff] }
 0x613   :  { %v1564_v13 = vld [vmem:[#allocation5 + $0x2af8] sm:$0xff]  ;;  %v15189_v57 = vcombine.high %v1559_v15, %v1563_v59  ;;  %v15188_v38 = vcombine.low %v1559_v15, %v1563_v59 }
 0x614   :  { %v15191_v45 = vcombine.high %v1560_v53, %v1564_v13  ;;  %v15190_v6 = vcombine.low %v1560_v53, %v1564_v13 }
 0x615   :  { %10918 = vmatpush1.bf16.msra.mxu0 %v15132_v60  ;;  %11434 = vmatpush1.bf16.msra.mxu1 %v15134_v62  ;;  %v1567_v60 = vld [vmem:[#allocation5 + $0x2b10] sm:$0xff] }
 0x616   :  { %10919 = vmatprep.subr.bf16.mxu0 %v15141_v58  ;;  %11435 = vmatprep.subr.bf16.mxu1 %v15143_v1  ;;  %v1571_v62 = vld [vmem:[#allocation5 + $0x2b30] sm:$0xff]  ;;  %v1568_v58 = vld [vmem:[#allocation5 + $0x2b18] sm:$0xff] }
 0x617   :  { %v1572_v1 = vld [vmem:[#allocation5 + $0x2b38] sm:$0xff]  ;;  %v15197_v37 = vcombine.high %v1567_v60, %v1571_v62  ;;  %v15196_v12 = vcombine.low %v1567_v60, %v1571_v62 }
 0x618   :  { %v15199_v25 = vcombine.high %v1568_v58, %v1572_v1  ;;  %v15198_v16 = vcombine.low %v1568_v58, %v1572_v1 }
 0x619   :  { %10920 = vmatpush1.bf16.msra.mxu0 %v15140_v8  ;;  %11436 = vmatpush1.bf16.msra.mxu1 %v15142_v3  ;;  %v1575_v8 = vld [vmem:[#allocation5 + $0x2b50] sm:$0xff] }
 0x61a   :  { %10921 = vmatprep.subr.bf16.mxu0 %v15149_v9  ;;  %11437 = vmatprep.subr.bf16.mxu1 %v15151_v11  ;;  %v1579_v3 = vld [vmem:[#allocation5 + $0x2b70] sm:$0xff]  ;;  %v1576_v9 = vld [vmem:[#allocation5 + $0x2b58] sm:$0xff] }
 0x61b   :  { %v1580_v11 = vld [vmem:[#allocation5 + $0x2b78] sm:$0xff]  ;;  %v15205_v18 = vcombine.high %v1575_v8, %v1579_v3  ;;  %v15204_v31 = vcombine.low %v1575_v8, %v1579_v3 }
 0x61c   :  { %v15207_v19 = vcombine.high %v1576_v9, %v1580_v11  ;;  %v15206_v28 = vcombine.low %v1576_v9, %v1580_v11  ;;  %v1631_v11 = vld [vmem:[#allocation5 + $0x2d10] sm:$0xff] }
 0x61d   :  { %10922 = vmatpush1.bf16.msra.mxu0 %v15148_v24  ;;  %11438 = vmatpush1.bf16.msra.mxu1 %v15150_v29  ;;  %v1583_v24 = vld [vmem:[#allocation5 + $0x2b90] sm:$0xff] }
 0x61e   :  { %10923 = vmatprep.subr.bf16.mxu0 %v15157_v23  ;;  %11439 = vmatprep.subr.bf16.mxu1 %v15159_v17  ;;  %v1587_v29 = vld [vmem:[#allocation5 + $0x2bb0] sm:$0xff]  ;;  %v1584_v23 = vld [vmem:[#allocation5 + $0x2b98] sm:$0xff] }
 0x61f   :  { %v1588_v17 = vld [vmem:[#allocation5 + $0x2bb8] sm:$0xff]  ;;  %v15213_v35 = vcombine.high %v1583_v24, %v1587_v29  ;;  %v15212_v43 = vcombine.low %v1583_v24, %v1587_v29 }
 0x620   :  { %v15215_v36 = vcombine.high %v1584_v23, %v1588_v17  ;;  %v15214_v44 = vcombine.low %v1584_v23, %v1588_v17  ;;  %v1639_v23 = vld [vmem:[#allocation5 + $0x2d50] sm:$0xff] }
 0x621   :  { %10924 = vmatpush1.bf16.msra.mxu0 %v15156_v40  ;;  %11440 = vmatpush1.bf16.msra.mxu1 %v15158_v41  ;;  %v1591_v40 = vld [vmem:[#allocation5 + $0x2bd0] sm:$0xff] }
 0x622   :  { %10925 = vmatprep.subr.bf16.mxu0 %v15165_v42  ;;  %11441 = vmatprep.subr.bf16.mxu1 %v15167_v14  ;;  %v1595_v41 = vld [vmem:[#allocation5 + $0x2bf0] sm:$0xff]  ;;  %v1592_v42 = vld [vmem:[#allocation5 + $0x2bd8] sm:$0xff] }
 0x623   :  { %v1596_v14 = vld [vmem:[#allocation5 + $0x2bf8] sm:$0xff]  ;;  %v15221_v47 = vcombine.high %v1591_v40, %v1595_v41  ;;  %v15220_v51 = vcombine.low %v1591_v40, %v1595_v41  ;;  %v1643_v17 = vld [vmem:[#allocation5 + $0x2d70] sm:$0xff] }
 0x624   :  { %v15223_v46 = vcombine.high %v1592_v42, %v1596_v14  ;;  %v15222_v63 = vcombine.low %v1592_v42, %v1596_v14  ;;  %v15269_v40 = vcombine.high %v1639_v23, %v1643_v17  ;;  %v1647_v42 = vld [vmem:[#allocation5 + $0x2d90] sm:$0xff] }
 0x625   :  { %10926 = vmatpush1.bf16.msra.mxu0 %v15164_v0  ;;  %11442 = vmatpush1.bf16.msra.mxu1 %v15166_v48  ;;  %v1599_v0 = vld [vmem:[#allocation5 + $0x2c10] sm:$0xff] }
 0x626   :  { %10927 = vmatprep.subr.bf16.mxu0 %v15173_v49  ;;  %11443 = vmatprep.subr.bf16.mxu1 %v15175_v50  ;;  %v1603_v48 = vld [vmem:[#allocation5 + $0x2c30] sm:$0xff]  ;;  %v1600_v49 = vld [vmem:[#allocation5 + $0x2c18] sm:$0xff] }
 0x627   :  { %v1604_v50 = vld [vmem:[#allocation5 + $0x2c38] sm:$0xff]  ;;  %v15229_v27 = vcombine.high %v1599_v0, %v1603_v48  ;;  %v15228_v15 = vcombine.low %v1599_v0, %v1603_v48  ;;  %v1651_v14 = vld [vmem:[#allocation5 + $0x2db0] sm:$0xff] }
 0x628   :  { %v15231_v52 = vcombine.high %v1600_v49, %v1604_v50  ;;  %v15230_v59 = vcombine.low %v1600_v49, %v1604_v50  ;;  %v15277_v0 = vcombine.high %v1647_v42, %v1651_v14  ;;  %v1655_v49 = vld [vmem:[#allocation5 + $0x2dd0] sm:$0xff] }
 0x629   :  { %10928 = vmatpush1.bf16.msra.mxu0 %v15172_v33  ;;  %11444 = vmatpush1.bf16.msra.mxu1 %v15174_v54  ;;  %v1607_v33 = vld [vmem:[#allocation5 + $0x2c50] sm:$0xff] }
 0x62a   :  { %10929 = vmatprep.subr.bf16.mxu0 %v15181_v55  ;;  %11445 = vmatprep.subr.bf16.mxu1 %v15183_v26  ;;  %v1611_v54 = vld [vmem:[#allocation5 + $0x2c70] sm:$0xff]  ;;  %v1608_v55 = vld [vmem:[#allocation5 + $0x2c58] sm:$0xff] }
 0x62b   :  { %v1612_v26 = vld [vmem:[#allocation5 + $0x2c78] sm:$0xff]  ;;  %v15237_v53 = vcombine.high %v1607_v33, %v1611_v54  ;;  %v15236_v60 = vcombine.low %v1607_v33, %v1611_v54  ;;  %v1659_v50 = vld [vmem:[#allocation5 + $0x2df0] sm:$0xff] }
 0x62c   :  { %v15239_v13 = vcombine.high %v1608_v55, %v1612_v26  ;;  %v15238_v62 = vcombine.low %v1608_v55, %v1612_v26  ;;  %v15285_v33 = vcombine.high %v1655_v49, %v1659_v50  ;;  %v1663_v55 = vld [vmem:[#allocation5 + $0x2e10] sm:$0xff] }
 0x62d   :  { %10930 = vmatpush1.bf16.msra.mxu0 %v15180_v10  ;;  %11446 = vmatpush1.bf16.msra.mxu1 %v15182_v56  ;;  %v1615_v10 = vld [vmem:[#allocation5 + $0x2c90] sm:$0xff] }
 0x62e   :  { %10931 = vmatprep.subr.bf16.mxu0 %v15189_v57  ;;  %11447 = vmatprep.subr.bf16.mxu1 %v15191_v45  ;;  %v1619_v56 = vld [vmem:[#allocation5 + $0x2cb0] sm:$0xff]  ;;  %v1616_v57 = vld [vmem:[#allocation5 + $0x2c98] sm:$0xff] }
 0x62f   :  { %v1620_v45 = vld [vmem:[#allocation5 + $0x2cb8] sm:$0xff]  ;;  %v15245_v58 = vcombine.high %v1615_v10, %v1619_v56  ;;  %v15244_v8 = vcombine.low %v1615_v10, %v1619_v56  ;;  %v1667_v26 = vld [vmem:[#allocation5 + $0x2e30] sm:$0xff] }
 0x630   :  { %v15247_v1 = vcombine.high %v1616_v57, %v1620_v45  ;;  %v15293_v10 = vcombine.high %v1663_v55, %v1667_v26 }
 0x631   :  { %10932 = vmatpush1.bf16.msra.mxu0 %v15188_v38  ;;  %11448 = vmatpush1.bf16.msra.mxu1 %v15190_v6  ;;  %v1623_v38 = vld [vmem:[#allocation5 + $0x2cd0] sm:$0xff] }
 0x632   :  { %10933 = vmatprep.subr.bf16.mxu0 %v15197_v37  ;;  %11449 = vmatprep.subr.bf16.mxu1 %v15199_v25  ;;  %v1627_v6 = vld [vmem:[#allocation5 + $0x2cf0] sm:$0xff]  ;;  %v1624_v37 = vld [vmem:[#allocation5 + $0x2cd8] sm:$0xff] }
 0x633   :  { %v1628_v25 = vld [vmem:[#allocation5 + $0x2cf8] sm:$0xff]  ;;  %v15253_v3 = vcombine.high %v1623_v38, %v1627_v6 }
 0x634   :  { %v15255_v9 = vcombine.high %v1624_v37, %v1628_v25  ;;  %v15254_v24 = vcombine.low %v1624_v37, %v1628_v25  ;;  %v1679_v37 = vld [vmem:[#allocation5 + $0x2e90] sm:$0xff] }
 0x635   :  { %10934 = vmatpush1.bf16.msra.mxu0 %v15196_v12  ;;  %11450 = vmatpush1.bf16.msra.mxu1 %v15198_v16  ;;  %v1635_v12 = vld [vmem:[#allocation5 + $0x2d30] sm:$0xff]  ;;  %v1632_v16 = vld [vmem:[#allocation5 + $0x2d18] sm:$0xff] }
 0x636   :  { %10935 = vmatprep.subr.bf16.mxu0 %v15205_v18  ;;  %11451 = vmatprep.subr.bf16.mxu1 %v15207_v19  ;;  %v1636_v18 = vld [vmem:[#allocation5 + $0x2d38] sm:$0xff]  ;;  %v15252_v19 = vcombine.low %v1623_v38, %v1627_v6  ;;  %v15261_v29 = vcombine.high %v1631_v11, %v1635_v12  ;;  %v1683_v25 = vld [vmem:[#allocation5 + $0x2eb0] sm:$0xff] }
 0x639   :  { %10936 = vmatpush1.bf16.msra.mxu0 %v15204_v31  ;;  %11452 = vmatpush1.bf16.msra.mxu1 %v15206_v28  ;;  %v1640_v31 = vld [vmem:[#allocation5 + $0x2d58] sm:$0xff] }
 0x63a   :  { %10937 = vmatprep.subr.bf16.mxu0 %v15213_v35  ;;  %11453 = vmatprep.subr.bf16.mxu1 %v15215_v36  ;;  %v1644_v28 = vld [vmem:[#allocation5 + $0x2d78] sm:$0xff]  ;;  %v15260_v35 = vcombine.low %v1631_v11, %v1635_v12  ;;  %v15262_v36 = vcombine.low %v1632_v16, %v1636_v18  ;;  %v15309_v11 = vcombine.high %v1679_v37, %v1683_v25 }
 0x63b   :  { %v15271_v41 = vcombine.high %v1640_v31, %v1644_v28 }
 0x63d   :  { %10938 = vmatpush1.bf16.msra.mxu0 %v15212_v43  ;;  %11454 = vmatpush1.bf16.msra.mxu1 %v15214_v44  ;;  %v1648_v43 = vld [vmem:[#allocation5 + $0x2d98] sm:$0xff] }
 0x63e   :  { %10939 = vmatprep.subr.bf16.mxu0 %v15221_v47  ;;  %11455 = vmatprep.subr.bf16.mxu1 %v15223_v46  ;;  %v1652_v44 = vld [vmem:[#allocation5 + $0x2db8] sm:$0xff]  ;;  %v15268_v47 = vcombine.low %v1639_v23, %v1643_v17  ;;  %v15270_v46 = vcombine.low %v1640_v31, %v1644_v28  ;;  %v1695_v31 = vld [vmem:[#allocation5 + $0x2f10] sm:$0xff] }
 0x63f   :  { %v15279_v48 = vcombine.high %v1648_v43, %v1652_v44  ;;  %v1699_v28 = vld [vmem:[#allocation5 + $0x2f30] sm:$0xff] }
 0x641   :  { %10940 = vmatpush1.bf16.msra.mxu0 %v15220_v51  ;;  %11456 = vmatpush1.bf16.msra.mxu1 %v15222_v63  ;;  %v1656_v51 = vld [vmem:[#allocation5 + $0x2dd8] sm:$0xff] }
 0x642   :  { %10952 = vmatprep.subr.bf16.mxu0 %v15229_v27  ;;  %11468 = vmatprep.subr.bf16.mxu1 %v15231_v52  ;;  %v1660_v63 = vld [vmem:[#allocation5 + $0x2df8] sm:$0xff]  ;;  %v15276_v27 = vcombine.low %v1647_v42, %v1651_v14  ;;  %v15278_v52 = vcombine.low %v1648_v43, %v1652_v44  ;;  %v15325_v42 = vcombine.high %v1695_v31, %v1699_v28  ;;  %v1703_v43 = vld [vmem:[#allocation5 + $0x2f50] sm:$0xff] }
 0x643   :  { %v15287_v54 = vcombine.high %v1656_v51, %v1660_v63  ;;  %v1707_v44 = vld [vmem:[#allocation5 + $0x2f70] sm:$0xff] }
 0x644   :  { %10942 = vmatmul.mubr.bf16.vlgmr.msra.gmra.mrb[4].mxu0 %v16756_v5  ;;  %11458 = vmatmul.mubr.bf16.vlgmr.msra.gmra.mrb[4].mxu1 %v16756_v5  ;;  %v15246_v5 = vcombine.low %v1616_v57, %v1620_v45  ;;  %v1671_v57 = vld [vmem:[#allocation5 + $0x2e50] sm:$0xff] }
 0x645   :  { %10953 = vmatpush1.bf16.msra.mxu0 %v15228_v15  ;;  %11469 = vmatpush1.bf16.msra.mxu1 %v15230_v59  ;;  %v1664_v15 = vld [vmem:[#allocation5 + $0x2e18] sm:$0xff]  ;;  %v1675_v45 = vld [vmem:[#allocation5 + $0x2e70] sm:$0xff] }
 0x646   :  { %10954 = vmatprep.subr.bf16.mxu0 %v15237_v53  ;;  %11470 = vmatprep.subr.bf16.mxu1 %v15239_v13  ;;  %v1668_v59 = vld [vmem:[#allocation5 + $0x2e38] sm:$0xff]  ;;  %v15284_v53 = vcombine.low %v1655_v49, %v1659_v50  ;;  %v15286_v13 = vcombine.low %v1656_v51, %v1660_v63  ;;  %v15301_v38 = vcombine.high %v1671_v57, %v1675_v45  ;;  %v1711_v51 = vld [vmem:[#allocation5 + $0x2f90] sm:$0xff] }
 0x647   :  { %10984 = vmatprep.mubr.bf16.mxu0 %v16758_v21  ;;  %11500 = vmatprep.mubr.bf16.mxu1 %v16758_v21  ;;  %v15263_v21 = vcombine.high %v1632_v16, %v1636_v18  ;;  %v15295_v56 = vcombine.high %v1664_v15, %v1668_v59  ;;  %v1687_v16 = vld [vmem:[#allocation5 + $0x2ed0] sm:$0xff]  ;;  %v15333_v49 = vcombine.high %v1703_v43, %v1707_v44 }
 0x648   :  { %v1691_v18 = vld [vmem:[#allocation5 + $0x2ef0] sm:$0xff] }
 0x649   :  { %10955 = vmatpush1.bf16.msra.mxu0 %v15236_v60  ;;  %11471 = vmatpush1.bf16.msra.mxu1 %v15238_v62  ;;  %v1672_v60 = vld [vmem:[#allocation5 + $0x2e58] sm:$0xff]  ;;  %v15317_v23 = vcombine.high %v1687_v16, %v1691_v18  ;;  %v1715_v63 = vld [vmem:[#allocation5 + $0x2fb0] sm:$0xff] }
 0x64a   :  { %10956 = vmatprep.subr.bf16.mxu0 %v15245_v58  ;;  %11472 = vmatprep.subr.bf16.mxu1 %v15247_v1  ;;  %v1676_v62 = vld [vmem:[#allocation5 + $0x2e78] sm:$0xff]  ;;  %v15292_v58 = vcombine.low %v1663_v55, %v1667_v26  ;;  %v15294_v1 = vcombine.low %v1664_v15, %v1668_v59  ;;  %v15341_v55 = vcombine.high %v1711_v51, %v1715_v63  ;;  %v1719_v15 = vld [vmem:[#allocation5 + $0x2fd0] sm:$0xff] }
 0x64b   :  { %v15303_v6 = vcombine.high %v1672_v60, %v1676_v62  ;;  %v1723_v59 = vld [vmem:[#allocation5 + $0x2ff0] sm:$0xff] }
 0x64d   :  { %10957 = vmatpush1.bf16.msra.mxu0 %v15244_v8  ;;  %11473 = vmatpush1.bf16.msra.mxu1 %v15246_v5  ;;  %v1680_v8 = vld [vmem:[#allocation5 + $0x2e98] sm:$0xff] }
 0x64e   :  { %10958 = vmatprep.subr.bf16.mxu0 %v15253_v3  ;;  %11474 = vmatprep.subr.bf16.mxu1 %v15255_v9  ;;  %v1684_v5 = vld [vmem:[#allocation5 + $0x2eb8] sm:$0xff]  ;;  %v15300_v3 = vcombine.low %v1671_v57, %v1675_v45  ;;  %v15302_v9 = vcombine.low %v1672_v60, %v1676_v62  ;;  %v15349_v57 = vcombine.high %v1719_v15, %v1723_v59 }
 0x64f   :  { %v15311_v12 = vcombine.high %v1680_v8, %v1684_v5  ;;  %v15348_v60 = vcombine.low %v1719_v15, %v1723_v59  ;;  %v15993_v15 = vld [vmem:[#allocation8 + $0x160] ss:$16 sps:$4 sm:$0xff]   ;;  %v15996_v59 = vld [vmem:[#allocation8 + $0x168] ss:$16 sps:$4 sm:$0xff]  }
 0x651   :  { %10959 = vmatpush1.bf16.msra.mxu0 %v15252_v19  ;;  %11475 = vmatpush1.bf16.msra.mxu1 %v15254_v24  ;;  %v1688_v19 = vld [vmem:[#allocation5 + $0x2ed8] sm:$0xff] }
 0x652   :  { %10960 = vmatprep.subr.bf16.mxu0 %v15261_v29  ;;  %11476 = vmatprep.subr.bf16.mxu1 %v15263_v21  ;;  %v1692_v24 = vld [vmem:[#allocation5 + $0x2ef8] sm:$0xff]  ;;  %v15308_v29 = vcombine.low %v1679_v37, %v1683_v25  ;;  %v15310_v21 = vcombine.low %v1680_v8, %v1684_v5  ;;  %v15938_v25 = vld [vmem:[#allocation8 + $0x2c] ss:$16 sps:$4 sm:$0xff]   ;;  %v15936_v5 = vld [vmem:[#allocation8 + $0x28] ss:$16 sps:$4 sm:$0xff]  }
 0x653   :  { %v15319_v17 = vcombine.high %v1688_v19, %v1692_v24  ;;  %v15935_v37 = vld [vmem:[#allocation8 + $0x24] ss:$16 sps:$4 sm:$0xff]   ;;  %v15933_v8 = vld [vmem:[#allocation8 + $0x20] ss:$16 sps:$4 sm:$0xff]  }
 0x655   :  { %10961 = vmatpush1.bf16.msra.mxu0 %v15260_v35  ;;  %11477 = vmatpush1.bf16.msra.mxu1 %v15262_v36  ;;  %v1696_v35 = vld [vmem:[#allocation5 + $0x2f18] sm:$0xff] }
 0x656   :  { %10962 = vmatprep.subr.bf16.mxu0 %v15269_v40  ;;  %11478 = vmatprep.subr.bf16.mxu1 %v15271_v41  ;;  %v1700_v36 = vld [vmem:[#allocation5 + $0x2f38] sm:$0xff]  ;;  %v15316_v40 = vcombine.low %v1687_v16, %v1691_v18  ;;  %v15318_v41 = vcombine.low %v1688_v19, %v1692_v24  ;;  %v15948_v19 = vld [vmem:[#allocation8 + $0x68] ss:$16 sps:$4 sm:$0xff]  }
 0x657   :  { %v15327_v14 = vcombine.high %v1696_v35, %v1700_v36  ;;  %v15947_v16 = vld [vmem:[#allocation8 + $0x64] ss:$16 sps:$4 sm:$0xff]   ;;  %v15945_v18 = vld [vmem:[#allocation8 + $0x60] ss:$16 sps:$4 sm:$0xff]  }
 0x658   :  { %v15953_v24 = vld [vmem:[#allocation8 + $0x84] ss:$16 sps:$4 sm:$0xff]  }
 0x659   :  { %10963 = vmatpush1.bf16.msra.mxu0 %v15268_v47  ;;  %11479 = vmatpush1.bf16.msra.mxu1 %v15270_v46  ;;  %v1704_v47 = vld [vmem:[#allocation5 + $0x2f58] sm:$0xff] }
 0x65a   :  { %10964 = vmatprep.subr.bf16.mxu0 %v15277_v0  ;;  %11480 = vmatprep.subr.bf16.mxu1 %v15279_v48  ;;  %v1708_v46 = vld [vmem:[#allocation5 + $0x2f78] sm:$0xff]  ;;  %v15324_v0 = vcombine.low %v1695_v31, %v1699_v28  ;;  %v15326_v48 = vcombine.low %v1696_v35, %v1700_v36  ;;  %v15960_v28 = vld [vmem:[#allocation8 + $0xa8] ss:$16 sps:$4 sm:$0xff]   ;;  %v15968_v36 = vld [vmem:[#allocation8 + $0xcc] ss:$16 sps:$4 sm:$0xff]  }
 0x65b   :  { %v15335_v50 = vcombine.high %v1704_v47, %v1708_v46  ;;  %v15957_v31 = vld [vmem:[#allocation8 + $0xa0] ss:$16 sps:$4 sm:$0xff]   ;;  %v15965_v35 = vld [vmem:[#allocation8 + $0xc4] ss:$16 sps:$4 sm:$0xff]  }
 0x65d   :  { %10965 = vmatpush1.bf16.msra.mxu0 %v15276_v27  ;;  %11481 = vmatpush1.bf16.msra.mxu1 %v15278_v52  ;;  %v1712_v27 = vld [vmem:[#allocation5 + $0x2f98] sm:$0xff] }
 0x65e   :  { %10966 = vmatprep.subr.bf16.mxu0 %v15285_v33  ;;  %11482 = vmatprep.subr.bf16.mxu1 %v15287_v54  ;;  %v1716_v52 = vld [vmem:[#allocation5 + $0x2fb8] sm:$0xff]  ;;  %v15332_v33 = vcombine.low %v1703_v43, %v1707_v44  ;;  %v15334_v54 = vcombine.low %v1704_v47, %v1708_v46  ;;  %v15972_v44 = vld [vmem:[#allocation8 + $0xe8] ss:$16 sps:$4 sm:$0xff]   ;;  %v15980_v46 = vld [vmem:[#allocation8 + $0x10c] ss:$16 sps:$4 sm:$0xff]  }
 0x65f   :  { %v15343_v26 = vcombine.high %v1712_v27, %v1716_v52  ;;  %v15969_v43 = vld [vmem:[#allocation8 + $0xe0] ss:$16 sps:$4 sm:$0xff]   ;;  %v15977_v47 = vld [vmem:[#allocation8 + $0x104] ss:$16 sps:$4 sm:$0xff]  }
 0x661   :  { %10967 = vmatpush1.bf16.msra.mxu0 %v15284_v53  ;;  %11483 = vmatpush1.bf16.msra.mxu1 %v15286_v13  ;;  %v1720_v53 = vld [vmem:[#allocation5 + $0x2fd8] sm:$0xff] }
 0x662   :  { %10968 = vmatprep.subr.bf16.mxu0 %v15293_v10  ;;  %11484 = vmatprep.subr.bf16.mxu1 %v15295_v56  ;;  %v1724_v13 = vld [vmem:[#allocation5 + $0x2ff8] sm:$0xff]  ;;  %v15340_v10 = vcombine.low %v1711_v51, %v1715_v63  ;;  %v15342_v56 = vcombine.low %v1712_v27, %v1716_v52  ;;  %v15984_v63 = vld [vmem:[#allocation8 + $0x128] ss:$16 sps:$4 sm:$0xff]   ;;  %v15992_v52 = vld [vmem:[#allocation8 + $0x14c] ss:$16 sps:$4 sm:$0xff]  }
 0x663   :  { %v15351_v45 = vcombine.high %v1720_v53, %v1724_v13  ;;  %v15350_v62 = vcombine.low %v1720_v53, %v1724_v13  ;;  %v15981_v51 = vld [vmem:[#allocation8 + $0x120] ss:$16 sps:$4 sm:$0xff]   ;;  %v15989_v27 = vld [vmem:[#allocation8 + $0x144] ss:$16 sps:$4 sm:$0xff]   ;;  %v16004_v13 = vld [vmem:[#allocation8 + $0x18c] ss:$16 sps:$4 sm:$0xff]  }
 0x664   :  { %v16001_v53 = vld [vmem:[#allocation8 + $0x184] ss:$16 sps:$4 sm:$0xff]  }
 0x665   :  { %10969 = vmatpush1.bf16.msra.mxu0 %v15292_v58  ;;  %11485 = vmatpush1.bf16.msra.mxu1 %v15294_v1  ;;  %v15929_v58 = vld [vmem:[#allocation8 + $0x4] ss:$16 sps:$4 sm:$0xff]   ;;  %v15932_v1 = vld [vmem:[#allocation8 + $0xc] ss:$16 sps:$4 sm:$0xff]  }
 0x666   :  { %10970 = vmatprep.subr.bf16.mxu0 %v15301_v38  ;;  %11486 = vmatprep.subr.bf16.mxu1 %v15303_v6  ;;  %v15927_v38 = vld [vmem:[#allocation8] ss:$16 sps:$4 sm:$0xff]   ;;  %v15930_v6 = vld [vmem:[#allocation8 + $0x8] ss:$16 sps:$4 sm:$0xff]  }
 0x669   :  { %10971 = vmatpush1.bf16.msra.mxu0 %v15300_v3  ;;  %11487 = vmatpush1.bf16.msra.mxu1 %v15302_v9  ;;  %v15941_v3 = vld [vmem:[#allocation8 + $0x44] ss:$16 sps:$4 sm:$0xff]   ;;  %v15944_v9 = vld [vmem:[#allocation8 + $0x4c] ss:$16 sps:$4 sm:$0xff]  }
 0x66a   :  { %10972 = vmatprep.subr.bf16.mxu0 %v15309_v11  ;;  %11488 = vmatprep.subr.bf16.mxu1 %v15311_v12  ;;  %v15939_v11 = vld [vmem:[#allocation8 + $0x40] ss:$16 sps:$4 sm:$0xff]   ;;  %v15942_v12 = vld [vmem:[#allocation8 + $0x48] ss:$16 sps:$4 sm:$0xff]  }
 0x66d   :  { %10973 = vmatpush1.bf16.msra.mxu0 %v15308_v29  ;;  %11489 = vmatpush1.bf16.msra.mxu1 %v15310_v21  ;;  %v15956_v29 = vld [vmem:[#allocation8 + $0x8c] ss:$16 sps:$4 sm:$0xff]   ;;  %v15954_v21 = vld [vmem:[#allocation8 + $0x88] ss:$16 sps:$4 sm:$0xff]  }
 0x66e   :  { %10974 = vmatprep.subr.bf16.mxu0 %v15317_v23  ;;  %11490 = vmatprep.subr.bf16.mxu1 %v15319_v17  ;;  %v15959_v23 = vld [vmem:[#allocation8 + $0xa4] ss:$16 sps:$4 sm:$0xff]   ;;  %v15962_v17 = vld [vmem:[#allocation8 + $0xac] ss:$16 sps:$4 sm:$0xff]  }
 0x671   :  { %10975 = vmatpush1.bf16.msra.mxu0 %v15316_v40  ;;  %11491 = vmatpush1.bf16.msra.mxu1 %v15318_v41  ;;  %v15963_v40 = vld [vmem:[#allocation8 + $0xc0] ss:$16 sps:$4 sm:$0xff]   ;;  %v15966_v41 = vld [vmem:[#allocation8 + $0xc8] ss:$16 sps:$4 sm:$0xff]  }
 0x672   :  { %10976 = vmatprep.subr.bf16.mxu0 %v15325_v42  ;;  %11492 = vmatprep.subr.bf16.mxu1 %v15327_v14  ;;  %v15971_v42 = vld [vmem:[#allocation8 + $0xe4] ss:$16 sps:$4 sm:$0xff]   ;;  %v15974_v14 = vld [vmem:[#allocation8 + $0xec] ss:$16 sps:$4 sm:$0xff]  }
 0x675   :  { %10977 = vmatpush1.bf16.msra.mxu0 %v15324_v0  ;;  %11493 = vmatpush1.bf16.msra.mxu1 %v15326_v48  ;;  %v15975_v0 = vld [vmem:[#allocation8 + $0x100] ss:$16 sps:$4 sm:$0xff]   ;;  %v15978_v48 = vld [vmem:[#allocation8 + $0x108] ss:$16 sps:$4 sm:$0xff]  }
 0x676   :  { %10978 = vmatprep.subr.bf16.mxu0 %v15333_v49  ;;  %11494 = vmatprep.subr.bf16.mxu1 %v15335_v50  ;;  %v15983_v49 = vld [vmem:[#allocation8 + $0x124] ss:$16 sps:$4 sm:$0xff]   ;;  %v15986_v50 = vld [vmem:[#allocation8 + $0x12c] ss:$16 sps:$4 sm:$0xff]  }
 0x679   :  { %10979 = vmatpush1.bf16.msra.mxu0 %v15332_v33  ;;  %11495 = vmatpush1.bf16.msra.mxu1 %v15334_v54  ;;  %v15987_v33 = vld [vmem:[#allocation8 + $0x140] ss:$16 sps:$4 sm:$0xff]   ;;  %v15990_v54 = vld [vmem:[#allocation8 + $0x148] ss:$16 sps:$4 sm:$0xff]  }
 0x67a   :  { %10980 = vmatprep.subr.bf16.mxu0 %v15341_v55  ;;  %11496 = vmatprep.subr.bf16.mxu1 %v15343_v26  ;;  %v15995_v55 = vld [vmem:[#allocation8 + $0x164] ss:$16 sps:$4 sm:$0xff]   ;;  %v15998_v26 = vld [vmem:[#allocation8 + $0x16c] ss:$16 sps:$4 sm:$0xff]  }
 0x67d   :  { %10981 = vmatpush1.bf16.msra.mxu0 %v15340_v10  ;;  %11497 = vmatpush1.bf16.msra.mxu1 %v15342_v56  ;;  %v15999_v10 = vld [vmem:[#allocation8 + $0x180] ss:$16 sps:$4 sm:$0xff]   ;;  %v16002_v56 = vld [vmem:[#allocation8 + $0x188] ss:$16 sps:$4 sm:$0xff]  }
 0x67e   :  { %10982 = vmatprep.subr.bf16.mxu0 %v15349_v57  ;;  %11498 = vmatprep.subr.bf16.mxu1 %v15351_v45  ;;  %v16007_v57 = vld [vmem:[#allocation8 + $0x1a4] ss:$16 sps:$4 sm:$0xff]   ;;  %v16010_v45 = vld [vmem:[#allocation8 + $0x1ac] ss:$16 sps:$4 sm:$0xff]  }
 0x681   :  { %10983 = vmatpush1.bf16.msra.mxu0 %v15348_v60  ;;  %11499 = vmatpush1.bf16.msra.mxu1 %v15350_v62  ;;  %v16005_v60 = vld [vmem:[#allocation8 + $0x1a0] ss:$16 sps:$4 sm:$0xff]   ;;  %v16008_v62 = vld [vmem:[#allocation8 + $0x1a8] ss:$16 sps:$4 sm:$0xff]  }
 0x682   :  { %13093 = vmatprep.subr.bf16.mxu0 %v15929_v58  ;;  %13265 = vmatprep.subr.bf16.mxu1 %v15932_v1  ;;  %v16013_v58 = vld [vmem:[#allocation8 + $0x1c4] ss:$16 sps:$4 sm:$0xff]   ;;  %v16016_v1 = vld [vmem:[#allocation8 + $0x1cc] ss:$16 sps:$4 sm:$0xff]  }
 0x684   :  { %10985 = vmatmul.mubr.bf16.vlgmr.msra.gmra.mrb[4].mxu0 %v16764_v20  ;;  %11501 = vmatmul.mubr.bf16.vlgmr.msra.gmra.mrb[4].mxu1 %v16764_v20  ;;  %v15950_v20 = vld [vmem:[#allocation8 + $0x6c] ss:$16 sps:$4 sm:$0xff]  }
 0x685   :  { %13094 = vmatpush1.bf16.msra.mxu0 %v15927_v38  ;;  %13125 = vmatprep.mubr.bf16.mxu0 %v16800_v34  ;;  %v16011_v38 = vld [vmem:[#allocation8 + $0x1c0] ss:$16 sps:$4 sm:$0xff]  }
 0x686   :  { %13266 = vmatpush1.bf16.msra.mxu1 %v15930_v6  ;;  %13297 = vmatprep.mubr.bf16.mxu1 %v16800_v34  ;;  %v15951_v34 = vld [vmem:[#allocation8 + $0x80] ss:$16 sps:$4 sm:$0xff]   ;;  %v16014_v6 = vld [vmem:[#allocation8 + $0x1c8] ss:$16 sps:$4 sm:$0xff]  }
 0x687   :  { %13095 = vmatprep.subr.bf16.mxu0 %v15935_v37  ;;  %13267 = vmatprep.subr.bf16.mxu1 %v15938_v25  ;;  %v16019_v37 = vld [vmem:[#allocation8 + $0x1e4] ss:$16 sps:$4 sm:$0xff]   ;;  %v16022_v25 = vld [vmem:[#allocation8 + $0x1ec] ss:$16 sps:$4 sm:$0xff]  }
 0x689   :  { %13096 = vmatpush1.bf16.msra.mxu0 %v15933_v8  ;;  %v16017_v8 = vld [vmem:[#allocation8 + $0x1e0] ss:$16 sps:$4 sm:$0xff]  }
 0x68a   :  { %13268 = vmatpush1.bf16.msra.mxu1 %v15936_v5  ;;  %13097 = vmatprep.subr.bf16.mxu0 %v15941_v3  ;;  %v16020_v5 = vld [vmem:[#allocation8 + $0x1e8] ss:$16 sps:$4 sm:$0xff]   ;;  %v16025_v3 = vld [vmem:[#allocation8 + $0x204] ss:$16 sps:$4 sm:$0xff]  }
 0x68b   :  { %13269 = vmatprep.subr.bf16.mxu1 %v15944_v9  ;;  %v16028_v9 = vld [vmem:[#allocation8 + $0x20c] ss:$16 sps:$4 sm:$0xff]  }
 0x68d   :  { %13098 = vmatpush1.bf16.msra.mxu0 %v15939_v11  ;;  %v16023_v11 = vld [vmem:[#allocation8 + $0x200] ss:$16 sps:$4 sm:$0xff]  }
 0x68e   :  { %13270 = vmatpush1.bf16.msra.mxu1 %v15942_v12  ;;  %13099 = vmatprep.subr.bf16.mxu0 %v15947_v16  ;;  %v16026_v12 = vld [vmem:[#allocation8 + $0x208] ss:$16 sps:$4 sm:$0xff]   ;;  %v16031_v16 = vld [vmem:[#allocation8 + $0x224] ss:$16 sps:$4 sm:$0xff]  }
 0x68f   :  { %13271 = vmatprep.subr.bf16.mxu1 %v15950_v20  ;;  %v16034_v20 = vld [vmem:[#allocation8 + $0x22c] ss:$16 sps:$4 sm:$0xff]  }
 0x691   :  { %13100 = vmatpush1.bf16.msra.mxu0 %v15945_v18  ;;  %v16029_v18 = vld [vmem:[#allocation8 + $0x220] ss:$16 sps:$4 sm:$0xff]  }
 0x692   :  { %13272 = vmatpush1.bf16.msra.mxu1 %v15948_v19  ;;  %13101 = vmatprep.subr.bf16.mxu0 %v15953_v24  ;;  %v16032_v19 = vld [vmem:[#allocation8 + $0x228] ss:$16 sps:$4 sm:$0xff]   ;;  %v16037_v24 = vld [vmem:[#allocation8 + $0x244] ss:$16 sps:$4 sm:$0xff]  }
 0x693   :  { %13273 = vmatprep.subr.bf16.mxu1 %v15956_v29  ;;  %v16040_v29 = vld [vmem:[#allocation8 + $0x24c] ss:$16 sps:$4 sm:$0xff]  }
 0x695   :  { %13102 = vmatpush1.bf16.msra.mxu0 %v15951_v34  ;;  %v16035_v34 = vld [vmem:[#allocation8 + $0x240] ss:$16 sps:$4 sm:$0xff]  }
 0x696   :  { %13274 = vmatpush1.bf16.msra.mxu1 %v15954_v21  ;;  %13103 = vmatprep.subr.bf16.mxu0 %v15959_v23  ;;  %v16038_v21 = vld [vmem:[#allocation8 + $0x248] ss:$16 sps:$4 sm:$0xff]   ;;  %v16043_v23 = vld [vmem:[#allocation8 + $0x264] ss:$16 sps:$4 sm:$0xff]  }
 0x697   :  { %13275 = vmatprep.subr.bf16.mxu1 %v15962_v17  ;;  %v16041_v17 = vld [vmem:[#allocation8 + $0x260] ss:$16 sps:$4 sm:$0xff]  }
 0x699   :  { %13104 = vmatpush1.bf16.msra.mxu0 %v15957_v31  ;;  %v16044_v31 = vld [vmem:[#allocation8 + $0x268] ss:$16 sps:$4 sm:$0xff]  }
 0x69a   :  { %13276 = vmatpush1.bf16.msra.mxu1 %v15960_v28  ;;  %13105 = vmatprep.subr.bf16.mxu0 %v15965_v35  ;;  %v16049_v28 = vld [vmem:[#allocation8 + $0x284] ss:$16 sps:$4 sm:$0xff]   ;;  %v16052_v35 = vld [vmem:[#allocation8 + $0x28c] ss:$16 sps:$4 sm:$0xff]  }
 0x69b   :  { %13277 = vmatprep.subr.bf16.mxu1 %v15968_v36  ;;  %v16050_v36 = vld [vmem:[#allocation8 + $0x288] ss:$16 sps:$4 sm:$0xff]  }
 0x69d   :  { %13106 = vmatpush1.bf16.msra.mxu0 %v15963_v40  ;;  %v16055_v40 = vld [vmem:[#allocation8 + $0x2a4] ss:$16 sps:$4 sm:$0xff]  }
 0x69e   :  { %13278 = vmatpush1.bf16.msra.mxu1 %v15966_v41  ;;  %13107 = vmatprep.subr.bf16.mxu0 %v15971_v42  ;;  %v16058_v41 = vld [vmem:[#allocation8 + $0x2ac] ss:$16 sps:$4 sm:$0xff]   ;;  %v16053_v42 = vld [vmem:[#allocation8 + $0x2a0] ss:$16 sps:$4 sm:$0xff]  }
 0x69f   :  { %13279 = vmatprep.subr.bf16.mxu1 %v15974_v14  ;;  %v16056_v14 = vld [vmem:[#allocation8 + $0x2a8] ss:$16 sps:$4 sm:$0xff]  }
 0x6a1   :  { %13108 = vmatpush1.bf16.msra.mxu0 %v15969_v43  ;;  %v16061_v43 = vld [vmem:[#allocation8 + $0x2c4] ss:$16 sps:$4 sm:$0xff]  }
 0x6a2   :  { %13280 = vmatpush1.bf16.msra.mxu1 %v15972_v44  ;;  %13109 = vmatprep.subr.bf16.mxu0 %v15977_v47  ;;  %v16064_v44 = vld [vmem:[#allocation8 + $0x2cc] ss:$16 sps:$4 sm:$0xff]   ;;  %v16059_v47 = vld [vmem:[#allocation8 + $0x2c0] ss:$16 sps:$4 sm:$0xff]  }
 0x6a3   :  { %13281 = vmatprep.subr.bf16.mxu1 %v15980_v46  ;;  %v16062_v46 = vld [vmem:[#allocation8 + $0x2c8] ss:$16 sps:$4 sm:$0xff]  }
 0x6a5   :  { %13110 = vmatpush1.bf16.msra.mxu0 %v15975_v0  ;;  %v16067_v0 = vld [vmem:[#allocation8 + $0x2e4] ss:$16 sps:$4 sm:$0xff]  }
 0x6a6   :  { %13282 = vmatpush1.bf16.msra.mxu1 %v15978_v48  ;;  %13111 = vmatprep.subr.bf16.mxu0 %v15983_v49  ;;  %v16070_v48 = vld [vmem:[#allocation8 + $0x2ec] ss:$16 sps:$4 sm:$0xff]   ;;  %v16065_v49 = vld [vmem:[#allocation8 + $0x2e0] ss:$16 sps:$4 sm:$0xff]  }
 0x6a7   :  { %13283 = vmatprep.subr.bf16.mxu1 %v15986_v50  ;;  %v16068_v50 = vld [vmem:[#allocation8 + $0x2e8] ss:$16 sps:$4 sm:$0xff]  }
 0x6a9   :  { %13112 = vmatpush1.bf16.msra.mxu0 %v15981_v51  ;;  %v16073_v51 = vld [vmem:[#allocation8 + $0x304] ss:$16 sps:$4 sm:$0xff]  }
 0x6aa   :  { %13284 = vmatpush1.bf16.msra.mxu1 %v15984_v63  ;;  %13113 = vmatprep.subr.bf16.mxu0 %v15989_v27  ;;  %v16076_v63 = vld [vmem:[#allocation8 + $0x30c] ss:$16 sps:$4 sm:$0xff]   ;;  %v16071_v27 = vld [vmem:[#allocation8 + $0x300] ss:$16 sps:$4 sm:$0xff]  }
 0x6ab   :  { %13285 = vmatprep.subr.bf16.mxu1 %v15992_v52  ;;  %v16074_v52 = vld [vmem:[#allocation8 + $0x308] ss:$16 sps:$4 sm:$0xff]  }
 0x6ad   :  { %13114 = vmatpush1.bf16.msra.mxu0 %v15987_v33  ;;  %v16079_v33 = vld [vmem:[#allocation8 + $0x324] ss:$16 sps:$4 sm:$0xff]  }
 0x6ae   :  { %13286 = vmatpush1.bf16.msra.mxu1 %v15990_v54  ;;  %13115 = vmatprep.subr.bf16.mxu0 %v15995_v55  ;;  %v16082_v54 = vld [vmem:[#allocation8 + $0x32c] ss:$16 sps:$4 sm:$0xff]   ;;  %v16077_v55 = vld [vmem:[#allocation8 + $0x320] ss:$16 sps:$4 sm:$0xff]  }
 0x6af   :  { %13287 = vmatprep.subr.bf16.mxu1 %v15998_v26  ;;  %v16080_v26 = vld [vmem:[#allocation8 + $0x328] ss:$16 sps:$4 sm:$0xff]  }
 0x6b1   :  { %13116 = vmatpush1.bf16.msra.mxu0 %v15993_v15  ;;  %v16085_v15 = vld [vmem:[#allocation8 + $0x344] ss:$16 sps:$4 sm:$0xff]  }
 0x6b2   :  { %13288 = vmatpush1.bf16.msra.mxu1 %v15996_v59  ;;  %13117 = vmatprep.subr.bf16.mxu0 %v16001_v53  ;;  %v16088_v59 = vld [vmem:[#allocation8 + $0x34c] ss:$16 sps:$4 sm:$0xff]   ;;  %v16083_v53 = vld [vmem:[#allocation8 + $0x340] ss:$16 sps:$4 sm:$0xff]  }
 0x6b3   :  { %13289 = vmatprep.subr.bf16.mxu1 %v16004_v13  ;;  %v16086_v13 = vld [vmem:[#allocation8 + $0x348] ss:$16 sps:$4 sm:$0xff]  }
 0x6b5   :  { %13118 = vmatpush1.bf16.msra.mxu0 %v15999_v10  ;;  %v16091_v10 = vld [vmem:[#allocation8 + $0x364] ss:$16 sps:$4 sm:$0xff]  }
 0x6b6   :  { %13290 = vmatpush1.bf16.msra.mxu1 %v16002_v56  ;;  %13119 = vmatprep.subr.bf16.mxu0 %v16007_v57  ;;  %v16094_v56 = vld [vmem:[#allocation8 + $0x36c] ss:$16 sps:$4 sm:$0xff]   ;;  %v16089_v57 = vld [vmem:[#allocation8 + $0x360] ss:$16 sps:$4 sm:$0xff]  }
 0x6b7   :  { %13291 = vmatprep.subr.bf16.mxu1 %v16010_v45  ;;  %v16092_v45 = vld [vmem:[#allocation8 + $0x368] ss:$16 sps:$4 sm:$0xff]  }
 0x6b9   :  { %13120 = vmatpush1.bf16.msra.mxu0 %v16005_v60  ;;  %v16097_v60 = vld [vmem:[#allocation8 + $0x384] ss:$16 sps:$4 sm:$0xff]  }
 0x6ba   :  { %13292 = vmatpush1.bf16.msra.mxu1 %v16008_v62  ;;  %13121 = vmatprep.subr.bf16.mxu0 %v16013_v58  ;;  %v16100_v62 = vld [vmem:[#allocation8 + $0x38c] ss:$16 sps:$4 sm:$0xff]   ;;  %v16095_v58 = vld [vmem:[#allocation8 + $0x380] ss:$16 sps:$4 sm:$0xff]  }
 0x6bb   :  { %13293 = vmatprep.subr.bf16.mxu1 %v16016_v1  ;;  %v16098_v1 = vld [vmem:[#allocation8 + $0x388] ss:$16 sps:$4 sm:$0xff]  }
 0x6bd   :  { %13122 = vmatpush1.bf16.msra.mxu0 %v16011_v38  ;;  %v16103_v38 = vld [vmem:[#allocation8 + $0x3a4] ss:$16 sps:$4 sm:$0xff]  }
 0x6be   :  { %13294 = vmatpush1.bf16.msra.mxu1 %v16014_v6  ;;  %13123 = vmatprep.subr.bf16.mxu0 %v16019_v37  ;;  %v16106_v6 = vld [vmem:[#allocation8 + $0x3ac] ss:$16 sps:$4 sm:$0xff]   ;;  %v16101_v37 = vld [vmem:[#allocation8 + $0x3a0] ss:$16 sps:$4 sm:$0xff]  }
 0x6bf   :  { %13295 = vmatprep.subr.bf16.mxu1 %v16022_v25  ;;  %v16104_v25 = vld [vmem:[#allocation8 + $0x3a8] ss:$16 sps:$4 sm:$0xff]  }
 0x6c1   :  { %13124 = vmatpush1.bf16.msra.mxu0 %v16017_v8  ;;  %v16109_v8 = vld [vmem:[#allocation8 + $0x3c4] ss:$16 sps:$4 sm:$0xff]  }
 0x6c2   :  { %13296 = vmatpush1.bf16.msra.mxu1 %v16020_v5  ;;  %13136 = vmatprep.subr.bf16.mxu0 %v16025_v3  ;;  %v16112_v5 = vld [vmem:[#allocation8 + $0x3cc] ss:$16 sps:$4 sm:$0xff]   ;;  %v16107_v3 = vld [vmem:[#allocation8 + $0x3c0] ss:$16 sps:$4 sm:$0xff]  }
 0x6c3   :  { %13308 = vmatprep.subr.bf16.mxu1 %v16028_v9  ;;  %v16110_v9 = vld [vmem:[#allocation8 + $0x3c8] ss:$16 sps:$4 sm:$0xff]  }
 0x6c4   :  { %13126 = vmatmul.mubr.bf16.vlgmr.msra.gmra.mrb[8].mxu0 %v16796_v22 }
 0x6c5   :  { %13298 = vmatmul.mubr.bf16.vlgmr.msra.gmra.mrb[8].mxu1 %v16796_v22  ;;  %13137 = vmatpush1.bf16.msra.mxu0 %v16023_v11  ;;  %v16046_v22 = vld [vmem:[#allocation8 + $0x26c] ss:$16 sps:$4 sm:$0xff]   ;;  %v16115_v11 = vld [vmem:[#allocation8 + $0x3e4] ss:$16 sps:$4 sm:$0xff]  }
 0x6c6   :  { %13168 = vmatprep.mubr.bf16.mxu0 %v16802_v39  ;;  %13309 = vmatpush1.bf16.msra.mxu1 %v16026_v12  ;;  %v16118_v12 = vld [vmem:[#allocation8 + $0x3ec] ss:$16 sps:$4 sm:$0xff]  }
 0x6c7   :  { %13340 = vmatprep.mubr.bf16.mxu1 %v16802_v39  ;;  %13138 = vmatprep.subr.bf16.mxu0 %v16031_v16  ;;  %v16047_v39 = vld [vmem:[#allocation8 + $0x280] ss:$16 sps:$4 sm:$0xff]  }
 0x6c8   :  { %13310 = vmatprep.subr.bf16.mxu1 %v16034_v20  ;;  %v16113_v16 = vld [vmem:[#allocation8 + $0x3e0] ss:$16 sps:$4 sm:$0xff]   ;;  %v16116_v20 = vld [vmem:[#allocation8 + $0x3e8] ss:$16 sps:$4 sm:$0xff]  }
 0x6c9   :  { %13139 = vmatpush1.bf16.msra.mxu0 %v16029_v18  ;;  %v16121_v18 = vld [vmem:[#allocation8 + $0x404] ss:$16 sps:$4 sm:$0xff]  }
 0x6ca   :  { %13311 = vmatpush1.bf16.msra.mxu1 %v16032_v19  ;;  %13140 = vmatprep.subr.bf16.mxu0 %v16037_v24  ;;  %v16124_v19 = vld [vmem:[#allocation8 + $0x40c] ss:$16 sps:$4 sm:$0xff]   ;;  %v16119_v24 = vld [vmem:[#allocation8 + $0x400] ss:$16 sps:$4 sm:$0xff]  }
 0x6cb   :  { %13312 = vmatprep.subr.bf16.mxu1 %v16040_v29  ;;  %v16122_v29 = vld [vmem:[#allocation8 + $0x408] ss:$16 sps:$4 sm:$0xff]  }
 0x6cd   :  { %13141 = vmatpush1.bf16.msra.mxu0 %v16035_v34  ;;  %v16127_v34 = vld [vmem:[#allocation8 + $0x424] ss:$16 sps:$4 sm:$0xff]  }
 0x6ce   :  { %13313 = vmatpush1.bf16.msra.mxu1 %v16038_v21  ;;  %13142 = vmatprep.subr.bf16.mxu0 %v16043_v23  ;;  %v16130_v21 = vld [vmem:[#allocation8 + $0x42c] ss:$16 sps:$4 sm:$0xff]   ;;  %v16125_v23 = vld [vmem:[#allocation8 + $0x420] ss:$16 sps:$4 sm:$0xff]  }
 0x6cf   :  { %13314 = vmatprep.subr.bf16.mxu1 %v16046_v22  ;;  %v16128_v22 = vld [vmem:[#allocation8 + $0x428] ss:$16 sps:$4 sm:$0xff]  }
 0x6d1   :  { %13143 = vmatpush1.bf16.msra.mxu0 %v16041_v17  ;;  %v16133_v17 = vld [vmem:[#allocation8 + $0x444] ss:$16 sps:$4 sm:$0xff]  }
 0x6d2   :  { %13315 = vmatpush1.bf16.msra.mxu1 %v16044_v31  ;;  %13144 = vmatprep.subr.bf16.mxu0 %v16049_v28  ;;  %v16136_v31 = vld [vmem:[#allocation8 + $0x44c] ss:$16 sps:$4 sm:$0xff]   ;;  %v16131_v28 = vld [vmem:[#allocation8 + $0x440] ss:$16 sps:$4 sm:$0xff]  }
 0x6d3   :  { %13316 = vmatprep.subr.bf16.mxu1 %v16052_v35  ;;  %v16134_v35 = vld [vmem:[#allocation8 + $0x448] ss:$16 sps:$4 sm:$0xff]  }
 0x6d5   :  { %13145 = vmatpush1.bf16.msra.mxu0 %v16047_v39  ;;  %v16139_v39 = vld [vmem:[#allocation8 + $0x464] ss:$16 sps:$4 sm:$0xff]  }
 0x6d6   :  { %13317 = vmatpush1.bf16.msra.mxu1 %v16050_v36  ;;  %13146 = vmatprep.subr.bf16.mxu0 %v16055_v40  ;;  %v16142_v36 = vld [vmem:[#allocation8 + $0x46c] ss:$16 sps:$4 sm:$0xff]   ;;  %v16137_v40 = vld [vmem:[#allocation8 + $0x460] ss:$16 sps:$4 sm:$0xff]  }
 0x6d7   :  { %13318 = vmatprep.subr.bf16.mxu1 %v16058_v41  ;;  %v16145_v41 = vld [vmem:[#allocation8 + $0x484] ss:$16 sps:$4 sm:$0xff]  }
 0x6d9   :  { %13147 = vmatpush1.bf16.msra.mxu0 %v16053_v42  ;;  %v16148_v42 = vld [vmem:[#allocation8 + $0x48c] ss:$16 sps:$4 sm:$0xff]  }
 0x6da   :  { %13319 = vmatpush1.bf16.msra.mxu1 %v16056_v14  ;;  %13148 = vmatprep.subr.bf16.mxu0 %v16061_v43  ;;  %v16143_v14 = vld [vmem:[#allocation8 + $0x480] ss:$16 sps:$4 sm:$0xff]   ;;  %v16146_v43 = vld [vmem:[#allocation8 + $0x488] ss:$16 sps:$4 sm:$0xff]  }
 0x6db   :  { %13320 = vmatprep.subr.bf16.mxu1 %v16064_v44  ;;  %v16151_v44 = vld [vmem:[#allocation8 + $0x4a4] ss:$16 sps:$4 sm:$0xff]  }
 0x6dd   :  { %13149 = vmatpush1.bf16.msra.mxu0 %v16059_v47  ;;  %v16154_v47 = vld [vmem:[#allocation8 + $0x4ac] ss:$16 sps:$4 sm:$0xff]  }
 0x6de   :  { %13321 = vmatpush1.bf16.msra.mxu1 %v16062_v46  ;;  %13150 = vmatprep.subr.bf16.mxu0 %v16067_v0  ;;  %v16149_v46 = vld [vmem:[#allocation8 + $0x4a0] ss:$16 sps:$4 sm:$0xff]   ;;  %v16152_v0 = vld [vmem:[#allocation8 + $0x4a8] ss:$16 sps:$4 sm:$0xff]  }
 0x6df   :  { %13322 = vmatprep.subr.bf16.mxu1 %v16070_v48  ;;  %v16157_v48 = vld [vmem:[#allocation8 + $0x4c4] ss:$16 sps:$4 sm:$0xff]  }
 0x6e1   :  { %13151 = vmatpush1.bf16.msra.mxu0 %v16065_v49  ;;  %v16160_v49 = vld [vmem:[#allocation8 + $0x4cc] ss:$16 sps:$4 sm:$0xff]  }
 0x6e2   :  { %13323 = vmatpush1.bf16.msra.mxu1 %v16068_v50  ;;  %13152 = vmatprep.subr.bf16.mxu0 %v16073_v51  ;;  %v16155_v50 = vld [vmem:[#allocation8 + $0x4c0] ss:$16 sps:$4 sm:$0xff]   ;;  %v16158_v51 = vld [vmem:[#allocation8 + $0x4c8] ss:$16 sps:$4 sm:$0xff]  }
 0x6e3   :  { %13324 = vmatprep.subr.bf16.mxu1 %v16076_v63  ;;  %v16163_v63 = vld [vmem:[#allocation8 + $0x4e4] ss:$16 sps:$4 sm:$0xff]  }
 0x6e5   :  { %13153 = vmatpush1.bf16.msra.mxu0 %v16071_v27  ;;  %v16166_v27 = vld [vmem:[#allocation8 + $0x4ec] ss:$16 sps:$4 sm:$0xff]  }
 0x6e6   :  { %13325 = vmatpush1.bf16.msra.mxu1 %v16074_v52  ;;  %13154 = vmatprep.subr.bf16.mxu0 %v16079_v33  ;;  %v16161_v52 = vld [vmem:[#allocation8 + $0x4e0] ss:$16 sps:$4 sm:$0xff]   ;;  %v16164_v33 = vld [vmem:[#allocation8 + $0x4e8] ss:$16 sps:$4 sm:$0xff]  }
 0x6e7   :  { %13326 = vmatprep.subr.bf16.mxu1 %v16082_v54  ;;  %v16169_v54 = vld [vmem:[#allocation8 + $0x504] ss:$16 sps:$4 sm:$0xff]  }
 0x6e9   :  { %13155 = vmatpush1.bf16.msra.mxu0 %v16077_v55  ;;  %v16172_v55 = vld [vmem:[#allocation8 + $0x50c] ss:$16 sps:$4 sm:$0xff]  }
 0x6ea   :  { %13327 = vmatpush1.bf16.msra.mxu1 %v16080_v26  ;;  %13156 = vmatprep.subr.bf16.mxu0 %v16085_v15  ;;  %v16167_v26 = vld [vmem:[#allocation8 + $0x500] ss:$16 sps:$4 sm:$0xff]   ;;  %v16170_v15 = vld [vmem:[#allocation8 + $0x508] ss:$16 sps:$4 sm:$0xff]  }
 0x6eb   :  { %13328 = vmatprep.subr.bf16.mxu1 %v16088_v59  ;;  %v16175_v59 = vld [vmem:[#allocation8 + $0x524] ss:$16 sps:$4 sm:$0xff]  }
 0x6ed   :  { %13157 = vmatpush1.bf16.msra.mxu0 %v16083_v53  ;;  %v16178_v53 = vld [vmem:[#allocation8 + $0x52c] ss:$16 sps:$4 sm:$0xff]  }
 0x6ee   :  { %13329 = vmatpush1.bf16.msra.mxu1 %v16086_v13  ;;  %13158 = vmatprep.subr.bf16.mxu0 %v16091_v10  ;;  %v16173_v13 = vld [vmem:[#allocation8 + $0x520] ss:$16 sps:$4 sm:$0xff]   ;;  %v16176_v10 = vld [vmem:[#allocation8 + $0x528] ss:$16 sps:$4 sm:$0xff]  }
 0x6ef   :  { %13330 = vmatprep.subr.bf16.mxu1 %v16094_v56  ;;  %v16181_v56 = vld [vmem:[#allocation8 + $0x544] ss:$16 sps:$4 sm:$0xff]  }
 0x6f1   :  { %13159 = vmatpush1.bf16.msra.mxu0 %v16089_v57  ;;  %v16184_v57 = vld [vmem:[#allocation8 + $0x54c] ss:$16 sps:$4 sm:$0xff]  }
 0x6f2   :  { %13331 = vmatpush1.bf16.msra.mxu1 %v16092_v45  ;;  %13160 = vmatprep.subr.bf16.mxu0 %v16097_v60  ;;  %v16179_v45 = vld [vmem:[#allocation8 + $0x540] ss:$16 sps:$4 sm:$0xff]   ;;  %v16182_v60 = vld [vmem:[#allocation8 + $0x548] ss:$16 sps:$4 sm:$0xff]  }
 0x6f3   :  { %13332 = vmatprep.subr.bf16.mxu1 %v16100_v62  ;;  %v16187_v62 = vld [vmem:[#allocation8 + $0x564] ss:$16 sps:$4 sm:$0xff]  }
 0x6f5   :  { %13161 = vmatpush1.bf16.msra.mxu0 %v16095_v58  ;;  %v16190_v58 = vld [vmem:[#allocation8 + $0x56c] ss:$16 sps:$4 sm:$0xff]  }
 0x6f6   :  { %13333 = vmatpush1.bf16.msra.mxu1 %v16098_v1  ;;  %13162 = vmatprep.subr.bf16.mxu0 %v16103_v38  ;;  %v16185_v1 = vld [vmem:[#allocation8 + $0x560] ss:$16 sps:$4 sm:$0xff]   ;;  %v16188_v38 = vld [vmem:[#allocation8 + $0x568] ss:$16 sps:$4 sm:$0xff]  }
 0x6f7   :  { %13334 = vmatprep.subr.bf16.mxu1 %v16106_v6  ;;  %v16193_v6 = vld [vmem:[#allocation8 + $0x584] ss:$16 sps:$4 sm:$0xff]  }
 0x6f9   :  { %13163 = vmatpush1.bf16.msra.mxu0 %v16101_v37  ;;  %v16196_v37 = vld [vmem:[#allocation8 + $0x58c] ss:$16 sps:$4 sm:$0xff]  }
 0x6fa   :  { %13335 = vmatpush1.bf16.msra.mxu1 %v16104_v25  ;;  %13164 = vmatprep.subr.bf16.mxu0 %v16109_v8  ;;  %v16191_v25 = vld [vmem:[#allocation8 + $0x580] ss:$16 sps:$4 sm:$0xff]   ;;  %v16194_v8 = vld [vmem:[#allocation8 + $0x588] ss:$16 sps:$4 sm:$0xff]  }
 0x6fb   :  { %13336 = vmatprep.subr.bf16.mxu1 %v16112_v5  ;;  %v16199_v5 = vld [vmem:[#allocation8 + $0x5a4] ss:$16 sps:$4 sm:$0xff]  }
 0x6fd   :  { %13165 = vmatpush1.bf16.msra.mxu0 %v16107_v3  ;;  %v16202_v3 = vld [vmem:[#allocation8 + $0x5ac] ss:$16 sps:$4 sm:$0xff]  }
 0x6fe   :  { %13337 = vmatpush1.bf16.msra.mxu1 %v16110_v9  ;;  %13166 = vmatprep.subr.bf16.mxu0 %v16115_v11  ;;  %v16197_v9 = vld [vmem:[#allocation8 + $0x5a0] ss:$16 sps:$4 sm:$0xff]   ;;  %v16200_v11 = vld [vmem:[#allocation8 + $0x5a8] ss:$16 sps:$4 sm:$0xff]  }
 0x6ff   :  { %13338 = vmatprep.subr.bf16.mxu1 %v16118_v12  ;;  %v16205_v12 = vld [vmem:[#allocation8 + $0x5c4] ss:$16 sps:$4 sm:$0xff]  }
 0x701   :  { %13167 = vmatpush1.bf16.msra.mxu0 %v16113_v16  ;;  %v16208_v16 = vld [vmem:[#allocation8 + $0x5cc] ss:$16 sps:$4 sm:$0xff]  }
 0x702   :  { %13339 = vmatpush1.bf16.msra.mxu1 %v16116_v20  ;;  %13179 = vmatprep.subr.bf16.mxu0 %v16121_v18  ;;  %v16203_v20 = vld [vmem:[#allocation8 + $0x5c0] ss:$16 sps:$4 sm:$0xff]   ;;  %v16206_v18 = vld [vmem:[#allocation8 + $0x5c8] ss:$16 sps:$4 sm:$0xff]  }
 0x703   :  { %13351 = vmatprep.subr.bf16.mxu1 %v16124_v19  ;;  %v16211_v19 = vld [vmem:[#allocation8 + $0x5e4] ss:$16 sps:$4 sm:$0xff]  }
 0x704   :  { %13169 = vmatmul.mubr.bf16.vlgmr.msra.gmra.mrb[8].mxu0 %v16798_v32 }
 0x705   :  { %13341 = vmatmul.mubr.bf16.vlgmr.msra.gmra.mrb[8].mxu1 %v16798_v32  ;;  %13180 = vmatpush1.bf16.msra.mxu0 %v16119_v24  ;;  %v16140_v32 = vld [vmem:[#allocation8 + $0x468] ss:$16 sps:$4 sm:$0xff]   ;;  %v16214_v24 = vld [vmem:[#allocation8 + $0x5ec] ss:$16 sps:$4 sm:$0xff]  }
 0x706   :  { %13352 = vmatpush1.bf16.msra.mxu1 %v16122_v29  ;;  %13181 = vmatprep.subr.bf16.mxu0 %v16127_v34  ;;  %v16209_v29 = vld [vmem:[#allocation8 + $0x5e0] ss:$16 sps:$4 sm:$0xff]   ;;  %v16212_v34 = vld [vmem:[#allocation8 + $0x5e8] ss:$16 sps:$4 sm:$0xff]  }
 0x707   :  { %13353 = vmatprep.subr.bf16.mxu1 %v16130_v21  ;;  %v16217_v21 = vld [vmem:[#allocation8 + $0x604] ss:$16 sps:$4 sm:$0xff]  }
 0x709   :  { %13182 = vmatpush1.bf16.msra.mxu0 %v16125_v23  ;;  %v16220_v23 = vld [vmem:[#allocation8 + $0x60c] ss:$16 sps:$4 sm:$0xff]  }
 0x70a   :  { %13354 = vmatpush1.bf16.msra.mxu1 %v16128_v22  ;;  %13183 = vmatprep.subr.bf16.mxu0 %v16133_v17  ;;  %v1745_v22 = vsub.s32 4, %v16782_v30  ;;  %v1753_v17 = vsub.s32 6, %v16782_v30 }
 0x70b   :  { %13355 = vmatprep.subr.bf16.mxu1 %v16136_v31  ;;  %v1749_v31 = vsub.s32 5, %v16782_v30 }
 0x70d   :  { %13184 = vmatpush1.bf16.msra.mxu0 %v16131_v28  ;;  %v1757_v28 = vsub.s32 7, %v16782_v30 }
 0x70e   :  { %13356 = vmatpush1.bf16.msra.mxu1 %v16134_v35  ;;  %13185 = vmatprep.subr.bf16.mxu0 %v16139_v39  ;;  %v16343_v35 = vld [vmem:[#allocation7] sm:$0xff] }
 0x70f   :  { %13357 = vmatprep.subr.bf16.mxu1 %v16142_v36  ;;  %v1746_v39 = vrot.slane %v16343_v35, %v1745_v22  ;;  %v1754_v36 = vrot.slane %v16343_v35, %v1753_v17  ;;  %v16253_v22 = vld [vmem:[#allocation8 + $0x6c4] ss:$16 sps:$4 sm:$0xff]   ;;  %v16256_v17 = vld [vmem:[#allocation8 + $0x6cc] ss:$16 sps:$4 sm:$0xff]  }
 0x711   :  { %13186 = vmatpush1.bf16.msra.mxu0 %v16137_v40  ;;  %v1750_v40 = vrot.slane %v16343_v35, %v1749_v31  ;;  %v16251_v31 = vld [vmem:[#allocation8 + $0x6c0] ss:$16 sps:$4 sm:$0xff]  }
 0x712   :  { %13358 = vmatpush1.bf16.msra.mxu1 %v16140_v32  ;;  %13187 = vmatprep.subr.bf16.mxu0 %v16145_v41  ;;  %v1758_v32 = vrot.slane %v16343_v35, %v1757_v28  ;;  %v16254_v28 = vld [vmem:[#allocation8 + $0x6c8] ss:$16 sps:$4 sm:$0xff]   ;;  %v16259_v35 = vld [vmem:[#allocation8 + $0x6e4] ss:$16 sps:$4 sm:$0xff]  }
 0x713   :  { %13359 = vmatprep.subr.bf16.mxu1 %v16148_v42 }
 0x715   :  { %13188 = vmatpush1.bf16.msra.mxu0 %v16143_v14 }
 0x716   :  { %13360 = vmatpush1.bf16.msra.mxu1 %v16146_v43  ;;  %13189 = vmatprep.subr.bf16.mxu0 %v16151_v44 }
 0x717   :  { %13361 = vmatprep.subr.bf16.mxu1 %v16154_v47 }
 0x719   :  { %13190 = vmatpush1.bf16.msra.mxu0 %v16149_v46 }
 0x71a   :  { %13362 = vmatpush1.bf16.msra.mxu1 %v16152_v0  ;;  %13191 = vmatprep.subr.bf16.mxu0 %v16157_v48 }
 0x71b   :  { %13363 = vmatprep.subr.bf16.mxu1 %v16160_v49 }
 0x71d   :  { %13192 = vmatpush1.bf16.msra.mxu0 %v16155_v50 }
 0x71e   :  { %13364 = vmatpush1.bf16.msra.mxu1 %v16158_v51  ;;  %13193 = vmatprep.subr.bf16.mxu0 %v16163_v63 }
 0x71f   :  { %13365 = vmatprep.subr.bf16.mxu1 %v16166_v27 }
 0x721   :  { %13194 = vmatpush1.bf16.msra.mxu0 %v16161_v52 }
 0x722   :  { %13366 = vmatpush1.bf16.msra.mxu1 %v16164_v33  ;;  %13195 = vmatprep.subr.bf16.mxu0 %v16169_v54 }
 0x723   :  { %13367 = vmatprep.subr.bf16.mxu1 %v16172_v55 }
 0x725   :  { %13196 = vmatpush1.bf16.msra.mxu0 %v16167_v26 }
 0x726   :  { %13368 = vmatpush1.bf16.msra.mxu1 %v16170_v15  ;;  %13197 = vmatprep.subr.bf16.mxu0 %v16175_v59 }
 0x727   :  { %13369 = vmatprep.subr.bf16.mxu1 %v16178_v53 }
 0x729   :  { %13198 = vmatpush1.bf16.msra.mxu0 %v16173_v13 }
 0x72a   :  { %13370 = vmatpush1.bf16.msra.mxu1 %v16176_v10  ;;  %13199 = vmatprep.subr.bf16.mxu0 %v16181_v56 }
 0x72b   :  { %13371 = vmatprep.subr.bf16.mxu1 %v16184_v57 }
 0x72d   :  { %13200 = vmatpush1.bf16.msra.mxu0 %v16179_v45 }
 0x72e   :  { %13372 = vmatpush1.bf16.msra.mxu1 %v16182_v60  ;;  %13201 = vmatprep.subr.bf16.mxu0 %v16187_v62  ;;  %v16215_v60 = vld [vmem:[#allocation8 + $0x600] ss:$16 sps:$4 sm:$0xff]   ;;  %v16218_v62 = vld [vmem:[#allocation8 + $0x608] ss:$16 sps:$4 sm:$0xff]  }
 0x72f   :  { %13373 = vmatprep.subr.bf16.mxu1 %v16190_v58 }
 0x731   :  { %13202 = vmatpush1.bf16.msra.mxu0 %v16185_v1  ;;  %v16223_v1 = vld [vmem:[#allocation8 + $0x624] ss:$16 sps:$4 sm:$0xff]  }
 0x732   :  { %13374 = vmatpush1.bf16.msra.mxu1 %v16188_v38  ;;  %13203 = vmatprep.subr.bf16.mxu0 %v16193_v6  ;;  %v16226_v38 = vld [vmem:[#allocation8 + $0x62c] ss:$16 sps:$4 sm:$0xff]   ;;  %v16221_v6 = vld [vmem:[#allocation8 + $0x620] ss:$16 sps:$4 sm:$0xff]  }
 0x733   :  { %13375 = vmatprep.subr.bf16.mxu1 %v16196_v37  ;;  %v16224_v37 = vld [vmem:[#allocation8 + $0x628] ss:$16 sps:$4 sm:$0xff]  }
 0x735   :  { %13204 = vmatpush1.bf16.msra.mxu0 %v16191_v25  ;;  %v16229_v25 = vld [vmem:[#allocation8 + $0x644] ss:$16 sps:$4 sm:$0xff]  }
 0x736   :  { %13376 = vmatpush1.bf16.msra.mxu1 %v16194_v8  ;;  %13205 = vmatprep.subr.bf16.mxu0 %v16199_v5  ;;  %v16232_v8 = vld [vmem:[#allocation8 + $0x64c] ss:$16 sps:$4 sm:$0xff]   ;;  %v16227_v5 = vld [vmem:[#allocation8 + $0x640] ss:$16 sps:$4 sm:$0xff]  }
 0x737   :  { %13377 = vmatprep.subr.bf16.mxu1 %v16202_v3  ;;  %v16230_v3 = vld [vmem:[#allocation8 + $0x648] ss:$16 sps:$4 sm:$0xff]  }
 0x739   :  { %13206 = vmatpush1.bf16.msra.mxu0 %v16197_v9  ;;  %v16235_v9 = vld [vmem:[#allocation8 + $0x664] ss:$16 sps:$4 sm:$0xff]  }
 0x73a   :  { %13378 = vmatpush1.bf16.msra.mxu1 %v16200_v11  ;;  %13207 = vmatprep.subr.bf16.mxu0 %v16205_v12  ;;  %v16238_v11 = vld [vmem:[#allocation8 + $0x66c] ss:$16 sps:$4 sm:$0xff]   ;;  %v16233_v12 = vld [vmem:[#allocation8 + $0x660] ss:$16 sps:$4 sm:$0xff]  }
 0x73b   :  { %13379 = vmatprep.subr.bf16.mxu1 %v16208_v16  ;;  %v16236_v16 = vld [vmem:[#allocation8 + $0x668] ss:$16 sps:$4 sm:$0xff]  }
 0x73d   :  { %13208 = vmatpush1.bf16.msra.mxu0 %v16203_v20  ;;  %v16241_v20 = vld [vmem:[#allocation8 + $0x684] ss:$16 sps:$4 sm:$0xff]  }
 0x73e   :  { %13380 = vmatpush1.bf16.msra.mxu1 %v16206_v18  ;;  %13209 = vmatprep.subr.bf16.mxu0 %v16211_v19  ;;  %v16244_v18 = vld [vmem:[#allocation8 + $0x68c] ss:$16 sps:$4 sm:$0xff]   ;;  %v16239_v19 = vld [vmem:[#allocation8 + $0x680] ss:$16 sps:$4 sm:$0xff]  }
 0x73f   :  { %13381 = vmatprep.subr.bf16.mxu1 %v16214_v24  ;;  %v16242_v24 = vld [vmem:[#allocation8 + $0x688] ss:$16 sps:$4 sm:$0xff]  }
 0x741   :  { %13210 = vmatpush1.bf16.msra.mxu0 %v16209_v29  ;;  %v16247_v29 = vld [vmem:[#allocation8 + $0x6a4] ss:$16 sps:$4 sm:$0xff]  }
 0x742   :  { %13382 = vmatpush1.bf16.msra.mxu1 %v16212_v34  ;;  %13222 = vmatprep.subr.bf16.mxu0 %v16217_v21  ;;  %v16250_v34 = vld [vmem:[#allocation8 + $0x6ac] ss:$16 sps:$4 sm:$0xff]   ;;  %v16245_v21 = vld [vmem:[#allocation8 + $0x6a0] ss:$16 sps:$4 sm:$0xff]  }
 0x743   :  { %13394 = vmatprep.subr.bf16.mxu1 %v16220_v23  ;;  %v16248_v23 = vld [vmem:[#allocation8 + $0x6a8] ss:$16 sps:$4 sm:$0xff]  }
 0x757   :  { %v10986_v41 = vpop.f32.mrb[4].mxu0  ;;  %v11502_v14 = vpop.f32.mrb[4].mxu1 }
 0x758   :  { %v15693_v42 = vadd.f32 %v10986_v41, %v1746_v39  ;;  %v10988_v43 = vpop.f32.mrb[5].mxu0  ;;  %v15697_v44 = vadd.f32 %v11502_v14, %v1754_v36  ;;  %v11504_v46 = vpop.f32.mrb[5].mxu1  ;;  %v16268_v41 = vld [vmem:[#allocation8 + $0x70c] ss:$16 sps:$4 sm:$0xff]   ;;  %v16266_v14 = vld [vmem:[#allocation8 + $0x708] ss:$16 sps:$4 sm:$0xff]  }
 0x759   :  { %v15694_v47 = vadd.f32 %v10988_v43, %v1750_v40  ;;  %v10990_v0 = vpop.f32.mrb[6].mxu0  ;;  %v15698_v48 = vadd.f32 %v11504_v46, %v1758_v32  ;;  %v11506_v50 = vpop.f32.mrb[6].mxu1  ;;  %v16271_v43 = vld [vmem:[#allocation8 + $0x724] ss:$16 sps:$4 sm:$0xff]   ;;  %v16272_v46 = vld [vmem:[#allocation8 + $0x728] ss:$16 sps:$4 sm:$0xff]  }
 0x75a   :  { %v15695_v49 = vadd.f32 %v10990_v0, %v1746_v39  ;;  %v10992_v51 = vpop.f32.mrb[7].mxu0  ;;  %v15699_v63 = vadd.f32 %v11506_v50, %v1754_v36  ;;  %v11508_v52 = vpop.f32.mrb[7].mxu1  ;;  %v11515_v33 = vmax.f32 %v15693_v42, 0.0  ;;  %v11517_v26 = vmax.f32 %v15697_v44, 0.0  ;;  %v16262_v39 = vld [vmem:[#allocation8 + $0x6ec] ss:$16 sps:$4 sm:$0xff]  }
 0x75b   :  { %v15696_v27 = vadd.f32 %v10992_v51, %v1750_v40  ;;  %v15700_v55 = vadd.f32 %v11508_v52, %v1758_v32  ;;  %v11516_v15 = vmax.f32 %v15694_v47, 0.0  ;;  %v11518_v13 = vmax.f32 %v15698_v48, 0.0  ;;  %v16257_v36 = vld [vmem:[#allocation8 + $0x6e0] ss:$16 sps:$4 sm:$0xff]   ;;  %v16260_v40 = vld [vmem:[#allocation8 + $0x6e8] ss:$16 sps:$4 sm:$0xff]  }
 0x75c   :  { %v11523_v54 = vmax.f32 %v15695_v49, 0.0  ;;  %v11525_v59 = vmax.f32 %v15699_v63, 0.0  ;;  %v16265_v32 = vld [vmem:[#allocation8 + $0x704] ss:$16 sps:$4 sm:$0xff]   ;;  %v16263_v42 = vld [vmem:[#allocation8 + $0x700] ss:$16 sps:$4 sm:$0xff]  }
 0x75d   :  { %v11524_v53 = vmax.f32 %v15696_v27, 0.0  ;;  %v11526_v56 = vmax.f32 %v15700_v55, 0.0  ;;  %v16274_v44 = vld [vmem:[#allocation8 + $0x72c] ss:$16 sps:$4 sm:$0xff]   ;;  %v16269_v47 = vld [vmem:[#allocation8 + $0x720] ss:$16 sps:$4 sm:$0xff]  }
 0x75e   :  { %v11531_v10 = vpack.c.bf16 %v11523_v54, %v11515_v33  ;;  %v16850_v57 = vpack.c.bf16 %v11525_v59, %v11517_v26  ;;  %v16277_v0 = vld [vmem:[#allocation8 + $0x744] ss:$16 sps:$4 sm:$0xff]   ;;  %v16280_v48 = vld [vmem:[#allocation8 + $0x74c] ss:$16 sps:$4 sm:$0xff]   ;;  %v16275_v49 = vld [vmem:[#allocation8 + $0x740] ss:$16 sps:$4 sm:$0xff]  }
 0x75f   :  { %v11532_v45 = vpack.c.bf16 %v11524_v53, %v11516_v15  ;;  %v11534_v58 = vpack.c.bf16 %v11526_v56, %v11518_v13  ;;  %v16278_v50 = vld [vmem:[#allocation8 + $0x748] ss:$16 sps:$4 sm:$0xff]   ;;  %v16283_v51 = vld [vmem:[#allocation8 + $0x764] ss:$16 sps:$4 sm:$0xff]   ;;  %v16286_v63 = vld [vmem:[#allocation8 + $0x76c] ss:$16 sps:$4 sm:$0xff]  }
 0x760   :  { %v16281_v27 = vld [vmem:[#allocation8 + $0x760] ss:$16 sps:$4 sm:$0xff]   ;;  %v16284_v52 = vld [vmem:[#allocation8 + $0x768] ss:$16 sps:$4 sm:$0xff]   ;;  %v16289_v33 = vld [vmem:[#allocation8 + $0x784] ss:$16 sps:$4 sm:$0xff]  }
 0x761   :  { %13211 = vmatprep.mubr.bf16.mxu0 %v11532_v45  ;;  %13383 = vmatprep.mubr.bf16.mxu1 %v11532_v45  ;;  %v16292_v54 = vld [vmem:[#allocation8 + $0x78c] ss:$16 sps:$4 sm:$0xff]   ;;  %v16287_v55 = vld [vmem:[#allocation8 + $0x780] ss:$16 sps:$4 sm:$0xff]   ;;  %v16290_v26 = vld [vmem:[#allocation8 + $0x788] ss:$16 sps:$4 sm:$0xff]  }
 0x762   :  { %13212 = vmatmul.mubr.bf16.vlgmr.msra.gmra.mrb[8].mxu0 %v11531_v10  ;;  %13384 = vmatmul.mubr.bf16.vlgmr.msra.gmra.mrb[8].mxu1 %v11531_v10  ;;  %v16295_v15 = vld [vmem:[#allocation8 + $0x7a4] ss:$16 sps:$4 sm:$0xff]   ;;  %v16298_v59 = vld [vmem:[#allocation8 + $0x7ac] ss:$16 sps:$4 sm:$0xff]   ;;  %v16293_v53 = vld [vmem:[#allocation8 + $0x7a0] ss:$16 sps:$4 sm:$0xff]  }
 0x763   :  { %13223 = vmatpush1.bf16.msra.mxu0 %v16215_v60  ;;  %13395 = vmatpush1.bf16.msra.mxu1 %v16218_v62  ;;  %v16296_v13 = vld [vmem:[#allocation8 + $0x7a8] ss:$16 sps:$4 sm:$0xff]   ;;  %v16301_v10 = vld [vmem:[#allocation8 + $0x7c4] ss:$16 sps:$4 sm:$0xff]   ;;  %v16304_v56 = vld [vmem:[#allocation8 + $0x7cc] ss:$16 sps:$4 sm:$0xff]  }
 0x764   :  { %13254 = vmatprep.mubr.bf16.mxu0 %v11534_v58  ;;  %13426 = vmatprep.mubr.bf16.mxu1 %v11534_v58  ;;  %v16299_v45 = vld [vmem:[#allocation8 + $0x7c0] ss:$16 sps:$4 sm:$0xff]   ;;  %v16302_v60 = vld [vmem:[#allocation8 + $0x7c8] ss:$16 sps:$4 sm:$0xff]   ;;  %v16307_v62 = vld [vmem:[#allocation8 + $0x7e4] ss:$16 sps:$4 sm:$0xff]  }
 0x765   :  { %13224 = vmatprep.subr.bf16.mxu0 %v16223_v1  ;;  %13396 = vmatprep.subr.bf16.mxu1 %v16226_v38  ;;  %v16310_v58 = vld [vmem:[#allocation8 + $0x7ec] ss:$16 sps:$4 sm:$0xff]   ;;  %v16305_v1 = vld [vmem:[#allocation8 + $0x7e0] ss:$16 sps:$4 sm:$0xff]   ;;  %v16308_v38 = vld [vmem:[#allocation8 + $0x7e8] ss:$16 sps:$4 sm:$0xff]  }
 0x767   :  { %13225 = vmatpush1.bf16.msra.mxu0 %v16221_v6  ;;  %13397 = vmatpush1.bf16.msra.mxu1 %v16224_v37  ;;  %v16311_v6 = vld [vmem:[#allocation11 + $0x40] sm:$0xff]  }
 0x768   :  { %13226 = vmatprep.subr.bf16.mxu0 %v16229_v25  ;;  %13398 = vmatprep.subr.bf16.mxu1 %v16232_v8  ;;  %v16312_v37 = vld [vmem:[#allocation11 + $0xc0] sm:$0xff]  }
 0x769   :  { %v16313_v25 = vld [vmem:[#allocation11] sm:$0xff]  }
 0x76a   :  { %v16314_v8 = vld [vmem:[#allocation11 + $0x80] sm:$0xff]  }
 0x76b   :  { %13227 = vmatpush1.bf16.msra.mxu0 %v16227_v5  ;;  %13399 = vmatpush1.bf16.msra.mxu1 %v16230_v3  ;;  %v16315_v5 = vld [vmem:[#allocation11 + $0x48] sm:$0xff]  }
 0x76c   :  { %13228 = vmatprep.subr.bf16.mxu0 %v16235_v9  ;;  %13400 = vmatprep.subr.bf16.mxu1 %v16238_v11  ;;  %v16316_v3 = vld [vmem:[#allocation11 + $0xc8] sm:$0xff]  }
 0x76d   :  { %v16317_v9 = vld [vmem:[#allocation11 + $0x8] sm:$0xff]  }
 0x76e   :  { %v16318_v11 = vld [vmem:[#allocation11 + $0x88] sm:$0xff]  }
 0x76f   :  { %13229 = vmatpush1.bf16.msra.mxu0 %v16233_v12  ;;  %13401 = vmatpush1.bf16.msra.mxu1 %v16236_v16  ;;  %v16319_v12 = vld [vmem:[#allocation11 + $0x50] sm:$0xff]  }
 0x770   :  { %13230 = vmatprep.subr.bf16.mxu0 %v16241_v20  ;;  %13402 = vmatprep.subr.bf16.mxu1 %v16244_v18  ;;  %v16320_v16 = vld [vmem:[#allocation11 + $0xd0] sm:$0xff]  }
 0x771   :  { %v16321_v20 = vld [vmem:[#allocation11 + $0x10] sm:$0xff]  }
 0x772   :  { %v16322_v18 = vld [vmem:[#allocation11 + $0x90] sm:$0xff]  }
 0x773   :  { %13231 = vmatpush1.bf16.msra.mxu0 %v16239_v19  ;;  %13403 = vmatpush1.bf16.msra.mxu1 %v16242_v24  ;;  %v16323_v19 = vld [vmem:[#allocation11 + $0x58] sm:$0xff]  }
 0x774   :  { %13232 = vmatprep.subr.bf16.mxu0 %v16247_v29  ;;  %13404 = vmatprep.subr.bf16.mxu1 %v16250_v34  ;;  %v16324_v24 = vld [vmem:[#allocation11 + $0xd8] sm:$0xff]   ;;  %v16327_v34 = vld [vmem:[#allocation11 + $0x60] sm:$0xff]  }
 0x775   :  { %v16325_v29 = vld [vmem:[#allocation11 + $0x18] sm:$0xff]  }
 0x777   :  { %13233 = vmatpush1.bf16.msra.mxu0 %v16245_v21  ;;  %13405 = vmatpush1.bf16.msra.mxu1 %v16248_v23  ;;  %v16328_v21 = vld [vmem:[#allocation11 + $0xe0] sm:$0xff]  }
 0x778   :  { %13234 = vmatprep.subr.bf16.mxu0 %v16253_v22  ;;  %13406 = vmatprep.subr.bf16.mxu1 %v16256_v17  ;;  %v16329_v23 = vld [vmem:[#allocation11 + $0x20] sm:$0xff]   ;;  %v16331_v17 = vld [vmem:[#allocation11 + $0x68] sm:$0xff]  }
 0x779   :  { %v16330_v22 = vld [vmem:[#allocation11 + $0xa0] sm:$0xff]  }
 0x77b   :  { %13235 = vmatpush1.bf16.msra.mxu0 %v16251_v31  ;;  %13407 = vmatpush1.bf16.msra.mxu1 %v16254_v28  ;;  %v16332_v31 = vld [vmem:[#allocation11 + $0xe8] sm:$0xff]  }
 0x77c   :  { %13236 = vmatprep.subr.bf16.mxu0 %v16259_v35  ;;  %13408 = vmatprep.subr.bf16.mxu1 %v16262_v39  ;;  %v16333_v28 = vld [vmem:[#allocation11 + $0x28] sm:$0xff]   ;;  %v16335_v39 = vld [vmem:[#allocation11 + $0x70] sm:$0xff]  }
 0x77d   :  { %v16334_v35 = vld [vmem:[#allocation11 + $0xa8] sm:$0xff]  }
 0x77f   :  { %13237 = vmatpush1.bf16.msra.mxu0 %v16257_v36  ;;  %13409 = vmatpush1.bf16.msra.mxu1 %v16260_v40  ;;  %v16336_v36 = vld [vmem:[#allocation11 + $0xf0] sm:$0xff]  }
 0x780   :  { %13238 = vmatprep.subr.bf16.mxu0 %v16265_v32  ;;  %13410 = vmatprep.subr.bf16.mxu1 %v16268_v41  ;;  %v16337_v40 = vld [vmem:[#allocation11 + $0x30] sm:$0xff]   ;;  %v16339_v41 = vld [vmem:[#allocation11 + $0x78] sm:$0xff]  }
 0x781   :  { %v16338_v32 = vld [vmem:[#allocation11 + $0xb0] sm:$0xff]  }
 0x783   :  { %13239 = vmatpush1.bf16.msra.mxu0 %v16263_v42  ;;  %13411 = vmatpush1.bf16.msra.mxu1 %v16266_v14  ;;  %v16340_v42 = vld [vmem:[#allocation11 + $0xf8] sm:$0xff]  }
 0x784   :  { %13240 = vmatprep.subr.bf16.mxu0 %v16271_v43  ;;  %13412 = vmatprep.subr.bf16.mxu1 %v16274_v44  ;;  %v16341_v14 = vld [vmem:[#allocation11 + $0x38] sm:$0xff]  }
 0x785   :  { %v16342_v43 = vld [vmem:[#allocation11 + $0xb8] sm:$0xff]  }
 0x786   :  { %v11791_v44 = vld [vmem:[#allocation10] sm:$0xf] }
 0x787   :  { %13241 = vmatpush1.bf16.msra.mxu0 %v16269_v47  ;;  %13413 = vmatpush1.bf16.msra.mxu1 %v16272_v46  ;;  %v11796_v47 = vrot.slane %v11791_v44, %v1729_v61  ;;  %v11804_v46 = vrot.slane %v11791_v44, %v1737_v2 }
 0x788   :  { %13242 = vmatprep.subr.bf16.mxu0 %v16277_v0  ;;  %13414 = vmatprep.subr.bf16.mxu1 %v16280_v48  ;;  %v11800_v0 = vrot.slane %v11791_v44, %v1733_v4  ;;  %v11808_v48 = vrot.slane %v11791_v44, %v1741_v7 }
 0x78b   :  { %13243 = vmatpush1.bf16.msra.mxu0 %v16275_v49  ;;  %13415 = vmatpush1.bf16.msra.mxu1 %v16278_v50 }
 0x78c   :  { %13244 = vmatprep.subr.bf16.mxu0 %v16283_v51  ;;  %13416 = vmatprep.subr.bf16.mxu1 %v16286_v63 }
 0x78f   :  { %13245 = vmatpush1.bf16.msra.mxu0 %v16281_v27  ;;  %13417 = vmatpush1.bf16.msra.mxu1 %v16284_v52 }
 0x790   :  { %13246 = vmatprep.subr.bf16.mxu0 %v16289_v33  ;;  %13418 = vmatprep.subr.bf16.mxu1 %v16292_v54 }
 0x793   :  { %13247 = vmatpush1.bf16.msra.mxu0 %v16287_v55  ;;  %13419 = vmatpush1.bf16.msra.mxu1 %v16290_v26 }
 0x794   :  { %13248 = vmatprep.subr.bf16.mxu0 %v16295_v15  ;;  %13420 = vmatprep.subr.bf16.mxu1 %v16298_v59 }
 0x797   :  { %13249 = vmatpush1.bf16.msra.mxu0 %v16293_v53  ;;  %13421 = vmatpush1.bf16.msra.mxu1 %v16296_v13 }
 0x798   :  { %13250 = vmatprep.subr.bf16.mxu0 %v16301_v10  ;;  %13422 = vmatprep.subr.bf16.mxu1 %v16304_v56 }
 0x79b   :  { %13251 = vmatpush1.bf16.msra.mxu0 %v16299_v45  ;;  %13423 = vmatpush1.bf16.msra.mxu1 %v16302_v60 }
 0x79c   :  { %13252 = vmatprep.subr.bf16.mxu0 %v16307_v62  ;;  %13424 = vmatprep.subr.bf16.mxu1 %v16310_v58 }
 0x79f   :  { %13253 = vmatpush1.bf16.msra.mxu0 %v16305_v1  ;;  %13425 = vmatpush1.bf16.msra.mxu1 %v16308_v38 }
 0x7a0   :  { %15641 = vmatprep.subr.bf16.mxu0 %v16311_v6  ;;  %15663 = vmatprep.subr.bf16.mxu1 %v16312_v37 }
 0x7a2   :  { %13255 = vmatmul.mubr.bf16.vlgmr.msra.gmra.mrb[8].mxu0 %v16850_v57  ;;  %13427 = vmatmul.mubr.bf16.vlgmr.msra.gmra.mrb[8].mxu1 %v16850_v57  ;;  %v16326_v57 = vld [vmem:[#allocation11 + $0x98] sm:$0xff]  }
 0x7a3   :  { %15642 = vmatpush3.bf16.msra.mxu0 %v16313_v25  ;;  %15664 = vmatpush3.bf16.msra.mxu1 %v16314_v8  ;;  %v15608_v8 = vld [vmem:[#allocation13] ss:$0 sm:$0xff] }
 0x7a4   :  { %15643 = vmatprep.subr.bf16.mxu0 %v16315_v5  ;;  %15665 = vmatprep.subr.bf16.mxu1 %v16316_v3 }
 0x7a7   :  { %15644 = vmatpush3.bf16.msra.mxu0 %v16317_v9  ;;  %15666 = vmatpush3.bf16.msra.mxu1 %v16318_v11 }
 0x7a8   :  { %15645 = vmatprep.subr.bf16.mxu0 %v16319_v12  ;;  %15667 = vmatprep.subr.bf16.mxu1 %v16320_v16 }
 0x7ab   :  { %15646 = vmatpush3.bf16.msra.mxu0 %v16321_v20  ;;  %15668 = vmatpush3.bf16.msra.mxu1 %v16322_v18 }
 0x7ac   :  { %15647 = vmatprep.subr.bf16.mxu0 %v16323_v19  ;;  %15669 = vmatprep.subr.bf16.mxu1 %v16324_v24 }
 0x7af   :  { %15648 = vmatpush3.bf16.msra.mxu0 %v16325_v29  ;;  %15670 = vmatpush3.bf16.msra.mxu1 %v16326_v57 }
 0x7b0   :  { %15649 = vmatprep.subr.bf16.mxu0 %v16327_v34  ;;  %15671 = vmatprep.subr.bf16.mxu1 %v16328_v21 }
 0x7b3   :  { %15650 = vmatpush3.bf16.msra.mxu0 %v16329_v23  ;;  %15672 = vmatpush3.bf16.msra.mxu1 %v16330_v22 }
 0x7b4   :  { %15651 = vmatprep.subr.bf16.mxu0 %v16331_v17  ;;  %15673 = vmatprep.subr.bf16.mxu1 %v16332_v31 }
 0x7b7   :  { %15652 = vmatpush3.bf16.msra.mxu0 %v16333_v28  ;;  %15674 = vmatpush3.bf16.msra.mxu1 %v16334_v35 }
 0x7b8   :  { %15653 = vmatprep.subr.bf16.mxu0 %v16335_v39  ;;  %15675 = vmatprep.subr.bf16.mxu1 %v16336_v36 }
 0x7bb   :  { %15654 = vmatpush3.bf16.msra.mxu0 %v16337_v40  ;;  %15676 = vmatpush3.bf16.msra.mxu1 %v16338_v32 }
 0x7bc   :  { %15655 = vmatprep.subr.bf16.mxu0 %v16339_v41  ;;  %15677 = vmatprep.subr.bf16.mxu1 %v16340_v42 }
 0x7bf   :  { %15656 = vmatpush3.bf16.msra.mxu0 %v16341_v14  ;;  %15678 = vmatpush3.bf16.msra.mxu1 %v16342_v43 }
 0x875   :  { %v13256_v49 = vpop.f32.mrb[8].mxu0  ;;  %v13428_v50 = vpop.f32.mrb[8].mxu1 }
 0x876   :  { %v15701_v51 = vadd.f32 %v13256_v49, %v11796_v47  ;;  %v15705_v63 = vadd.f32 %v13428_v50, %v11804_v46  ;;  %v13258_v27 = vpop.f32.mrb[9].mxu0  ;;  %v13430_v52 = vpop.f32.mrb[9].mxu1 }
 0x877   :  { %v15702_v33 = vadd.f32 %v13258_v27, %v11800_v0  ;;  %v15706_v54 = vadd.f32 %v13430_v52, %v11808_v48  ;;  %v13260_v55 = vpop.f32.mrb[10].mxu0  ;;  %v13432_v26 = vpop.f32.mrb[10].mxu1 }
 0x878   :  { %v15703_v61 = vadd.f32 %v13260_v55, %v11796_v47  ;;  %v15707_v15 = vadd.f32 %v13432_v26, %v11804_v46  ;;  %v13262_v59 = vpop.f32.mrb[11].mxu0  ;;  %v13434_v2 = vpop.f32.mrb[11].mxu1  ;;  %v13437_v4 = vmax.f32 %v15701_v51, 0.0  ;;  %v13439_v10 = vmax.f32 %v15705_v63, 0.0 }
 0x879   :  { %v15704_v53 = vadd.f32 %v13262_v59, %v11800_v0  ;;  %v15708_v13 = vadd.f32 %v13434_v2, %v11808_v48  ;;  %v13438_v56 = vmax.f32 %v15702_v33, 0.0  ;;  %v13440_v45 = vmax.f32 %v15706_v54, 0.0 }
 0x87a   :  { %v13441_v30 = vmax.f32 %v15703_v61, 0.0  ;;  %v13443_v7 = vmax.f32 %v15707_v15, 0.0 }
 0x87b   :  { %v13442_v60 = vmax.f32 %v15704_v53, 0.0  ;;  %v13444_v62 = vmax.f32 %v15708_v13, 0.0 }
 0x87c   :  { %v13445_v58 = vpack.c.bf16 %v13441_v30, %v13437_v4  ;;  %v13447_v1 = vpack.c.bf16 %v13443_v7, %v13439_v10 }
 0x87d   :  { %v13446_v38 = vpack.c.bf16 %v13442_v60, %v13438_v56  ;;  %v13448_v6 = vpack.c.bf16 %v13444_v62, %v13440_v45 }
 0x87f   :  { %13744 = vmatprep.mubr.bf16.mxu0 %v13446_v38  ;;  %13785 = vmatprep.mubr.bf16.mxu1 %v13448_v6 }
 0x880   :  { %13745 = vmatmul.mubr.bf16.vlgmr.msra.gmra.mrb[12].mxu0 %v13445_v58  ;;  %13786 = vmatmul.mubr.bf16.vlgmr.msra.gmra.mrb[12].mxu1 %v13447_v1 }
 0x953   :  { %v15657_v37 = vpop.f32.mrb[12].mxu0  ;;  %v15679_v25 = vpop.f32.mrb[12].mxu1 }
 0x954   :  { %v15658_v5 = vpop.f32.mrb[13].mxu0  ;;  %v15680_v3 = vpop.f32.mrb[13].mxu1 }
 0x955   :  { %v15659_v9 = vadd.f32 %v15658_v5, %v15657_v37  ;;  %v15681_v11 = vadd.f32 %v15680_v3, %v15679_v25  ;;  %v15660_v12 = vpop.f32.mrb[14].mxu0  ;;  %v15682_v16 = vpop.f32.mrb[14].mxu1 }
 0x956   :  { %v15661_v20 = vpop.f32.mrb[15].mxu0  ;;  %v15683_v18 = vpop.f32.mrb[15].mxu1 }
 0x957   :  { %v13747_v19 = vadd.f32 %v15659_v9, %v15608_v8  ;;  %v15662_v24 = vadd.f32 %v15661_v20, %v15660_v12  ;;  %v15684_v29 = vadd.f32 %v15683_v18, %v15682_v16 }
 0x959   :  { %v13788_v57 = vadd.f32 %v15681_v11, %v13747_v19  ;;  %v13750_v34 = vadd.f32 %v15662_v24, %v15608_v8 }
 0x95b   :  { %13794 = vst [vmem:[#allocation14] sm:$0xff] %v13788_v57  ;;  %v13791_v21 = vadd.f32 %v15684_v29, %v13750_v34 }
 0x95d   :  { %13795 = vst [vmem:[#allocation14 + $0x8] sm:$0xff] %v13791_v21 }
 0x95e   :  { %16509 = shalt.err (!%p16506_p4)
}
 0x95f   :  { %s16510_s17 = scalar_lea.hbm %s16881_s7, 256 }
 0x960   :  { %p16511_p5 = scmp.ne.s32.totalorder %s16881_s7, %s16510_s17  ;;  %p16514_p6 = scmp.lt.u32.totalorder %s16510_s17, %s16881_s7 }
 0x962   :  { %p16516_p7 = pnand %p16514_p6, %p16511_p5 }
 0x964   :  { %16519 = shalt.err (!%p16516_p7)
}
 0x965   :  { %s16546_s22 = smov 128   ;;  %s16547_s23 = smov 8  }
 0x966   :  { %13807 = dma.vmem_to_hbm [thread:$0]  %s13802_s3, 256, %s16881_s7, [#allocation4], %s16546_s22, %s16546_s22, %s16547_s23  }
 0x967   :  { %16528 = dma.done.wait [#allocation4], 256  }
 0x968   :  { %16529 = vsyncadd [#allocation4], 4294967040 }
 0x969   :  { %13811 = vsyncpa [#allocation3], 1 }
 0x96a   :  { %13812 = vsyncpa [#allocation6], 1 }
 0x96b   :  { %13813 = vsyncpa [#allocation9], 1 }
 0x96c   :  { %13814 = vsyncpa [#allocation12], 1 }
 0x96d   :  { %13815 = vsyncpa [#allocation4], 1 }

</bundles_post_ra>
